<compile_context>
chip_gen: v6e
topology: v6e:2x2x1
jax: 0.10.0
libtpu: 0.0.40
codegen_flags: <defaults>
</compile_context>

<pallas_src>
import functools
import math

import jax
import jax.numpy as jnp
from jax.experimental import pallas as pl
from jax.experimental.pallas import tpu as pltpu


LANE = 128
ROW_TILE = 512
VMEM_LIMIT = 32 * 1024 * 1024   # < physical VMEM on v5e/v6e (128M) and v7x (64M)


# ============================================================================
# small helpers
# ============================================================================

def _round_up(x, m):
    return (x + m - 1) // m * m


def _pad_rows(a, m_to):
    m = a.shape[0]
    if m == m_to:
        return a
    return jnp.pad(a, [(0, m_to - m)] + [(0, 0)] * (a.ndim - 1))


def _choose_row_tile(m, target=ROW_TILE):
    """(tile_rows, padded_rows); tile multiple of 8; >= 2 grid steps when possible."""
    m8 = _round_up(max(m, 1), 8)
    if m8 <= 8:
        return m8, m8
    if m8 <= target:
        tm = _round_up((m8 + 1) // 2, 8)
        return tm, _round_up(m8, tm)
    return target, _round_up(m, target)


def _pick_batch_group(b, cap=8):
    """Largest divisor of b (<= cap) that still leaves >= 2 grid steps."""
    if b <= 1:
        return 1
    best = 1
    for g in range(1, min(b, cap) + 1):
        if b % g == 0 and b // g >= 2:
            best = g
    return best


def _pick_corr_tiles(bs, n, c, hw, budget=8 * 2 ** 20):
    """Pick (batch group, HW lane tile) under a VMEM budget with >=2 grid steps."""
    if hw % 128 == 0 and hw > 2048:
        thw = next((t for t in (2048, 1024, 512, 256, 128) if hw % t == 0), hw)
    else:
        thw = hw
    n_hw = hw // thw

    def step_bytes(g):
        return 2 * g * (n * c * 4 + c * thw * 4 + n * thw * 4)  # dbl-buffered blocks

    gb = 1
    for g in range(min(bs, 8), 0, -1):
        if bs % g:
            continue
        if step_bytes(g) > budget:
            continue
        if (bs // g) * n_hw >= 2 or bs * n_hw < 2:
            gb = g
            break
    return gb, thw


def _cparams(n_parallel):
    return pltpu.CompilerParams(
        dimension_semantics=("parallel",) * n_parallel,
        vmem_limit_bytes=VMEM_LIMIT)


# ============================================================================
# in-kernel math helpers
# ============================================================================

def _ln_stats(x, eps):
    mu = jnp.mean(x, axis=-1, keepdims=True)
    xc = x - mu
    var = jnp.mean(xc * xc, axis=-1, keepdims=True)
    return xc * jax.lax.rsqrt(var + eps)


def _gelu_tanh(y):
    c = 0.7978845608028654  # sqrt(2/pi)
    return 0.5 * y * (1.0 + jnp.tanh(c * (y + 0.044715 * y * y * y)))


def _erf(x):
    # Abramowitz & Stegun 7.1.26 (|err| < 1.5e-7); avoids relying on an erf
    # lowering inside Mosaic — uses only exp / div / where.
    p = 0.3275911
    a1, a2, a3, a4, a5 = (0.254829592, -0.284496736, 1.421413741,
                          -1.453152027, 1.061405429)
    sgn = jnp.where(x >= 0.0, 1.0, -1.0)
    ax = jnp.abs(x)
    t = 1.0 / (1.0 + p * ax)
    poly = ((((a5 * t + a4) * t + a3) * t + a2) * t + a1) * t
    return sgn * (1.0 - poly * jnp.exp(-ax * ax))


def _gelu_erf(y):
    return 0.5 * y * (1.0 + _erf(y * 0.7071067811865476))


def _apply_act(y, act):
    if act is None:
        return y
    if act == "gelu_tanh":
        return _gelu_tanh(y)
    if act == "gelu_erf":
        return _gelu_erf(y)
    if act == "sigmoid":
        return jax.nn.sigmoid(y)
    raise ValueError(act)


def _mm(x, w_ref, b_ref):
    """bf16 x bf16 -> f32 MXU matmul with bias."""
    return jnp.dot(x.astype(jnp.bfloat16), w_ref[...],
                   preferred_element_type=jnp.float32) + b_ref[...]


# ============================================================================
# Pallas kernels
# ============================================================================

def _channel_ln_kernel(x_ref, g_ref, b_ref, o_ref, *, eps):
    """LayerNorm over the channel (sublane) axis of a (1, C, TL) block."""
    x = x_ref[...]
    mu = jnp.mean(x, axis=1, keepdims=True)
    xc = x - mu
    var = jnp.mean(xc * xc, axis=1, keepdims=True)
    o_ref[...] = xc * jax.lax.rsqrt(var + eps) * g_ref[...] + b_ref[...]


def _linear_kernel(*refs, act, use_add):
    """out = act((x [+ add]) @ W + b)."""
    refs = list(refs)
    o_ref = refs.pop()
    x_ref = refs.pop(0)
    a_ref = refs.pop(0) if use_add else None
    w_ref, b_ref = refs
    x = x_ref[...]
    if use_add:
        x = x + a_ref[...]
    o_ref[...] = _apply_act(_mm(x, w_ref, b_ref), act).astype(o_ref.dtype)


def _mlp_kernel(x_ref, w1_ref, b1_ref, w2_ref, b2_ref, o_ref, *, act):
    """Fused 2-layer MLP; the hidden activation never leaves VMEM."""
    h = _apply_act(_mm(x_ref[...], w1_ref, b1_ref), act)
    o_ref[...] = _mm(h, w2_ref, b2_ref).astype(o_ref.dtype)


def _corr_kernel(t_ref, f_ref, o_ref, *, inv_sqrt_c):
    t = t_ref[...].astype(jnp.bfloat16)   # (GB, N, C)
    f = f_ref[...].astype(jnp.bfloat16)   # (GB, C, THW)
    o_ref[...] = jnp.einsum("gnc,gch->gnh", t, f,
                            preferred_element_type=jnp.float32) * inv_sqrt_c


def _heads_attention(q, k, v, num_heads, scale):
    """q: (GB, Lq, Hd), k/v: (GB, Lk, Hd) -> (GB, Lq, Hd); per-head softmax."""
    hd = q.shape[-1]
    dh = hd // num_heads
    outs = []
    for h in range(num_heads):
        sl = slice(h * dh, (h + 1) * dh)
        qh = q[..., sl].astype(jnp.bfloat16)
        kh = k[..., sl].astype(jnp.bfloat16)
        vh = v[..., sl].astype(jnp.bfloat16)
        s = jnp.einsum("bqd,bkd->bqk", qh, kh,
                       preferred_element_type=jnp.float32) * scale
        m = jnp.max(s, axis=-1, keepdims=True)
        p = jnp.exp(s - m)
        denom = jnp.sum(p, axis=-1, keepdims=True)
        p = p * pl.reciprocal(denom, approx=True)      # EUP slot
        outs.append(jnp.einsum("bqk,bkd->bqd", p.astype(jnp.bfloat16), vh,
                               preferred_element_type=jnp.float32))
    return jnp.concatenate(outs, axis=-1)


def _attn_block_kernel(x_ref, wqkv_ref, bqkv_ref, wo_ref, bo_ref,
                       w1_ref, b1_ref, w2_ref, b2_ref, o_ref,
                       *, num_heads, eps, scale):
    """Whole self-attention transformer block fused in one kernel."""
    x = x_ref[...]                                       # (GB, L, Hd) f32
    gb, l, hd = x.shape
    xn = _ln_stats(x, eps)                               # non-affine pre-norm
    qkv = _mm(xn.reshape(gb * l, hd), wqkv_ref, bqkv_ref).reshape(gb, l, 3 * hd)
    q, k, v = qkv[..., :hd], qkv[..., hd:2 * hd], qkv[..., 2 * hd:]
    attn = _heads_attention(q, k, v, num_heads, scale)
    attn = _mm(attn.reshape(gb * l, hd), wo_ref, bo_ref).reshape(gb, l, hd)
    x = x + attn
    xn2 = _ln_stats(x, eps)
    h1 = _gelu_tanh(_mm(xn2.reshape(gb * l, hd), w1_ref, b1_ref))
    y = _mm(h1, w2_ref, b2_ref).reshape(gb, l, hd)
    o_ref[...] = x + y


def _cross_block_kernel(x_ref, c_ref, wq_ref, bq_ref, wkv_ref, bkv_ref,
                        ncw_ref, ncb_ref, wo_ref, bo_ref,
                        w1_ref, b1_ref, w2_ref, b2_ref, o_ref,
                        *, num_heads, eps, eps_ctx, scale):
    """Whole cross-attention transformer block fused in one kernel."""
    x = x_ref[...]                                       # (GB, Lq, Hd)
    ctx = c_ref[...]                                     # (GB, Lk, Hd)
    gb, lq, hd = x.shape
    lk = ctx.shape[1]
    xn = _ln_stats(x, eps)
    cn = _ln_stats(ctx, eps_ctx) * ncw_ref[...] + ncb_ref[...]    # affine ctx norm
    q = _mm(xn.reshape(gb * lq, hd), wq_ref, bq_ref).reshape(gb, lq, hd)
    kv = _mm(cn.reshape(gb * lk, hd), wkv_ref, bkv_ref).reshape(gb, lk, 2 * hd)
    k, v = kv[..., :hd], kv[..., hd:]
    attn = _heads_attention(q, k, v, num_heads, scale)
    attn = _mm(attn.reshape(gb * lq, hd), wo_ref, bo_ref).reshape(gb, lq, hd)
    x = x + attn
    xn2 = _ln_stats(x, eps)
    h1 = _gelu_tanh(_mm(xn2.reshape(gb * lq, hd), w1_ref, b1_ref))
    y = _mm(h1, w2_ref, b2_ref).reshape(gb, lq, hd)
    o_ref[...] = x + y


def _tail_kernel(tok_ref, tf_ref, wout_ref, bout_ref, gn_g_ref, gn_b_ref,
                 wu_ref, bu_ref, wh_ref, bh_ref,
                 dc_ref, ntf_ref, hd_ref, *, latent, eps, apply_sigmoid):
    """out_proj + GroupNorm(1) + ffeat_updater(+GELU)+residual + vis/conf heads."""
    delta = _mm(tok_ref[...], wout_ref, bout_ref)        # (TM, latent+2)
    dc_ref[...] = delta[:, :2]
    df = delta[:, 2:2 + latent]
    mu = jnp.mean(df, axis=-1, keepdims=True)
    xc = df - mu
    var = jnp.mean(xc * xc, axis=-1, keepdims=True)
    gn = xc * jax.lax.rsqrt(var + eps) * gn_g_ref[...] + gn_b_ref[...]
    upd = _gelu_erf(_mm(gn, wu_ref, bu_ref))
    ntf = upd + tf_ref[...]
    ntf_ref[...] = ntf
    heads = _mm(ntf, wh_ref, bh_ref)
    if apply_sigmoid:
        heads = jax.nn.sigmoid(heads)
    hd_ref[...] = heads


# ============================================================================
# Pallas wrappers
# ============================================================================

def pallas_channel_layernorm(x, gamma, beta, eps=1e-5):
    """x: (M, C, L); LayerNorm over the channel axis C (no transposes)."""
    M, C, L = x.shape
    Lp = _round_up(L, LANE)
    TL = Lp if Lp <= 512 else 512
    if Lp % TL:
        Lp = _round_up(Lp, TL)
    xp = jnp.pad(x, ((0, 0), (0, 0), (0, Lp - L))) if Lp != L else x
    out = pl.pallas_call(
        functools.partial(_channel_ln_kernel, eps=eps),
        out_shape=jax.ShapeDtypeStruct((M, C, Lp), jnp.float32),
        grid=(M, Lp // TL),
        in_specs=[pl.BlockSpec((1, C, TL), lambda i, j: (i, 0, j)),
                  pl.BlockSpec((C, 1), lambda i, j: (0, 0)),
                  pl.BlockSpec((C, 1), lambda i, j: (0, 0))],
        out_specs=pl.BlockSpec((1, C, TL), lambda i, j: (i, 0, j)),
        compiler_params=_cparams(2),
    )(xp, gamma, beta)
    return out[:, :, :L] if Lp != L else out


def pallas_linear(x, lin, act=None, add=None):
    """y = act((x [+ add]) @ w + b) with pre-padded / pre-cast weights."""
    lead = x.shape[:-1]
    K = x.shape[-1]
    M = int(math.prod(lead)) if lead else 1
    N = lin["w"].shape[1]
    TM, Mp = _choose_row_tile(M)

    x2 = _pad_rows(x.reshape(M, K), Mp)
    args = [x2]
    in_specs = [pl.BlockSpec((TM, K), lambda i: (i, 0))]
    if add is not None:
        args.append(_pad_rows(add.reshape(M, K), Mp))
        in_specs.append(pl.BlockSpec((TM, K), lambda i: (i, 0)))
    args += [lin["w"], lin["b"]]
    in_specs += [pl.BlockSpec(lin["w"].shape, lambda i: (0, 0)),
                 pl.BlockSpec(lin["b"].shape, lambda i: (0, 0))]

    out = pl.pallas_call(
        functools.partial(_linear_kernel, act=act, use_add=add is not None),
        out_shape=jax.ShapeDtypeStruct((Mp, N), jnp.float32),
        grid=(Mp // TM,),
        in_specs=in_specs,
        out_specs=pl.BlockSpec((TM, N), lambda i: (i, 0)),
        compiler_params=_cparams(1),
    )(*args)
    out = out[:M] if Mp != M else out
    return out.reshape(lead + (N,))


def pallas_mlp(x, mlp, act):
    """Fused 2-layer MLP with pre-prepared weights."""
    lead = x.shape[:-1]
    K = x.shape[-1]
    M = int(math.prod(lead)) if lead else 1
    N = mlp["w2"].shape[1]
    TM, Mp = _choose_row_tile(M)
    x2 = _pad_rows(x.reshape(M, K), Mp)
    out = pl.pallas_call(
        functools.partial(_mlp_kernel, act=act),
        out_shape=jax.ShapeDtypeStruct((Mp, N), jnp.float32),
        grid=(Mp // TM,),
        in_specs=[pl.BlockSpec((TM, K), lambda i: (i, 0)),
                  pl.BlockSpec(mlp["w1"].shape, lambda i: (0, 0)),
                  pl.BlockSpec(mlp["b1"].shape, lambda i: (0, 0)),
                  pl.BlockSpec(mlp["w2"].shape, lambda i: (0, 0)),
                  pl.BlockSpec(mlp["b2"].shape, lambda i: (0, 0))],
        out_specs=pl.BlockSpec((TM, N), lambda i: (i, 0)),
        compiler_params=_cparams(1),
    )(x2, mlp["w1"], mlp["b1"], mlp["w2"], mlp["b2"])
    out = out[:M] if Mp != M else out
    return out.reshape(lead + (N,))


def pallas_corr(targets, fmap2s, c_latent):
    """targets: (BS, N, C), fmap2s: (BS, C, HW) -> (BS, N, HW) / sqrt(C)."""
    BS, N, C = targets.shape
    HW = fmap2s.shape[2]
    GB, THW = _pick_corr_tiles(BS, N, C, HW)
    return pl.pallas_call(
        functools.partial(_corr_kernel, inv_sqrt_c=1.0 / math.sqrt(c_latent)),
        out_shape=jax.ShapeDtypeStruct((BS, N, HW), jnp.float32),
        grid=(BS // GB, HW // THW),
        in_specs=[pl.BlockSpec((GB, N, C), lambda i, j: (i, 0, 0)),
                  pl.BlockSpec((GB, C, THW), lambda i, j: (i, 0, j))],
        out_specs=pl.BlockSpec((GB, N, THW), lambda i, j: (i, 0, j)),
        compiler_params=_cparams(2),
    )(targets, fmap2s)


def fused_attn_block(x, blk, num_heads):
    """x: (B_, L, Hd) -> (B_, L, Hd); whole self-attn block in one kernel."""
    B_, L, Hd = x.shape
    GB = _pick_batch_group(B_)
    ws = [blk["w_qkv"], blk["b_qkv"], blk["wo"], blk["bo"],
          blk["w1"], blk["b1"], blk["w2"], blk["b2"]]
    return pl.pallas_call(
        functools.partial(_attn_block_kernel, num_heads=num_heads, eps=1e-6,
                          scale=float((Hd // num_heads) ** -0.5)),
        out_shape=jax.ShapeDtypeStruct((B_, L, Hd), jnp.float32),
        grid=(B_ // GB,),
        in_specs=[pl.BlockSpec((GB, L, Hd), lambda i: (i, 0, 0))]
                 + [pl.BlockSpec(w.shape, lambda i: (0, 0)) for w in ws],
        out_specs=pl.BlockSpec((GB, L, Hd), lambda i: (i, 0, 0)),
        compiler_params=_cparams(1),
    )(x, *ws)


def fused_cross_block(x, ctx, blk, num_heads):
    """x: (B_, Lq, Hd), ctx: (B_, Lk, Hd) -> (B_, Lq, Hd)."""
    B_, Lq, Hd = x.shape
    Lk = ctx.shape[1]
    GB = _pick_batch_group(B_)
    ws = [blk["wq"], blk["bq"], blk["wkv"], blk["bkv"], blk["ncw"], blk["ncb"],
          blk["wo"], blk["bo"], blk["w1"], blk["b1"], blk["w2"], blk["b2"]]
    return pl.pallas_call(
        functools.partial(_cross_block_kernel, num_heads=num_heads, eps=1e-6,
                          eps_ctx=1e-5, scale=float((Hd // num_heads) ** -0.5)),
        out_shape=jax.ShapeDtypeStruct((B_, Lq, Hd), jnp.float32),
        grid=(B_ // GB,),
        in_specs=[pl.BlockSpec((GB, Lq, Hd), lambda i: (i, 0, 0)),
                  pl.BlockSpec((GB, Lk, Hd), lambda i: (i, 0, 0))]
                 + [pl.BlockSpec(w.shape, lambda i: (0, 0)) for w in ws],
        out_specs=pl.BlockSpec((GB, Lq, Hd), lambda i: (i, 0, 0)),
        compiler_params=_cparams(1),
    )(x, ctx, *ws)


def pallas_tail(tok_rows, tf_rows, tail, *, apply_sigmoid):
    """Fused out-proj + GroupNorm + feature updater + vis/conf heads."""
    M, Hd = tok_rows.shape
    latent = tf_rows.shape[1]
    TM, Mp = _choose_row_tile(M)
    tok2 = _pad_rows(tok_rows, Mp)
    tf2 = _pad_rows(tf_rows, Mp)
    ws = [tail["wout"], tail["bout"], tail["gn_g"], tail["gn_b"],
          tail["wu"], tail["bu"], tail["wh"], tail["bh"]]
    dc, ntf, heads = pl.pallas_call(
        functools.partial(_tail_kernel, latent=latent, eps=1e-5,
                          apply_sigmoid=apply_sigmoid),
        out_shape=(jax.ShapeDtypeStruct((Mp, 2), jnp.float32),
                   jax.ShapeDtypeStruct((Mp, latent), jnp.float32),
                   jax.ShapeDtypeStruct((Mp, 2), jnp.float32)),
        grid=(Mp // TM,),
        in_specs=[pl.BlockSpec((TM, Hd), lambda i: (i, 0)),
                  pl.BlockSpec((TM, latent), lambda i: (i, 0))]
                 + [pl.BlockSpec(w.shape, lambda i: (0, 0)) for w in ws],
        out_specs=[pl.BlockSpec((TM, 2), lambda i: (i, 0)),
                   pl.BlockSpec((TM, latent), lambda i: (i, 0)),
                   pl.BlockSpec((TM, 2), lambda i: (i, 0))],
        compiler_params=_cparams(1),
    )(tok2, tf2, *ws)
    if Mp != M:
        dc, ntf, heads = dc[:M], ntf[:M], heads[:M]
    return dc, ntf, heads


# ============================================================================
# JAX glue: bilinear sampling, positional embeddings, pyramids
# ============================================================================

# TODO(synk): data-dependent bilinear gather (F.grid_sample) has no clean
# BlockSpec expression; kept in plain JAX (gather). All matmuls stay in Pallas.
def _grid_sample_single(img, grid, padding_mode):
    """img: (C, H, W); grid: (Hg, Wg, 2) pixel coords (x, y); align_corners=True."""
    C, H, W = img.shape
    x = grid[..., 0]
    y = grid[..., 1]
    if padding_mode == "border":
        x = jnp.clip(x, 0.0, W - 1.0)
        y = jnp.clip(y, 0.0, H - 1.0)
    x0 = jnp.floor(x); y0 = jnp.floor(y)
    x1 = x0 + 1.0;     y1 = y0 + 1.0
    wx1 = x - x0; wx0 = 1.0 - wx1
    wy1 = y - y0; wy0 = 1.0 - wy1

    def fetch(ix, iy):
        inb = (ix >= 0) & (ix <= W - 1) & (iy >= 0) & (iy <= H - 1)
        ixc = jnp.clip(ix, 0, W - 1).astype(jnp.int32)
        iyc = jnp.clip(iy, 0, H - 1).astype(jnp.int32)
        val = img[:, iyc, ixc]              # (C, Hg, Wg)
        if padding_mode == "zeros":
            val = val * inb.astype(img.dtype)
        return val

    v00 = fetch(x0, y0); v10 = fetch(x1, y0)
    v01 = fetch(x0, y1); v11 = fetch(x1, y1)
    return (v00 * (wx0 * wy0) + v10 * (wx1 * wy0)
            + v01 * (wx0 * wy1) + v11 * (wx1 * wy1))


def sample_features4d(fm, coords):
    """fm: (B, C, H, W); coords: (B, N, 2) pixel (x, y) -> (B, N, C)."""
    grid = coords[:, :, None, :]                                  # (B, N, 1, 2)
    sampled = jax.vmap(lambda im, g: _grid_sample_single(im, g, "border"))(fm, grid)
    return jnp.transpose(sampled[..., 0], (0, 2, 1))              # (B, N, C)


def get_2d_embedding(xy, C):
    """xy: (M, S, 2) -> (M, S, 2*C)  (cat_coords=False), sin/cos interleave."""
    x = xy[..., 0:1]
    y = xy[..., 1:2]
    div_term = (jnp.arange(0, C, 2, dtype=jnp.float32) * (1000.0 / C)).reshape(1, 1, C // 2)
    pe_x = jnp.stack([jnp.sin(x * div_term), jnp.cos(x * div_term)],
                     axis=-1).reshape(xy.shape[:-1] + (C,))
    pe_y = jnp.stack([jnp.sin(y * div_term), jnp.cos(y * div_term)],
                     axis=-1).reshape(xy.shape[:-1] + (C,))
    return jnp.concatenate([pe_x, pe_y], axis=-1)


def get_2d_sincos_pos_embed(embed_dim, grid_size_h, grid_size_w):
    def emb_1d(dim, pos):
        omega = jnp.arange(dim // 2, dtype=jnp.float32) / (dim / 2.0)
        omega = 1.0 / (10000.0 ** omega)
        out = pos.reshape(-1)[:, None] * omega[None, :]
        return jnp.concatenate([jnp.sin(out), jnp.cos(out)], axis=1)

    grid_h = jnp.arange(grid_size_h, dtype=jnp.float32)
    grid_w = jnp.arange(grid_size_w, dtype=jnp.float32)
    gx, gy = jnp.meshgrid(grid_w, grid_h)
    emb = jnp.concatenate([emb_1d(embed_dim // 2, gx),
                           emb_1d(embed_dim // 2, gy)], axis=1)    # (H*W, D)
    return emb.reshape(1, grid_size_h, grid_size_w, embed_dim).transpose(0, 3, 1, 2)


def build_corr_pyramid(fmaps, num_levels):
    """fmaps: (B, S, C, H, W) -> list of 2x avg-pooled levels."""
    pyr = [fmaps]
    cur = fmaps
    for _ in range(num_levels - 1):
        B, S, C, H, W = cur.shape
        H2, W2 = H // 2, W // 2
        x = cur[:, :, :, : H2 * 2, : W2 * 2].reshape(B, S, C, H2, 2, W2, 2)
        cur = x.mean(axis=(4, 6))
        pyr.append(cur)
    return pyr


def corr_pyramid_sample(pyramid, targets, coords, radius, latent_dim):
    """targets: (B,S,N,C), coords: (B,S,N,2) -> (B,S,N, levels*(2r+1)^2)."""
    B, S, N, C = targets.shape
    r = radius
    d = jnp.linspace(-r, r, 2 * r + 1, dtype=jnp.float32)
    dy, dx = jnp.meshgrid(d, d, indexing="ij")
    delta = jnp.stack([dy, dx], axis=-1)                           # (2r+1, 2r+1, 2)
    t = targets.reshape(B * S, N, C)
    out_pyr = []
    for lvl, fm in enumerate(pyramid):
        H, W = fm.shape[-2:]
        fmap2s = fm.reshape(B * S, C, H * W)
        corrs = pallas_corr(t, fmap2s, latent_dim)                 # (B*S, N, H*W)
        corrs = corrs.reshape(B * S * N, 1, H, W)
        centroid = coords.reshape(B * S * N, 1, 1, 2) / (2.0 ** lvl)
        coords_lvl = centroid + delta[None]
        sampled = jax.vmap(lambda im, g: _grid_sample_single(im, g, "zeros"))(corrs, coords_lvl)
        out_pyr.append(sampled.reshape(B, S, N, (2 * r + 1) ** 2))
    return jnp.concatenate(out_pyr, axis=-1)


# ============================================================================
# EfficientUpdateFormer (fused-block version)
# ============================================================================

def updateformer_forward(uf, tokens, cfg):
    """tokens: (B, N, T, hidden) -> (B, N, T, hidden) (pre output-projection)."""
    B, N, T, hidden = tokens.shape
    nh = cfg["num_heads"]
    add_space = cfg["use_spaceatt"]
    init_tokens = tokens
    if add_space:
        virt = jnp.tile(uf["virtual_tracks"], (B, 1, T, 1))
        tokens = jnp.concatenate([tokens, virt], axis=1)
    Ntot = tokens.shape[1]
    n_time = len(uf["time_blocks"])
    n_space = len(uf["space_virtual_blocks"]) if add_space else 0
    j = 0
    for i in range(n_time):
        tt = tokens.reshape(B * Ntot, T, hidden)
        tt = fused_attn_block(tt, uf["time_blocks"][i], nh)
        tokens = tt.reshape(B, Ntot, T, hidden)
        if add_space and (i % (n_time // n_space) == 0):
            st = jnp.transpose(tokens, (0, 2, 1, 3)).reshape(B * T, Ntot, hidden)
            nv = cfg["num_virtual_tracks"]
            pts = st[:, : Ntot - nv]
            vts = st[:, Ntot - nv:]
            vts = fused_cross_block(vts, pts, uf["space_virtual2point_blocks"][j], nh)
            vts = fused_attn_block(vts, uf["space_virtual_blocks"][j], nh)
            pts = fused_cross_block(pts, vts, uf["space_point2virtual_blocks"][j], nh)
            st = jnp.concatenate([pts, vts], axis=1)
            tokens = jnp.transpose(st.reshape(B, T, Ntot, hidden), (0, 2, 1, 3))
            j += 1
    if add_space:
        tokens = tokens[:, : Ntot - cfg["num_virtual_tracks"]]
    return tokens + init_tokens


# ============================================================================
# BaseTrackerPredictor forward
# ============================================================================

def base_tracker_predictor_forward(pp, query_points, fmaps, cfg,
                                   iters=2, down_ratio=1, apply_sigmoid=True):
    B, N, _ = query_points.shape
    _, S, C, HH, WW = fmaps.shape
    latent = cfg["latent_dim"]
    D_t = cfg["transformer_dim"]
    D_t_pad = _round_up(D_t, LANE)

    # fmap_norm: LayerNorm over the channel dim, no big permutes
    fmaps_n = pallas_channel_layernorm(
        fmaps.reshape(B * S, C, HH * WW),
        pp["fmap_norm_g"], pp["fmap_norm_b"], 1e-5).reshape(B, S, C, HH, WW)

    qp = query_points
    if down_ratio > 1:
        qp = qp / float(down_ratio)
    qp = qp / float(cfg["stride"])
    coords = jnp.tile(qp.reshape(B, 1, N, 2), (1, S, 1, 1))        # (B, S, N, 2)
    query_track_feat = sample_features4d(fmaps_n[:, 0], coords[:, 0])   # (B, N, C)
    track_feats = jnp.tile(query_track_feat[:, None], (1, S, 1, 1))     # (B, S, N, C)
    coords_backup = coords

    pyramid = build_corr_pyramid(fmaps_n, cfg["corr_levels"])
    pos_embed = get_2d_sincos_pos_embed(D_t, HH, WW)               # (1, D_t, H, W)
    pos_embed_b = jnp.broadcast_to(pos_embed, (B,) + pos_embed.shape[1:])

    qrt = jnp.concatenate(
        [pp["query_ref_token"][:, 0:1],
         jnp.tile(pp["query_ref_token"][:, 1:2], (1, S - 1, 1))], axis=1)   # (1, S, D_t)

    # loop-invariant: coords[:, 0] is pinned to the query points, so both the
    # positional-embedding gather and the query-ref-token add are hoisted.
    sampled_pos_emb = sample_features4d(pos_embed_b, coords[:, 0]).reshape(B * N, 1, D_t)
    pos_plus_qrt = sampled_pos_emb + qrt                            # (B*N, S, D_t)
    if D_t_pad != D_t:
        pos_plus_qrt = jnp.pad(pos_plus_qrt, ((0, 0), (0, 0), (0, D_t_pad - D_t)))

    coord_preds = []
    vis_conf = None
    for _ in range(iters):
        fcorrs = corr_pyramid_sample(pyramid, track_feats, coords,
                                     cfg["corr_radius"], latent)    # (B, S, N, LRR)
        corr_dim = fcorrs.shape[3]
        fcorrs_ = jnp.transpose(fcorrs, (0, 2, 1, 3)).reshape(B * N, S, corr_dim)
        # corr_mlp: Linear -> exact GELU -> Linear fused in one kernel
        fcorrs_ = pallas_mlp(fcorrs_, pp["corr_mlp"], act="gelu_erf")

        flows = jnp.transpose(coords - coords[:, 0:1], (0, 2, 1, 3)).reshape(B * N, S, 2)
        flows_emb = get_2d_embedding(flows, cfg["flows_emb_dim"])
        flows_emb = jnp.concatenate([flows_emb,
                                     flows / cfg["max_scale"],
                                     flows / cfg["max_scale"]], axis=-1)
        track_feats_ = jnp.transpose(track_feats, (0, 2, 1, 3)).reshape(B * N, S, latent)
        pieces = [flows_emb, fcorrs_, track_feats_]
        if D_t_pad != D_t:                    # carry the features lane-padded
            pieces.append(jnp.zeros((B * N, S, D_t_pad - D_t), jnp.float32))
        transformer_input = jnp.concatenate(pieces, axis=2)

        # in-projection with the (pos_emb + query_ref_token) add fused in
        tokens = pallas_linear(transformer_input, pp["uf"]["in_proj"],
                               add=pos_plus_qrt)
        tokens = tokens.reshape(B, N, S, -1)
        tokens = updateformer_forward(pp["uf"], tokens, cfg)

        # fused: out-proj + GroupNorm + feature updater (+residual) + heads
        dc, ntf, heads = pallas_tail(tokens.reshape(B * N * S, -1),
                                     track_feats_.reshape(B * N * S, latent),
                                     pp["tail"], apply_sigmoid=apply_sigmoid)

        track_feats = ntf.reshape(B, N, S, latent).transpose(0, 2, 1, 3)
        coords = coords + dc.reshape(B, N, S, 2).transpose(0, 2, 1, 3)
        coords = coords.at[:, 0].set(coords_backup[:, 0])
        scale = cfg["stride"] * (down_ratio if down_ratio > 1 else 1)
        coord_preds.append(coords * scale)
        vis_conf = heads.reshape(B, N, S, 2).transpose(0, 2, 1, 3)   # (B, S, N, 2)

    vis_e = vis_conf[..., 0]
    conf_e = vis_conf[..., 1] if cfg["predict_conf"] else None
    return coord_preds, vis_e, conf_e


# ============================================================================
# Deterministic synthetic parameters + one-time preparation (pad / bf16 cast)
# ============================================================================

def init_params(key, cfg):
    latent = cfg["latent_dim"]
    hidden = cfg["hidden_size"]
    D_t = cfg["transformer_dim"]
    corr_in = cfg["corr_levels"] * (2 * cfg["corr_radius"] + 1) ** 2
    mlp_hidden = int(hidden * 4.0)

    keys = iter(jax.random.split(key, 2048))

    def w(shape, scale=0.02):
        return (scale * jax.random.normal(next(keys), shape)).astype(jnp.float32)

    def zeros(shape):
        return jnp.zeros(shape, jnp.float32)

    def ones(shape):
        return jnp.ones(shape, jnp.float32)

    def self_attn_params():
        return dict(w_qkv=w((hidden, 3 * hidden)), b_qkv=zeros((3 * hidden,)),
                    wo=w((hidden, hidden)), bo=zeros((hidden,)))

    def cross_attn_params():
        return dict(wq=w((hidden, hidden)), bq=zeros((hidden,)),
                    w_kv=w((hidden, 2 * hidden)), b_kv=zeros((2 * hidden,)),
                    wo=w((hidden, hidden)), bo=zeros((hidden,)))

    def attn_block_params():
        return dict(attn=self_attn_params(),
                    mlp_w1=w((hidden, mlp_hidden)), mlp_b1=zeros((mlp_hidden,)),
                    mlp_w2=w((mlp_hidden, hidden)), mlp_b2=zeros((hidden,)))

    def cross_block_params():
        return dict(attn=cross_attn_params(),
                    mlp_w1=w((hidden, mlp_hidden)), mlp_b1=zeros((mlp_hidden,)),
                    mlp_w2=w((mlp_hidden, hidden)), mlp_b2=zeros((hidden,)),
                    norm_ctx_w=ones((hidden,)), norm_ctx_b=zeros((hidden,)))

    depth = cfg["depth"]
    space_depth = depth if cfg["use_spaceatt"] else 0
    uf = dict(
        in_w=w((D_t, hidden)), in_b=zeros((hidden,)),
        out_w=w((hidden, latent + 2)), out_b=zeros((latent + 2,)),
        virtual_tracks=w((1, cfg["num_virtual_tracks"], 1, hidden), 1.0),
        time_blocks=[attn_block_params() for _ in range(depth)],
        space_virtual_blocks=[attn_block_params() for _ in range(space_depth)],
        space_point2virtual_blocks=[cross_block_params() for _ in range(space_depth)],
        space_virtual2point_blocks=[cross_block_params() for _ in range(space_depth)],
    )
    return dict(
        fmap_norm_w=ones((latent,)), fmap_norm_b=zeros((latent,)),
        corr_mlp_w1=w((corr_in, hidden)), corr_mlp_b1=zeros((hidden,)),
        corr_mlp_w2=w((hidden, latent)), corr_mlp_b2=zeros((latent,)),
        query_ref_token=w((1, 2, D_t), 1.0),
        updateformer=uf,
        ffeat_norm_w=ones((latent,)), ffeat_norm_b=zeros((latent,)),
        ffeat_updater_w=w((latent, latent)), ffeat_updater_b=zeros((latent,)),
        vis_w=w((latent, 1)), vis_b=zeros((1,)),
        conf_w=w((latent, 1)), conf_b=zeros((1,)),
    )


def prepare_params(params, cfg):
    """One-time weight preparation: bf16 cast, K-padding, bias reshape."""
    D_t = cfg["transformer_dim"]
    D_t_pad = _round_up(D_t, LANE)

    def lin(wname, bname=None, w=None, b=None, k_pad=None):
        ww = params[wname] if w is None else w
        bb = params[bname] if b is None else b
        K, Nout = ww.shape
        if k_pad is not None and k_pad != K:
            ww = jnp.pad(ww, ((0, k_pad - K), (0, 0)))
        return dict(w=ww.astype(jnp.bfloat16), b=bb.reshape(1, Nout))

    def prep_block(b):
        return dict(w_qkv=b["attn"]["w_qkv"].astype(jnp.bfloat16),
                    b_qkv=b["attn"]["b_qkv"].reshape(1, -1),
                    wo=b["attn"]["wo"].astype(jnp.bfloat16),
                    bo=b["attn"]["bo"].reshape(1, -1),
                    w1=b["mlp_w1"].astype(jnp.bfloat16), b1=b["mlp_b1"].reshape(1, -1),
                    w2=b["mlp_w2"].astype(jnp.bfloat16), b2=b["mlp_b2"].reshape(1, -1))

    def prep_cross(b):
        return dict(wq=b["attn"]["wq"].astype(jnp.bfloat16),
                    bq=b["attn"]["bq"].reshape(1, -1),
                    wkv=b["attn"]["w_kv"].astype(jnp.bfloat16),
                    bkv=b["attn"]["b_kv"].reshape(1, -1),
                    ncw=b["norm_ctx_w"].reshape(1, -1),
                    ncb=b["norm_ctx_b"].reshape(1, -1),
                    wo=b["attn"]["wo"].astype(jnp.bfloat16),
                    bo=b["attn"]["bo"].reshape(1, -1),
                    w1=b["mlp_w1"].astype(jnp.bfloat16), b1=b["mlp_b1"].reshape(1, -1),
                    w2=b["mlp_w2"].astype(jnp.bfloat16), b2=b["mlp_b2"].reshape(1, -1))

    uf = params["updateformer"]
    head_w = jnp.concatenate([params["vis_w"], params["conf_w"]], axis=1)    # (latent, 2)
    head_b = jnp.concatenate([params["vis_b"], params["conf_b"]], axis=0)    # (2,)

    return dict(
        fmap_norm_g=params["fmap_norm_w"].reshape(-1, 1),
        fmap_norm_b=params["fmap_norm_b"].reshape(-1, 1),
        corr_mlp=dict(w1=params["corr_mlp_w1"].astype(jnp.bfloat16),
                      b1=params["corr_mlp_b1"].reshape(1, -1),
                      w2=params["corr_mlp_w2"].astype(jnp.bfloat16),
                      b2=params["corr_mlp_b2"].reshape(1, -1)),
        query_ref_token=params["query_ref_token"],
        uf=dict(
            in_proj=lin(None, None, w=uf["in_w"], b=uf["in_b"], k_pad=D_t_pad),
            virtual_tracks=uf["virtual_tracks"],
            time_blocks=[prep_block(b) for b in uf["time_blocks"]],
            space_virtual_blocks=[prep_block(b) for b in uf["space_virtual_blocks"]],
            space_virtual2point_blocks=[prep_cross(b) for b in uf["space_virtual2point_blocks"]],
            space_point2virtual_blocks=[prep_cross(b) for b in uf["space_point2virtual_blocks"]],
        ),
        tail=dict(wout=uf["out_w"].astype(jnp.bfloat16),
                  bout=uf["out_b"].reshape(1, -1),
                  gn_g=params["ffeat_norm_w"].reshape(1, -1),
                  gn_b=params["ffeat_norm_b"].reshape(1, -1),
                  wu=params["ffeat_updater_w"].astype(jnp.bfloat16),
                  bu=params["ffeat_updater_b"].reshape(1, -1),
                  wh=head_w.astype(jnp.bfloat16),
                  bh=head_b.reshape(1, -1)),
    )


# ============================================================================
# Main
# ============================================================================

if __name__ == "__main__":
    cfg = dict(stride=1, corr_levels=2, corr_radius=1, latent_dim=32,
               hidden_size=64, num_heads=4, depth=1, max_scale=518,
               predict_conf=True, use_spaceatt=True, num_virtual_tracks=4)
    cfg["flows_emb_dim"] = cfg["latent_dim"] // 2
    cfg["transformer_dim"] = 3 * cfg["latent_dim"] + 4   # = 100

    B, N, S, HH, WW = 1, 4, 4, 16, 16

    key = jax.random.PRNGKey(0)
    kp, kq, kf = jax.random.split(key, 3)
    raw_params = init_params(kp, cfg)
    pp = prepare_params(raw_params, cfg)   # one-time pad / bf16 cast, outside jit

    query_points = jax.random.uniform(kq, (B, N, 2), dtype=jnp.float32,
                                      minval=1.0, maxval=float(HH - 2))
    fmaps = jax.random.normal(kf, (B, S, cfg["latent_dim"], HH, WW), dtype=jnp.float32)

    fwd = jax.jit(lambda p, q, f: base_tracker_predictor_forward(
        p, q, f, cfg, iters=2, down_ratio=1, apply_sigmoid=True))

    coord_preds, vis_e, conf_e = fwd(pp, query_points, fmaps)
    jax.block_until_ready((coord_preds, vis_e, conf_e))

    assert len(coord_preds) == 2 and coord_preds[0].shape == (B, S, N, 2)
    assert vis_e.shape == (B, S, N) and conf_e.shape == (B, S, N)
    assert bool(jnp.all(jnp.isfinite(coord_preds[-1])))
    assert bool(jnp.all(jnp.isfinite(vis_e))) and bool(jnp.all(jnp.isfinite(conf_e)))
    print("KERNEL_OK")
</pallas_src>

<mosaic_0001>
module attributes {stable_mosaic.version = 11 : i64} {
  func.func @_channel_ln_kernel(%arg0: i32, %arg1: i32, %arg2: memref<1x32x256xf32, #tpu.memory_space<vmem>>, %arg3: memref<32x1xf32, #tpu.memory_space<vmem>>, %arg4: memref<32x1xf32, #tpu.memory_space<vmem>>, %arg5: memref<1x32x256xf32, #tpu.memory_space<vmem>>) attributes {dimension_semantics = [#tpu.dimension_semantics<parallel>, #tpu.dimension_semantics<parallel>], iteration_bounds = array<i64: 4, 1>, scalar_prefetch = 0 : i64, scratch_operands = 0 : i64, tpu.core_type = #tpu.core_type<tc>, window_params = [{transform_indices = @transform_0, window_bounds = array<i64: 1, 32, 256>}, {pipeline_mode = #tpu.pipeline_mode<synchronous>, transform_indices = @transform_1, window_bounds = array<i64: 32, 1>}, {pipeline_mode = #tpu.pipeline_mode<synchronous>, transform_indices = @transform_2, window_bounds = array<i64: 32, 1>}, {transform_indices = @transform_3, window_bounds = array<i64: 1, 32, 256>}]} {
    %c0 = arith.constant 0 : index
    %c0_0 = arith.constant 0 : index
    %c0_1 = arith.constant 0 : index
    %0 = vector.load %arg2[%c0, %c0_0, %c0_1] : memref<1x32x256xf32, #tpu.memory_space<vmem>>, vector<1x32x256xf32>
    %cst = arith.constant dense<0.000000e+00> : vector<1x256xf32>
    %1 = vector.multi_reduction <add>, %0, %cst [1] : vector<1x32x256xf32> to vector<1x256xf32>
    %2 = vector.shape_cast %1 : vector<1x256xf32> to vector<1x1x256xf32>
    %cst_2 = arith.constant 3.200000e+01 : f32
    %3 = vector.broadcast %cst_2 : f32 to vector<1x1x256xf32>
    %4 = arith.divf %2, %3 : vector<1x1x256xf32>
    %5 = vector.broadcast %4 : vector<1x1x256xf32> to vector<1x32x256xf32>
    %6 = arith.subf %0, %5 : vector<1x32x256xf32>
    %7 = arith.mulf %6, %6 : vector<1x32x256xf32>
    %cst_3 = arith.constant dense<0.000000e+00> : vector<1x256xf32>
    %8 = vector.multi_reduction <add>, %7, %cst_3 [1] : vector<1x32x256xf32> to vector<1x256xf32>
    %9 = vector.shape_cast %8 : vector<1x256xf32> to vector<1x1x256xf32>
    %cst_4 = arith.constant 3.200000e+01 : f32
    %10 = vector.broadcast %cst_4 : f32 to vector<1x1x256xf32>
    %11 = arith.divf %9, %10 : vector<1x1x256xf32>
    %cst_5 = arith.constant 9.99999974E-6 : f32
    %12 = vector.broadcast %cst_5 : f32 to vector<1x1x256xf32>
    %13 = arith.addf %11, %12 : vector<1x1x256xf32>
    %14 = math.rsqrt %13 : vector<1x1x256xf32>
    %15 = vector.broadcast %14 : vector<1x1x256xf32> to vector<1x32x256xf32>
    %16 = arith.mulf %6, %15 : vector<1x32x256xf32>
    %c0_6 = arith.constant 0 : index
    %c0_7 = arith.constant 0 : index
    %17 = vector.load %arg3[%c0_6, %c0_7] : memref<32x1xf32, #tpu.memory_space<vmem>>, vector<32x1xf32>
    %18 = vector.shape_cast %17 : vector<32x1xf32> to vector<1x32x1xf32>
    %19 = vector.broadcast %18 : vector<1x32x1xf32> to vector<1x32x256xf32>
    %20 = arith.mulf %16, %19 : vector<1x32x256xf32>
    %c0_8 = arith.constant 0 : index
    %c0_9 = arith.constant 0 : index
    %21 = vector.load %arg4[%c0_8, %c0_9] : memref<32x1xf32, #tpu.memory_space<vmem>>, vector<32x1xf32>
    %22 = vector.shape_cast %21 : vector<32x1xf32> to vector<1x32x1xf32>
    %23 = vector.broadcast %22 : vector<1x32x1xf32> to vector<1x32x256xf32>
    %24 = arith.addf %20, %23 : vector<1x32x256xf32>
    %c0_10 = arith.constant 0 : index
    %c0_11 = arith.constant 0 : index
    %c0_12 = arith.constant 0 : index
    %25 = vector.load %arg5[%c0_10, %c0_11, %c0_12] : memref<1x32x256xf32, #tpu.memory_space<vmem>>, vector<1x32x256xf32>
    tpu.vector_store %arg5[%c0_10, %c0_11, %c0_12], %24 {strides = array<i32>} : memref<1x32x256xf32, #tpu.memory_space<vmem>>, vector<1x32x256xf32>,
    return
  }
  func.func @transform_0(%arg0: i32, %arg1: i32) -> (i32, i32, i32) {
    %c0_i32 = arith.constant 0 : i32
    %c0_i32_0 = arith.constant 0 : i32
    return %arg0, %c0_i32, %arg1 : i32, i32, i32
  }
  func.func @transform_1(%arg0: i32, %arg1: i32) -> (i32, i32) {
    %c0_i32 = arith.constant 0 : i32
    %c0_i32_0 = arith.constant 0 : i32
    %c0_i32_1 = arith.constant 0 : i32
    return %c0_i32, %c0_i32_0 : i32, i32
  }
  func.func @transform_2(%arg0: i32, %arg1: i32) -> (i32, i32) {
    %c0_i32 = arith.constant 0 : i32
    %c0_i32_0 = arith.constant 0 : i32
    %c0_i32_1 = arith.constant 0 : i32
    return %c0_i32, %c0_i32_0 : i32, i32
  }
  func.func @transform_3(%arg0: i32, %arg1: i32) -> (i32, i32, i32) {
    %c0_i32 = arith.constant 0 : i32
    %c0_i32_0 = arith.constant 0 : i32
    return %arg0, %c0_i32, %arg1 : i32, i32, i32
  }
}

module attributes {stable_mosaic.version = 11 : i64} {
  func.func @_corr_kernel(%arg0: i32, %arg1: i32, %arg2: memref<2x4x32xf32, #tpu.memory_space<vmem>>, %arg3: memref<2x32x64xf32, #tpu.memory_space<vmem>>, %arg4: memref<2x4x64xf32, #tpu.memory_space<vmem>>) attributes {dimension_semantics = [#tpu.dimension_semantics<parallel>, #tpu.dimension_semantics<parallel>], iteration_bounds = array<i64: 2, 1>, scalar_prefetch = 0 : i64, scratch_operands = 0 : i64, tpu.core_type = #tpu.core_type<tc>, window_params = [{transform_indices = @transform_0, window_bounds = array<i64: 2, 4, 32>}, {transform_indices = @transform_1, window_bounds = array<i64: 2, 32, 64>}, {transform_indices = @transform_2, window_bounds = array<i64: 2, 4, 64>}]} {
    %c0 = arith.constant 0 : index
    %c0_0 = arith.constant 0 : index
    %c0_1 = arith.constant 0 : index
    %0 = vector.load %arg2[%c0, %c0_0, %c0_1] : memref<2x4x32xf32, #tpu.memory_space<vmem>>, vector<2x4x32xf32>
    %1 = arith.truncf %0 : vector<2x4x32xf32> to vector<2x4x32xbf16>
    %c0_2 = arith.constant 0 : index
    %c0_3 = arith.constant 0 : index
    %c0_4 = arith.constant 0 : index
    %2 = vector.load %arg3[%c0_2, %c0_3, %c0_4] : memref<2x32x64xf32, #tpu.memory_space<vmem>>, vector<2x32x64xf32>
    %3 = arith.truncf %2 : vector<2x32x64xf32> to vector<2x32x64xbf16>
    "tpu.trace_start"() <{level = 10 : i32, message = "gnc,gch->gnh"}> : () -> ()
    %cst = arith.constant dense<0.000000e+00> : vector<2x4x64xf32>
    %4 = tpu.matmul %1, %3, %cst {dimension_numbers = #tpu.dot_dimension_numbers<[2], [1], [1], [2], [0, 0, 0, 1, 1, 2], [0], [0]>} : vector<2x4x32xbf16>, vector<2x32x64xbf16>, vector<2x4x64xf32> -> vector<2x4x64xf32>
    "tpu.trace_stop"() : () -> ()
    %cst_5 = arith.constant 0.176776692 : f32
    %5 = vector.broadcast %cst_5 : f32 to vector<2x4x64xf32>
    %6 = arith.mulf %4, %5 : vector<2x4x64xf32>
    %c0_6 = arith.constant 0 : index
    %c0_7 = arith.constant 0 : index
    %c0_8 = arith.constant 0 : index
    %7 = vector.load %arg4[%c0_6, %c0_7, %c0_8] : memref<2x4x64xf32, #tpu.memory_space<vmem>>, vector<2x4x64xf32>
    tpu.vector_store %arg4[%c0_6, %c0_7, %c0_8], %6 {strides = array<i32>} : memref<2x4x64xf32, #tpu.memory_space<vmem>>, vector<2x4x64xf32>,
    return
  }
  func.func @transform_0(%arg0: i32, %arg1: i32) -> (i32, i32, i32) {
    %c0_i32 = arith.constant 0 : i32
    %c0_i32_0 = arith.constant 0 : i32
    %c0_i32_1 = arith.constant 0 : i32
    return %arg0, %c0_i32, %c0_i32_0 : i32, i32, i32
  }
  func.func @transform_1(%arg0: i32, %arg1: i32) -> (i32, i32, i32) {
    %c0_i32 = arith.constant 0 : i32
    %c0_i32_0 = arith.constant 0 : i32
    return %arg0, %c0_i32, %arg1 : i32, i32, i32
  }
  func.func @transform_2(%arg0: i32, %arg1: i32) -> (i32, i32, i32) {
    %c0_i32 = arith.constant 0 : i32
    %c0_i32_0 = arith.constant 0 : i32
    return %arg0, %c0_i32, %arg1 : i32, i32, i32
  }
}

module attributes {stable_mosaic.version = 11 : i64} {
  func.func @_corr_kernel(%arg0: i32, %arg1: i32, %arg2: memref<2x4x32xf32, #tpu.memory_space<vmem>>, %arg3: memref<2x32x256xf32, #tpu.memory_space<vmem>>, %arg4: memref<2x4x256xf32, #tpu.memory_space<vmem>>) attributes {dimension_semantics = [#tpu.dimension_semantics<parallel>, #tpu.dimension_semantics<parallel>], iteration_bounds = array<i64: 2, 1>, scalar_prefetch = 0 : i64, scratch_operands = 0 : i64, tpu.core_type = #tpu.core_type<tc>, window_params = [{transform_indices = @transform_0, window_bounds = array<i64: 2, 4, 32>}, {transform_indices = @transform_1, window_bounds = array<i64: 2, 32, 256>}, {transform_indices = @transform_2, window_bounds = array<i64: 2, 4, 256>}]} {
    %c0 = arith.constant 0 : index
    %c0_0 = arith.constant 0 : index
    %c0_1 = arith.constant 0 : index
    %0 = vector.load %arg2[%c0, %c0_0, %c0_1] : memref<2x4x32xf32, #tpu.memory_space<vmem>>, vector<2x4x32xf32>
    %1 = arith.truncf %0 : vector<2x4x32xf32> to vector<2x4x32xbf16>
    %c0_2 = arith.constant 0 : index
    %c0_3 = arith.constant 0 : index
    %c0_4 = arith.constant 0 : index
    %2 = vector.load %arg3[%c0_2, %c0_3, %c0_4] : memref<2x32x256xf32, #tpu.memory_space<vmem>>, vector<2x32x256xf32>
    %3 = arith.truncf %2 : vector<2x32x256xf32> to vector<2x32x256xbf16>
    "tpu.trace_start"() <{level = 10 : i32, message = "gnc,gch->gnh"}> : () -> ()
    %cst = arith.constant dense<0.000000e+00> : vector<2x4x256xf32>
    %4 = tpu.matmul %1, %3, %cst {dimension_numbers = #tpu.dot_dimension_numbers<[2], [1], [1], [2], [0, 0, 0, 1, 1, 2], [0], [0]>} : vector<2x4x32xbf16>, vector<2x32x256xbf16>, vector<2x4x256xf32> -> vector<2x4x256xf32>
    "tpu.trace_stop"() : () -> ()
    %cst_5 = arith.constant 0.176776692 : f32
    %5 = vector.broadcast %cst_5 : f32 to vector<2x4x256xf32>
    %6 = arith.mulf %4, %5 : vector<2x4x256xf32>
    %c0_6 = arith.constant 0 : index
    %c0_7 = arith.constant 0 : index
    %c0_8 = arith.constant 0 : index
    %7 = vector.load %arg4[%c0_6, %c0_7, %c0_8] : memref<2x4x256xf32, #tpu.memory_space<vmem>>, vector<2x4x256xf32>
    tpu.vector_store %arg4[%c0_6, %c0_7, %c0_8], %6 {strides = array<i32>} : memref<2x4x256xf32, #tpu.memory_space<vmem>>, vector<2x4x256xf32>,
    return
  }
  func.func @transform_0(%arg0: i32, %arg1: i32) -> (i32, i32, i32) {
    %c0_i32 = arith.constant 0 : i32
    %c0_i32_0 = arith.constant 0 : i32
    %c0_i32_1 = arith.constant 0 : i32
    return %arg0, %c0_i32, %c0_i32_0 : i32, i32, i32
  }
  func.func @transform_1(%arg0: i32, %arg1: i32) -> (i32, i32, i32) {
    %c0_i32 = arith.constant 0 : i32
    %c0_i32_0 = arith.constant 0 : i32
    return %arg0, %c0_i32, %arg1 : i32, i32, i32
  }
  func.func @transform_2(%arg0: i32, %arg1: i32) -> (i32, i32, i32) {
    %c0_i32 = arith.constant 0 : i32
    %c0_i32_0 = arith.constant 0 : i32
    return %arg0, %c0_i32, %arg1 : i32, i32, i32
  }
}

module attributes {stable_mosaic.version = 11 : i64} {
  func.func @_mlp_kernel(%arg0: i32, %arg1: memref<8x18xf32, #tpu.memory_space<vmem>>, %arg2: memref<18x64xbf16, #tpu.memory_space<vmem>>, %arg3: memref<1x64xf32, #tpu.memory_space<vmem>>, %arg4: memref<64x32xbf16, #tpu.memory_space<vmem>>, %arg5: memref<1x32xf32, #tpu.memory_space<vmem>>, %arg6: memref<8x32xf32, #tpu.memory_space<vmem>>) attributes {dimension_semantics = [#tpu.dimension_semantics<parallel>], iteration_bounds = array<i64: 2>, scalar_prefetch = 0 : i64, scratch_operands = 0 : i64, tpu.core_type = #tpu.core_type<tc>, window_params = [{transform_indices = @transform_0, window_bounds = array<i64: 8, 18>}, {pipeline_mode = #tpu.pipeline_mode<synchronous>, transform_indices = @transform_1, window_bounds = array<i64: 18, 64>}, {pipeline_mode = #tpu.pipeline_mode<synchronous>, transform_indices = @transform_2, window_bounds = array<i64: 1, 64>}, {pipeline_mode = #tpu.pipeline_mode<synchronous>, transform_indices = @transform_3, window_bounds = array<i64: 64, 32>}, {pipeline_mode = #tpu.pipeline_mode<synchronous>, transform_indices = @transform_4, window_bounds = array<i64: 1, 32>}, {transform_indices = @transform_5, window_bounds = array<i64: 8, 32>}]} {
    %c0 = arith.constant 0 : index
    %c0_0 = arith.constant 0 : index
    %0 = vector.load %arg1[%c0, %c0_0] : memref<8x18xf32, #tpu.memory_space<vmem>>, vector<8x18xf32>
    %1 = arith.truncf %0 : vector<8x18xf32> to vector<8x18xbf16>
    %c0_1 = arith.constant 0 : index
    %c0_2 = arith.constant 0 : index
    %2 = vector.load %arg2[%c0_1, %c0_2] : memref<18x64xbf16, #tpu.memory_space<vmem>>, vector<18x64xbf16>
    %cst = arith.constant dense<0.000000e+00> : vector<8x64xf32>
    %3 = tpu.matmul %1, %2, %cst {dimension_numbers = #tpu.dot_dimension_numbers<[1], [0], [0], [1], [0, 0, 1, 1], [], []>} : vector<8x18xbf16>, vector<18x64xbf16>, vector<8x64xf32> -> vector<8x64xf32>
    %c0_3 = arith.constant 0 : index
    %c0_4 = arith.constant 0 : index
    %4 = vector.load %arg3[%c0_3, %c0_4] : memref<1x64xf32, #tpu.memory_space<vmem>>, vector<1x64xf32>
    %5 = vector.broadcast %4 : vector<1x64xf32> to vector<8x64xf32>
    %6 = arith.addf %3, %5 : vector<8x64xf32>
    %cst_5 = arith.constant 5.000000e-01 : f32
    %7 = vector.broadcast %cst_5 : f32 to vector<8x64xf32>
    %8 = arith.mulf %7, %6 : vector<8x64xf32>
    %cst_6 = arith.constant 0.707106769 : f32
    %9 = vector.broadcast %cst_6 : f32 to vector<8x64xf32>
    %10 = arith.mulf %6, %9 : vector<8x64xf32>
    %cst_7 = arith.constant 0.000000e+00 : f32
    %11 = vector.broadcast %cst_7 : f32 to vector<8x64xf32>
    %12 = arith.cmpf oge, %10, %11 : vector<8x64xf32>
    %cst_8 = arith.constant 1.000000e+00 : f32
    %cst_9 = arith.constant -1.000000e+00 : f32
    %13 = vector.broadcast %cst_8 : f32 to vector<8x64xf32>
    %14 = vector.broadcast %cst_9 : f32 to vector<8x64xf32>
    %15 = arith.select %12, %13, %14 : vector<8x64xi1>, vector<8x64xf32>
    %16 = math.absf %10 : vector<8x64xf32>
    %cst_10 = arith.constant 0.327591091 : f32
    %17 = vector.broadcast %cst_10 : f32 to vector<8x64xf32>
    %18 = arith.mulf %17, %16 : vector<8x64xf32>
    %cst_11 = arith.constant 1.000000e+00 : f32
    %19 = vector.broadcast %cst_11 : f32 to vector<8x64xf32>
    %20 = arith.addf %19, %18 : vector<8x64xf32>
    %cst_12 = arith.constant 1.000000e+00 : f32
    %21 = vector.broadcast %cst_12 : f32 to vector<8x64xf32>
    %22 = arith.divf %21, %20 : vector<8x64xf32>
    %cst_13 = arith.constant 1.06140542 : f32
    %23 = vector.broadcast %cst_13 : f32 to vector<8x64xf32>
    %24 = arith.mulf %23, %22 : vector<8x64xf32>
    %cst_14 = arith.constant -1.45315206 : f32
    %25 = vector.broadcast %cst_14 : f32 to vector<8x64xf32>
    %26 = arith.addf %24, %25 : vector<8x64xf32>
    %27 = arith.mulf %26, %22 : vector<8x64xf32>
    %cst_15 = arith.constant 1.42141378 : f32
    %28 = vector.broadcast %cst_15 : f32 to vector<8x64xf32>
    %29 = arith.addf %27, %28 : vector<8x64xf32>
    %30 = arith.mulf %29, %22 : vector<8x64xf32>
    %cst_16 = arith.constant -0.284496725 : f32
    %31 = vector.broadcast %cst_16 : f32 to vector<8x64xf32>
    %32 = arith.addf %30, %31 : vector<8x64xf32>
    %33 = arith.mulf %32, %22 : vector<8x64xf32>
    %cst_17 = arith.constant 0.254829586 : f32
    %34 = vector.broadcast %cst_17 : f32 to vector<8x64xf32>
    %35 = arith.addf %33, %34 : vector<8x64xf32>
    %36 = arith.mulf %35, %22 : vector<8x64xf32>
    %cst_18 = arith.constant 0.000000e+00 : f32
    %37 = vector.broadcast %cst_18 : f32 to vector<8x64xf32>
    %38 = arith.subf %37, %16 : vector<8x64xf32>
    %39 = arith.mulf %38, %16 : vector<8x64xf32>
    %40 = math.exp %39 : vector<8x64xf32>
    %41 = arith.mulf %36, %40 : vector<8x64xf32>
    %cst_19 = arith.constant 1.000000e+00 : f32
    %42 = vector.broadcast %cst_19 : f32 to vector<8x64xf32>
    %43 = arith.subf %42, %41 : vector<8x64xf32>
    %44 = arith.mulf %15, %43 : vector<8x64xf32>
    %cst_20 = arith.constant 1.000000e+00 : f32
    %45 = vector.broadcast %cst_20 : f32 to vector<8x64xf32>
    %46 = arith.addf %45, %44 : vector<8x64xf32>
    %47 = arith.mulf %8, %46 : vector<8x64xf32>
    %48 = arith.truncf %47 : vector<8x64xf32> to vector<8x64xbf16>
    %c0_21 = arith.constant 0 : index
    %c0_22 = arith.constant 0 : index
    %49 = vector.load %arg4[%c0_21, %c0_22] : memref<64x32xbf16, #tpu.memory_space<vmem>>, vector<64x32xbf16>
    %cst_23 = arith.constant dense<0.000000e+00> : vector<8x32xf32>
    %50 = tpu.matmul %48, %49, %cst_23 {dimension_numbers = #tpu.dot_dimension_numbers<[1], [0], [0], [1], [0, 0, 1, 1], [], []>} : vector<8x64xbf16>, vector<64x32xbf16>, vector<8x32xf32> -> vector<8x32xf32>
    %c0_24 = arith.constant 0 : index
    %c0_25 = arith.constant 0 : index
    %51 = vector.load %arg5[%c0_24, %c0_25] : memref<1x32xf32, #tpu.memory_space<vmem>>, vector<1x32xf32>
    %52 = vector.broadcast %51 : vector<1x32xf32> to vector<8x32xf32>
    %53 = arith.addf %50, %52 : vector<8x32xf32>
    %c0_26 = arith.constant 0 : index
    %c0_27 = arith.constant 0 : index
    %54 = vector.load %arg6[%c0_26, %c0_27] : memref<8x32xf32, #tpu.memory_space<vmem>>, vector<8x32xf32>
    tpu.vector_store %arg6[%c0_26, %c0_27], %53 {strides = array<i32>} : memref<8x32xf32, #tpu.memory_space<vmem>>, vector<8x32xf32>,
    return
  }
  func.func @transform_0(%arg0: i32) -> (i32, i32) {
    %c0_i32 = arith.constant 0 : i32
    %c0_i32_0 = arith.constant 0 : i32
    return %arg0, %c0_i32 : i32, i32
  }
  func.func @transform_1(%arg0: i32) -> (i32, i32) {
    %c0_i32 = arith.constant 0 : i32
    %c0_i32_0 = arith.constant 0 : i32
    %c0_i32_1 = arith.constant 0 : i32
    return %c0_i32, %c0_i32_0 : i32, i32
  }
  func.func @transform_2(%arg0: i32) -> (i32, i32) {
    %c0_i32 = arith.constant 0 : i32
    %c0_i32_0 = arith.constant 0 : i32
    %c0_i32_1 = arith.constant 0 : i32
    return %c0_i32, %c0_i32_0 : i32, i32
  }
  func.func @transform_3(%arg0: i32) -> (i32, i32) {
    %c0_i32 = arith.constant 0 : i32
    %c0_i32_0 = arith.constant 0 : i32
    %c0_i32_1 = arith.constant 0 : i32
    return %c0_i32, %c0_i32_0 : i32, i32
  }
  func.func @transform_4(%arg0: i32) -> (i32, i32) {
    %c0_i32 = arith.constant 0 : i32
    %c0_i32_0 = arith.constant 0 : i32
    %c0_i32_1 = arith.constant 0 : i32
    return %c0_i32, %c0_i32_0 : i32, i32
  }
  func.func @transform_5(%arg0: i32) -> (i32, i32) {
    %c0_i32 = arith.constant 0 : i32
    %c0_i32_0 = arith.constant 0 : i32
    return %arg0, %c0_i32 : i32, i32
  }
}

module attributes {stable_mosaic.version = 11 : i64} {
  func.func @_linear_kernel(%arg0: i32, %arg1: memref<8x128xf32, #tpu.memory_space<vmem>>, %arg2: memref<8x128xf32, #tpu.memory_space<vmem>>, %arg3: memref<128x64xbf16, #tpu.memory_space<vmem>>, %arg4: memref<1x64xf32, #tpu.memory_space<vmem>>, %arg5: memref<8x64xf32, #tpu.memory_space<vmem>>) attributes {dimension_semantics = [#tpu.dimension_semantics<parallel>], iteration_bounds = array<i64: 2>, scalar_prefetch = 0 : i64, scratch_operands = 0 : i64, tpu.core_type = #tpu.core_type<tc>, window_params = [{transform_indices = @transform_0, window_bounds = array<i64: 8, 128>}, {transform_indices = @transform_1, window_bounds = array<i64: 8, 128>}, {pipeline_mode = #tpu.pipeline_mode<synchronous>, transform_indices = @transform_2, window_bounds = array<i64: 128, 64>}, {pipeline_mode = #tpu.pipeline_mode<synchronous>, transform_indices = @transform_3, window_bounds = array<i64: 1, 64>}, {transform_indices = @transform_4, window_bounds = array<i64: 8, 64>}]} {
    %c0 = arith.constant 0 : index
    %c0_0 = arith.constant 0 : index
    %0 = vector.load %arg1[%c0, %c0_0] : memref<8x128xf32, #tpu.memory_space<vmem>>, vector<8x128xf32>
    %c0_1 = arith.constant 0 : index
    %c0_2 = arith.constant 0 : index
    %1 = vector.load %arg2[%c0_1, %c0_2] : memref<8x128xf32, #tpu.memory_space<vmem>>, vector<8x128xf32>
    %2 = arith.addf %0, %1 : vector<8x128xf32>
    %3 = arith.truncf %2 : vector<8x128xf32> to vector<8x128xbf16>
    %c0_3 = arith.constant 0 : index
    %c0_4 = arith.constant 0 : index
    %4 = vector.load %arg3[%c0_3, %c0_4] : memref<128x64xbf16, #tpu.memory_space<vmem>>, vector<128x64xbf16>
    %cst = arith.constant dense<0.000000e+00> : vector<8x64xf32>
    %5 = tpu.matmul %3, %4, %cst {dimension_numbers = #tpu.dot_dimension_numbers<[1], [0], [0], [1], [0, 0, 1, 1], [], []>} : vector<8x128xbf16>, vector<128x64xbf16>, vector<8x64xf32> -> vector<8x64xf32>
    %c0_5 = arith.constant 0 : index
    %c0_6 = arith.constant 0 : index
    %6 = vector.load %arg4[%c0_5, %c0_6] : memref<1x64xf32, #tpu.memory_space<vmem>>, vector<1x64xf32>
    %7 = vector.broadcast %6 : vector<1x64xf32> to vector<8x64xf32>
    %8 = arith.addf %5, %7 : vector<8x64xf32>
    %c0_7 = arith.constant 0 : index
    %c0_8 = arith.constant 0 : index
    %9 = vector.load %arg5[%c0_7, %c0_8] : memref<8x64xf32, #tpu.memory_space<vmem>>, vector<8x64xf32>
    tpu.vector_store %arg5[%c0_7, %c0_8], %8 {strides = array<i32>} : memref<8x64xf32, #tpu.memory_space<vmem>>, vector<8x64xf32>,
    return
  }
  func.func @transform_0(%arg0: i32) -> (i32, i32) {
    %c0_i32 = arith.constant 0 : i32
    %c0_i32_0 = arith.constant 0 : i32
    return %arg0, %c0_i32 : i32, i32
  }
  func.func @transform_1(%arg0: i32) -> (i32, i32) {
    %c0_i32 = arith.constant 0 : i32
    %c0_i32_0 = arith.constant 0 : i32
    return %arg0, %c0_i32 : i32, i32
  }
  func.func @transform_2(%arg0: i32) -> (i32, i32) {
    %c0_i32 = arith.constant 0 : i32
    %c0_i32_0 = arith.constant 0 : i32
    %c0_i32_1 = arith.constant 0 : i32
    return %c0_i32, %c0_i32_0 : i32, i32
  }
  func.func @transform_3(%arg0: i32) -> (i32, i32) {
    %c0_i32 = arith.constant 0 : i32
    %c0_i32_0 = arith.constant 0 : i32
    %c0_i32_1 = arith.constant 0 : i32
    return %c0_i32, %c0_i32_0 : i32, i32
  }
  func.func @transform_4(%arg0: i32) -> (i32, i32) {
    %c0_i32 = arith.constant 0 : i32
    %c0_i32_0 = arith.constant 0 : i32
    return %arg0, %c0_i32 : i32, i32
  }
}

module attributes {stable_mosaic.version = 11 : i64} {
  func.func @_attn_block_kernel(%arg0: i32, %arg1: memref<4x4x64xf32, #tpu.memory_space<vmem>>, %arg2: memref<64x192xbf16, #tpu.memory_space<vmem>>, %arg3: memref<1x192xf32, #tpu.memory_space<vmem>>, %arg4: memref<64x64xbf16, #tpu.memory_space<vmem>>, %arg5: memref<1x64xf32, #tpu.memory_space<vmem>>, %arg6: memref<64x256xbf16, #tpu.memory_space<vmem>>, %arg7: memref<1x256xf32, #tpu.memory_space<vmem>>, %arg8: memref<256x64xbf16, #tpu.memory_space<vmem>>, %arg9: memref<1x64xf32, #tpu.memory_space<vmem>>, %arg10: memref<4x4x64xf32, #tpu.memory_space<vmem>>) attributes {dimension_semantics = [#tpu.dimension_semantics<parallel>], iteration_bounds = array<i64: 2>, scalar_prefetch = 0 : i64, scratch_operands = 0 : i64, tpu.core_type = #tpu.core_type<tc>, window_params = [{transform_indices = @transform_0, window_bounds = array<i64: 4, 4, 64>}, {pipeline_mode = #tpu.pipeline_mode<synchronous>, transform_indices = @transform_1, window_bounds = array<i64: 64, 192>}, {pipeline_mode = #tpu.pipeline_mode<synchronous>, transform_indices = @transform_2, window_bounds = array<i64: 1, 192>}, {pipeline_mode = #tpu.pipeline_mode<synchronous>, transform_indices = @transform_3, window_bounds = array<i64: 64, 64>}, {pipeline_mode = #tpu.pipeline_mode<synchronous>, transform_indices = @transform_4, window_bounds = array<i64: 1, 64>}, {pipeline_mode = #tpu.pipeline_mode<synchronous>, transform_indices = @transform_5, window_bounds = array<i64: 64, 256>}, {pipeline_mode = #tpu.pipeline_mode<synchronous>, transform_indices = @transform_6, window_bounds = array<i64: 1, 256>}, {pipeline_mode = #tpu.pipeline_mode<synchronous>, transform_indices = @transform_7, window_bounds = array<i64: 256, 64>}, {pipeline_mode = #tpu.pipeline_mode<synchronous>, transform_indices = @transform_8, window_bounds = array<i64: 1, 64>}, {transform_indices = @transform_9, window_bounds = array<i64: 4, 4, 64>}]} {
    %c0 = arith.constant 0 : index
    %c0_0 = arith.constant 0 : index
    %c0_1 = arith.constant 0 : index
    %0 = vector.load %arg1[%c0, %c0_0, %c0_1] : memref<4x4x64xf32, #tpu.memory_space<vmem>>, vector<4x4x64xf32>
    %cst = arith.constant dense<0.000000e+00> : vector<4x4xf32>
    %1 = vector.multi_reduction <add>, %0, %cst [2] : vector<4x4x64xf32> to vector<4x4xf32>
    %2 = vector.shape_cast %1 : vector<4x4xf32> to vector<4x4x1xf32>
    %cst_2 = arith.constant 6.400000e+01 : f32
    %3 = vector.broadcast %cst_2 : f32 to vector<4x4x1xf32>
    %4 = arith.divf %2, %3 : vector<4x4x1xf32>
    %5 = vector.broadcast %4 : vector<4x4x1xf32> to vector<4x4x64xf32>
    %6 = arith.subf %0, %5 : vector<4x4x64xf32>
    %7 = arith.mulf %6, %6 : vector<4x4x64xf32>
    %cst_3 = arith.constant dense<0.000000e+00> : vector<4x4xf32>
    %8 = vector.multi_reduction <add>, %7, %cst_3 [2] : vector<4x4x64xf32> to vector<4x4xf32>
    %9 = vector.shape_cast %8 : vector<4x4xf32> to vector<4x4x1xf32>
    %cst_4 = arith.constant 6.400000e+01 : f32
    %10 = vector.broadcast %cst_4 : f32 to vector<4x4x1xf32>
    %11 = arith.divf %9, %10 : vector<4x4x1xf32>
    %cst_5 = arith.constant 9.99999997E-7 : f32
    %12 = vector.broadcast %cst_5 : f32 to vector<4x4x1xf32>
    %13 = arith.addf %11, %12 : vector<4x4x1xf32>
    %14 = math.rsqrt %13 : vector<4x4x1xf32>
    %15 = vector.broadcast %14 : vector<4x4x1xf32> to vector<4x4x64xf32>
    %16 = arith.mulf %6, %15 : vector<4x4x64xf32>
    %17 = vector.shape_cast %16 : vector<4x4x64xf32> to vector<16x64xf32>
    %18 = arith.truncf %17 : vector<16x64xf32> to vector<16x64xbf16>
    %c0_6 = arith.constant 0 : index
    %c0_7 = arith.constant 0 : index
    %19 = vector.load %arg2[%c0_6, %c0_7] : memref<64x192xbf16, #tpu.memory_space<vmem>>, vector<64x192xbf16>
    %cst_8 = arith.constant dense<0.000000e+00> : vector<16x192xf32>
    %20 = tpu.matmul %18, %19, %cst_8 {dimension_numbers = #tpu.dot_dimension_numbers<[1], [0], [0], [1], [0, 0, 1, 1], [], []>} : vector<16x64xbf16>, vector<64x192xbf16>, vector<16x192xf32> -> vector<16x192xf32>
    %c0_9 = arith.constant 0 : index
    %c0_10 = arith.constant 0 : index
    %21 = vector.load %arg3[%c0_9, %c0_10] : memref<1x192xf32, #tpu.memory_space<vmem>>, vector<1x192xf32>
    %22 = vector.broadcast %21 : vector<1x192xf32> to vector<16x192xf32>
    %23 = arith.addf %20, %22 : vector<16x192xf32>
    %24 = vector.shape_cast %23 : vector<16x192xf32> to vector<4x4x192xf32>
    %25 = vector.extract_strided_slice %24 {offsets = [0, 0, 0], sizes = [4, 4, 64], strides = [1, 1, 1]} : vector<4x4x192xf32> to vector<4x4x64xf32>
    %26 = vector.extract_strided_slice %24 {offsets = [0, 0, 64], sizes = [4, 4, 64], strides = [1, 1, 1]} : vector<4x4x192xf32> to vector<4x4x64xf32>
    %27 = vector.extract_strided_slice %24 {offsets = [0, 0, 128], sizes = [4, 4, 64], strides = [1, 1, 1]} : vector<4x4x192xf32> to vector<4x4x64xf32>
    %28 = vector.extract_strided_slice %25 {offsets = [0, 0, 0], sizes = [4, 4, 16], strides = [1, 1, 1]} : vector<4x4x64xf32> to vector<4x4x16xf32>
    %29 = arith.truncf %28 : vector<4x4x16xf32> to vector<4x4x16xbf16>
    %30 = vector.extract_strided_slice %26 {offsets = [0, 0, 0], sizes = [4, 4, 16], strides = [1, 1, 1]} : vector<4x4x64xf32> to vector<4x4x16xf32>
    %31 = arith.truncf %30 : vector<4x4x16xf32> to vector<4x4x16xbf16>
    %32 = vector.extract_strided_slice %27 {offsets = [0, 0, 0], sizes = [4, 4, 16], strides = [1, 1, 1]} : vector<4x4x64xf32> to vector<4x4x16xf32>
    %33 = arith.truncf %32 : vector<4x4x16xf32> to vector<4x4x16xbf16>
    "tpu.trace_start"() <{level = 10 : i32, message = "bqd,bkd->bqk"}> : () -> ()
    %cst_11 = arith.constant dense<0.000000e+00> : vector<4x4x4xf32>
    %34 = tpu.matmul %29, %31, %cst_11 {dimension_numbers = #tpu.dot_dimension_numbers<[2], [2], [1], [1], [0, 0, 0, 1, 1, 1], [0], [0]>} : vector<4x4x16xbf16>, vector<4x4x16xbf16>, vector<4x4x4xf32> -> vector<4x4x4xf32>
    "tpu.trace_stop"() : () -> ()
    %cst_12 = arith.constant 2.500000e-01 : f32
    %35 = vector.broadcast %cst_12 : f32 to vector<4x4x4xf32>
    %36 = arith.mulf %34, %35 : vector<4x4x4xf32>
    %cst_13 = arith.constant dense<0xFF800000> : vector<4x4xf32>
    %37 = vector.multi_reduction <maximumf>, %36, %cst_13 [2] : vector<4x4x4xf32> to vector<4x4xf32>
    %38 = vector.shape_cast %37 : vector<4x4xf32> to vector<4x4x1xf32>
    %39 = vector.broadcast %38 : vector<4x4x1xf32> to vector<4x4x4xf32>
    %40 = arith.subf %36, %39 : vector<4x4x4xf32>
    %41 = math.exp %40 : vector<4x4x4xf32>
    %cst_14 = arith.constant dense<0.000000e+00> : vector<4x4xf32>
    %42 = vector.multi_reduction <add>, %41, %cst_14 [2] : vector<4x4x4xf32> to vector<4x4xf32>
    %43 = vector.shape_cast %42 : vector<4x4xf32> to vector<4x4x1xf32>
    %44 = tpu.reciprocal %43 {approx = true} : vector<4x4x1xf32> -> vector<4x4x1xf32>
    %45 = vector.broadcast %44 : vector<4x4x1xf32> to vector<4x4x4xf32>
    %46 = arith.mulf %41, %45 : vector<4x4x4xf32>
    %47 = arith.truncf %46 : vector<4x4x4xf32> to vector<4x4x4xbf16>
    "tpu.trace_start"() <{level = 10 : i32, message = "bqk,bkd->bqd"}> : () -> ()
    %cst_15 = arith.constant dense<0.000000e+00> : vector<4x4x16xf32>
    %48 = tpu.matmul %47, %33, %cst_15 {dimension_numbers = #tpu.dot_dimension_numbers<[2], [1], [1], [2], [0, 0, 0, 1, 1, 2], [0], [0]>} : vector<4x4x4xbf16>, vector<4x4x16xbf16>, vector<4x4x16xf32> -> vector<4x4x16xf32>
    "tpu.trace_stop"() : () -> ()
    %49 = vector.extract_strided_slice %25 {offsets = [0, 0, 16], sizes = [4, 4, 16], strides = [1, 1, 1]} : vector<4x4x64xf32> to vector<4x4x16xf32>
    %50 = arith.truncf %49 : vector<4x4x16xf32> to vector<4x4x16xbf16>
    %51 = vector.extract_strided_slice %26 {offsets = [0, 0, 16], sizes = [4, 4, 16], strides = [1, 1, 1]} : vector<4x4x64xf32> to vector<4x4x16xf32>
    %52 = arith.truncf %51 : vector<4x4x16xf32> to vector<4x4x16xbf16>
    %53 = vector.extract_strided_slice %27 {offsets = [0, 0, 16], sizes = [4, 4, 16], strides = [1, 1, 1]} : vector<4x4x64xf32> to vector<4x4x16xf32>
    %54 = arith.truncf %53 : vector<4x4x16xf32> to vector<4x4x16xbf16>
    "tpu.trace_start"() <{level = 10 : i32, message = "bqd,bkd->bqk"}> : () -> ()
    %cst_16 = arith.constant dense<0.000000e+00> : vector<4x4x4xf32>
    %55 = tpu.matmul %50, %52, %cst_16 {dimension_numbers = #tpu.dot_dimension_numbers<[2], [2], [1], [1], [0, 0, 0, 1, 1, 1], [0], [0]>} : vector<4x4x16xbf16>, vector<4x4x16xbf16>, vector<4x4x4xf32> -> vector<4x4x4xf32>
    "tpu.trace_stop"() : () -> ()
    %cst_17 = arith.constant 2.500000e-01 : f32
    %56 = vector.broadcast %cst_17 : f32 to vector<4x4x4xf32>
    %57 = arith.mulf %55, %56 : vector<4x4x4xf32>
    %cst_18 = arith.constant dense<0xFF800000> : vector<4x4xf32>
    %58 = vector.multi_reduction <maximumf>, %57, %cst_18 [2] : vector<4x4x4xf32> to vector<4x4xf32>
    %59 = vector.shape_cast %58 : vector<4x4xf32> to vector<4x4x1xf32>
    %60 = vector.broadcast %59 : vector<4x4x1xf32> to vector<4x4x4xf32>
    %61 = arith.subf %57, %60 : vector<4x4x4xf32>
    %62 = math.exp %61 : vector<4x4x4xf32>
    %cst_19 = arith.constant dense<0.000000e+00> : vector<4x4xf32>
    %63 = vector.multi_reduction <add>, %62, %cst_19 [2] : vector<4x4x4xf32> to vector<4x4xf32>
    %64 = vector.shape_cast %63 : vector<4x4xf32> to vector<4x4x1xf32>
    %65 = tpu.reciprocal %64 {approx = true} : vector<4x4x1xf32> -> vector<4x4x1xf32>
    %66 = vector.broadcast %65 : vector<4x4x1xf32> to vector<4x4x4xf32>
    %67 = arith.mulf %62, %66 : vector<4x4x4xf32>
    %68 = arith.truncf %67 : vector<4x4x4xf32> to vector<4x4x4xbf16>
    "tpu.trace_start"() <{level = 10 : i32, message = "bqk,bkd->bqd"}> : () -> ()
    %cst_20 = arith.constant dense<0.000000e+00> : vector<4x4x16xf32>
    %69 = tpu.matmul %68, %54, %cst_20 {dimension_numbers = #tpu.dot_dimension_numbers<[2], [1], [1], [2], [0, 0, 0, 1, 1, 2], [0], [0]>} : vector<4x4x4xbf16>, vector<4x4x16xbf16>, vector<4x4x16xf32> -> vector<4x4x16xf32>
    "tpu.trace_stop"() : () -> ()
    %70 = vector.extract_strided_slice %25 {offsets = [0, 0, 32], sizes = [4, 4, 16], strides = [1, 1, 1]} : vector<4x4x64xf32> to vector<4x4x16xf32>
    %71 = arith.truncf %70 : vector<4x4x16xf32> to vector<4x4x16xbf16>
    %72 = vector.extract_strided_slice %26 {offsets = [0, 0, 32], sizes = [4, 4, 16], strides = [1, 1, 1]} : vector<4x4x64xf32> to vector<4x4x16xf32>
    %73 = arith.truncf %72 : vector<4x4x16xf32> to vector<4x4x16xbf16>
    %74 = vector.extract_strided_slice %27 {offsets = [0, 0, 32], sizes = [4, 4, 16], strides = [1, 1, 1]} : vector<4x4x64xf32> to vector<4x4x16xf32>
    %75 = arith.truncf %74 : vector<4x4x16xf32> to vector<4x4x16xbf16>
    "tpu.trace_start"() <{level = 10 : i32, message = "bqd,bkd->bqk"}> : () -> ()
    %cst_21 = arith.constant dense<0.000000e+00> : vector<4x4x4xf32>
    %76 = tpu.matmul %71, %73, %cst_21 {dimension_numbers = #tpu.dot_dimension_numbers<[2], [2], [1], [1], [0, 0, 0, 1, 1, 1], [0], [0]>} : vector<4x4x16xbf16>, vector<4x4x16xbf16>, vector<4x4x4xf32> -> vector<4x4x4xf32>
    "tpu.trace_stop"() : () -> ()
    %cst_22 = arith.constant 2.500000e-01 : f32
    %77 = vector.broadcast %cst_22 : f32 to vector<4x4x4xf32>
    %78 = arith.mulf %76, %77 : vector<4x4x4xf32>
    %cst_23 = arith.constant dense<0xFF800000> : vector<4x4xf32>
    %79 = vector.multi_reduction <maximumf>, %78, %cst_23 [2] : vector<4x4x4xf32> to vector<4x4xf32>
    %80 = vector.shape_cast %79 : vector<4x4xf32> to vector<4x4x1xf32>
    %81 = vector.broadcast %80 : vector<4x4x1xf32> to vector<4x4x4xf32>
    %82 = arith.subf %78, %81 : vector<4x4x4xf32>
    %83 = math.exp %82 : vector<4x4x4xf32>
    %cst_24 = arith.constant dense<0.000000e+00> : vector<4x4xf32>
    %84 = vector.multi_reduction <add>, %83, %cst_24 [2] : vector<4x4x4xf32> to vector<4x4xf32>
    %85 = vector.shape_cast %84 : vector<4x4xf32> to vector<4x4x1xf32>
    %86 = tpu.reciprocal %85 {approx = true} : vector<4x4x1xf32> -> vector<4x4x1xf32>
    %87 = vector.broadcast %86 : vector<4x4x1xf32> to vector<4x4x4xf32>
    %88 = arith.mulf %83, %87 : vector<4x4x4xf32>
    %89 = arith.truncf %88 : vector<4x4x4xf32> to vector<4x4x4xbf16>
    "tpu.trace_start"() <{level = 10 : i32, message = "bqk,bkd->bqd"}> : () -> ()
    %cst_25 = arith.constant dense<0.000000e+00> : vector<4x4x16xf32>
    %90 = tpu.matmul %89, %75, %cst_25 {dimension_numbers = #tpu.dot_dimension_numbers<[2], [1], [1], [2], [0, 0, 0, 1, 1, 2], [0], [0]>} : vector<4x4x4xbf16>, vector<4x4x16xbf16>, vector<4x4x16xf32> -> vector<4x4x16xf32>
    "tpu.trace_stop"() : () -> ()
    %91 = vector.extract_strided_slice %25 {offsets = [0, 0, 48], sizes = [4, 4, 16], strides = [1, 1, 1]} : vector<4x4x64xf32> to vector<4x4x16xf32>
    %92 = arith.truncf %91 : vector<4x4x16xf32> to vector<4x4x16xbf16>
    %93 = vector.extract_strided_slice %26 {offsets = [0, 0, 48], sizes = [4, 4, 16], strides = [1, 1, 1]} : vector<4x4x64xf32> to vector<4x4x16xf32>
    %94 = arith.truncf %93 : vector<4x4x16xf32> to vector<4x4x16xbf16>
    %95 = vector.extract_strided_slice %27 {offsets = [0, 0, 48], sizes = [4, 4, 16], strides = [1, 1, 1]} : vector<4x4x64xf32> to vector<4x4x16xf32>
    %96 = arith.truncf %95 : vector<4x4x16xf32> to vector<4x4x16xbf16>
    "tpu.trace_start"() <{level = 10 : i32, message = "bqd,bkd->bqk"}> : () -> ()
    %cst_26 = arith.constant dense<0.000000e+00> : vector<4x4x4xf32>
    %97 = tpu.matmul %92, %94, %cst_26 {dimension_numbers = #tpu.dot_dimension_numbers<[2], [2], [1], [1], [0, 0, 0, 1, 1, 1], [0], [0]>} : vector<4x4x16xbf16>, vector<4x4x16xbf16>, vector<4x4x4xf32> -> vector<4x4x4xf32>
    "tpu.trace_stop"() : () -> ()
    %cst_27 = arith.constant 2.500000e-01 : f32
    %98 = vector.broadcast %cst_27 : f32 to vector<4x4x4xf32>
    %99 = arith.mulf %97, %98 : vector<4x4x4xf32>
    %cst_28 = arith.constant dense<0xFF800000> : vector<4x4xf32>
    %100 = vector.multi_reduction <maximumf>, %99, %cst_28 [2] : vector<4x4x4xf32> to vector<4x4xf32>
    %101 = vector.shape_cast %100 : vector<4x4xf32> to vector<4x4x1xf32>
    %102 = vector.broadcast %101 : vector<4x4x1xf32> to vector<4x4x4xf32>
    %103 = arith.subf %99, %102 : vector<4x4x4xf32>
    %104 = math.exp %103 : vector<4x4x4xf32>
    %cst_29 = arith.constant dense<0.000000e+00> : vector<4x4xf32>
    %105 = vector.multi_reduction <add>, %104, %cst_29 [2] : vector<4x4x4xf32> to vector<4x4xf32>
    %106 = vector.shape_cast %105 : vector<4x4xf32> to vector<4x4x1xf32>
    %107 = tpu.reciprocal %106 {approx = true} : vector<4x4x1xf32> -> vector<4x4x1xf32>
    %108 = vector.broadcast %107 : vector<4x4x1xf32> to vector<4x4x4xf32>
    %109 = arith.mulf %104, %108 : vector<4x4x4xf32>
    %110 = arith.truncf %109 : vector<4x4x4xf32> to vector<4x4x4xbf16>
    "tpu.trace_start"() <{level = 10 : i32, message = "bqk,bkd->bqd"}> : () -> ()
    %cst_30 = arith.constant dense<0.000000e+00> : vector<4x4x16xf32>
    %111 = tpu.matmul %110, %96, %cst_30 {dimension_numbers = #tpu.dot_dimension_numbers<[2], [1], [1], [2], [0, 0, 0, 1, 1, 2], [0], [0]>} : vector<4x4x4xbf16>, vector<4x4x16xbf16>, vector<4x4x16xf32> -> vector<4x4x16xf32>
    "tpu.trace_stop"() : () -> ()
    %112 = tpu.concatenate %48, %69, %90, %111 in 2 : vector<4x4x16xf32>, vector<4x4x16xf32>, vector<4x4x16xf32>, vector<4x4x16xf32> -> vector<4x4x64xf32>
    %113 = vector.shape_cast %112 : vector<4x4x64xf32> to vector<16x64xf32>
    %114 = arith.truncf %113 : vector<16x64xf32> to vector<16x64xbf16>
    %c0_31 = arith.constant 0 : index
    %c0_32 = arith.constant 0 : index
    %115 = vector.load %arg4[%c0_31, %c0_32] : memref<64x64xbf16, #tpu.memory_space<vmem>>, vector<64x64xbf16>
    %cst_33 = arith.constant dense<0.000000e+00> : vector<16x64xf32>
    %116 = tpu.matmul %114, %115, %cst_33 {dimension_numbers = #tpu.dot_dimension_numbers<[1], [0], [0], [1], [0, 0, 1, 1], [], []>} : vector<16x64xbf16>, vector<64x64xbf16>, vector<16x64xf32> -> vector<16x64xf32>
    %c0_34 = arith.constant 0 : index
    %c0_35 = arith.constant 0 : index
    %117 = vector.load %arg5[%c0_34, %c0_35] : memref<1x64xf32, #tpu.memory_space<vmem>>, vector<1x64xf32>
    %118 = vector.broadcast %117 : vector<1x64xf32> to vector<16x64xf32>
    %119 = arith.addf %116, %118 : vector<16x64xf32>
    %120 = vector.shape_cast %119 : vector<16x64xf32> to vector<4x4x64xf32>
    %121 = arith.addf %0, %120 : vector<4x4x64xf32>
    %cst_36 = arith.constant dense<0.000000e+00> : vector<4x4xf32>
    %122 = vector.multi_reduction <add>, %121, %cst_36 [2] : vector<4x4x64xf32> to vector<4x4xf32>
    %123 = vector.shape_cast %122 : vector<4x4xf32> to vector<4x4x1xf32>
    %cst_37 = arith.constant 6.400000e+01 : f32
    %124 = vector.broadcast %cst_37 : f32 to vector<4x4x1xf32>
    %125 = arith.divf %123, %124 : vector<4x4x1xf32>
    %126 = vector.broadcast %125 : vector<4x4x1xf32> to vector<4x4x64xf32>
    %127 = arith.subf %121, %126 : vector<4x4x64xf32>
    %128 = arith.mulf %127, %127 : vector<4x4x64xf32>
    %cst_38 = arith.constant dense<0.000000e+00> : vector<4x4xf32>
    %129 = vector.multi_reduction <add>, %128, %cst_38 [2] : vector<4x4x64xf32> to vector<4x4xf32>
    %130 = vector.shape_cast %129 : vector<4x4xf32> to vector<4x4x1xf32>
    %cst_39 = arith.constant 6.400000e+01 : f32
    %131 = vector.broadcast %cst_39 : f32 to vector<4x4x1xf32>
    %132 = arith.divf %130, %131 : vector<4x4x1xf32>
    %cst_40 = arith.constant 9.99999997E-7 : f32
    %133 = vector.broadcast %cst_40 : f32 to vector<4x4x1xf32>
    %134 = arith.addf %132, %133 : vector<4x4x1xf32>
    %135 = math.rsqrt %134 : vector<4x4x1xf32>
    %136 = vector.broadcast %135 : vector<4x4x1xf32> to vector<4x4x64xf32>
    %137 = arith.mulf %127, %136 : vector<4x4x64xf32>
    %138 = vector.shape_cast %137 : vector<4x4x64xf32> to vector<16x64xf32>
    %139 = arith.truncf %138 : vector<16x64xf32> to vector<16x64xbf16>
    %c0_41 = arith.constant 0 : index
    %c0_42 = arith.constant 0 : index
    %140 = vector.load %arg6[%c0_41, %c0_42] : memref<64x256xbf16, #tpu.memory_space<vmem>>, vector<64x256xbf16>
    %cst_43 = arith.constant dense<0.000000e+00> : vector<16x256xf32>
    %141 = tpu.matmul %139, %140, %cst_43 {dimension_numbers = #tpu.dot_dimension_numbers<[1], [0], [0], [1], [0, 0, 1, 1], [], []>} : vector<16x64xbf16>, vector<64x256xbf16>, vector<16x256xf32> -> vector<16x256xf32>
    %c0_44 = arith.constant 0 : index
    %c0_45 = arith.constant 0 : index
    %142 = vector.load %arg7[%c0_44, %c0_45] : memref<1x256xf32, #tpu.memory_space<vmem>>, vector<1x256xf32>
    %143 = vector.broadcast %142 : vector<1x256xf32> to vector<16x256xf32>
    %144 = arith.addf %141, %143 : vector<16x256xf32>
    %cst_46 = arith.constant 5.000000e-01 : f32
    %145 = vector.broadcast %cst_46 : f32 to vector<16x256xf32>
    %146 = arith.mulf %145, %144 : vector<16x256xf32>
    %cst_47 = arith.constant 4.471500e-02 : f32
    %147 = vector.broadcast %cst_47 : f32 to vector<16x256xf32>
    %148 = arith.mulf %147, %144 : vector<16x256xf32>
    %149 = arith.mulf %148, %144 : vector<16x256xf32>
    %150 = arith.mulf %149, %144 : vector<16x256xf32>
    %151 = arith.addf %144, %150 : vector<16x256xf32>
    %cst_48 = arith.constant 0.797884583 : f32
    %152 = vector.broadcast %cst_48 : f32 to vector<16x256xf32>
    %153 = arith.mulf %152, %151 : vector<16x256xf32>
    %154 = math.tanh %153 : vector<16x256xf32>
    %cst_49 = arith.constant 1.000000e+00 : f32
    %155 = vector.broadcast %cst_49 : f32 to vector<16x256xf32>
    %156 = arith.addf %155, %154 : vector<16x256xf32>
    %157 = arith.mulf %146, %156 : vector<16x256xf32>
    %158 = arith.truncf %157 : vector<16x256xf32> to vector<16x256xbf16>
    %c0_50 = arith.constant 0 : index
    %c0_51 = arith.constant 0 : index
    %159 = vector.load %arg8[%c0_50, %c0_51] : memref<256x64xbf16, #tpu.memory_space<vmem>>, vector<256x64xbf16>
    %cst_52 = arith.constant dense<0.000000e+00> : vector<16x64xf32>
    %160 = tpu.matmul %158, %159, %cst_52 {dimension_numbers = #tpu.dot_dimension_numbers<[1], [0], [0], [1], [0, 0, 1, 1], [], []>} : vector<16x256xbf16>, vector<256x64xbf16>, vector<16x64xf32> -> vector<16x64xf32>
    %c0_53 = arith.constant 0 : index
    %c0_54 = arith.constant 0 : index
    %161 = vector.load %arg9[%c0_53, %c0_54] : memref<1x64xf32, #tpu.memory_space<vmem>>, vector<1x64xf32>
    %162 = vector.broadcast %161 : vector<1x64xf32> to vector<16x64xf32>
    %163 = arith.addf %160, %162 : vector<16x64xf32>
    %164 = vector.shape_cast %163 : vector<16x64xf32> to vector<4x4x64xf32>
    %165 = arith.addf %121, %164 : vector<4x4x64xf32>
    %c0_55 = arith.constant 0 : index
    %c0_56 = arith.constant 0 : index
    %c0_57 = arith.constant 0 : index
    %166 = vector.load %arg10[%c0_55, %c0_56, %c0_57] : memref<4x4x64xf32, #tpu.memory_space<vmem>>, vector<4x4x64xf32>
    tpu.vector_store %arg10[%c0_55, %c0_56, %c0_57], %165 {strides = array<i32>} : memref<4x4x64xf32, #tpu.memory_space<vmem>>, vector<4x4x64xf32>,
    return
  }
  func.func @transform_0(%arg0: i32) -> (i32, i32, i32) {
    %c0_i32 = arith.constant 0 : i32
    %c0_i32_0 = arith.constant 0 : i32
    %c0_i32_1 = arith.constant 0 : i32
    return %arg0, %c0_i32, %c0_i32_0 : i32, i32, i32
  }
  func.func @transform_1(%arg0: i32) -> (i32, i32) {
    %c0_i32 = arith.constant 0 : i32
    %c0_i32_0 = arith.constant 0 : i32
    %c0_i32_1 = arith.constant 0 : i32
    return %c0_i32, %c0_i32_0 : i32, i32
  }
  func.func @transform_2(%arg0: i32) -> (i32, i32) {
    %c0_i32 = arith.constant 0 : i32
    %c0_i32_0 = arith.constant 0 : i32
    %c0_i32_1 = arith.constant 0 : i32
    return %c0_i32, %c0_i32_0 : i32, i32
  }
  func.func @transform_3(%arg0: i32) -> (i32, i32) {
    %c0_i32 = arith.constant 0 : i32
    %c0_i32_0 = arith.constant 0 : i32
    %c0_i32_1 = arith.constant 0 : i32
    return %c0_i32, %c0_i32_0 : i32, i32
  }
  func.func @transform_4(%arg0: i32) -> (i32, i32) {
    %c0_i32 = arith.constant 0 : i32
    %c0_i32_0 = arith.constant 0 : i32
    %c0_i32_1 = arith.constant 0 : i32
    return %c0_i32, %c0_i32_0 : i32, i32
  }
  func.func @transform_5(%arg0: i32) -> (i32, i32) {
    %c0_i32 = arith.constant 0 : i32
    %c0_i32_0 = arith.constant 0 : i32
    %c0_i32_1 = arith.constant 0 : i32
    return %c0_i32, %c0_i32_0 : i32, i32
  }
  func.func @transform_6(%arg0: i32) -> (i32, i32) {
    %c0_i32 = arith.constant 0 : i32
    %c0_i32_0 = arith.constant 0 : i32
    %c0_i32_1 = arith.constant 0 : i32
    return %c0_i32, %c0_i32_0 : i32, i32
  }
  func.func @transform_7(%arg0: i32) -> (i32, i32) {
    %c0_i32 = arith.constant 0 : i32
    %c0_i32_0 = arith.constant 0 : i32
    %c0_i32_1 = arith.constant 0 : i32
    return %c0_i32, %c0_i32_0 : i32, i32
  }
  func.func @transform_8(%arg0: i32) -> (i32, i32) {
    %c0_i32 = arith.constant 0 : i32
    %c0_i32_0 = arith.constant 0 : i32
    %c0_i32_1 = arith.constant 0 : i32
    return %c0_i32, %c0_i32_0 : i32, i32
  }
  func.func @transform_9(%arg0: i32) -> (i32, i32, i32) {
    %c0_i32 = arith.constant 0 : i32
    %c0_i32_0 = arith.constant 0 : i32
    %c0_i32_1 = arith.constant 0 : i32
    return %arg0, %c0_i32, %c0_i32_0 : i32, i32, i32
  }
}

module attributes {stable_mosaic.version = 11 : i64} {
  func.func @_cross_block_kernel(%arg0: i32, %arg1: memref<2x4x64xf32, #tpu.memory_space<vmem>>, %arg2: memref<2x4x64xf32, #tpu.memory_space<vmem>>, %arg3: memref<64x64xbf16, #tpu.memory_space<vmem>>, %arg4: memref<1x64xf32, #tpu.memory_space<vmem>>, %arg5: memref<64x128xbf16, #tpu.memory_space<vmem>>, %arg6: memref<1x128xf32, #tpu.memory_space<vmem>>, %arg7: memref<1x64xf32, #tpu.memory_space<vmem>>, %arg8: memref<1x64xf32, #tpu.memory_space<vmem>>, %arg9: memref<64x64xbf16, #tpu.memory_space<vmem>>, %arg10: memref<1x64xf32, #tpu.memory_space<vmem>>, %arg11: memref<64x256xbf16, #tpu.memory_space<vmem>>, %arg12: memref<1x256xf32, #tpu.memory_space<vmem>>, %arg13: memref<256x64xbf16, #tpu.memory_space<vmem>>, %arg14: memref<1x64xf32, #tpu.memory_space<vmem>>, %arg15: memref<2x4x64xf32, #tpu.memory_space<vmem>>) attributes {dimension_semantics = [#tpu.dimension_semantics<parallel>], iteration_bounds = array<i64: 2>, scalar_prefetch = 0 : i64, scratch_operands = 0 : i64, tpu.core_type = #tpu.core_type<tc>, window_params = [{transform_indices = @transform_0, window_bounds = array<i64: 2, 4, 64>}, {transform_indices = @transform_1, window_bounds = array<i64: 2, 4, 64>}, {pipeline_mode = #tpu.pipeline_mode<synchronous>, transform_indices = @transform_2, window_bounds = array<i64: 64, 64>}, {pipeline_mode = #tpu.pipeline_mode<synchronous>, transform_indices = @transform_3, window_bounds = array<i64: 1, 64>}, {pipeline_mode = #tpu.pipeline_mode<synchronous>, transform_indices = @transform_4, window_bounds = array<i64: 64, 128>}, {pipeline_mode = #tpu.pipeline_mode<synchronous>, transform_indices = @transform_5, window_bounds = array<i64: 1, 128>}, {pipeline_mode = #tpu.pipeline_mode<synchronous>, transform_indices = @transform_6, window_bounds = array<i64: 1, 64>}, {pipeline_mode = #tpu.pipeline_mode<synchronous>, transform_indices = @transform_7, window_bounds = array<i64: 1, 64>}, {pipeline_mode = #tpu.pipeline_mode<synchronous>, transform_indices = @transform_8, window_bounds = array<i64: 64, 64>}, {pipeline_mode = #tpu.pipeline_mode<synchronous>, transform_indices = @transform_9, window_bounds = array<i64: 1, 64>}, {pipeline_mode = #tpu.pipeline_mode<synchronous>, transform_indices = @transform_10, window_bounds = array<i64: 64, 256>}, {pipeline_mode = #tpu.pipeline_mode<synchronous>, transform_indices = @transform_11, window_bounds = array<i64: 1, 256>}, {pipeline_mode = #tpu.pipeline_mode<synchronous>, transform_indices = @transform_12, window_bounds = array<i64: 256, 64>}, {pipeline_mode = #tpu.pipeline_mode<synchronous>, transform_indices = @transform_13, window_bounds = array<i64: 1, 64>}, {transform_indices = @transform_14, window_bounds = array<i64: 2, 4, 64>}]} {
    %c0 = arith.constant 0 : index
    %c0_0 = arith.constant 0 : index
    %c0_1 = arith.constant 0 : index
    %0 = vector.load %arg1[%c0, %c0_0, %c0_1] : memref<2x4x64xf32, #tpu.memory_space<vmem>>, vector<2x4x64xf32>
    %c0_2 = arith.constant 0 : index
    %c0_3 = arith.constant 0 : index
    %c0_4 = arith.constant 0 : index
    %1 = vector.load %arg2[%c0_2, %c0_3, %c0_4] : memref<2x4x64xf32, #tpu.memory_space<vmem>>, vector<2x4x64xf32>
    %cst = arith.constant dense<0.000000e+00> : vector<2x4xf32>
    %2 = vector.multi_reduction <add>, %0, %cst [2] : vector<2x4x64xf32> to vector<2x4xf32>
    %3 = vector.shape_cast %2 : vector<2x4xf32> to vector<2x4x1xf32>
    %cst_5 = arith.constant 6.400000e+01 : f32
    %4 = vector.broadcast %cst_5 : f32 to vector<2x4x1xf32>
    %5 = arith.divf %3, %4 : vector<2x4x1xf32>
    %6 = vector.broadcast %5 : vector<2x4x1xf32> to vector<2x4x64xf32>
    %7 = arith.subf %0, %6 : vector<2x4x64xf32>
    %8 = arith.mulf %7, %7 : vector<2x4x64xf32>
    %cst_6 = arith.constant dense<0.000000e+00> : vector<2x4xf32>
    %9 = vector.multi_reduction <add>, %8, %cst_6 [2] : vector<2x4x64xf32> to vector<2x4xf32>
    %10 = vector.shape_cast %9 : vector<2x4xf32> to vector<2x4x1xf32>
    %cst_7 = arith.constant 6.400000e+01 : f32
    %11 = vector.broadcast %cst_7 : f32 to vector<2x4x1xf32>
    %12 = arith.divf %10, %11 : vector<2x4x1xf32>
    %cst_8 = arith.constant 9.99999997E-7 : f32
    %13 = vector.broadcast %cst_8 : f32 to vector<2x4x1xf32>
    %14 = arith.addf %12, %13 : vector<2x4x1xf32>
    %15 = math.rsqrt %14 : vector<2x4x1xf32>
    %16 = vector.broadcast %15 : vector<2x4x1xf32> to vector<2x4x64xf32>
    %17 = arith.mulf %7, %16 : vector<2x4x64xf32>
    %cst_9 = arith.constant dense<0.000000e+00> : vector<2x4xf32>
    %18 = vector.multi_reduction <add>, %1, %cst_9 [2] : vector<2x4x64xf32> to vector<2x4xf32>
    %19 = vector.shape_cast %18 : vector<2x4xf32> to vector<2x4x1xf32>
    %cst_10 = arith.constant 6.400000e+01 : f32
    %20 = vector.broadcast %cst_10 : f32 to vector<2x4x1xf32>
    %21 = arith.divf %19, %20 : vector<2x4x1xf32>
    %22 = vector.broadcast %21 : vector<2x4x1xf32> to vector<2x4x64xf32>
    %23 = arith.subf %1, %22 : vector<2x4x64xf32>
    %24 = arith.mulf %23, %23 : vector<2x4x64xf32>
    %cst_11 = arith.constant dense<0.000000e+00> : vector<2x4xf32>
    %25 = vector.multi_reduction <add>, %24, %cst_11 [2] : vector<2x4x64xf32> to vector<2x4xf32>
    %26 = vector.shape_cast %25 : vector<2x4xf32> to vector<2x4x1xf32>
    %cst_12 = arith.constant 6.400000e+01 : f32
    %27 = vector.broadcast %cst_12 : f32 to vector<2x4x1xf32>
    %28 = arith.divf %26, %27 : vector<2x4x1xf32>
    %cst_13 = arith.constant 9.99999974E-6 : f32
    %29 = vector.broadcast %cst_13 : f32 to vector<2x4x1xf32>
    %30 = arith.addf %28, %29 : vector<2x4x1xf32>
    %31 = math.rsqrt %30 : vector<2x4x1xf32>
    %32 = vector.broadcast %31 : vector<2x4x1xf32> to vector<2x4x64xf32>
    %33 = arith.mulf %23, %32 : vector<2x4x64xf32>
    %c0_14 = arith.constant 0 : index
    %c0_15 = arith.constant 0 : index
    %34 = vector.load %arg7[%c0_14, %c0_15] : memref<1x64xf32, #tpu.memory_space<vmem>>, vector<1x64xf32>
    %35 = vector.shape_cast %34 : vector<1x64xf32> to vector<1x1x64xf32>
    %36 = vector.broadcast %35 : vector<1x1x64xf32> to vector<2x4x64xf32>
    %37 = arith.mulf %33, %36 : vector<2x4x64xf32>
    %c0_16 = arith.constant 0 : index
    %c0_17 = arith.constant 0 : index
    %38 = vector.load %arg8[%c0_16, %c0_17] : memref<1x64xf32, #tpu.memory_space<vmem>>, vector<1x64xf32>
    %39 = vector.shape_cast %38 : vector<1x64xf32> to vector<1x1x64xf32>
    %40 = vector.broadcast %39 : vector<1x1x64xf32> to vector<2x4x64xf32>
    %41 = arith.addf %37, %40 : vector<2x4x64xf32>
    %42 = vector.shape_cast %17 : vector<2x4x64xf32> to vector<8x64xf32>
    %43 = arith.truncf %42 : vector<8x64xf32> to vector<8x64xbf16>
    %c0_18 = arith.constant 0 : index
    %c0_19 = arith.constant 0 : index
    %44 = vector.load %arg3[%c0_18, %c0_19] : memref<64x64xbf16, #tpu.memory_space<vmem>>, vector<64x64xbf16>
    %cst_20 = arith.constant dense<0.000000e+00> : vector<8x64xf32>
    %45 = tpu.matmul %43, %44, %cst_20 {dimension_numbers = #tpu.dot_dimension_numbers<[1], [0], [0], [1], [0, 0, 1, 1], [], []>} : vector<8x64xbf16>, vector<64x64xbf16>, vector<8x64xf32> -> vector<8x64xf32>
    %c0_21 = arith.constant 0 : index
    %c0_22 = arith.constant 0 : index
    %46 = vector.load %arg4[%c0_21, %c0_22] : memref<1x64xf32, #tpu.memory_space<vmem>>, vector<1x64xf32>
    %47 = vector.broadcast %46 : vector<1x64xf32> to vector<8x64xf32>
    %48 = arith.addf %45, %47 : vector<8x64xf32>
    %49 = vector.shape_cast %48 : vector<8x64xf32> to vector<2x4x64xf32>
    %50 = vector.shape_cast %41 : vector<2x4x64xf32> to vector<8x64xf32>
    %51 = arith.truncf %50 : vector<8x64xf32> to vector<8x64xbf16>
    %c0_23 = arith.constant 0 : index
    %c0_24 = arith.constant 0 : index
    %52 = vector.load %arg5[%c0_23, %c0_24] : memref<64x128xbf16, #tpu.memory_space<vmem>>, vector<64x128xbf16>
    %cst_25 = arith.constant dense<0.000000e+00> : vector<8x128xf32>
    %53 = tpu.matmul %51, %52, %cst_25 {dimension_numbers = #tpu.dot_dimension_numbers<[1], [0], [0], [1], [0, 0, 1, 1], [], []>} : vector<8x64xbf16>, vector<64x128xbf16>, vector<8x128xf32> -> vector<8x128xf32>
    %c0_26 = arith.constant 0 : index
    %c0_27 = arith.constant 0 : index
    %54 = vector.load %arg6[%c0_26, %c0_27] : memref<1x128xf32, #tpu.memory_space<vmem>>, vector<1x128xf32>
    %55 = vector.broadcast %54 : vector<1x128xf32> to vector<8x128xf32>
    %56 = arith.addf %53, %55 : vector<8x128xf32>
    %57 = vector.shape_cast %56 : vector<8x128xf32> to vector<2x4x128xf32>
    %58 = vector.extract_strided_slice %57 {offsets = [0, 0, 0], sizes = [2, 4, 64], strides = [1, 1, 1]} : vector<2x4x128xf32> to vector<2x4x64xf32>
    %59 = vector.extract_strided_slice %57 {offsets = [0, 0, 64], sizes = [2, 4, 64], strides = [1, 1, 1]} : vector<2x4x128xf32> to vector<2x4x64xf32>
    %60 = vector.extract_strided_slice %49 {offsets = [0, 0, 0], sizes = [2, 4, 16], strides = [1, 1, 1]} : vector<2x4x64xf32> to vector<2x4x16xf32>
    %61 = arith.truncf %60 : vector<2x4x16xf32> to vector<2x4x16xbf16>
    %62 = vector.extract_strided_slice %58 {offsets = [0, 0, 0], sizes = [2, 4, 16], strides = [1, 1, 1]} : vector<2x4x64xf32> to vector<2x4x16xf32>
    %63 = arith.truncf %62 : vector<2x4x16xf32> to vector<2x4x16xbf16>
    %64 = vector.extract_strided_slice %59 {offsets = [0, 0, 0], sizes = [2, 4, 16], strides = [1, 1, 1]} : vector<2x4x64xf32> to vector<2x4x16xf32>
    %65 = arith.truncf %64 : vector<2x4x16xf32> to vector<2x4x16xbf16>
    "tpu.trace_start"() <{level = 10 : i32, message = "bqd,bkd->bqk"}> : () -> ()
    %cst_28 = arith.constant dense<0.000000e+00> : vector<2x4x4xf32>
    %66 = tpu.matmul %61, %63, %cst_28 {dimension_numbers = #tpu.dot_dimension_numbers<[2], [2], [1], [1], [0, 0, 0, 1, 1, 1], [0], [0]>} : vector<2x4x16xbf16>, vector<2x4x16xbf16>, vector<2x4x4xf32> -> vector<2x4x4xf32>
    "tpu.trace_stop"() : () -> ()
    %cst_29 = arith.constant 2.500000e-01 : f32
    %67 = vector.broadcast %cst_29 : f32 to vector<2x4x4xf32>
    %68 = arith.mulf %66, %67 : vector<2x4x4xf32>
    %cst_30 = arith.constant dense<0xFF800000> : vector<2x4xf32>
    %69 = vector.multi_reduction <maximumf>, %68, %cst_30 [2] : vector<2x4x4xf32> to vector<2x4xf32>
    %70 = vector.shape_cast %69 : vector<2x4xf32> to vector<2x4x1xf32>
    %71 = vector.broadcast %70 : vector<2x4x1xf32> to vector<2x4x4xf32>
    %72 = arith.subf %68, %71 : vector<2x4x4xf32>
    %73 = math.exp %72 : vector<2x4x4xf32>
    %cst_31 = arith.constant dense<0.000000e+00> : vector<2x4xf32>
    %74 = vector.multi_reduction <add>, %73, %cst_31 [2] : vector<2x4x4xf32> to vector<2x4xf32>
    %75 = vector.shape_cast %74 : vector<2x4xf32> to vector<2x4x1xf32>
    %76 = tpu.reciprocal %75 {approx = true} : vector<2x4x1xf32> -> vector<2x4x1xf32>
    %77 = vector.broadcast %76 : vector<2x4x1xf32> to vector<2x4x4xf32>
    %78 = arith.mulf %73, %77 : vector<2x4x4xf32>
    %79 = arith.truncf %78 : vector<2x4x4xf32> to vector<2x4x4xbf16>
    "tpu.trace_start"() <{level = 10 : i32, message = "bqk,bkd->bqd"}> : () -> ()
    %cst_32 = arith.constant dense<0.000000e+00> : vector<2x4x16xf32>
    %80 = tpu.matmul %79, %65, %cst_32 {dimension_numbers = #tpu.dot_dimension_numbers<[2], [1], [1], [2], [0, 0, 0, 1, 1, 2], [0], [0]>} : vector<2x4x4xbf16>, vector<2x4x16xbf16>, vector<2x4x16xf32> -> vector<2x4x16xf32>
    "tpu.trace_stop"() : () -> ()
    %81 = vector.extract_strided_slice %49 {offsets = [0, 0, 16], sizes = [2, 4, 16], strides = [1, 1, 1]} : vector<2x4x64xf32> to vector<2x4x16xf32>
    %82 = arith.truncf %81 : vector<2x4x16xf32> to vector<2x4x16xbf16>
    %83 = vector.extract_strided_slice %58 {offsets = [0, 0, 16], sizes = [2, 4, 16], strides = [1, 1, 1]} : vector<2x4x64xf32> to vector<2x4x16xf32>
    %84 = arith.truncf %83 : vector<2x4x16xf32> to vector<2x4x16xbf16>
    %85 = vector.extract_strided_slice %59 {offsets = [0, 0, 16], sizes = [2, 4, 16], strides = [1, 1, 1]} : vector<2x4x64xf32> to vector<2x4x16xf32>
    %86 = arith.truncf %85 : vector<2x4x16xf32> to vector<2x4x16xbf16>
    "tpu.trace_start"() <{level = 10 : i32, message = "bqd,bkd->bqk"}> : () -> ()
    %cst_33 = arith.constant dense<0.000000e+00> : vector<2x4x4xf32>
    %87 = tpu.matmul %82, %84, %cst_33 {dimension_numbers = #tpu.dot_dimension_numbers<[2], [2], [1], [1], [0, 0, 0, 1, 1, 1], [0], [0]>} : vector<2x4x16xbf16>, vector<2x4x16xbf16>, vector<2x4x4xf32> -> vector<2x4x4xf32>
    "tpu.trace_stop"() : () -> ()
    %cst_34 = arith.constant 2.500000e-01 : f32
    %88 = vector.broadcast %cst_34 : f32 to vector<2x4x4xf32>
    %89 = arith.mulf %87, %88 : vector<2x4x4xf32>
    %cst_35 = arith.constant dense<0xFF800000> : vector<2x4xf32>
    %90 = vector.multi_reduction <maximumf>, %89, %cst_35 [2] : vector<2x4x4xf32> to vector<2x4xf32>
    %91 = vector.shape_cast %90 : vector<2x4xf32> to vector<2x4x1xf32>
    %92 = vector.broadcast %91 : vector<2x4x1xf32> to vector<2x4x4xf32>
    %93 = arith.subf %89, %92 : vector<2x4x4xf32>
    %94 = math.exp %93 : vector<2x4x4xf32>
    %cst_36 = arith.constant dense<0.000000e+00> : vector<2x4xf32>
    %95 = vector.multi_reduction <add>, %94, %cst_36 [2] : vector<2x4x4xf32> to vector<2x4xf32>
    %96 = vector.shape_cast %95 : vector<2x4xf32> to vector<2x4x1xf32>
    %97 = tpu.reciprocal %96 {approx = true} : vector<2x4x1xf32> -> vector<2x4x1xf32>
    %98 = vector.broadcast %97 : vector<2x4x1xf32> to vector<2x4x4xf32>
    %99 = arith.mulf %94, %98 : vector<2x4x4xf32>
    %100 = arith.truncf %99 : vector<2x4x4xf32> to vector<2x4x4xbf16>
    "tpu.trace_start"() <{level = 10 : i32, message = "bqk,bkd->bqd"}> : () -> ()
    %cst_37 = arith.constant dense<0.000000e+00> : vector<2x4x16xf32>
    %101 = tpu.matmul %100, %86, %cst_37 {dimension_numbers = #tpu.dot_dimension_numbers<[2], [1], [1], [2], [0, 0, 0, 1, 1, 2], [0], [0]>} : vector<2x4x4xbf16>, vector<2x4x16xbf16>, vector<2x4x16xf32> -> vector<2x4x16xf32>
    "tpu.trace_stop"() : () -> ()
    %102 = vector.extract_strided_slice %49 {offsets = [0, 0, 32], sizes = [2, 4, 16], strides = [1, 1, 1]} : vector<2x4x64xf32> to vector<2x4x16xf32>
    %103 = arith.truncf %102 : vector<2x4x16xf32> to vector<2x4x16xbf16>
    %104 = vector.extract_strided_slice %58 {offsets = [0, 0, 32], sizes = [2, 4, 16], strides = [1, 1, 1]} : vector<2x4x64xf32> to vector<2x4x16xf32>
    %105 = arith.truncf %104 : vector<2x4x16xf32> to vector<2x4x16xbf16>
    %106 = vector.extract_strided_slice %59 {offsets = [0, 0, 32], sizes = [2, 4, 16], strides = [1, 1, 1]} : vector<2x4x64xf32> to vector<2x4x16xf32>
    %107 = arith.truncf %106 : vector<2x4x16xf32> to vector<2x4x16xbf16>
    "tpu.trace_start"() <{level = 10 : i32, message = "bqd,bkd->bqk"}> : () -> ()
    %cst_38 = arith.constant dense<0.000000e+00> : vector<2x4x4xf32>
    %108 = tpu.matmul %103, %105, %cst_38 {dimension_numbers = #tpu.dot_dimension_numbers<[2], [2], [1], [1], [0, 0, 0, 1, 1, 1], [0], [0]>} : vector<2x4x16xbf16>, vector<2x4x16xbf16>, vector<2x4x4xf32> -> vector<2x4x4xf32>
    "tpu.trace_stop"() : () -> ()
    %cst_39 = arith.constant 2.500000e-01 : f32
    %109 = vector.broadcast %cst_39 : f32 to vector<2x4x4xf32>
    %110 = arith.mulf %108, %109 : vector<2x4x4xf32>
    %cst_40 = arith.constant dense<0xFF800000> : vector<2x4xf32>
    %111 = vector.multi_reduction <maximumf>, %110, %cst_40 [2] : vector<2x4x4xf32> to vector<2x4xf32>
    %112 = vector.shape_cast %111 : vector<2x4xf32> to vector<2x4x1xf32>
    %113 = vector.broadcast %112 : vector<2x4x1xf32> to vector<2x4x4xf32>
    %114 = arith.subf %110, %113 : vector<2x4x4xf32>
    %115 = math.exp %114 : vector<2x4x4xf32>
    %cst_41 = arith.constant dense<0.000000e+00> : vector<2x4xf32>
    %116 = vector.multi_reduction <add>, %115, %cst_41 [2] : vector<2x4x4xf32> to vector<2x4xf32>
    %117 = vector.shape_cast %116 : vector<2x4xf32> to vector<2x4x1xf32>
    %118 = tpu.reciprocal %117 {approx = true} : vector<2x4x1xf32> -> vector<2x4x1xf32>
    %119 = vector.broadcast %118 : vector<2x4x1xf32> to vector<2x4x4xf32>
    %120 = arith.mulf %115, %119 : vector<2x4x4xf32>
    %121 = arith.truncf %120 : vector<2x4x4xf32> to vector<2x4x4xbf16>
    "tpu.trace_start"() <{level = 10 : i32, message = "bqk,bkd->bqd"}> : () -> ()
    %cst_42 = arith.constant dense<0.000000e+00> : vector<2x4x16xf32>
    %122 = tpu.matmul %121, %107, %cst_42 {dimension_numbers = #tpu.dot_dimension_numbers<[2], [1], [1], [2], [0, 0, 0, 1, 1, 2], [0], [0]>} : vector<2x4x4xbf16>, vector<2x4x16xbf16>, vector<2x4x16xf32> -> vector<2x4x16xf32>
    "tpu.trace_stop"() : () -> ()
    %123 = vector.extract_strided_slice %49 {offsets = [0, 0, 48], sizes = [2, 4, 16], strides = [1, 1, 1]} : vector<2x4x64xf32> to vector<2x4x16xf32>
    %124 = arith.truncf %123 : vector<2x4x16xf32> to vector<2x4x16xbf16>
    %125 = vector.extract_strided_slice %58 {offsets = [0, 0, 48], sizes = [2, 4, 16], strides = [1, 1, 1]} : vector<2x4x64xf32> to vector<2x4x16xf32>
    %126 = arith.truncf %125 : vector<2x4x16xf32> to vector<2x4x16xbf16>
    %127 = vector.extract_strided_slice %59 {offsets = [0, 0, 48], sizes = [2, 4, 16], strides = [1, 1, 1]} : vector<2x4x64xf32> to vector<2x4x16xf32>
    %128 = arith.truncf %127 : vector<2x4x16xf32> to vector<2x4x16xbf16>
    "tpu.trace_start"() <{level = 10 : i32, message = "bqd,bkd->bqk"}> : () -> ()
    %cst_43 = arith.constant dense<0.000000e+00> : vector<2x4x4xf32>
    %129 = tpu.matmul %124, %126, %cst_43 {dimension_numbers = #tpu.dot_dimension_numbers<[2], [2], [1], [1], [0, 0, 0, 1, 1, 1], [0], [0]>} : vector<2x4x16xbf16>, vector<2x4x16xbf16>, vector<2x4x4xf32> -> vector<2x4x4xf32>
    "tpu.trace_stop"() : () -> ()
    %cst_44 = arith.constant 2.500000e-01 : f32
    %130 = vector.broadcast %cst_44 : f32 to vector<2x4x4xf32>
    %131 = arith.mulf %129, %130 : vector<2x4x4xf32>
    %cst_45 = arith.constant dense<0xFF800000> : vector<2x4xf32>
    %132 = vector.multi_reduction <maximumf>, %131, %cst_45 [2] : vector<2x4x4xf32> to vector<2x4xf32>
    %133 = vector.shape_cast %132 : vector<2x4xf32> to vector<2x4x1xf32>
    %134 = vector.broadcast %133 : vector<2x4x1xf32> to vector<2x4x4xf32>
    %135 = arith.subf %131, %134 : vector<2x4x4xf32>
    %136 = math.exp %135 : vector<2x4x4xf32>
    %cst_46 = arith.constant dense<0.000000e+00> : vector<2x4xf32>
    %137 = vector.multi_reduction <add>, %136, %cst_46 [2] : vector<2x4x4xf32> to vector<2x4xf32>
    %138 = vector.shape_cast %137 : vector<2x4xf32> to vector<2x4x1xf32>
    %139 = tpu.reciprocal %138 {approx = true} : vector<2x4x1xf32> -> vector<2x4x1xf32>
    %140 = vector.broadcast %139 : vector<2x4x1xf32> to vector<2x4x4xf32>
    %141 = arith.mulf %136, %140 : vector<2x4x4xf32>
    %142 = arith.truncf %141 : vector<2x4x4xf32> to vector<2x4x4xbf16>
    "tpu.trace_start"() <{level = 10 : i32, message = "bqk,bkd->bqd"}> : () -> ()
    %cst_47 = arith.constant dense<0.000000e+00> : vector<2x4x16xf32>
    %143 = tpu.matmul %142, %128, %cst_47 {dimension_numbers = #tpu.dot_dimension_numbers<[2], [1], [1], [2], [0, 0, 0, 1, 1, 2], [0], [0]>} : vector<2x4x4xbf16>, vector<2x4x16xbf16>, vector<2x4x16xf32> -> vector<2x4x16xf32>
    "tpu.trace_stop"() : () -> ()
    %144 = tpu.concatenate %80, %101, %122, %143 in 2 : vector<2x4x16xf32>, vector<2x4x16xf32>, vector<2x4x16xf32>, vector<2x4x16xf32> -> vector<2x4x64xf32>
    %145 = vector.shape_cast %144 : vector<2x4x64xf32> to vector<8x64xf32>
    %146 = arith.truncf %145 : vector<8x64xf32> to vector<8x64xbf16>
    %c0_48 = arith.constant 0 : index
    %c0_49 = arith.constant 0 : index
    %147 = vector.load %arg9[%c0_48, %c0_49] : memref<64x64xbf16, #tpu.memory_space<vmem>>, vector<64x64xbf16>
    %cst_50 = arith.constant dense<0.000000e+00> : vector<8x64xf32>
    %148 = tpu.matmul %146, %147, %cst_50 {dimension_numbers = #tpu.dot_dimension_numbers<[1], [0], [0], [1], [0, 0, 1, 1], [], []>} : vector<8x64xbf16>, vector<64x64xbf16>, vector<8x64xf32> -> vector<8x64xf32>
    %c0_51 = arith.constant 0 : index
    %c0_52 = arith.constant 0 : index
    %149 = vector.load %arg10[%c0_51, %c0_52] : memref<1x64xf32, #tpu.memory_space<vmem>>, vector<1x64xf32>
    %150 = vector.broadcast %149 : vector<1x64xf32> to vector<8x64xf32>
    %151 = arith.addf %148, %150 : vector<8x64xf32>
    %152 = vector.shape_cast %151 : vector<8x64xf32> to vector<2x4x64xf32>
    %153 = arith.addf %0, %152 : vector<2x4x64xf32>
    %cst_53 = arith.constant dense<0.000000e+00> : vector<2x4xf32>
    %154 = vector.multi_reduction <add>, %153, %cst_53 [2] : vector<2x4x64xf32> to vector<2x4xf32>
    %155 = vector.shape_cast %154 : vector<2x4xf32> to vector<2x4x1xf32>
    %cst_54 = arith.constant 6.400000e+01 : f32
    %156 = vector.broadcast %cst_54 : f32 to vector<2x4x1xf32>
    %157 = arith.divf %155, %156 : vector<2x4x1xf32>
    %158 = vector.broadcast %157 : vector<2x4x1xf32> to vector<2x4x64xf32>
    %159 = arith.subf %153, %158 : vector<2x4x64xf32>
    %160 = arith.mulf %159, %159 : vector<2x4x64xf32>
    %cst_55 = arith.constant dense<0.000000e+00> : vector<2x4xf32>
    %161 = vector.multi_reduction <add>, %160, %cst_55 [2] : vector<2x4x64xf32> to vector<2x4xf32>
    %162 = vector.shape_cast %161 : vector<2x4xf32> to vector<2x4x1xf32>
    %cst_56 = arith.constant 6.400000e+01 : f32
    %163 = vector.broadcast %cst_56 : f32 to vector<2x4x1xf32>
    %164 = arith.divf %162, %163 : vector<2x4x1xf32>
    %cst_57 = arith.constant 9.99999997E-7 : f32
    %165 = vector.broadcast %cst_57 : f32 to vector<2x4x1xf32>
    %166 = arith.addf %164, %165 : vector<2x4x1xf32>
    %167 = math.rsqrt %166 : vector<2x4x1xf32>
    %168 = vector.broadcast %167 : vector<2x4x1xf32> to vector<2x4x64xf32>
    %169 = arith.mulf %159, %168 : vector<2x4x64xf32>
    %170 = vector.shape_cast %169 : vector<2x4x64xf32> to vector<8x64xf32>
    %171 = arith.truncf %170 : vector<8x64xf32> to vector<8x64xbf16>
    %c0_58 = arith.constant 0 : index
    %c0_59 = arith.constant 0 : index
    %172 = vector.load %arg11[%c0_58, %c0_59] : memref<64x256xbf16, #tpu.memory_space<vmem>>, vector<64x256xbf16>
    %cst_60 = arith.constant dense<0.000000e+00> : vector<8x256xf32>
    %173 = tpu.matmul %171, %172, %cst_60 {dimension_numbers = #tpu.dot_dimension_numbers<[1], [0], [0], [1], [0, 0, 1, 1], [], []>} : vector<8x64xbf16>, vector<64x256xbf16>, vector<8x256xf32> -> vector<8x256xf32>
    %c0_61 = arith.constant 0 : index
    %c0_62 = arith.constant 0 : index
    %174 = vector.load %arg12[%c0_61, %c0_62] : memref<1x256xf32, #tpu.memory_space<vmem>>, vector<1x256xf32>
    %175 = vector.broadcast %174 : vector<1x256xf32> to vector<8x256xf32>
    %176 = arith.addf %173, %175 : vector<8x256xf32>
    %cst_63 = arith.constant 5.000000e-01 : f32
    %177 = vector.broadcast %cst_63 : f32 to vector<8x256xf32>
    %178 = arith.mulf %177, %176 : vector<8x256xf32>
    %cst_64 = arith.constant 4.471500e-02 : f32
    %179 = vector.broadcast %cst_64 : f32 to vector<8x256xf32>
    %180 = arith.mulf %179, %176 : vector<8x256xf32>
    %181 = arith.mulf %180, %176 : vector<8x256xf32>
    %182 = arith.mulf %181, %176 : vector<8x256xf32>
    %183 = arith.addf %176, %182 : vector<8x256xf32>
    %cst_65 = arith.constant 0.797884583 : f32
    %184 = vector.broadcast %cst_65 : f32 to vector<8x256xf32>
    %185 = arith.mulf %184, %183 : vector<8x256xf32>
    %186 = math.tanh %185 : vector<8x256xf32>
    %cst_66 = arith.constant 1.000000e+00 : f32
    %187 = vector.broadcast %cst_66 : f32 to vector<8x256xf32>
    %188 = arith.addf %187, %186 : vector<8x256xf32>
    %189 = arith.mulf %178, %188 : vector<8x256xf32>
    %190 = arith.truncf %189 : vector<8x256xf32> to vector<8x256xbf16>
    %c0_67 = arith.constant 0 : index
    %c0_68 = arith.constant 0 : index
    %191 = vector.load %arg13[%c0_67, %c0_68] : memref<256x64xbf16, #tpu.memory_space<vmem>>, vector<256x64xbf16>
    %cst_69 = arith.constant dense<0.000000e+00> : vector<8x64xf32>
    %192 = tpu.matmul %190, %191, %cst_69 {dimension_numbers = #tpu.dot_dimension_numbers<[1], [0], [0], [1], [0, 0, 1, 1], [], []>} : vector<8x256xbf16>, vector<256x64xbf16>, vector<8x64xf32> -> vector<8x64xf32>
    %c0_70 = arith.constant 0 : index
    %c0_71 = arith.constant 0 : index
    %193 = vector.load %arg14[%c0_70, %c0_71] : memref<1x64xf32, #tpu.memory_space<vmem>>, vector<1x64xf32>
    %194 = vector.broadcast %193 : vector<1x64xf32> to vector<8x64xf32>
    %195 = arith.addf %192, %194 : vector<8x64xf32>
    %196 = vector.shape_cast %195 : vector<8x64xf32> to vector<2x4x64xf32>
    %197 = arith.addf %153, %196 : vector<2x4x64xf32>
    %c0_72 = arith.constant 0 : index
    %c0_73 = arith.constant 0 : index
    %c0_74 = arith.constant 0 : index
    %198 = vector.load %arg15[%c0_72, %c0_73, %c0_74] : memref<2x4x64xf32, #tpu.memory_space<vmem>>, vector<2x4x64xf32>
    tpu.vector_store %arg15[%c0_72, %c0_73, %c0_74], %197 {strides = array<i32>} : memref<2x4x64xf32, #tpu.memory_space<vmem>>, vector<2x4x64xf32>,
    return
  }
  func.func @transform_0(%arg0: i32) -> (i32, i32, i32) {
    %c0_i32 = arith.constant 0 : i32
    %c0_i32_0 = arith.constant 0 : i32
    %c0_i32_1 = arith.constant 0 : i32
    return %arg0, %c0_i32, %c0_i32_0 : i32, i32, i32
  }
  func.func @transform_1(%arg0: i32) -> (i32, i32, i32) {
    %c0_i32 = arith.constant 0 : i32
    %c0_i32_0 = arith.constant 0 : i32
    %c0_i32_1 = arith.constant 0 : i32
    return %arg0, %c0_i32, %c0_i32_0 : i32, i32, i32
  }
  func.func @transform_2(%arg0: i32) -> (i32, i32) {
    %c0_i32 = arith.constant 0 : i32
    %c0_i32_0 = arith.constant 0 : i32
    %c0_i32_1 = arith.constant 0 : i32
    return %c0_i32, %c0_i32_0 : i32, i32
  }
  func.func @transform_3(%arg0: i32) -> (i32, i32) {
    %c0_i32 = arith.constant 0 : i32
    %c0_i32_0 = arith.constant 0 : i32
    %c0_i32_1 = arith.constant 0 : i32
    return %c0_i32, %c0_i32_0 : i32, i32
  }
  func.func @transform_4(%arg0: i32) -> (i32, i32) {
    %c0_i32 = arith.constant 0 : i32
    %c0_i32_0 = arith.constant 0 : i32
    %c0_i32_1 = arith.constant 0 : i32
    return %c0_i32, %c0_i32_0 : i32, i32
  }
  func.func @transform_5(%arg0: i32) -> (i32, i32) {
    %c0_i32 = arith.constant 0 : i32
    %c0_i32_0 = arith.constant 0 : i32
    %c0_i32_1 = arith.constant 0 : i32
    return %c0_i32, %c0_i32_0 : i32, i32
  }
  func.func @transform_6(%arg0: i32) -> (i32, i32) {
    %c0_i32 = arith.constant 0 : i32
    %c0_i32_0 = arith.constant 0 : i32
    %c0_i32_1 = arith.constant 0 : i32
    return %c0_i32, %c0_i32_0 : i32, i32
  }
  func.func @transform_7(%arg0: i32) -> (i32, i32) {
    %c0_i32 = arith.constant 0 : i32
    %c0_i32_0 = arith.constant 0 : i32
    %c0_i32_1 = arith.constant 0 : i32
    return %c0_i32, %c0_i32_0 : i32, i32
  }
  func.func @transform_8(%arg0: i32) -> (i32, i32) {
    %c0_i32 = arith.constant 0 : i32
    %c0_i32_0 = arith.constant 0 : i32
    %c0_i32_1 = arith.constant 0 : i32
    return %c0_i32, %c0_i32_0 : i32, i32
  }
  func.func @transform_9(%arg0: i32) -> (i32, i32) {
    %c0_i32 = arith.constant 0 : i32
    %c0_i32_0 = arith.constant 0 : i32
    %c0_i32_1 = arith.constant 0 : i32
    return %c0_i32, %c0_i32_0 : i32, i32
  }
  func.func @transform_10(%arg0: i32) -> (i32, i32) {
    %c0_i32 = arith.constant 0 : i32
    %c0_i32_0 = arith.constant 0 : i32
    %c0_i32_1 = arith.constant 0 : i32
    return %c0_i32, %c0_i32_0 : i32, i32
  }
  func.func @transform_11(%arg0: i32) -> (i32, i32) {
    %c0_i32 = arith.constant 0 : i32
    %c0_i32_0 = arith.constant 0 : i32
    %c0_i32_1 = arith.constant 0 : i32
    return %c0_i32, %c0_i32_0 : i32, i32
  }
  func.func @transform_12(%arg0: i32) -> (i32, i32) {
    %c0_i32 = arith.constant 0 : i32
    %c0_i32_0 = arith.constant 0 : i32
    %c0_i32_1 = arith.constant 0 : i32
    return %c0_i32, %c0_i32_0 : i32, i32
  }
  func.func @transform_13(%arg0: i32) -> (i32, i32) {
    %c0_i32 = arith.constant 0 : i32
    %c0_i32_0 = arith.constant 0 : i32
    %c0_i32_1 = arith.constant 0 : i32
    return %c0_i32, %c0_i32_0 : i32, i32
  }
  func.func @transform_14(%arg0: i32) -> (i32, i32, i32) {
    %c0_i32 = arith.constant 0 : i32
    %c0_i32_0 = arith.constant 0 : i32
    %c0_i32_1 = arith.constant 0 : i32
    return %arg0, %c0_i32, %c0_i32_0 : i32, i32, i32
  }
}

module attributes {stable_mosaic.version = 11 : i64} {
  func.func @_attn_block_kernel(%arg0: i32, %arg1: memref<2x4x64xf32, #tpu.memory_space<vmem>>, %arg2: memref<64x192xbf16, #tpu.memory_space<vmem>>, %arg3: memref<1x192xf32, #tpu.memory_space<vmem>>, %arg4: memref<64x64xbf16, #tpu.memory_space<vmem>>, %arg5: memref<1x64xf32, #tpu.memory_space<vmem>>, %arg6: memref<64x256xbf16, #tpu.memory_space<vmem>>, %arg7: memref<1x256xf32, #tpu.memory_space<vmem>>, %arg8: memref<256x64xbf16, #tpu.memory_space<vmem>>, %arg9: memref<1x64xf32, #tpu.memory_space<vmem>>, %arg10: memref<2x4x64xf32, #tpu.memory_space<vmem>>) attributes {dimension_semantics = [#tpu.dimension_semantics<parallel>], iteration_bounds = array<i64: 2>, scalar_prefetch = 0 : i64, scratch_operands = 0 : i64, tpu.core_type = #tpu.core_type<tc>, window_params = [{transform_indices = @transform_0, window_bounds = array<i64: 2, 4, 64>}, {pipeline_mode = #tpu.pipeline_mode<synchronous>, transform_indices = @transform_1, window_bounds = array<i64: 64, 192>}, {pipeline_mode = #tpu.pipeline_mode<synchronous>, transform_indices = @transform_2, window_bounds = array<i64: 1, 192>}, {pipeline_mode = #tpu.pipeline_mode<synchronous>, transform_indices = @transform_3, window_bounds = array<i64: 64, 64>}, {pipeline_mode = #tpu.pipeline_mode<synchronous>, transform_indices = @transform_4, window_bounds = array<i64: 1, 64>}, {pipeline_mode = #tpu.pipeline_mode<synchronous>, transform_indices = @transform_5, window_bounds = array<i64: 64, 256>}, {pipeline_mode = #tpu.pipeline_mode<synchronous>, transform_indices = @transform_6, window_bounds = array<i64: 1, 256>}, {pipeline_mode = #tpu.pipeline_mode<synchronous>, transform_indices = @transform_7, window_bounds = array<i64: 256, 64>}, {pipeline_mode = #tpu.pipeline_mode<synchronous>, transform_indices = @transform_8, window_bounds = array<i64: 1, 64>}, {transform_indices = @transform_9, window_bounds = array<i64: 2, 4, 64>}]} {
    %c0 = arith.constant 0 : index
    %c0_0 = arith.constant 0 : index
    %c0_1 = arith.constant 0 : index
    %0 = vector.load %arg1[%c0, %c0_0, %c0_1] : memref<2x4x64xf32, #tpu.memory_space<vmem>>, vector<2x4x64xf32>
    %cst = arith.constant dense<0.000000e+00> : vector<2x4xf32>
    %1 = vector.multi_reduction <add>, %0, %cst [2] : vector<2x4x64xf32> to vector<2x4xf32>
    %2 = vector.shape_cast %1 : vector<2x4xf32> to vector<2x4x1xf32>
    %cst_2 = arith.constant 6.400000e+01 : f32
    %3 = vector.broadcast %cst_2 : f32 to vector<2x4x1xf32>
    %4 = arith.divf %2, %3 : vector<2x4x1xf32>
    %5 = vector.broadcast %4 : vector<2x4x1xf32> to vector<2x4x64xf32>
    %6 = arith.subf %0, %5 : vector<2x4x64xf32>
    %7 = arith.mulf %6, %6 : vector<2x4x64xf32>
    %cst_3 = arith.constant dense<0.000000e+00> : vector<2x4xf32>
    %8 = vector.multi_reduction <add>, %7, %cst_3 [2] : vector<2x4x64xf32> to vector<2x4xf32>
    %9 = vector.shape_cast %8 : vector<2x4xf32> to vector<2x4x1xf32>
    %cst_4 = arith.constant 6.400000e+01 : f32
    %10 = vector.broadcast %cst_4 : f32 to vector<2x4x1xf32>
    %11 = arith.divf %9, %10 : vector<2x4x1xf32>
    %cst_5 = arith.constant 9.99999997E-7 : f32
    %12 = vector.broadcast %cst_5 : f32 to vector<2x4x1xf32>
    %13 = arith.addf %11, %12 : vector<2x4x1xf32>
    %14 = math.rsqrt %13 : vector<2x4x1xf32>
    %15 = vector.broadcast %14 : vector<2x4x1xf32> to vector<2x4x64xf32>
    %16 = arith.mulf %6, %15 : vector<2x4x64xf32>
    %17 = vector.shape_cast %16 : vector<2x4x64xf32> to vector<8x64xf32>
    %18 = arith.truncf %17 : vector<8x64xf32> to vector<8x64xbf16>
    %c0_6 = arith.constant 0 : index
    %c0_7 = arith.constant 0 : index
    %19 = vector.load %arg2[%c0_6, %c0_7] : memref<64x192xbf16, #tpu.memory_space<vmem>>, vector<64x192xbf16>
    %cst_8 = arith.constant dense<0.000000e+00> : vector<8x192xf32>
    %20 = tpu.matmul %18, %19, %cst_8 {dimension_numbers = #tpu.dot_dimension_numbers<[1], [0], [0], [1], [0, 0, 1, 1], [], []>} : vector<8x64xbf16>, vector<64x192xbf16>, vector<8x192xf32> -> vector<8x192xf32>
    %c0_9 = arith.constant 0 : index
    %c0_10 = arith.constant 0 : index
    %21 = vector.load %arg3[%c0_9, %c0_10] : memref<1x192xf32, #tpu.memory_space<vmem>>, vector<1x192xf32>
    %22 = vector.broadcast %21 : vector<1x192xf32> to vector<8x192xf32>
    %23 = arith.addf %20, %22 : vector<8x192xf32>
    %24 = vector.shape_cast %23 : vector<8x192xf32> to vector<2x4x192xf32>
    %25 = vector.extract_strided_slice %24 {offsets = [0, 0, 0], sizes = [2, 4, 64], strides = [1, 1, 1]} : vector<2x4x192xf32> to vector<2x4x64xf32>
    %26 = vector.extract_strided_slice %24 {offsets = [0, 0, 64], sizes = [2, 4, 64], strides = [1, 1, 1]} : vector<2x4x192xf32> to vector<2x4x64xf32>
    %27 = vector.extract_strided_slice %24 {offsets = [0, 0, 128], sizes = [2, 4, 64], strides = [1, 1, 1]} : vector<2x4x192xf32> to vector<2x4x64xf32>
    %28 = vector.extract_strided_slice %25 {offsets = [0, 0, 0], sizes = [2, 4, 16], strides = [1, 1, 1]} : vector<2x4x64xf32> to vector<2x4x16xf32>
    %29 = arith.truncf %28 : vector<2x4x16xf32> to vector<2x4x16xbf16>
    %30 = vector.extract_strided_slice %26 {offsets = [0, 0, 0], sizes = [2, 4, 16], strides = [1, 1, 1]} : vector<2x4x64xf32> to vector<2x4x16xf32>
    %31 = arith.truncf %30 : vector<2x4x16xf32> to vector<2x4x16xbf16>
    %32 = vector.extract_strided_slice %27 {offsets = [0, 0, 0], sizes = [2, 4, 16], strides = [1, 1, 1]} : vector<2x4x64xf32> to vector<2x4x16xf32>
    %33 = arith.truncf %32 : vector<2x4x16xf32> to vector<2x4x16xbf16>
    "tpu.trace_start"() <{level = 10 : i32, message = "bqd,bkd->bqk"}> : () -> ()
    %cst_11 = arith.constant dense<0.000000e+00> : vector<2x4x4xf32>
    %34 = tpu.matmul %29, %31, %cst_11 {dimension_numbers = #tpu.dot_dimension_numbers<[2], [2], [1], [1], [0, 0, 0, 1, 1, 1], [0], [0]>} : vector<2x4x16xbf16>, vector<2x4x16xbf16>, vector<2x4x4xf32> -> vector<2x4x4xf32>
    "tpu.trace_stop"() : () -> ()
    %cst_12 = arith.constant 2.500000e-01 : f32
    %35 = vector.broadcast %cst_12 : f32 to vector<2x4x4xf32>
    %36 = arith.mulf %34, %35 : vector<2x4x4xf32>
    %cst_13 = arith.constant dense<0xFF800000> : vector<2x4xf32>
    %37 = vector.multi_reduction <maximumf>, %36, %cst_13 [2] : vector<2x4x4xf32> to vector<2x4xf32>
    %38 = vector.shape_cast %37 : vector<2x4xf32> to vector<2x4x1xf32>
    %39 = vector.broadcast %38 : vector<2x4x1xf32> to vector<2x4x4xf32>
    %40 = arith.subf %36, %39 : vector<2x4x4xf32>
    %41 = math.exp %40 : vector<2x4x4xf32>
    %cst_14 = arith.constant dense<0.000000e+00> : vector<2x4xf32>
    %42 = vector.multi_reduction <add>, %41, %cst_14 [2] : vector<2x4x4xf32> to vector<2x4xf32>
    %43 = vector.shape_cast %42 : vector<2x4xf32> to vector<2x4x1xf32>
    %44 = tpu.reciprocal %43 {approx = true} : vector<2x4x1xf32> -> vector<2x4x1xf32>
    %45 = vector.broadcast %44 : vector<2x4x1xf32> to vector<2x4x4xf32>
    %46 = arith.mulf %41, %45 : vector<2x4x4xf32>
    %47 = arith.truncf %46 : vector<2x4x4xf32> to vector<2x4x4xbf16>
    "tpu.trace_start"() <{level = 10 : i32, message = "bqk,bkd->bqd"}> : () -> ()
    %cst_15 = arith.constant dense<0.000000e+00> : vector<2x4x16xf32>
    %48 = tpu.matmul %47, %33, %cst_15 {dimension_numbers = #tpu.dot_dimension_numbers<[2], [1], [1], [2], [0, 0, 0, 1, 1, 2], [0], [0]>} : vector<2x4x4xbf16>, vector<2x4x16xbf16>, vector<2x4x16xf32> -> vector<2x4x16xf32>
    "tpu.trace_stop"() : () -> ()
    %49 = vector.extract_strided_slice %25 {offsets = [0, 0, 16], sizes = [2, 4, 16], strides = [1, 1, 1]} : vector<2x4x64xf32> to vector<2x4x16xf32>
    %50 = arith.truncf %49 : vector<2x4x16xf32> to vector<2x4x16xbf16>
    %51 = vector.extract_strided_slice %26 {offsets = [0, 0, 16], sizes = [2, 4, 16], strides = [1, 1, 1]} : vector<2x4x64xf32> to vector<2x4x16xf32>
    %52 = arith.truncf %51 : vector<2x4x16xf32> to vector<2x4x16xbf16>
    %53 = vector.extract_strided_slice %27 {offsets = [0, 0, 16], sizes = [2, 4, 16], strides = [1, 1, 1]} : vector<2x4x64xf32> to vector<2x4x16xf32>
    %54 = arith.truncf %53 : vector<2x4x16xf32> to vector<2x4x16xbf16>
    "tpu.trace_start"() <{level = 10 : i32, message = "bqd,bkd->bqk"}> : () -> ()
    %cst_16 = arith.constant dense<0.000000e+00> : vector<2x4x4xf32>
    %55 = tpu.matmul %50, %52, %cst_16 {dimension_numbers = #tpu.dot_dimension_numbers<[2], [2], [1], [1], [0, 0, 0, 1, 1, 1], [0], [0]>} : vector<2x4x16xbf16>, vector<2x4x16xbf16>, vector<2x4x4xf32> -> vector<2x4x4xf32>
    "tpu.trace_stop"() : () -> ()
    %cst_17 = arith.constant 2.500000e-01 : f32
    %56 = vector.broadcast %cst_17 : f32 to vector<2x4x4xf32>
    %57 = arith.mulf %55, %56 : vector<2x4x4xf32>
    %cst_18 = arith.constant dense<0xFF800000> : vector<2x4xf32>
    %58 = vector.multi_reduction <maximumf>, %57, %cst_18 [2] : vector<2x4x4xf32> to vector<2x4xf32>
    %59 = vector.shape_cast %58 : vector<2x4xf32> to vector<2x4x1xf32>
    %60 = vector.broadcast %59 : vector<2x4x1xf32> to vector<2x4x4xf32>
    %61 = arith.subf %57, %60 : vector<2x4x4xf32>
    %62 = math.exp %61 : vector<2x4x4xf32>
    %cst_19 = arith.constant dense<0.000000e+00> : vector<2x4xf32>
    %63 = vector.multi_reduction <add>, %62, %cst_19 [2] : vector<2x4x4xf32> to vector<2x4xf32>
    %64 = vector.shape_cast %63 : vector<2x4xf32> to vector<2x4x1xf32>
    %65 = tpu.reciprocal %64 {approx = true} : vector<2x4x1xf32> -> vector<2x4x1xf32>
    %66 = vector.broadcast %65 : vector<2x4x1xf32> to vector<2x4x4xf32>
    %67 = arith.mulf %62, %66 : vector<2x4x4xf32>
    %68 = arith.truncf %67 : vector<2x4x4xf32> to vector<2x4x4xbf16>
    "tpu.trace_start"() <{level = 10 : i32, message = "bqk,bkd->bqd"}> : () -> ()
    %cst_20 = arith.constant dense<0.000000e+00> : vector<2x4x16xf32>
    %69 = tpu.matmul %68, %54, %cst_20 {dimension_numbers = #tpu.dot_dimension_numbers<[2], [1], [1], [2], [0, 0, 0, 1, 1, 2], [0], [0]>} : vector<2x4x4xbf16>, vector<2x4x16xbf16>, vector<2x4x16xf32> -> vector<2x4x16xf32>
    "tpu.trace_stop"() : () -> ()
    %70 = vector.extract_strided_slice %25 {offsets = [0, 0, 32], sizes = [2, 4, 16], strides = [1, 1, 1]} : vector<2x4x64xf32> to vector<2x4x16xf32>
    %71 = arith.truncf %70 : vector<2x4x16xf32> to vector<2x4x16xbf16>
    %72 = vector.extract_strided_slice %26 {offsets = [0, 0, 32], sizes = [2, 4, 16], strides = [1, 1, 1]} : vector<2x4x64xf32> to vector<2x4x16xf32>
    %73 = arith.truncf %72 : vector<2x4x16xf32> to vector<2x4x16xbf16>
    %74 = vector.extract_strided_slice %27 {offsets = [0, 0, 32], sizes = [2, 4, 16], strides = [1, 1, 1]} : vector<2x4x64xf32> to vector<2x4x16xf32>
    %75 = arith.truncf %74 : vector<2x4x16xf32> to vector<2x4x16xbf16>
    "tpu.trace_start"() <{level = 10 : i32, message = "bqd,bkd->bqk"}> : () -> ()
    %cst_21 = arith.constant dense<0.000000e+00> : vector<2x4x4xf32>
    %76 = tpu.matmul %71, %73, %cst_21 {dimension_numbers = #tpu.dot_dimension_numbers<[2], [2], [1], [1], [0, 0, 0, 1, 1, 1], [0], [0]>} : vector<2x4x16xbf16>, vector<2x4x16xbf16>, vector<2x4x4xf32> -> vector<2x4x4xf32>
    "tpu.trace_stop"() : () -> ()
    %cst_22 = arith.constant 2.500000e-01 : f32
    %77 = vector.broadcast %cst_22 : f32 to vector<2x4x4xf32>
    %78 = arith.mulf %76, %77 : vector<2x4x4xf32>
    %cst_23 = arith.constant dense<0xFF800000> : vector<2x4xf32>
    %79 = vector.multi_reduction <maximumf>, %78, %cst_23 [2] : vector<2x4x4xf32> to vector<2x4xf32>
    %80 = vector.shape_cast %79 : vector<2x4xf32> to vector<2x4x1xf32>
    %81 = vector.broadcast %80 : vector<2x4x1xf32> to vector<2x4x4xf32>
    %82 = arith.subf %78, %81 : vector<2x4x4xf32>
    %83 = math.exp %82 : vector<2x4x4xf32>
    %cst_24 = arith.constant dense<0.000000e+00> : vector<2x4xf32>
    %84 = vector.multi_reduction <add>, %83, %cst_24 [2] : vector<2x4x4xf32> to vector<2x4xf32>
    %85 = vector.shape_cast %84 : vector<2x4xf32> to vector<2x4x1xf32>
    %86 = tpu.reciprocal %85 {approx = true} : vector<2x4x1xf32> -> vector<2x4x1xf32>
    %87 = vector.broadcast %86 : vector<2x4x1xf32> to vector<2x4x4xf32>
    %88 = arith.mulf %83, %87 : vector<2x4x4xf32>
    %89 = arith.truncf %88 : vector<2x4x4xf32> to vector<2x4x4xbf16>
    "tpu.trace_start"() <{level = 10 : i32, message = "bqk,bkd->bqd"}> : () -> ()
    %cst_25 = arith.constant dense<0.000000e+00> : vector<2x4x16xf32>
    %90 = tpu.matmul %89, %75, %cst_25 {dimension_numbers = #tpu.dot_dimension_numbers<[2], [1], [1], [2], [0, 0, 0, 1, 1, 2], [0], [0]>} : vector<2x4x4xbf16>, vector<2x4x16xbf16>, vector<2x4x16xf32> -> vector<2x4x16xf32>
    "tpu.trace_stop"() : () -> ()
    %91 = vector.extract_strided_slice %25 {offsets = [0, 0, 48], sizes = [2, 4, 16], strides = [1, 1, 1]} : vector<2x4x64xf32> to vector<2x4x16xf32>
    %92 = arith.truncf %91 : vector<2x4x16xf32> to vector<2x4x16xbf16>
    %93 = vector.extract_strided_slice %26 {offsets = [0, 0, 48], sizes = [2, 4, 16], strides = [1, 1, 1]} : vector<2x4x64xf32> to vector<2x4x16xf32>
    %94 = arith.truncf %93 : vector<2x4x16xf32> to vector<2x4x16xbf16>
    %95 = vector.extract_strided_slice %27 {offsets = [0, 0, 48], sizes = [2, 4, 16], strides = [1, 1, 1]} : vector<2x4x64xf32> to vector<2x4x16xf32>
    %96 = arith.truncf %95 : vector<2x4x16xf32> to vector<2x4x16xbf16>
    "tpu.trace_start"() <{level = 10 : i32, message = "bqd,bkd->bqk"}> : () -> ()
    %cst_26 = arith.constant dense<0.000000e+00> : vector<2x4x4xf32>
    %97 = tpu.matmul %92, %94, %cst_26 {dimension_numbers = #tpu.dot_dimension_numbers<[2], [2], [1], [1], [0, 0, 0, 1, 1, 1], [0], [0]>} : vector<2x4x16xbf16>, vector<2x4x16xbf16>, vector<2x4x4xf32> -> vector<2x4x4xf32>
    "tpu.trace_stop"() : () -> ()
    %cst_27 = arith.constant 2.500000e-01 : f32
    %98 = vector.broadcast %cst_27 : f32 to vector<2x4x4xf32>
    %99 = arith.mulf %97, %98 : vector<2x4x4xf32>
    %cst_28 = arith.constant dense<0xFF800000> : vector<2x4xf32>
    %100 = vector.multi_reduction <maximumf>, %99, %cst_28 [2] : vector<2x4x4xf32> to vector<2x4xf32>
    %101 = vector.shape_cast %100 : vector<2x4xf32> to vector<2x4x1xf32>
    %102 = vector.broadcast %101 : vector<2x4x1xf32> to vector<2x4x4xf32>
    %103 = arith.subf %99, %102 : vector<2x4x4xf32>
    %104 = math.exp %103 : vector<2x4x4xf32>
    %cst_29 = arith.constant dense<0.000000e+00> : vector<2x4xf32>
    %105 = vector.multi_reduction <add>, %104, %cst_29 [2] : vector<2x4x4xf32> to vector<2x4xf32>
    %106 = vector.shape_cast %105 : vector<2x4xf32> to vector<2x4x1xf32>
    %107 = tpu.reciprocal %106 {approx = true} : vector<2x4x1xf32> -> vector<2x4x1xf32>
    %108 = vector.broadcast %107 : vector<2x4x1xf32> to vector<2x4x4xf32>
    %109 = arith.mulf %104, %108 : vector<2x4x4xf32>
    %110 = arith.truncf %109 : vector<2x4x4xf32> to vector<2x4x4xbf16>
    "tpu.trace_start"() <{level = 10 : i32, message = "bqk,bkd->bqd"}> : () -> ()
    %cst_30 = arith.constant dense<0.000000e+00> : vector<2x4x16xf32>
    %111 = tpu.matmul %110, %96, %cst_30 {dimension_numbers = #tpu.dot_dimension_numbers<[2], [1], [1], [2], [0, 0, 0, 1, 1, 2], [0], [0]>} : vector<2x4x4xbf16>, vector<2x4x16xbf16>, vector<2x4x16xf32> -> vector<2x4x16xf32>
    "tpu.trace_stop"() : () -> ()
    %112 = tpu.concatenate %48, %69, %90, %111 in 2 : vector<2x4x16xf32>, vector<2x4x16xf32>, vector<2x4x16xf32>, vector<2x4x16xf32> -> vector<2x4x64xf32>
    %113 = vector.shape_cast %112 : vector<2x4x64xf32> to vector<8x64xf32>
    %114 = arith.truncf %113 : vector<8x64xf32> to vector<8x64xbf16>
    %c0_31 = arith.constant 0 : index
    %c0_32 = arith.constant 0 : index
    %115 = vector.load %arg4[%c0_31, %c0_32] : memref<64x64xbf16, #tpu.memory_space<vmem>>, vector<64x64xbf16>
    %cst_33 = arith.constant dense<0.000000e+00> : vector<8x64xf32>
    %116 = tpu.matmul %114, %115, %cst_33 {dimension_numbers = #tpu.dot_dimension_numbers<[1], [0], [0], [1], [0, 0, 1, 1], [], []>} : vector<8x64xbf16>, vector<64x64xbf16>, vector<8x64xf32> -> vector<8x64xf32>
    %c0_34 = arith.constant 0 : index
    %c0_35 = arith.constant 0 : index
    %117 = vector.load %arg5[%c0_34, %c0_35] : memref<1x64xf32, #tpu.memory_space<vmem>>, vector<1x64xf32>
    %118 = vector.broadcast %117 : vector<1x64xf32> to vector<8x64xf32>
    %119 = arith.addf %116, %118 : vector<8x64xf32>
    %120 = vector.shape_cast %119 : vector<8x64xf32> to vector<2x4x64xf32>
    %121 = arith.addf %0, %120 : vector<2x4x64xf32>
    %cst_36 = arith.constant dense<0.000000e+00> : vector<2x4xf32>
    %122 = vector.multi_reduction <add>, %121, %cst_36 [2] : vector<2x4x64xf32> to vector<2x4xf32>
    %123 = vector.shape_cast %122 : vector<2x4xf32> to vector<2x4x1xf32>
    %cst_37 = arith.constant 6.400000e+01 : f32
    %124 = vector.broadcast %cst_37 : f32 to vector<2x4x1xf32>
    %125 = arith.divf %123, %124 : vector<2x4x1xf32>
    %126 = vector.broadcast %125 : vector<2x4x1xf32> to vector<2x4x64xf32>
    %127 = arith.subf %121, %126 : vector<2x4x64xf32>
    %128 = arith.mulf %127, %127 : vector<2x4x64xf32>
    %cst_38 = arith.constant dense<0.000000e+00> : vector<2x4xf32>
    %129 = vector.multi_reduction <add>, %128, %cst_38 [2] : vector<2x4x64xf32> to vector<2x4xf32>
    %130 = vector.shape_cast %129 : vector<2x4xf32> to vector<2x4x1xf32>
    %cst_39 = arith.constant 6.400000e+01 : f32
    %131 = vector.broadcast %cst_39 : f32 to vector<2x4x1xf32>
    %132 = arith.divf %130, %131 : vector<2x4x1xf32>
    %cst_40 = arith.constant 9.99999997E-7 : f32
    %133 = vector.broadcast %cst_40 : f32 to vector<2x4x1xf32>
    %134 = arith.addf %132, %133 : vector<2x4x1xf32>
    %135 = math.rsqrt %134 : vector<2x4x1xf32>
    %136 = vector.broadcast %135 : vector<2x4x1xf32> to vector<2x4x64xf32>
    %137 = arith.mulf %127, %136 : vector<2x4x64xf32>
    %138 = vector.shape_cast %137 : vector<2x4x64xf32> to vector<8x64xf32>
    %139 = arith.truncf %138 : vector<8x64xf32> to vector<8x64xbf16>
    %c0_41 = arith.constant 0 : index
    %c0_42 = arith.constant 0 : index
    %140 = vector.load %arg6[%c0_41, %c0_42] : memref<64x256xbf16, #tpu.memory_space<vmem>>, vector<64x256xbf16>
    %cst_43 = arith.constant dense<0.000000e+00> : vector<8x256xf32>
    %141 = tpu.matmul %139, %140, %cst_43 {dimension_numbers = #tpu.dot_dimension_numbers<[1], [0], [0], [1], [0, 0, 1, 1], [], []>} : vector<8x64xbf16>, vector<64x256xbf16>, vector<8x256xf32> -> vector<8x256xf32>
    %c0_44 = arith.constant 0 : index
    %c0_45 = arith.constant 0 : index
    %142 = vector.load %arg7[%c0_44, %c0_45] : memref<1x256xf32, #tpu.memory_space<vmem>>, vector<1x256xf32>
    %143 = vector.broadcast %142 : vector<1x256xf32> to vector<8x256xf32>
    %144 = arith.addf %141, %143 : vector<8x256xf32>
    %cst_46 = arith.constant 5.000000e-01 : f32
    %145 = vector.broadcast %cst_46 : f32 to vector<8x256xf32>
    %146 = arith.mulf %145, %144 : vector<8x256xf32>
    %cst_47 = arith.constant 4.471500e-02 : f32
    %147 = vector.broadcast %cst_47 : f32 to vector<8x256xf32>
    %148 = arith.mulf %147, %144 : vector<8x256xf32>
    %149 = arith.mulf %148, %144 : vector<8x256xf32>
    %150 = arith.mulf %149, %144 : vector<8x256xf32>
    %151 = arith.addf %144, %150 : vector<8x256xf32>
    %cst_48 = arith.constant 0.797884583 : f32
    %152 = vector.broadcast %cst_48 : f32 to vector<8x256xf32>
    %153 = arith.mulf %152, %151 : vector<8x256xf32>
    %154 = math.tanh %153 : vector<8x256xf32>
    %cst_49 = arith.constant 1.000000e+00 : f32
    %155 = vector.broadcast %cst_49 : f32 to vector<8x256xf32>
    %156 = arith.addf %155, %154 : vector<8x256xf32>
    %157 = arith.mulf %146, %156 : vector<8x256xf32>
    %158 = arith.truncf %157 : vector<8x256xf32> to vector<8x256xbf16>
    %c0_50 = arith.constant 0 : index
    %c0_51 = arith.constant 0 : index
    %159 = vector.load %arg8[%c0_50, %c0_51] : memref<256x64xbf16, #tpu.memory_space<vmem>>, vector<256x64xbf16>
    %cst_52 = arith.constant dense<0.000000e+00> : vector<8x64xf32>
    %160 = tpu.matmul %158, %159, %cst_52 {dimension_numbers = #tpu.dot_dimension_numbers<[1], [0], [0], [1], [0, 0, 1, 1], [], []>} : vector<8x256xbf16>, vector<256x64xbf16>, vector<8x64xf32> -> vector<8x64xf32>
    %c0_53 = arith.constant 0 : index
    %c0_54 = arith.constant 0 : index
    %161 = vector.load %arg9[%c0_53, %c0_54] : memref<1x64xf32, #tpu.memory_space<vmem>>, vector<1x64xf32>
    %162 = vector.broadcast %161 : vector<1x64xf32> to vector<8x64xf32>
    %163 = arith.addf %160, %162 : vector<8x64xf32>
    %164 = vector.shape_cast %163 : vector<8x64xf32> to vector<2x4x64xf32>
    %165 = arith.addf %121, %164 : vector<2x4x64xf32>
    %c0_55 = arith.constant 0 : index
    %c0_56 = arith.constant 0 : index
    %c0_57 = arith.constant 0 : index
    %166 = vector.load %arg10[%c0_55, %c0_56, %c0_57] : memref<2x4x64xf32, #tpu.memory_space<vmem>>, vector<2x4x64xf32>
    tpu.vector_store %arg10[%c0_55, %c0_56, %c0_57], %165 {strides = array<i32>} : memref<2x4x64xf32, #tpu.memory_space<vmem>>, vector<2x4x64xf32>,
    return
  }
  func.func @transform_0(%arg0: i32) -> (i32, i32, i32) {
    %c0_i32 = arith.constant 0 : i32
    %c0_i32_0 = arith.constant 0 : i32
    %c0_i32_1 = arith.constant 0 : i32
    return %arg0, %c0_i32, %c0_i32_0 : i32, i32, i32
  }
  func.func @transform_1(%arg0: i32) -> (i32, i32) {
    %c0_i32 = arith.constant 0 : i32
    %c0_i32_0 = arith.constant 0 : i32
    %c0_i32_1 = arith.constant 0 : i32
    return %c0_i32, %c0_i32_0 : i32, i32
  }
  func.func @transform_2(%arg0: i32) -> (i32, i32) {
    %c0_i32 = arith.constant 0 : i32
    %c0_i32_0 = arith.constant 0 : i32
    %c0_i32_1 = arith.constant 0 : i32
    return %c0_i32, %c0_i32_0 : i32, i32
  }
  func.func @transform_3(%arg0: i32) -> (i32, i32) {
    %c0_i32 = arith.constant 0 : i32
    %c0_i32_0 = arith.constant 0 : i32
    %c0_i32_1 = arith.constant 0 : i32
    return %c0_i32, %c0_i32_0 : i32, i32
  }
  func.func @transform_4(%arg0: i32) -> (i32, i32) {
    %c0_i32 = arith.constant 0 : i32
    %c0_i32_0 = arith.constant 0 : i32
    %c0_i32_1 = arith.constant 0 : i32
    return %c0_i32, %c0_i32_0 : i32, i32
  }
  func.func @transform_5(%arg0: i32) -> (i32, i32) {
    %c0_i32 = arith.constant 0 : i32
    %c0_i32_0 = arith.constant 0 : i32
    %c0_i32_1 = arith.constant 0 : i32
    return %c0_i32, %c0_i32_0 : i32, i32
  }
  func.func @transform_6(%arg0: i32) -> (i32, i32) {
    %c0_i32 = arith.constant 0 : i32
    %c0_i32_0 = arith.constant 0 : i32
    %c0_i32_1 = arith.constant 0 : i32
    return %c0_i32, %c0_i32_0 : i32, i32
  }
  func.func @transform_7(%arg0: i32) -> (i32, i32) {
    %c0_i32 = arith.constant 0 : i32
    %c0_i32_0 = arith.constant 0 : i32
    %c0_i32_1 = arith.constant 0 : i32
    return %c0_i32, %c0_i32_0 : i32, i32
  }
  func.func @transform_8(%arg0: i32) -> (i32, i32) {
    %c0_i32 = arith.constant 0 : i32
    %c0_i32_0 = arith.constant 0 : i32
    %c0_i32_1 = arith.constant 0 : i32
    return %c0_i32, %c0_i32_0 : i32, i32
  }
  func.func @transform_9(%arg0: i32) -> (i32, i32, i32) {
    %c0_i32 = arith.constant 0 : i32
    %c0_i32_0 = arith.constant 0 : i32
    %c0_i32_1 = arith.constant 0 : i32
    return %arg0, %c0_i32, %c0_i32_0 : i32, i32, i32
  }
}

module attributes {stable_mosaic.version = 11 : i64} {
  func.func @_tail_kernel(%arg0: i32, %arg1: memref<8x64xf32, #tpu.memory_space<vmem>>, %arg2: memref<8x32xf32, #tpu.memory_space<vmem>>, %arg3: memref<64x34xbf16, #tpu.memory_space<vmem>>, %arg4: memref<1x34xf32, #tpu.memory_space<vmem>>, %arg5: memref<1x32xf32, #tpu.memory_space<vmem>>, %arg6: memref<1x32xf32, #tpu.memory_space<vmem>>, %arg7: memref<32x32xbf16, #tpu.memory_space<vmem>>, %arg8: memref<1x32xf32, #tpu.memory_space<vmem>>, %arg9: memref<32x2xbf16, #tpu.memory_space<vmem>>, %arg10: memref<1x2xf32, #tpu.memory_space<vmem>>, %arg11: memref<8x2xf32, #tpu.memory_space<vmem>>, %arg12: memref<8x32xf32, #tpu.memory_space<vmem>>, %arg13: memref<8x2xf32, #tpu.memory_space<vmem>>) attributes {dimension_semantics = [#tpu.dimension_semantics<parallel>], iteration_bounds = array<i64: 2>, scalar_prefetch = 0 : i64, scratch_operands = 0 : i64, tpu.core_type = #tpu.core_type<tc>, window_params = [{transform_indices = @transform_0, window_bounds = array<i64: 8, 64>}, {transform_indices = @transform_1, window_bounds = array<i64: 8, 32>}, {pipeline_mode = #tpu.pipeline_mode<synchronous>, transform_indices = @transform_2, window_bounds = array<i64: 64, 34>}, {pipeline_mode = #tpu.pipeline_mode<synchronous>, transform_indices = @transform_3, window_bounds = array<i64: 1, 34>}, {pipeline_mode = #tpu.pipeline_mode<synchronous>, transform_indices = @transform_4, window_bounds = array<i64: 1, 32>}, {pipeline_mode = #tpu.pipeline_mode<synchronous>, transform_indices = @transform_5, window_bounds = array<i64: 1, 32>}, {pipeline_mode = #tpu.pipeline_mode<synchronous>, transform_indices = @transform_6, window_bounds = array<i64: 32, 32>}, {pipeline_mode = #tpu.pipeline_mode<synchronous>, transform_indices = @transform_7, window_bounds = array<i64: 1, 32>}, {pipeline_mode = #tpu.pipeline_mode<synchronous>, transform_indices = @transform_8, window_bounds = array<i64: 32, 2>}, {pipeline_mode = #tpu.pipeline_mode<synchronous>, transform_indices = @transform_9, window_bounds = array<i64: 1, 2>}, {transform_indices = @transform_10, window_bounds = array<i64: 8, 2>}, {transform_indices = @transform_11, window_bounds = array<i64: 8, 32>}, {transform_indices = @transform_12, window_bounds = array<i64: 8, 2>}]} {
    %c0 = arith.constant 0 : index
    %c0_0 = arith.constant 0 : index
    %0 = vector.load %arg1[%c0, %c0_0] : memref<8x64xf32, #tpu.memory_space<vmem>>, vector<8x64xf32>
    %1 = arith.truncf %0 : vector<8x64xf32> to vector<8x64xbf16>
    %c0_1 = arith.constant 0 : index
    %c0_2 = arith.constant 0 : index
    %2 = vector.load %arg3[%c0_1, %c0_2] : memref<64x34xbf16, #tpu.memory_space<vmem>>, vector<64x34xbf16>
    %cst = arith.constant dense<0.000000e+00> : vector<8x34xf32>
    %3 = tpu.matmul %1, %2, %cst {dimension_numbers = #tpu.dot_dimension_numbers<[1], [0], [0], [1], [0, 0, 1, 1], [], []>} : vector<8x64xbf16>, vector<64x34xbf16>, vector<8x34xf32> -> vector<8x34xf32>
    %c0_3 = arith.constant 0 : index
    %c0_4 = arith.constant 0 : index
    %4 = vector.load %arg4[%c0_3, %c0_4] : memref<1x34xf32, #tpu.memory_space<vmem>>, vector<1x34xf32>
    %5 = vector.broadcast %4 : vector<1x34xf32> to vector<8x34xf32>
    %6 = arith.addf %3, %5 : vector<8x34xf32>
    %7 = vector.extract_strided_slice %6 {offsets = [0, 0], sizes = [8, 2], strides = [1, 1]} : vector<8x34xf32> to vector<8x2xf32>
    %c0_5 = arith.constant 0 : index
    %c0_6 = arith.constant 0 : index
    %8 = vector.load %arg11[%c0_5, %c0_6] : memref<8x2xf32, #tpu.memory_space<vmem>>, vector<8x2xf32>
    tpu.vector_store %arg11[%c0_5, %c0_6], %7 {strides = array<i32>} : memref<8x2xf32, #tpu.memory_space<vmem>>, vector<8x2xf32>,
    %9 = vector.extract_strided_slice %6 {offsets = [0, 2], sizes = [8, 32], strides = [1, 1]} : vector<8x34xf32> to vector<8x32xf32>
    %cst_7 = arith.constant dense<0.000000e+00> : vector<8xf32>
    %10 = vector.multi_reduction <add>, %9, %cst_7 [1] : vector<8x32xf32> to vector<8xf32>
    %11 = vector.shape_cast %10 : vector<8xf32> to vector<8x1xf32>
    %cst_8 = arith.constant 3.200000e+01 : f32
    %12 = vector.broadcast %cst_8 : f32 to vector<8x1xf32>
    %13 = arith.divf %11, %12 : vector<8x1xf32>
    %14 = vector.broadcast %13 : vector<8x1xf32> to vector<8x32xf32>
    %15 = arith.subf %9, %14 : vector<8x32xf32>
    %16 = arith.mulf %15, %15 : vector<8x32xf32>
    %cst_9 = arith.constant dense<0.000000e+00> : vector<8xf32>
    %17 = vector.multi_reduction <add>, %16, %cst_9 [1] : vector<8x32xf32> to vector<8xf32>
    %18 = vector.shape_cast %17 : vector<8xf32> to vector<8x1xf32>
    %cst_10 = arith.constant 3.200000e+01 : f32
    %19 = vector.broadcast %cst_10 : f32 to vector<8x1xf32>
    %20 = arith.divf %18, %19 : vector<8x1xf32>
    %cst_11 = arith.constant 9.99999974E-6 : f32
    %21 = vector.broadcast %cst_11 : f32 to vector<8x1xf32>
    %22 = arith.addf %20, %21 : vector<8x1xf32>
    %23 = math.rsqrt %22 : vector<8x1xf32>
    %24 = vector.broadcast %23 : vector<8x1xf32> to vector<8x32xf32>
    %25 = arith.mulf %15, %24 : vector<8x32xf32>
    %c0_12 = arith.constant 0 : index
    %c0_13 = arith.constant 0 : index
    %26 = vector.load %arg5[%c0_12, %c0_13] : memref<1x32xf32, #tpu.memory_space<vmem>>, vector<1x32xf32>
    %27 = vector.broadcast %26 : vector<1x32xf32> to vector<8x32xf32>
    %28 = arith.mulf %25, %27 : vector<8x32xf32>
    %c0_14 = arith.constant 0 : index
    %c0_15 = arith.constant 0 : index
    %29 = vector.load %arg6[%c0_14, %c0_15] : memref<1x32xf32, #tpu.memory_space<vmem>>, vector<1x32xf32>
    %30 = vector.broadcast %29 : vector<1x32xf32> to vector<8x32xf32>
    %31 = arith.addf %28, %30 : vector<8x32xf32>
    %32 = arith.truncf %31 : vector<8x32xf32> to vector<8x32xbf16>
    %c0_16 = arith.constant 0 : index
    %c0_17 = arith.constant 0 : index
    %33 = vector.load %arg7[%c0_16, %c0_17] : memref<32x32xbf16, #tpu.memory_space<vmem>>, vector<32x32xbf16>
    %cst_18 = arith.constant dense<0.000000e+00> : vector<8x32xf32>
    %34 = tpu.matmul %32, %33, %cst_18 {dimension_numbers = #tpu.dot_dimension_numbers<[1], [0], [0], [1], [0, 0, 1, 1], [], []>} : vector<8x32xbf16>, vector<32x32xbf16>, vector<8x32xf32> -> vector<8x32xf32>
    %c0_19 = arith.constant 0 : index
    %c0_20 = arith.constant 0 : index
    %35 = vector.load %arg8[%c0_19, %c0_20] : memref<1x32xf32, #tpu.memory_space<vmem>>, vector<1x32xf32>
    %36 = vector.broadcast %35 : vector<1x32xf32> to vector<8x32xf32>
    %37 = arith.addf %34, %36 : vector<8x32xf32>
    %cst_21 = arith.constant 5.000000e-01 : f32
    %38 = vector.broadcast %cst_21 : f32 to vector<8x32xf32>
    %39 = arith.mulf %38, %37 : vector<8x32xf32>
    %cst_22 = arith.constant 0.707106769 : f32
    %40 = vector.broadcast %cst_22 : f32 to vector<8x32xf32>
    %41 = arith.mulf %37, %40 : vector<8x32xf32>
    %cst_23 = arith.constant 0.000000e+00 : f32
    %42 = vector.broadcast %cst_23 : f32 to vector<8x32xf32>
    %43 = arith.cmpf oge, %41, %42 : vector<8x32xf32>
    %cst_24 = arith.constant 1.000000e+00 : f32
    %cst_25 = arith.constant -1.000000e+00 : f32
    %44 = vector.broadcast %cst_24 : f32 to vector<8x32xf32>
    %45 = vector.broadcast %cst_25 : f32 to vector<8x32xf32>
    %46 = arith.select %43, %44, %45 : vector<8x32xi1>, vector<8x32xf32>
    %47 = math.absf %41 : vector<8x32xf32>
    %cst_26 = arith.constant 0.327591091 : f32
    %48 = vector.broadcast %cst_26 : f32 to vector<8x32xf32>
    %49 = arith.mulf %48, %47 : vector<8x32xf32>
    %cst_27 = arith.constant 1.000000e+00 : f32
    %50 = vector.broadcast %cst_27 : f32 to vector<8x32xf32>
    %51 = arith.addf %50, %49 : vector<8x32xf32>
    %cst_28 = arith.constant 1.000000e+00 : f32
    %52 = vector.broadcast %cst_28 : f32 to vector<8x32xf32>
    %53 = arith.divf %52, %51 : vector<8x32xf32>
    %cst_29 = arith.constant 1.06140542 : f32
    %54 = vector.broadcast %cst_29 : f32 to vector<8x32xf32>
    %55 = arith.mulf %54, %53 : vector<8x32xf32>
    %cst_30 = arith.constant -1.45315206 : f32
    %56 = vector.broadcast %cst_30 : f32 to vector<8x32xf32>
    %57 = arith.addf %55, %56 : vector<8x32xf32>
    %58 = arith.mulf %57, %53 : vector<8x32xf32>
    %cst_31 = arith.constant 1.42141378 : f32
    %59 = vector.broadcast %cst_31 : f32 to vector<8x32xf32>
    %60 = arith.addf %58, %59 : vector<8x32xf32>
    %61 = arith.mulf %60, %53 : vector<8x32xf32>
    %cst_32 = arith.constant -0.284496725 : f32
    %62 = vector.broadcast %cst_32 : f32 to vector<8x32xf32>
    %63 = arith.addf %61, %62 : vector<8x32xf32>
    %64 = arith.mulf %63, %53 : vector<8x32xf32>
    %cst_33 = arith.constant 0.254829586 : f32
    %65 = vector.broadcast %cst_33 : f32 to vector<8x32xf32>
    %66 = arith.addf %64, %65 : vector<8x32xf32>
    %67 = arith.mulf %66, %53 : vector<8x32xf32>
    %cst_34 = arith.constant 0.000000e+00 : f32
    %68 = vector.broadcast %cst_34 : f32 to vector<8x32xf32>
    %69 = arith.subf %68, %47 : vector<8x32xf32>
    %70 = arith.mulf %69, %47 : vector<8x32xf32>
    %71 = math.exp %70 : vector<8x32xf32>
    %72 = arith.mulf %67, %71 : vector<8x32xf32>
    %cst_35 = arith.constant 1.000000e+00 : f32
    %73 = vector.broadcast %cst_35 : f32 to vector<8x32xf32>
    %74 = arith.subf %73, %72 : vector<8x32xf32>
    %75 = arith.mulf %46, %74 : vector<8x32xf32>
    %cst_36 = arith.constant 1.000000e+00 : f32
    %76 = vector.broadcast %cst_36 : f32 to vector<8x32xf32>
    %77 = arith.addf %76, %75 : vector<8x32xf32>
    %78 = arith.mulf %39, %77 : vector<8x32xf32>
    %c0_37 = arith.constant 0 : index
    %c0_38 = arith.constant 0 : index
    %79 = vector.load %arg2[%c0_37, %c0_38] : memref<8x32xf32, #tpu.memory_space<vmem>>, vector<8x32xf32>
    %80 = arith.addf %78, %79 : vector<8x32xf32>
    %c0_39 = arith.constant 0 : index
    %c0_40 = arith.constant 0 : index
    %81 = vector.load %arg12[%c0_39, %c0_40] : memref<8x32xf32, #tpu.memory_space<vmem>>, vector<8x32xf32>
    tpu.vector_store %arg12[%c0_39, %c0_40], %80 {strides = array<i32>} : memref<8x32xf32, #tpu.memory_space<vmem>>, vector<8x32xf32>,
    %82 = arith.truncf %80 : vector<8x32xf32> to vector<8x32xbf16>
    %c0_41 = arith.constant 0 : index
    %c0_42 = arith.constant 0 : index
    %83 = vector.load %arg9[%c0_41, %c0_42] : memref<32x2xbf16, #tpu.memory_space<vmem>>, vector<32x2xbf16>
    %cst_43 = arith.constant dense<0.000000e+00> : vector<8x2xf32>
    %84 = tpu.matmul %82, %83, %cst_43 {dimension_numbers = #tpu.dot_dimension_numbers<[1], [0], [0], [1], [0, 0, 1, 1], [], []>} : vector<8x32xbf16>, vector<32x2xbf16>, vector<8x2xf32> -> vector<8x2xf32>
    %c0_44 = arith.constant 0 : index
    %c0_45 = arith.constant 0 : index
    %85 = vector.load %arg10[%c0_44, %c0_45] : memref<1x2xf32, #tpu.memory_space<vmem>>, vector<1x2xf32>
    %86 = vector.broadcast %85 : vector<1x2xf32> to vector<8x2xf32>
    %87 = arith.addf %84, %86 : vector<8x2xf32>
    %88 = arith.negf %87 : vector<8x2xf32>
    %89 = math.exp %88 : vector<8x2xf32>
    %cst_46 = arith.constant 1.000000e+00 : f32
    %90 = vector.broadcast %cst_46 : f32 to vector<8x2xf32>
    %91 = arith.addf %90, %89 : vector<8x2xf32>
    %92 = arith.divf %90, %91 : vector<8x2xf32>
    %c0_47 = arith.constant 0 : index
    %c0_48 = arith.constant 0 : index
    %93 = vector.load %arg13[%c0_47, %c0_48] : memref<8x2xf32, #tpu.memory_space<vmem>>, vector<8x2xf32>
    tpu.vector_store %arg13[%c0_47, %c0_48], %92 {strides = array<i32>} : memref<8x2xf32, #tpu.memory_space<vmem>>, vector<8x2xf32>,
    return
  }
  func.func @transform_0(%arg0: i32) -> (i32, i32) {
    %c0_i32 = arith.constant 0 : i32
    %c0_i32_0 = arith.constant 0 : i32
    return %arg0, %c0_i32 : i32, i32
  }
  func.func @transform_1(%arg0: i32) -> (i32, i32) {
    %c0_i32 = arith.constant 0 : i32
    %c0_i32_0 = arith.constant 0 : i32
    return %arg0, %c0_i32 : i32, i32
  }
  func.func @transform_2(%arg0: i32) -> (i32, i32) {
    %c0_i32 = arith.constant 0 : i32
    %c0_i32_0 = arith.constant 0 : i32
    %c0_i32_1 = arith.constant 0 : i32
    return %c0_i32, %c0_i32_0 : i32, i32
  }
  func.func @transform_3(%arg0: i32) -> (i32, i32) {
    %c0_i32 = arith.constant 0 : i32
    %c0_i32_0 = arith.constant 0 : i32
    %c0_i32_1 = arith.constant 0 : i32
    return %c0_i32, %c0_i32_0 : i32, i32
  }
  func.func @transform_4(%arg0: i32) -> (i32, i32) {
    %c0_i32 = arith.constant 0 : i32
    %c0_i32_0 = arith.constant 0 : i32
    %c0_i32_1 = arith.constant 0 : i32
    return %c0_i32, %c0_i32_0 : i32, i32
  }
  func.func @transform_5(%arg0: i32) -> (i32, i32) {
    %c0_i32 = arith.constant 0 : i32
    %c0_i32_0 = arith.constant 0 : i32
    %c0_i32_1 = arith.constant 0 : i32
    return %c0_i32, %c0_i32_0 : i32, i32
  }
  func.func @transform_6(%arg0: i32) -> (i32, i32) {
    %c0_i32 = arith.constant 0 : i32
    %c0_i32_0 = arith.constant 0 : i32
    %c0_i32_1 = arith.constant 0 : i32
    return %c0_i32, %c0_i32_0 : i32, i32
  }
  func.func @transform_7(%arg0: i32) -> (i32, i32) {
    %c0_i32 = arith.constant 0 : i32
    %c0_i32_0 = arith.constant 0 : i32
    %c0_i32_1 = arith.constant 0 : i32
    return %c0_i32, %c0_i32_0 : i32, i32
  }
  func.func @transform_8(%arg0: i32) -> (i32, i32) {
    %c0_i32 = arith.constant 0 : i32
    %c0_i32_0 = arith.constant 0 : i32
    %c0_i32_1 = arith.constant 0 : i32
    return %c0_i32, %c0_i32_0 : i32, i32
  }
  func.func @transform_9(%arg0: i32) -> (i32, i32) {
    %c0_i32 = arith.constant 0 : i32
    %c0_i32_0 = arith.constant 0 : i32
    %c0_i32_1 = arith.constant 0 : i32
    return %c0_i32, %c0_i32_0 : i32, i32
  }
  func.func @transform_10(%arg0: i32) -> (i32, i32) {
    %c0_i32 = arith.constant 0 : i32
    %c0_i32_0 = arith.constant 0 : i32
    return %arg0, %c0_i32 : i32, i32
  }
  func.func @transform_11(%arg0: i32) -> (i32, i32) {
    %c0_i32 = arith.constant 0 : i32
    %c0_i32_0 = arith.constant 0 : i32
    return %arg0, %c0_i32 : i32, i32
  }
  func.func @transform_12(%arg0: i32) -> (i32, i32) {
    %c0_i32 = arith.constant 0 : i32
    %c0_i32_0 = arith.constant 0 : i32
    return %arg0, %c0_i32 : i32, i32
  }
}

module attributes {stable_mosaic.version = 11 : i64} {
  func.func @_tail_kernel(%arg0: i32, %arg1: memref<8x64xf32, #tpu.memory_space<vmem>>, %arg2: memref<8x32xf32, #tpu.memory_space<vmem>>, %arg3: memref<64x34xbf16, #tpu.memory_space<vmem>>, %arg4: memref<1x34xf32, #tpu.memory_space<vmem>>, %arg5: memref<1x32xf32, #tpu.memory_space<vmem>>, %arg6: memref<1x32xf32, #tpu.memory_space<vmem>>, %arg7: memref<32x32xbf16, #tpu.memory_space<vmem>>, %arg8: memref<1x32xf32, #tpu.memory_space<vmem>>, %arg9: memref<32x2xbf16, #tpu.memory_space<vmem>>, %arg10: memref<1x2xf32, #tpu.memory_space<vmem>>, %arg11: memref<8x2xf32, #tpu.memory_space<vmem>>, %arg12: memref<8x32xf32, #tpu.memory_space<vmem>>, %arg13: memref<8x2xf32, #tpu.memory_space<vmem>>) attributes {dimension_semantics = [#tpu.dimension_semantics<parallel>], iteration_bounds = array<i64: 2>, scalar_prefetch = 0 : i64, scratch_operands = 0 : i64, tpu.core_type = #tpu.core_type<tc>, window_params = [{transform_indices = @transform_0, window_bounds = array<i64: 8, 64>}, {transform_indices = @transform_1, window_bounds = array<i64: 8, 32>}, {pipeline_mode = #tpu.pipeline_mode<synchronous>, transform_indices = @transform_2, window_bounds = array<i64: 64, 34>}, {pipeline_mode = #tpu.pipeline_mode<synchronous>, transform_indices = @transform_3, window_bounds = array<i64: 1, 34>}, {pipeline_mode = #tpu.pipeline_mode<synchronous>, transform_indices = @transform_4, window_bounds = array<i64: 1, 32>}, {pipeline_mode = #tpu.pipeline_mode<synchronous>, transform_indices = @transform_5, window_bounds = array<i64: 1, 32>}, {pipeline_mode = #tpu.pipeline_mode<synchronous>, transform_indices = @transform_6, window_bounds = array<i64: 32, 32>}, {pipeline_mode = #tpu.pipeline_mode<synchronous>, transform_indices = @transform_7, window_bounds = array<i64: 1, 32>}, {pipeline_mode = #tpu.pipeline_mode<synchronous>, transform_indices = @transform_8, window_bounds = array<i64: 32, 2>}, {pipeline_mode = #tpu.pipeline_mode<synchronous>, transform_indices = @transform_9, window_bounds = array<i64: 1, 2>}, {transform_indices = @transform_10, window_bounds = array<i64: 8, 2>}, {transform_indices = @transform_11, window_bounds = array<i64: 8, 32>}, {transform_indices = @transform_12, window_bounds = array<i64: 8, 2>}]} {
    %c0 = arith.constant 0 : index
    %c0_0 = arith.constant 0 : index
    %0 = vector.load %arg1[%c0, %c0_0] : memref<8x64xf32, #tpu.memory_space<vmem>>, vector<8x64xf32>
    %1 = arith.truncf %0 : vector<8x64xf32> to vector<8x64xbf16>
    %c0_1 = arith.constant 0 : index
    %c0_2 = arith.constant 0 : index
    %2 = vector.load %arg3[%c0_1, %c0_2] : memref<64x34xbf16, #tpu.memory_space<vmem>>, vector<64x34xbf16>
    %cst = arith.constant dense<0.000000e+00> : vector<8x34xf32>
    %3 = tpu.matmul %1, %2, %cst {dimension_numbers = #tpu.dot_dimension_numbers<[1], [0], [0], [1], [0, 0, 1, 1], [], []>} : vector<8x64xbf16>, vector<64x34xbf16>, vector<8x34xf32> -> vector<8x34xf32>
    %c0_3 = arith.constant 0 : index
    %c0_4 = arith.constant 0 : index
    %4 = vector.load %arg4[%c0_3, %c0_4] : memref<1x34xf32, #tpu.memory_space<vmem>>, vector<1x34xf32>
    %5 = vector.broadcast %4 : vector<1x34xf32> to vector<8x34xf32>
    %6 = arith.addf %3, %5 : vector<8x34xf32>
    %7 = vector.extract_strided_slice %6 {offsets = [0, 0], sizes = [8, 2], strides = [1, 1]} : vector<8x34xf32> to vector<8x2xf32>
    %c0_5 = arith.constant 0 : index
    %c0_6 = arith.constant 0 : index
    %8 = vector.load %arg11[%c0_5, %c0_6] : memref<8x2xf32, #tpu.memory_space<vmem>>, vector<8x2xf32>
    tpu.vector_store %arg11[%c0_5, %c0_6], %7 {strides = array<i32>} : memref<8x2xf32, #tpu.memory_space<vmem>>, vector<8x2xf32>,
    %9 = vector.extract_strided_slice %6 {offsets = [0, 2], sizes = [8, 32], strides = [1, 1]} : vector<8x34xf32> to vector<8x32xf32>
    %cst_7 = arith.constant dense<0.000000e+00> : vector<8xf32>
    %10 = vector.multi_reduction <add>, %9, %cst_7 [1] : vector<8x32xf32> to vector<8xf32>
    %11 = vector.shape_cast %10 : vector<8xf32> to vector<8x1xf32>
    %cst_8 = arith.constant 3.200000e+01 : f32
    %12 = vector.broadcast %cst_8 : f32 to vector<8x1xf32>
    %13 = arith.divf %11, %12 : vector<8x1xf32>
    %14 = vector.broadcast %13 : vector<8x1xf32> to vector<8x32xf32>
    %15 = arith.subf %9, %14 : vector<8x32xf32>
    %16 = arith.mulf %15, %15 : vector<8x32xf32>
    %cst_9 = arith.constant dense<0.000000e+00> : vector<8xf32>
    %17 = vector.multi_reduction <add>, %16, %cst_9 [1] : vector<8x32xf32> to vector<8xf32>
    %18 = vector.shape_cast %17 : vector<8xf32> to vector<8x1xf32>
    %cst_10 = arith.constant 3.200000e+01 : f32
    %19 = vector.broadcast %cst_10 : f32 to vector<8x1xf32>
    %20 = arith.divf %18, %19 : vector<8x1xf32>
    %cst_11 = arith.constant 9.99999974E-6 : f32
    %21 = vector.broadcast %cst_11 : f32 to vector<8x1xf32>
    %22 = arith.addf %20, %21 : vector<8x1xf32>
    %23 = math.rsqrt %22 : vector<8x1xf32>
    %24 = vector.broadcast %23 : vector<8x1xf32> to vector<8x32xf32>
    %25 = arith.mulf %15, %24 : vector<8x32xf32>
    %c0_12 = arith.constant 0 : index
    %c0_13 = arith.constant 0 : index
    %26 = vector.load %arg5[%c0_12, %c0_13] : memref<1x32xf32, #tpu.memory_space<vmem>>, vector<1x32xf32>
    %27 = vector.broadcast %26 : vector<1x32xf32> to vector<8x32xf32>
    %28 = arith.mulf %25, %27 : vector<8x32xf32>
    %c0_14 = arith.constant 0 : index
    %c0_15 = arith.constant 0 : index
    %29 = vector.load %arg6[%c0_14, %c0_15] : memref<1x32xf32, #tpu.memory_space<vmem>>, vector<1x32xf32>
    %30 = vector.broadcast %29 : vector<1x32xf32> to vector<8x32xf32>
    %31 = arith.addf %28, %30 : vector<8x32xf32>
    %32 = arith.truncf %31 : vector<8x32xf32> to vector<8x32xbf16>
    %c0_16 = arith.constant 0 : index
    %c0_17 = arith.constant 0 : index
    %33 = vector.load %arg7[%c0_16, %c0_17] : memref<32x32xbf16, #tpu.memory_space<vmem>>, vector<32x32xbf16>
    %cst_18 = arith.constant dense<0.000000e+00> : vector<8x32xf32>
    %34 = tpu.matmul %32, %33, %cst_18 {dimension_numbers = #tpu.dot_dimension_numbers<[1], [0], [0], [1], [0, 0, 1, 1], [], []>} : vector<8x32xbf16>, vector<32x32xbf16>, vector<8x32xf32> -> vector<8x32xf32>
    %c0_19 = arith.constant 0 : index
    %c0_20 = arith.constant 0 : index
    %35 = vector.load %arg8[%c0_19, %c0_20] : memref<1x32xf32, #tpu.memory_space<vmem>>, vector<1x32xf32>
    %36 = vector.broadcast %35 : vector<1x32xf32> to vector<8x32xf32>
    %37 = arith.addf %34, %36 : vector<8x32xf32>
    %cst_21 = arith.constant 5.000000e-01 : f32
    %38 = vector.broadcast %cst_21 : f32 to vector<8x32xf32>
    %39 = arith.mulf %38, %37 : vector<8x32xf32>
    %cst_22 = arith.constant 0.707106769 : f32
    %40 = vector.broadcast %cst_22 : f32 to vector<8x32xf32>
    %41 = arith.mulf %37, %40 : vector<8x32xf32>
    %cst_23 = arith.constant 0.000000e+00 : f32
    %42 = vector.broadcast %cst_23 : f32 to vector<8x32xf32>
    %43 = arith.cmpf oge, %41, %42 : vector<8x32xf32>
    %cst_24 = arith.constant 1.000000e+00 : f32
    %cst_25 = arith.constant -1.000000e+00 : f32
    %44 = vector.broadcast %cst_24 : f32 to vector<8x32xf32>
    %45 = vector.broadcast %cst_25 : f32 to vector<8x32xf32>
    %46 = arith.select %43, %44, %45 : vector<8x32xi1>, vector<8x32xf32>
    %47 = math.absf %41 : vector<8x32xf32>
    %cst_26 = arith.constant 0.327591091 : f32
    %48 = vector.broadcast %cst_26 : f32 to vector<8x32xf32>
    %49 = arith.mulf %48, %47 : vector<8x32xf32>
    %cst_27 = arith.constant 1.000000e+00 : f32
    %50 = vector.broadcast %cst_27 : f32 to vector<8x32xf32>
    %51 = arith.addf %50, %49 : vector<8x32xf32>
    %cst_28 = arith.constant 1.000000e+00 : f32
    %52 = vector.broadcast %cst_28 : f32 to vector<8x32xf32>
    %53 = arith.divf %52, %51 : vector<8x32xf32>
    %cst_29 = arith.constant 1.06140542 : f32
    %54 = vector.broadcast %cst_29 : f32 to vector<8x32xf32>
    %55 = arith.mulf %54, %53 : vector<8x32xf32>
    %cst_30 = arith.constant -1.45315206 : f32
    %56 = vector.broadcast %cst_30 : f32 to vector<8x32xf32>
    %57 = arith.addf %55, %56 : vector<8x32xf32>
    %58 = arith.mulf %57, %53 : vector<8x32xf32>
    %cst_31 = arith.constant 1.42141378 : f32
    %59 = vector.broadcast %cst_31 : f32 to vector<8x32xf32>
    %60 = arith.addf %58, %59 : vector<8x32xf32>
    %61 = arith.mulf %60, %53 : vector<8x32xf32>
    %cst_32 = arith.constant -0.284496725 : f32
    %62 = vector.broadcast %cst_32 : f32 to vector<8x32xf32>
    %63 = arith.addf %61, %62 : vector<8x32xf32>
    %64 = arith.mulf %63, %53 : vector<8x32xf32>
    %cst_33 = arith.constant 0.254829586 : f32
    %65 = vector.broadcast %cst_33 : f32 to vector<8x32xf32>
    %66 = arith.addf %64, %65 : vector<8x32xf32>
    %67 = arith.mulf %66, %53 : vector<8x32xf32>
    %cst_34 = arith.constant 0.000000e+00 : f32
    %68 = vector.broadcast %cst_34 : f32 to vector<8x32xf32>
    %69 = arith.subf %68, %47 : vector<8x32xf32>
    %70 = arith.mulf %69, %47 : vector<8x32xf32>
    %71 = math.exp %70 : vector<8x32xf32>
    %72 = arith.mulf %67, %71 : vector<8x32xf32>
    %cst_35 = arith.constant 1.000000e+00 : f32
    %73 = vector.broadcast %cst_35 : f32 to vector<8x32xf32>
    %74 = arith.subf %73, %72 : vector<8x32xf32>
    %75 = arith.mulf %46, %74 : vector<8x32xf32>
    %cst_36 = arith.constant 1.000000e+00 : f32
    %76 = vector.broadcast %cst_36 : f32 to vector<8x32xf32>
    %77 = arith.addf %76, %75 : vector<8x32xf32>
    %78 = arith.mulf %39, %77 : vector<8x32xf32>
    %c0_37 = arith.constant 0 : index
    %c0_38 = arith.constant 0 : index
    %79 = vector.load %arg2[%c0_37, %c0_38] : memref<8x32xf32, #tpu.memory_space<vmem>>, vector<8x32xf32>
    %80 = arith.addf %78, %79 : vector<8x32xf32>
    %c0_39 = arith.constant 0 : index
    %c0_40 = arith.constant 0 : index
    %81 = vector.load %arg12[%c0_39, %c0_40] : memref<8x32xf32, #tpu.memory_space<vmem>>, vector<8x32xf32>
    tpu.vector_store %arg12[%c0_39, %c0_40], %80 {strides = array<i32>} : memref<8x32xf32, #tpu.memory_space<vmem>>, vector<8x32xf32>,
    %82 = arith.truncf %80 : vector<8x32xf32> to vector<8x32xbf16>
    %c0_41 = arith.constant 0 : index
    %c0_42 = arith.constant 0 : index
    %83 = vector.load %arg9[%c0_41, %c0_42] : memref<32x2xbf16, #tpu.memory_space<vmem>>, vector<32x2xbf16>
    %cst_43 = arith.constant dense<0.000000e+00> : vector<8x2xf32>
    %84 = tpu.matmul %82, %83, %cst_43 {dimension_numbers = #tpu.dot_dimension_numbers<[1], [0], [0], [1], [0, 0, 1, 1], [], []>} : vector<8x32xbf16>, vector<32x2xbf16>, vector<8x2xf32> -> vector<8x2xf32>
    %c0_44 = arith.constant 0 : index
    %c0_45 = arith.constant 0 : index
    %85 = vector.load %arg10[%c0_44, %c0_45] : memref<1x2xf32, #tpu.memory_space<vmem>>, vector<1x2xf32>
    %86 = vector.broadcast %85 : vector<1x2xf32> to vector<8x2xf32>
    %87 = arith.addf %84, %86 : vector<8x2xf32>
    %88 = arith.negf %87 : vector<8x2xf32>
    %89 = math.exp %88 : vector<8x2xf32>
    %cst_46 = arith.constant 1.000000e+00 : f32
    %90 = vector.broadcast %cst_46 : f32 to vector<8x2xf32>
    %91 = arith.addf %90, %89 : vector<8x2xf32>
    %92 = arith.divf %90, %91 : vector<8x2xf32>
    %c0_47 = arith.constant 0 : index
    %c0_48 = arith.constant 0 : index
    %93 = vector.load %arg13[%c0_47, %c0_48] : memref<8x2xf32, #tpu.memory_space<vmem>>, vector<8x2xf32>
    tpu.vector_store %arg13[%c0_47, %c0_48], %92 {strides = array<i32>} : memref<8x2xf32, #tpu.memory_space<vmem>>, vector<8x2xf32>,
    return
  }
  func.func @transform_0(%arg0: i32) -> (i32, i32) {
    %c0_i32 = arith.constant 0 : i32
    %c0_i32_0 = arith.constant 0 : i32
    return %arg0, %c0_i32 : i32, i32
  }
  func.func @transform_1(%arg0: i32) -> (i32, i32) {
    %c0_i32 = arith.constant 0 : i32
    %c0_i32_0 = arith.constant 0 : i32
    return %arg0, %c0_i32 : i32, i32
  }
  func.func @transform_2(%arg0: i32) -> (i32, i32) {
    %c0_i32 = arith.constant 0 : i32
    %c0_i32_0 = arith.constant 0 : i32
    %c0_i32_1 = arith.constant 0 : i32
    return %c0_i32, %c0_i32_0 : i32, i32
  }
  func.func @transform_3(%arg0: i32) -> (i32, i32) {
    %c0_i32 = arith.constant 0 : i32
    %c0_i32_0 = arith.constant 0 : i32
    %c0_i32_1 = arith.constant 0 : i32
    return %c0_i32, %c0_i32_0 : i32, i32
  }
  func.func @transform_4(%arg0: i32) -> (i32, i32) {
    %c0_i32 = arith.constant 0 : i32
    %c0_i32_0 = arith.constant 0 : i32
    %c0_i32_1 = arith.constant 0 : i32
    return %c0_i32, %c0_i32_0 : i32, i32
  }
  func.func @transform_5(%arg0: i32) -> (i32, i32) {
    %c0_i32 = arith.constant 0 : i32
    %c0_i32_0 = arith.constant 0 : i32
    %c0_i32_1 = arith.constant 0 : i32
    return %c0_i32, %c0_i32_0 : i32, i32
  }
  func.func @transform_6(%arg0: i32) -> (i32, i32) {
    %c0_i32 = arith.constant 0 : i32
    %c0_i32_0 = arith.constant 0 : i32
    %c0_i32_1 = arith.constant 0 : i32
    return %c0_i32, %c0_i32_0 : i32, i32
  }
  func.func @transform_7(%arg0: i32) -> (i32, i32) {
    %c0_i32 = arith.constant 0 : i32
    %c0_i32_0 = arith.constant 0 : i32
    %c0_i32_1 = arith.constant 0 : i32
    return %c0_i32, %c0_i32_0 : i32, i32
  }
  func.func @transform_8(%arg0: i32) -> (i32, i32) {
    %c0_i32 = arith.constant 0 : i32
    %c0_i32_0 = arith.constant 0 : i32
    %c0_i32_1 = arith.constant 0 : i32
    return %c0_i32, %c0_i32_0 : i32, i32
  }
  func.func @transform_9(%arg0: i32) -> (i32, i32) {
    %c0_i32 = arith.constant 0 : i32
    %c0_i32_0 = arith.constant 0 : i32
    %c0_i32_1 = arith.constant 0 : i32
    return %c0_i32, %c0_i32_0 : i32, i32
  }
  func.func @transform_10(%arg0: i32) -> (i32, i32) {
    %c0_i32 = arith.constant 0 : i32
    %c0_i32_0 = arith.constant 0 : i32
    return %arg0, %c0_i32 : i32, i32
  }
  func.func @transform_11(%arg0: i32) -> (i32, i32) {
    %c0_i32 = arith.constant 0 : i32
    %c0_i32_0 = arith.constant 0 : i32
    return %arg0, %c0_i32 : i32, i32
  }
  func.func @transform_12(%arg0: i32) -> (i32, i32) {
    %c0_i32 = arith.constant 0 : i32
    %c0_i32_0 = arith.constant 0 : i32
    return %arg0, %c0_i32 : i32, i32
  }
}

</mosaic_0001>

<bundles_post_ra>
// kernel: _lambda_.19
= control target key start
LH: loop header
LB: loop body
LE: loop exit
PB: predicated region body
PF: predicated region fallthrough
CT: control target
= control target key end

     0   :  { %s535_s12 = smov 0   ;;  %s537_s13 = smov 0   ;;  %s599_s0 = inlined_call_operand.vmem [shape: f32[4,32,256], index: 0, kind: input, shape index: {}]   ;;  %s600_s1 = inlined_call_operand.vmem [shape: f32[32,1], index: 1, kind: input, shape index: {}]   ;;  %s601_s2 = inlined_call_operand.vmem [shape: f32[32,1], index: 2, kind: input, shape index: {}]   ;;  %s602_s3 = inlined_call_operand.vmem [shape: f32[4,32,256], index: 3, kind: output, shape index: {}]  }
   0x1   :  { %s539_s14 = smov 0  }
   0x2 LB: > { %s25_s15 = sadd.s32 1, %s508_s13  ;;  %p450_p0 = scmp.ge.s32.totalorder %s512_s14, 1  ;;  %s512_s14 = sphi %s539_s14, %s13_s14   ;;  %s508_s13 = sphi %s537_s13, %s604_s13   ;;  %s504_s12 = sphi %s535_s12, %s603_s12  }
   0x3   : > { %p27_p1 = scmp.ge.s32.totalorder %s25_s15, 4  ;;  %p158_p2 = scmp.lt.s32.totalorder %s512_s14, 5 }
   0x5   : > { %s606_s15 = smov (%p27_p1, %s25_s15), 0  ;;  %p159_p3 = pnand %p450_p0, %p158_p2 }
   0x6   : > { %p191_p4 = scmp.lt.s32.totalorder (!%p159_p3), %s504_s12, 3 }
   0x7   : > { %162 = sbr.rel (%p159_p3) target bundleno = 154 (0x9a), region = 32 }
   0xc   : > { %v289_v0 = vld [vmem:[%s600_s1 + $0x10] sm:$0xff]  ;;  %v287_v1 = vld [vmem:[%s600_s1] sm:$0xff]  ;;  %v514_v2 = vmov 0   ;;  %v290_v3 = vld [vmem:[%s600_s1 + $0x18] sm:$0xff]  ;;  %s608_s12 = smov (!%p191_p4, %s504_s12), 3 }
   0xd   : > { %485 = vset.pattern.permute.xlu1 %v514_v2  ;;  %484 = vset.pattern.permute.xlu0 %v514_v2  ;;  %v288_v4 = vld [vmem:[%s600_s1 + $0x8] sm:$0xff]  ;;  %v319_v6 = vld [vmem:[%s601_s2] sm:$0xff]  ;;  %s457_s28 = sshll.u32 %s608_s12, 6  ;;  %v322_v7 = vld [vmem:[%s601_s2 + $0x18] sm:$0xff] }
   0xe   : > { %303 = vperm.xlu1 %485, %v289_v0   ;;  %293 = vperm.xlu0 %484, %v287_v1   ;;  %v320_v5 = vld [vmem:[%s601_s2 + $0x8] sm:$0xff]  ;;  %v321_v8 = vld [vmem:[%s601_s2 + $0x10] sm:$0xff]  ;;  %s198_s8 = scalar_lea.vmem %s599_s0, %s457_s28  ;;  %s208_s11 = scalar_lea.vmem %s602_s3, %s457_s28 }
   0xf   : > { %v210_v9 = vld [vmem:[%s198_s8] sm:$0xff]  ;;  %v212_v10 = vld [vmem:[%s198_s8 + $0x10] sm:$0xff]  ;;  %v211_v11 = vld [vmem:[%s198_s8 + $0x8] sm:$0xff] }
  0x10   : > { %v213_v12 = vld [vmem:[%s198_s8 + $0x18] sm:$0xff]  ;;  %v218_v13 = vadd.f32 %v212_v10, %v210_v9  ;;  %v214_v14 = vld [vmem:[%s198_s8 + $0x20] sm:$0xff]  ;;  %v215_v16 = vld [vmem:[%s198_s8 + $0x28] sm:$0xff] }
  0x11   : > { %v227_v15 = vadd.f32 %v213_v12, %v211_v11  ;;  %v216_v18 = vld [vmem:[%s198_s8 + $0x30] sm:$0xff]  ;;  %v217_v20 = vld [vmem:[%s198_s8 + $0x38] sm:$0xff] }
  0x12   : > { %308 = vperm.xlu1 %485, %v290_v3   ;;  %298 = vperm.xlu0 %484, %v288_v4   ;;  %v219_v17 = vadd.f32 %v218_v13, %v214_v14 }
  0x13   : > { %v228_v19 = vadd.f32 %v227_v15, %v215_v16 }
  0x14   : > { %v220_v21 = vadd.f32 %v219_v17, %v216_v18 }
  0x15   : > { %v229_v22 = vadd.f32 %v228_v19, %v217_v20 }
  0x16   : > { %330 = vperm.xlu1 %485, %v320_v5   ;;  %325 = vperm.xlu0 %484, %v319_v6   ;;  %v221_v23 = vrot.slane %v220_v21, 4 }
  0x17   : > { %v230_v24 = vrot.slane %v229_v22, 4 }
  0x18   : > { %v222_v25 = vadd.f32 %v221_v23, %v220_v21 }
  0x19   : > { %v231_v26 = vadd.f32 %v230_v24, %v229_v22 }
  0x1a   : > { %340 = vperm.xlu1 %485, %v322_v7   ;;  %335 = vperm.xlu0 %484, %v321_v8   ;;  %v223_v27 = vrot.slane %v222_v25, 2 }
  0x1b   : > { %v232_v28 = vrot.slane %v231_v26, 2 }
  0x1c   : > { %v224_v29 = vadd.f32 %v223_v27, %v222_v25 }
  0x1d   : > { %v233_v30 = vadd.f32 %v232_v28, %v231_v26 }
  0x1e   : > { %v225_v31 = vrot.slane %v224_v29, 1 }
  0x1f   : > { %v234_v32 = vrot.slane %v233_v30, 1 }
  0x20   : > { %v226_v33 = vadd.f32 %v225_v31, %v224_v29 }
  0x21   : > { %v235_v34 = vadd.f32 %v234_v32, %v233_v30 }
  0x22   : > { %v237_v35 = vmul.f32 0.03125, %v226_v33 }
  0x23   : > { %v238_v36 = vmul.f32 0.03125, %v235_v34 }
  0x24   : > { %v239_v37 = vsub.f32 %v210_v9, %v237_v35  ;;  %v241_v38 = vsub.f32 %v212_v10, %v237_v35  ;;  %v243_v41 = vsub.f32 %v214_v14, %v237_v35  ;;  %v245_v47 = vsub.f32 %v216_v18, %v237_v35 }
  0x25   : > { %v240_v39 = vsub.f32 %v211_v11, %v238_v36  ;;  %v242_v40 = vsub.f32 %v213_v12, %v238_v36  ;;  %v244_v44 = vsub.f32 %v215_v16, %v238_v36  ;;  %v246_v50 = vsub.f32 %v217_v20, %v238_v36 }
  0x26   : > { %v247_v42 = vmul.f32 %v239_v37, %v239_v37  ;;  %v249_v43 = vmul.f32 %v241_v38, %v241_v38  ;;  %v251_v48 = vmul.f32 %v243_v41, %v243_v41  ;;  %v253_v53 = vmul.f32 %v245_v47, %v245_v47 }
  0x27   : > { %v248_v45 = vmul.f32 %v240_v39, %v240_v39  ;;  %v250_v46 = vmul.f32 %v242_v40, %v242_v40  ;;  %v252_v51 = vmul.f32 %v244_v44, %v244_v44  ;;  %v254_v55 = vmul.f32 %v246_v50, %v246_v50 }
  0x28   : > { %v255_v49 = vadd.f32 %v249_v43, %v247_v42 }
  0x29   : > { %v264_v52 = vadd.f32 %v250_v46, %v248_v45 }
  0x2a   : > { %v256_v54 = vadd.f32 %v255_v49, %v251_v48 }
  0x2b   : > { %v265_v56 = vadd.f32 %v264_v52, %v252_v51 }
  0x2c   : > { %v257_v57 = vadd.f32 %v256_v54, %v253_v53 }
  0x2d   : > { %v266_v58 = vadd.f32 %v265_v56, %v254_v55 }
  0x2e   : > { %v258_v59 = vrot.slane %v257_v57, 4 }
  0x2f   : > { %v267_v60 = vrot.slane %v266_v58, 4 }
  0x30   : > { %v259_v61 = vadd.f32 %v258_v59, %v257_v57 }
  0x31   : > { %v268_v62 = vadd.f32 %v267_v60, %v266_v58 }
  0x32   : > { %v260_v63 = vrot.slane %v259_v61, 2 }
  0x33   : > { %v269_v0 = vrot.slane %v268_v62, 2 }
  0x34   : > { %v261_v1 = vadd.f32 %v260_v63, %v259_v61 }
  0x35   : > { %v270_v2 = vadd.f32 %v269_v0, %v268_v62 }
  0x36   : > { %v262_v3 = vrot.slane %v261_v1, 1 }
  0x37   : > { %v271_v4 = vrot.slane %v270_v2, 1 }
  0x38   : > { %v263_v5 = vadd.f32 %v262_v3, %v261_v1 }
  0x39   : > { %v272_v6 = vadd.f32 %v271_v4, %v270_v2 }
  0x3a   : > { %v273_v7 = vmul.f32 0.03125, %v263_v5 }
  0x3b   : > { %v274_v8 = vmul.f32 0.03125, %v272_v6 }
  0x3c   : > { %v275_v9 = vadd.f32 1e-05, %v273_v7 }
  0x3d   : > { %v276_v10 = vadd.f32 1e-05, %v274_v8 }
  0x3e   : > { %486 = vrsqrt.f32 %v275_v9 }
  0x3f   : > { %488 = vrsqrt.f32 %v276_v10 }
  0x4b   : > { %v487_v11 = vpop.eup %486 }
  0x4c   : > { %v489_v12 = vpop.eup %488  ;;  %v279_v15 = vmul.f32 %v487_v11, %v239_v37  ;;  %v281_v17 = vmul.f32 %v487_v11, %v241_v38  ;;  %v283_v21 = vmul.f32 %v487_v11, %v243_v41  ;;  %v285_v23 = vmul.f32 %v487_v11, %v245_v47 }
  0x4d   : > { %v280_v16 = vmul.f32 %v489_v12, %v240_v39  ;;  %v282_v18 = vmul.f32 %v489_v12, %v242_v40  ;;  %v284_v22 = vmul.f32 %v489_v12, %v244_v44  ;;  %v286_v24 = vmul.f32 %v489_v12, %v246_v50 }
  0x89   : > { %v304_v13 = vpop.permute.xlu1 %303  ;;  %v294_v14 = vpop.permute.xlu0 %293 }
  0x8a   : > { %v311_v25 = vmul.f32 %v294_v14, %v279_v15  ;;  %v312_v26 = vmul.f32 %v294_v14, %v280_v16  ;;  %v315_v35 = vmul.f32 %v304_v13, %v283_v21  ;;  %v316_v36 = vmul.f32 %v304_v13, %v284_v22 }
  0x8d   : > { %v309_v19 = vpop.permute.xlu1 %308  ;;  %v299_v20 = vpop.permute.xlu0 %298 }
  0x8e   : > { %v313_v27 = vmul.f32 %v299_v20, %v281_v17  ;;  %v314_v28 = vmul.f32 %v299_v20, %v282_v18  ;;  %v317_v37 = vmul.f32 %v309_v19, %v285_v23  ;;  %v318_v38 = vmul.f32 %v309_v19, %v286_v24 }
  0x91   : > { %v331_v29 = vpop.permute.xlu1 %330  ;;  %v326_v30 = vpop.permute.xlu0 %325 }
  0x92   : > { %v345_v31 = vadd.f32 %v331_v29, %v313_v27  ;;  %v346_v32 = vadd.f32 %v331_v29, %v314_v28  ;;  %v343_v33 = vadd.f32 %v326_v30, %v311_v25  ;;  %v344_v34 = vadd.f32 %v326_v30, %v312_v26 }
  0x94   : > { %353 = vst [vmem:[%s208_s11 + $0x10] sm:$0xff] %v345_v31  ;;  %354 = vst [vmem:[%s208_s11 + $0x18] sm:$0xff] %v346_v32 }
  0x95   : > { %351 = vst [vmem:[%s208_s11] sm:$0xff] %v343_v33  ;;  %352 = vst [vmem:[%s208_s11 + $0x8] sm:$0xff] %v344_v34  ;;  %v341_v39 = vpop.permute.xlu1 %340  ;;  %v336_v40 = vpop.permute.xlu0 %335 }
  0x96   : > { %v349_v41 = vadd.f32 %v341_v39, %v317_v37  ;;  %v350_v42 = vadd.f32 %v341_v39, %v318_v38  ;;  %v347_v43 = vadd.f32 %v336_v40, %v315_v35  ;;  %v348_v44 = vadd.f32 %v336_v40, %v316_v36 }
  0x98   : > { %357 = vst [vmem:[%s208_s11 + $0x30] sm:$0xff] %v349_v41  ;;  %358 = vst [vmem:[%s208_s11 + $0x38] sm:$0xff] %v350_v42 }
  0x99   : > { %355 = vst [vmem:[%s208_s11 + $0x20] sm:$0xff] %v347_v43  ;;  %356 = vst [vmem:[%s208_s11 + $0x28] sm:$0xff] %v348_v44 }
  0x9a PF: > { %s13_s14 = sadd.s32 1, %s512_s14   ;;  %s603_s12 = smov %s508_s13 }
  0x9b   : > { %p10_p5 = scmp.ge.s32.totalorder %s13_s14, 6   ;;  %s604_s13 = smov %s606_s15 }
  0x9d   :  { %12 = sbr.rel (!%p10_p5) target bundleno = 2 (0x2), region = 62 }

// kernel: _lambda_.21
= control target key start
LH: loop header
LB: loop body
LE: loop exit
PB: predicated region body
PF: predicated region fallthrough
CT: control target
= control target key end

     0   :  { %s511_s9 = smov 0   ;;  %s513_s10 = smov 0   ;;  %s551_s0 = inlined_call_operand.vmem [shape: f32[4,4,32], index: 0, kind: input, shape index: {}]   ;;  %s552_s1 = inlined_call_operand.vmem [shape: f32[4,32,64], index: 1, kind: input, shape index: {}]   ;;  %s553_s2 = inlined_call_operand.vmem [shape: f32[4,4,64], index: 2, kind: output, shape index: {}]  }
   0x1   :  { %s515_s11 = smov 0  }
   0x2 LB: > { %s24_s12 = sadd.s32 1, %s488_s10  ;;  %p409_p0 = scmp.ge.s32.totalorder %s492_s11, 1  ;;  %s492_s11 = sphi %s515_s11, %s12_s11   ;;  %s488_s10 = sphi %s513_s10, %s555_s10   ;;  %s484_s9 = sphi %s511_s9, %s554_s9  }
   0x3   : > { %p26_p1 = scmp.ge.s32.totalorder %s24_s12, 2  ;;  %p144_p2 = scmp.lt.s32.totalorder %s492_s11, 3 }
   0x5   : > { %s557_s12 = smov (%p26_p1, %s24_s12), 0  ;;  %p145_p3 = pnand %p409_p0, %p144_p2 }
   0x6   : > { %s410_s13 = sshll.u32 (!%p145_p3), %s484_s9, 1 }
   0x7   : > { %148 = sbr.rel (%p145_p3) target bundleno = 225 (0xe1), region = 28  ;;  %p179_p4 = scmp.lt.s32.totalorder (!%p145_p3), %s410_s13, 3 }
   0xc   : > { %v494_v0 = vmov 0.0   ;;  %vm495_vm0 = vmmov 0   ;;  %s559_s13 = smov (!%p179_p4, %s410_s13), 3  ;;  %vm220_vm1 = vcmask 261120   ;;  %vm309_vm2 = vcmask 519168  }
   0xd   : > { %428 = vmatprep.subr.bf16.mxu0 %v494_v0  ;;  %436 = vmatprep.subr.bf16.mxu1 %v494_v0  ;;  %s421_s14 = sshll.u32 %s559_s13, 5  ;;  %s411_s15 = sshll.u32 %s559_s13, 2 }
   0xe   : > { %432 = vmatprep.mubr.msk.bf16.mxu0 %vm495_vm0, %v494_v0  ;;  %440 = vmatprep.mubr.msk.bf16.mxu1 %vm495_vm0, %v494_v0  ;;  %s192_s18 = scalar_lea.vmem %s552_s1, %s421_s14  ;;  %s182_s21 = scalar_lea.vmem %s551_s0, %s411_s15 }
   0xf   : > { %v210_v1 = vld [vmem:[%s192_s18 + $0x10] sm:$0xff]  ;;  %v211_v2 = vld [vmem:[%s192_s18 + $0x18] sm:$0xff]  ;;  %v208_v6 = vld [vmem:[%s192_s18] sm:$0xff]  ;;  %s201_s24 = scalar_lea.vmem %s553_s2, %s411_s15 }
  0x10   : > { %v214_v3 = vld [vmem:[%s192_s18 + $0x30] sm:$0xff]  ;;  %v217_v4 = vpack.c.bf16 %v211_v2, %v210_v1  ;;  %v215_v5 = vld [vmem:[%s192_s18 + $0x38] sm:$0xff]  ;;  %v209_v7 = vld [vmem:[%s192_s18 + $0x8] sm:$0xff] }
  0x11   : > { %v219_v8 = vpack.c.bf16 %v215_v5, %v214_v3  ;;  %v212_v9 = vld [vmem:[%s192_s18 + $0x20] sm:$0xff]  ;;  %v213_v10 = vld [vmem:[%s192_s18 + $0x28] sm:$0xff]  ;;  %v216_v11 = vpack.c.bf16 %v209_v7, %v208_v6 }
  0x12   : > { %429 = vmatpush3.bf16.msra.mxu0 %v217_v4  ;;  %v204_v12 = vld [vmem:[%s182_s21] sm:$0xf]  ;;  %v218_v13 = vpack.c.bf16 %v213_v10, %v212_v9  ;;  %v205_v14 = vld [vmem:[%s182_s21 + $0x4] sm:$0xf] }
  0x13   : > { %437 = vmatpush3.bf16.msra.mxu1 %v219_v8  ;;  %430 = vmatprep.subr.bf16.mxu0 %v494_v0  ;;  %v206_v15 = vpack.c.bf16 %v204_v12, %v204_v12  ;;  %v207_v16 = vpack.c.bf16 %v205_v14, %v205_v14 }
  0x14   : > { %438 = vmatprep.subr.bf16.mxu1 %v494_v0 }
  0x16   : > { %431 = vmatpush3.bf16.msra.mxu0 %v216_v11 }
  0x17   : > { %439 = vmatpush3.bf16.msra.mxu1 %v218_v13 }
  0x19   : > { %433 = vmatmul.mubr.msk.bf16.vlgmr.msra.gmra.mxu0 %vm220_vm1, %v206_v15 }
  0x1a   : > { %441 = vmatmul.mubr.msk.bf16.vlgmr.msra.gmra.mxu1 %vm220_vm1, %v207_v16 }
  0xd9   : > { %v258_v17 = vpop.f32.mrf.mxu0 }
  0xda   : > { %v307_v18 = vmul.f32 0.17677669, %v258_v17  ;;  %v301_v19 = vpop.f32.mrf.mxu1 }
  0xdb   : > { %v308_v20 = vmul.f32 0.17677669, %v301_v19  ;;  %v434_v21 = vpop.f32.mrf.mxu0 }
  0xdc   : > { %310 = vst.msk [vmem:[%s201_s24] sm:$0xf] %vm309_vm2, %v307_v18  ;;  %v442_v22 = vpop.f32.mrf.mxu1 }
  0xdd   : > { %311 = vst.msk [vmem:[%s201_s24 + $0x4] sm:$0xf] %vm309_vm2, %v308_v20  ;;  %v261_v23 = vpop.f32.mrf.mxu0 }
  0xde   : > { %v304_v24 = vpop.f32.mrf.mxu1 }
  0xdf   : > { %v435_v25 = vpop.f32.mrf.mxu0 }
  0xe0   : > { %v443_v26 = vpop.f32.mrf.mxu1 }
  0xe1 PF: > { %s12_s11 = sadd.s32 1, %s492_s11   ;;  %s554_s9 = smov %s488_s10 }
  0xe2   : > { %p9_p5 = scmp.ge.s32.totalorder %s12_s11, 4   ;;  %s555_s10 = smov %s557_s12 }
  0xe4   :  { %11 = sbr.rel (!%p9_p5) target bundleno = 2 (0x2), region = 61 }

// kernel: _lambda_.20
= control target key start
LH: loop header
LB: loop body
LE: loop exit
PB: predicated region body
PF: predicated region fallthrough
CT: control target
= control target key end

     0   :  { %s531_s9 = smov 0   ;;  %s533_s10 = smov 0   ;;  %s572_s0 = inlined_call_operand.vmem [shape: f32[4,4,32], index: 0, kind: input, shape index: {}]   ;;  %s573_s1 = inlined_call_operand.vmem [shape: f32[4,32,256], index: 1, kind: input, shape index: {}]   ;;  %s574_s2 = inlined_call_operand.vmem [shape: f32[4,4,256], index: 2, kind: output, shape index: {}]  }
   0x1   :  { %s535_s11 = smov 0  }
   0x2 LB: > { %s24_s12 = sadd.s32 1, %s509_s10  ;;  %p451_p0 = scmp.ge.s32.totalorder %s513_s11, 1  ;;  %s513_s11 = sphi %s535_s11, %s12_s11   ;;  %s509_s10 = sphi %s533_s10, %s576_s10   ;;  %s505_s9 = sphi %s531_s9, %s575_s9  }
   0x3   : > { %p26_p1 = scmp.ge.s32.totalorder %s24_s12, 2  ;;  %p146_p2 = scmp.lt.s32.totalorder %s513_s11, 3 }
   0x5   : > { %s578_s12 = smov (%p26_p1, %s24_s12), 0  ;;  %p147_p3 = pnand %p451_p0, %p146_p2 }
   0x6   : > { %s452_s13 = sshll.u32 (!%p147_p3), %s505_s9, 1 }
   0x7   : > { %150 = sbr.rel (%p147_p3) target bundleno = 227 (0xe3), region = 28  ;;  %p184_p4 = scmp.lt.s32.totalorder (!%p147_p3), %s452_s13, 3 }
   0xc   : > { %v515_v0 = vmov 0   ;;  %s580_s13 = smov (!%p184_p4, %s452_s13), 3  ;;  %vm242_vm0 = vcmask 261120  }
   0xd   : > { %278 = vmatprep.mubr.bf16.mxu0 %v515_v0  ;;  %322 = vmatprep.mubr.bf16.mxu1 %v515_v0  ;;  %s464_s14 = sshll.u32 %s580_s13, 6  ;;  %s453_s18 = sshll.u32 %s580_s13, 2 }
   0xe   : > { %s198_s17 = scalar_lea.vmem %s573_s1, %s464_s14  ;;  %s187_s21 = scalar_lea.vmem %s572_s0, %s453_s18 }
   0xf   : > { %v223_v1 = vld [vmem:[%s198_s17 + $0x28] sm:$0xff]  ;;  %v225_v2 = vld [vmem:[%s198_s17 + $0x38] sm:$0xff]  ;;  %v222_v6 = vld [vmem:[%s198_s17 + $0x20] sm:$0xff]  ;;  %s465_s22 = sshll.u32 %s580_s13, 3 }
  0x10   : > { %v231_v3 = vld [vmem:[%s198_s17 + $0x68] sm:$0xff]  ;;  %v237_v4 = vpack.c.bf16 %v225_v2, %v223_v1  ;;  %v233_v5 = vld [vmem:[%s198_s17 + $0x78] sm:$0xff]  ;;  %v224_v7 = vld [vmem:[%s198_s17 + $0x30] sm:$0xff]  ;;  %s210_s25 = scalar_lea.vmem %s574_s2, %s465_s22 }
  0x11   : > { %v241_v8 = vpack.c.bf16 %v233_v5, %v231_v3  ;;  %v236_v9 = vpack.c.bf16 %v224_v7, %v222_v6  ;;  %v230_v10 = vld [vmem:[%s198_s17 + $0x60] sm:$0xff]  ;;  %v232_v11 = vld [vmem:[%s198_s17 + $0x70] sm:$0xff]  ;;  %v219_v12 = vld [vmem:[%s198_s17 + $0x8] sm:$0xff] }
  0x12   : > { %258 = vmatprep.subr.bf16.mxu0 %v237_v4  ;;  %v240_v13 = vpack.c.bf16 %v232_v11, %v230_v10  ;;  %v221_v14 = vld [vmem:[%s198_s17 + $0x18] sm:$0xff]  ;;  %v227_v15 = vld [vmem:[%s198_s17 + $0x48] sm:$0xff]  ;;  %v218_v19 = vld [vmem:[%s198_s17] sm:$0xff] }
  0x13   : > { %v229_v16 = vld [vmem:[%s198_s17 + $0x58] sm:$0xff]  ;;  %302 = vmatprep.subr.bf16.mxu1 %v241_v8  ;;  %259 = vmatpush1.bf16.msra.mxu0 %v236_v9  ;;  %v235_v17 = vpack.c.bf16 %v221_v14, %v219_v12  ;;  %v220_v20 = vld [vmem:[%s198_s17 + $0x10] sm:$0xff]  ;;  %v226_v21 = vld [vmem:[%s198_s17 + $0x40] sm:$0xff] }
  0x14   : > { %v239_v18 = vpack.c.bf16 %v229_v16, %v227_v15  ;;  %303 = vmatpush1.bf16.msra.mxu1 %v240_v13  ;;  %v234_v22 = vpack.c.bf16 %v220_v20, %v218_v19  ;;  %v228_v23 = vld [vmem:[%s198_s17 + $0x50] sm:$0xff]  ;;  %v214_v24 = vld [vmem:[%s187_s21] sm:$0xf]  ;;  %v215_v25 = vld [vmem:[%s187_s21 + $0x4] sm:$0xf] }
  0x15   : > { %260 = vmatprep.subr.bf16.mxu0 %v235_v17  ;;  %v238_v26 = vpack.c.bf16 %v228_v23, %v226_v21  ;;  %v216_v27 = vpack.c.bf16 %v214_v24, %v214_v24  ;;  %v217_v28 = vpack.c.bf16 %v215_v25, %v215_v25 }
  0x16   : > { %304 = vmatprep.subr.bf16.mxu1 %v239_v18 }
  0x17   : > { %261 = vmatpush1.bf16.msra.mxu0 %v234_v22 }
  0x18   : > { %305 = vmatpush1.bf16.msra.mxu1 %v238_v26 }
  0x1a   : > { %460 = vmatmul.mubr.msk.bf16.vlgmr.msra.gmra.mxu0 %vm242_vm0, %v216_v27 }
  0x1b   : > { %461 = vmatmul.mubr.msk.bf16.vlgmr.msra.gmra.mxu1 %vm242_vm0, %v217_v28 }
  0xda   : > { %v280_v29 = vpop.f32.mrf.mxu0 }
  0xdb   : > { %v324_v30 = vpop.f32.mrf.mxu1  ;;  %v331_v33 = vmul.f32 0.17677669, %v280_v29 }
  0xdc   : > { %v333_v31 = vmul.f32 0.17677669, %v324_v30  ;;  %v282_v32 = vpop.f32.mrf.mxu0 }
  0xdd   : > { %v332_v34 = vmul.f32 0.17677669, %v282_v32  ;;  %v326_v35 = vpop.f32.mrf.mxu1 }
  0xde   : > { %v334_v36 = vmul.f32 0.17677669, %v326_v35  ;;  %v284_v37 = vpop.f32.mrf.mxu0 }
  0xdf   : > { %v339_v38 = vcombine.low %v331_v33, %v332_v34  ;;  %v328_v39 = vpop.f32.mrf.mxu1 }
  0xe0   : > { %v340_v40 = vcombine.low %v333_v31, %v334_v36  ;;  %v285_v41 = vpop.f32.mrf.mxu0 }
  0xe1   : > { %343 = vst [vmem:[%s210_s25] sm:$0xff] %v339_v38  ;;  %v329_v42 = vpop.f32.mrf.mxu1 }
  0xe2   : > { %344 = vst [vmem:[%s210_s25 + $0x8] sm:$0xff] %v340_v40 }
  0xe3 PF: > { %s12_s11 = sadd.s32 1, %s513_s11   ;;  %s575_s9 = smov %s509_s10 }
  0xe4   : > { %p9_p5 = scmp.ge.s32.totalorder %s12_s11, 4   ;;  %s576_s10 = smov %s578_s12 }
  0xe6   :  { %11 = sbr.rel (!%p9_p5) target bundleno = 2 (0x2), region = 61 }

// kernel: _lambda_.22
= control target key start
LH: loop header
LB: loop body
LE: loop exit
PB: predicated region body
PF: predicated region fallthrough
CT: control target
= control target key end

     0   :  { %s565_s18 = smov 0   ;;  %s613_s0 = inlined_call_operand.vmem [shape: f32[16,18], index: 0, kind: input, shape index: {}]   ;;  %s614_s1 = inlined_call_operand.vmem [shape: bf16[18,64], index: 1, kind: input, shape index: {}]   ;;  %s615_s2 = inlined_call_operand.vmem [shape: f32[1,64], index: 2, kind: input, shape index: {}]   ;;  %s616_s3 = inlined_call_operand.vmem [shape: bf16[64,32], index: 3, kind: input, shape index: {}]   ;;  %s617_s4 = inlined_call_operand.vmem [shape: f32[1,32], index: 4, kind: input, shape index: {}]   ;;  %s618_s5 = inlined_call_operand.vmem [shape: f32[16,32], index: 5, kind: output, shape index: {}]  }
   0x1 LB: > { %s456_s19 = sadd.s32 4294967295, %s530_s18   ;;  %p460_p0 = scmp.ge.s32.totalorder %s530_s18, 1  ;;  %s530_s18 = sphi %s565_s18, %s15_s18  }
   0x2   : > { %p186_p1 = scmp.lt.s32.totalorder %s530_s18, 3 }
   0x4   : > { %p187_p2 = pnand %p460_p0, %p186_p1 }
   0x5   : > { %p212_p3 = scmp.lt.s32.totalorder (!%p187_p2), %s456_s19, 1 }
   0x6   : > { %190 = sbr.rel (%p187_p2) target bundleno = 466 (0x1d2), region = 40 }
   0xb   : > { %v514_v0 = vld [vmem:[%s614_s1 + $0x8] ss:$0 sps:$4 sm:$0x11]   ;;  %v532_v1 = vmov 0.0   ;;  %vm246_vm0 = vcmask 1040384   ;;  %v515_v3 = vld [vmem:[%s614_s1] sm:$0xff]  }
   0xc   : > { %483 = vmatprep.subr.bf16.mxu0 %v532_v1  ;;  %491 = vmatprep.subr.bf16.mxu1 %v532_v1  ;;  %v248_v2 = vsel %vm246_vm0, %v514_v0, 0  ;;  %vm533_vm1 = vmmov 0   ;;  %s620_s19 = smov (!%p212_p3, %s456_s19), 1  ;;  %vm242_vm2 = vcmask 146432   ;;  %v516_v6 = vld [vmem:[%s616_s3 + $0x18] sm:$0xff]   ;;  %v517_v7 = vld [vmem:[%s616_s3 + $0x10] sm:$0xff]  }
   0xd   : > { %484 = vmatpush3.bf16.msra.mxu0 %v248_v2  ;;  %487 = vmatprep.mubr.msk.bf16.mxu0 %vm533_vm1, %v532_v1  ;;  %s461_s24 = sshll.u32 %s620_s19, 3  ;;  %v518_v8 = vld [vmem:[%s616_s3 + $0x8] sm:$0xff]   ;;  %v519_v9 = vld [vmem:[%s616_s3] sm:$0xff]   ;;  %v534_v36 = vmov -1.0   ;;  %vm357_vm4 = vcmask 523264   ;;  %vm401_vm5 = vcmask 261120  }
   0xe   : > { %485 = vmatprep.subr.bf16.mxu0 %v532_v1  ;;  %499 = vmatprep.mubr.msk.bf16.mxu1 %vm533_vm1, %v532_v1  ;;  %s215_s27 = scalar_lea.vmem %s613_s0, %s461_s24  ;;  %v463_v10 = vld [vmem:[%s615_s2] ss:$0 sm:$0xff]  ;;  %s219_s17 = scalar_lea.vmem %s618_s5, %s461_s24 }
   0xf   : > { %v221_v4 = vld [vmem:[%s215_s27] sm:$0xff]  ;;  %492 = vmatpush3.bf16.msra.mxu1 %v516_v6 }
  0x10   : > { %v222_v5 = vpack.c.bf16 %v221_v4, %v221_v4  ;;  %493 = vmatprep.subr.bf16.mxu1 %v532_v1  ;;  %v467_v43 = vld [vmem:[%s617_s4] ss:$0 sm:$0xff] }
  0x11   : > { %486 = vmatpush3.bf16.msra.mxu0 %v515_v3 }
  0x13   : > { %494 = vmatpush3.bf16.msra.mxu1 %v517_v7 }
  0x14   : > { %488 = vmatmul.mubr.msk.bf16.vlgmr.msra.gmra.mxu0 %vm242_vm2, %v222_v5  ;;  %495 = vmatprep.subr.bf16.mxu1 %v532_v1 }
  0x17   : > { %496 = vmatpush3.bf16.msra.mxu1 %v518_v8 }
  0x18   : > { %497 = vmatprep.subr.bf16.mxu1 %v532_v1 }
  0x1b   : > { %498 = vmatpush3.bf16.msra.mxu1 %v519_v9 }
  0xd4   : > { %v284_v11 = vpop.f32.mrf.mxu0 }
  0xd5   : > { %v285_v12 = vadd.f32 %v463_v10, %v284_v11 }
  0xd6   : > { %v489_v13 = vpop.f32.mrf.mxu0 }
  0xd7   : > { %v291_v14 = vmul.f32 0.70710677, %v285_v12  ;;  %v290_v39 = vmul.f32 0.5, %v285_v12 }
  0xd8   : > { %v287_v15 = vpop.f32.mrf.mxu0 }
  0xd9   : > { %v294_v16 = vand.u32 2147483647, %v291_v14  ;;  %vm292_vm3 = vcmp.ge.f32.partialorder %v291_v14, 0.0 }
  0xda   : > { %v490_v17 = vpop.f32.mrf.mxu0  ;;  %v293_v37 = vsel %vm292_vm3, 1.0, %v534_v36 }
  0xdb   : > { %v295_v18 = vmul.f32 0.3275911, %v294_v16  ;;  %v308_v20 = vsub.f32 0.0, %v294_v16 }
  0xdd   : > { %v296_v19 = vadd.f32 1.0, %v295_v18  ;;  %v309_v21 = vmul.f32 %v308_v20, %v294_v16 }
  0xdf   : > { %520 = vrcp.f32 %v296_v19  ;;  %v310_v24 = vmul.f32 1.442695, %v309_v21 }
  0xe1   : > { %522 = vpow2.f32 %v310_v24 }
  0xec   : > { %v521_v22 = vpop.eup %520 }
  0xed   : > { %v299_v23 = vmul.f32 1.0614054, %v521_v22 }
  0xee   : > { %v523_v33 = vpop.eup %522 }
  0xef   : > { %v300_v25 = vadd.f32 -1.4531521, %v299_v23 }
  0xf1   : > { %v301_v26 = vmul.f32 %v521_v22, %v300_v25 }
  0xf3   : > { %v302_v27 = vadd.f32 1.4214138, %v301_v26 }
  0xf5   : > { %v303_v28 = vmul.f32 %v521_v22, %v302_v27 }
  0xf7   : > { %v304_v29 = vadd.f32 -0.28449672, %v303_v28 }
  0xf9   : > { %v305_v30 = vmul.f32 %v521_v22, %v304_v29 }
  0xfb   : > { %v306_v31 = vadd.f32 0.2548296, %v305_v30 }
  0xfd   : > { %v307_v32 = vmul.f32 %v521_v22, %v306_v31 }
  0xff   : > { %v312_v34 = vmul.f32 %v523_v33, %v307_v32 }
 0x101   : > { %v313_v35 = vsub.f32 1.0, %v312_v34 }
 0x103   : > { %v314_v38 = vmul.f32 %v313_v35, %v293_v37 }
 0x105   : > { %v315_v40 = vadd.f32 1.0, %v314_v38 }
 0x107   : > { %v316_v41 = vmul.f32 %v315_v40, %v290_v39 }
 0x109   : > { %v317_v42 = vpack.c.bf16 %v316_v41, %v316_v41 }
 0x10b   : > { %500 = vmatmul.mubr.msk.bf16.vlgmr.msra.gmra.mxu1 %vm357_vm4, %v317_v42 }
 0x1cb   : > { %v395_v44 = vpop.f32.mrf.mxu1 }
 0x1cc   : > { %v396_v45 = vadd.f32 %v467_v43, %v395_v44 }
 0x1cd   : > { %v501_v46 = vpop.f32.mrf.mxu1 }
 0x1ce   : > { %402 = vst.msk [vmem:[%s219_s17] sm:$0xff] %vm401_vm5, %v396_v45 }
 0x1cf   : > { %v398_v47 = vpop.f32.mrf.mxu1 }
 0x1d1   : > { %v502_v48 = vpop.f32.mrf.mxu1 }
 0x1d2 PF: > { %s15_s18 = sadd.s32 1, %s530_s18  }
 0x1d3   : > { %p12_p4 = scmp.ge.s32.totalorder %s15_s18, 4  }
 0x1d5   :  { %14 = sbr.rel (!%p12_p4) target bundleno = 1 (0x1), region = 70 }

// kernel: _lambda_.23
= control target key start
LH: loop header
LB: loop body
LE: loop exit
PB: predicated region body
PF: predicated region fallthrough
CT: control target
= control target key end

     0   :  { %s494_s15 = smov 0   ;;  %s541_s0 = inlined_call_operand.vmem [shape: f32[16,128], index: 0, kind: input, shape index: {}]   ;;  %s542_s1 = inlined_call_operand.vmem [shape: f32[16,128], index: 1, kind: input, shape index: {}]   ;;  %s543_s2 = inlined_call_operand.vmem [shape: bf16[128,64], index: 2, kind: input, shape index: {}]   ;;  %s544_s3 = inlined_call_operand.vmem [shape: f32[1,64], index: 3, kind: input, shape index: {}]   ;;  %s545_s4 = inlined_call_operand.vmem [shape: f32[16,64], index: 4, kind: output, shape index: {}]  }
   0x1 LB: > { %s393_s16 = sadd.s32 4294967295, %s465_s15   ;;  %p397_p0 = scmp.ge.s32.totalorder %s465_s15, 1  ;;  %s465_s15 = sphi %s494_s15, %s14_s15  }
   0x2   : > { %p170_p1 = scmp.lt.s32.totalorder %s465_s15, 3 }
   0x4   : > { %p171_p2 = pnand %p397_p0, %p170_p1 }
   0x5   : > { %p198_p3 = scmp.lt.s32.totalorder (!%p171_p2), %s393_s16, 1 }
   0x6   : > { %174 = sbr.rel (%p171_p2) target bundleno = 243 (0xf3), region = 36 }
   0xb   : > { %v451_v0 = vld [vmem:[%s543_s2 + $0x38] sm:$0xff]   ;;  %v467_v1 = vmov 0.0   ;;  %v452_v2 = vld [vmem:[%s543_s2 + $0x30] sm:$0xff]   ;;  %vm468_vm0 = vmmov 0   ;;  %v453_v3 = vld [vmem:[%s543_s2 + $0x28] sm:$0xff]   ;;  %s547_s16 = smov (!%p198_p3, %s393_s16), 1 }
   0xc   : > { %421 = vmatprep.subr.bf16.mxu0 %v467_v1  ;;  %437 = vmatprep.mubr.msk.bf16.mxu0 %vm468_vm0, %v467_v1  ;;  %v454_v4 = vld [vmem:[%s543_s2 + $0x20] sm:$0xff]   ;;  %v455_v5 = vld [vmem:[%s543_s2 + $0x18] sm:$0xff]   ;;  %s398_s27 = sshll.u32 %s547_s16, 3  ;;  %v456_v6 = vld [vmem:[%s543_s2 + $0x10] sm:$0xff]   ;;  %vm326_vm1 = vcmask 523264  }
   0xd   : > { %422 = vmatpush3.bf16.msra.mxu0 %v451_v0  ;;  %s201_s6 = scalar_lea.vmem %s541_s0, %s398_s27  ;;  %s205_s9 = scalar_lea.vmem %s542_s1, %s398_s27  ;;  %v457_v7 = vld [vmem:[%s543_s2 + $0x8] sm:$0xff]   ;;  %v458_v11 = vld [vmem:[%s543_s2] sm:$0xff]  }
   0xe   : > { %423 = vmatprep.subr.bf16.mxu0 %v467_v1  ;;  %v211_v8 = vld [vmem:[%s201_s6] sm:$0xff]  ;;  %s209_s19 = scalar_lea.vmem %s545_s4, %s398_s27 }
   0xf   : > { %v212_v9 = vld [vmem:[%s205_s9] sm:$0xff] }
  0x10   : > { %v213_v10 = vadd.f32 %v212_v9, %v211_v8  ;;  %v401_v13 = vld [vmem:[%s544_s3] ss:$0 sm:$0xff] }
  0x11   : > { %424 = vmatpush3.bf16.msra.mxu0 %v452_v2 }
  0x12   : > { %425 = vmatprep.subr.bf16.mxu0 %v467_v1  ;;  %v214_v12 = vpack.c.bf16 %v213_v10, %v213_v10 }
  0x15   : > { %426 = vmatpush3.bf16.msra.mxu0 %v453_v3 }
  0x16   : > { %427 = vmatprep.subr.bf16.mxu0 %v467_v1 }
  0x19   : > { %428 = vmatpush3.bf16.msra.mxu0 %v454_v4 }
  0x1a   : > { %429 = vmatprep.subr.bf16.mxu0 %v467_v1 }
  0x1d   : > { %430 = vmatpush3.bf16.msra.mxu0 %v455_v5 }
  0x1e   : > { %431 = vmatprep.subr.bf16.mxu0 %v467_v1 }
  0x21   : > { %432 = vmatpush3.bf16.msra.mxu0 %v456_v6 }
  0x22   : > { %433 = vmatprep.subr.bf16.mxu0 %v467_v1 }
  0x25   : > { %434 = vmatpush3.bf16.msra.mxu0 %v457_v7 }
  0x26   : > { %435 = vmatprep.subr.bf16.mxu0 %v467_v1 }
  0x29   : > { %436 = vmatpush3.bf16.msra.mxu0 %v458_v11 }
  0x2c   : > { %438 = vmatmul.mubr.bf16.vlgmr.msra.gmra.mxu0 %v214_v12 }
  0xec   : > { %v320_v14 = vpop.f32.mrf.mxu0 }
  0xed   : > { %v321_v15 = vadd.f32 %v401_v13, %v320_v14 }
  0xee   : > { %v439_v16 = vpop.f32.mrf.mxu0 }
  0xef   : > { %327 = vst.msk [vmem:[%s209_s19] sm:$0xff] %vm326_vm1, %v321_v15 }
  0xf0   : > { %v323_v17 = vpop.f32.mrf.mxu0 }
  0xf2   : > { %v440_v18 = vpop.f32.mrf.mxu0 }
  0xf3 PF: > { %s14_s15 = sadd.s32 1, %s465_s15  }
  0xf4   : > { %p11_p4 = scmp.ge.s32.totalorder %s14_s15, 4  }
  0xf6   :  { %13 = sbr.rel (!%p11_p4) target bundleno = 1 (0x1), region = 69 }

// kernel: _lambda_.25
= control target key start
LH: loop header
LB: loop body
LE: loop exit
PB: predicated region body
PF: predicated region fallthrough
CT: control target
= control target key end

     0   :  { %s2649_s29 = smov 0   ;;  %s3010_s0 = inlined_call_operand.vmem [shape: f32[4,4,64], index: 0, kind: input, shape index: {}]   ;;  %s3011_s1 = inlined_call_operand.vmem [shape: f32[4,4,64], index: 1, kind: input, shape index: {}]   ;;  %s3012_s2 = inlined_call_operand.vmem [shape: bf16[64,64], index: 2, kind: input, shape index: {}]   ;;  %s3013_s3 = inlined_call_operand.vmem [shape: f32[1,64], index: 3, kind: input, shape index: {}]   ;;  %s3014_s4 = inlined_call_operand.vmem [shape: bf16[64,128], index: 4, kind: input, shape index: {}]   ;;  %s3015_s5 = inlined_call_operand.vmem [shape: f32[1,128], index: 5, kind: input, shape index: {}]   ;;  %s3016_s6 = inlined_call_operand.vmem [shape: f32[1,64], index: 6, kind: input, shape index: {}]   ;;  %s3017_s7 = inlined_call_operand.vmem [shape: f32[1,64], index: 7, kind: input, shape index: {}]   ;;  %s3018_s8 = inlined_call_operand.vmem [shape: bf16[64,64], index: 8, kind: input, shape index: {}]   ;;  %s3019_s9 = inlined_call_operand.vmem [shape: f32[1,64], index: 9, kind: input, shape index: {}]   ;;  %s3020_s10 = inlined_call_operand.vmem [shape: bf16[64,256], index: 10, kind: input, shape index: {}]   ;;  %s3021_s11 = inlined_call_operand.vmem [shape: f32[1,256], index: 11, kind: input, shape index: {}]   ;;  %s3022_s12 = inlined_call_operand.vmem [shape: bf16[256,64], index: 12, kind: input, shape index: {}]   ;;  %s3023_s13 = inlined_call_operand.vmem [shape: f32[1,64], index: 13, kind: input, shape index: {}]   ;;  %s3024_s14 = inlined_call_operand.vmem [shape: f32[4,4,64], index: 14, kind: output, shape index: {}]  }
   0x1 LB: > { %s2172_s30 = sadd.s32 4294967295, %s2562_s29   ;;  %p2176_p0 = scmp.ge.s32.totalorder %s2562_s29, 1  ;;  %s2562_s29 = sphi %s2649_s29, %s24_s29  }
   0x2   : > { %p424_p1 = scmp.lt.s32.totalorder %s2562_s29, 3 }
   0x4   : > { %p425_p2 = pnand %p2176_p0, %p424_p1 }
   0x5   : > { %s2177_s15 = sshll.u32 (!%p425_p2), %s2172_s30, 1  ;;  %s2566_s21 = smov (!%p425_p2), 64  }
   0x6   : > { %428 = sbr.rel (%p425_p2) target bundleno = 3866 (0xf1a), region = 76  ;;  %p476_p3 = scmp.lt.s32.totalorder (!%p425_p2), %s2177_s15, 3 }
   0x7   : > { %s2568_s23 = smov (!%p425_p2), 48   ;;  %s2569_s24 = smov (!%p425_p2), 96  }
   0x8   : > { %s2570_s25 = smov (!%p425_p2), 32   ;;  %s2571_s26 = smov (!%p425_p2), 80  }
   0x9   : > { %s2572_s27 = smov (!%p425_p2), 16  }
   0xb   : > { %vm498_vm0 = vcmask 519168   ;;  %s3026_s15 = smov (!%p476_p3, %s2177_s15), 3  ;;  %v2466_v28 = vld [vmem:[%s3012_s2 + $0x18] sm:$0xff]   ;;  %v2564_v29 = vmov 0.0   ;;  %v2467_v30 = vld [vmem:[%s3012_s2 + $0x10] sm:$0xff]   ;;  %v2468_v31 = vld [vmem:[%s3012_s2 + $0x8] sm:$0xff]  }
   0xc   : > { %s2657_s16 = sshll.u32 %s3026_s15, 2  ;;  %2316 = vmatprep.subr.bf16.mxu1 %v2564_v29  ;;  %2340 = vmatprep.subr.bf16.mxu0 %v2564_v29  ;;  %v2469_v32 = vld [vmem:[%s3012_s2] sm:$0xff]   ;;  %vm2565_vm1 = vmmov 0   ;;  %vm614_vm2 = vcmask 523264   ;;  %v2470_v52 = vld [vmem:[%s3014_s4 + $0x18] sm:$0xff]   ;;  %v2471_v56 = vld [vmem:[%s3014_s4 + $0x10] sm:$0xff]  }
   0xd   : > { %s2663_s19 = scalar_lea.vmem %s3010_s0, %s2657_s16  ;;  %s485_s22 = scalar_lea.vmem %s3011_s1, %s2657_s16  ;;  %2317 = vmatpush3.bf16.msra.mxu1 %v2466_v28  ;;  %2324 = vmatprep.mubr.msk.bf16.mxu1 %vm2565_vm1, %v2564_v29  ;;  %v2183_v57 = vld [vmem:[%s3016_s6] ss:$0 sm:$0xff]  ;;  %v2472_v60 = vld [vmem:[%s3014_s4 + $0x8] sm:$0xff]   ;;  %vm755_vm3 = vcmask 130048   ;;  %vm850_vm4 = vcmask 27648   ;;  %vm882_vm5 = vcmask 1041408  }
   0xe   : > { %v494_v0 = vld [vmem:[%s2663_s19] sm:$0xf]  ;;  %v495_v1 = vld [vmem:[%s2663_s19 + $0x4] sm:$0xf]  ;;  %2318 = vmatprep.subr.bf16.mxu1 %v2564_v29  ;;  %2342 = vmatprep.mubr.msk.bf16.mxu0 %vm2565_vm1, %v2564_v29  ;;  %vm878_vm6 = vcmask 31744   ;;  %vm1669_vm7 = vcmask 261120  }
   0xf   : > { %v499_v2 = vsel %vm498_vm0, %v494_v0, 0.0  ;;  %v496_v3 = vld [vmem:[%s485_s22] sm:$0xf]  ;;  %v497_v4 = vld [vmem:[%s485_s22 + $0x4] sm:$0xf]  ;;  %v502_v6 = vsel %vm498_vm0, %v495_v1, 0.0 }
  0x10   : > { %500 = vadd.xlane.f32.xlu0 %v499_v2  ;;  %v526_v5 = vsel %vm498_vm0, %v496_v3, 0.0  ;;  %v529_v7 = vsel %vm498_vm0, %v497_v4, 0.0  ;;  %v2184_v61 = vld [vmem:[%s3017_s7] ss:$0 sm:$0xff]  ;;  %s2567_s22 = smov 112   ;;  %vm1672_vm8 = vcmask 392192  }
  0x11   : > { %527 = vadd.xlane.f32.xlu1 %v526_v5  ;;  %2319 = vmatpush3.bf16.msra.mxu1 %v2467_v30 }
  0x12   : > { %2320 = vmatprep.subr.bf16.mxu1 %v2564_v29 }
  0x14   : > { %503 = vadd.xlane.f32.xlu0 %v502_v6 }
  0x15   : > { %530 = vadd.xlane.f32.xlu1 %v529_v7  ;;  %2321 = vmatpush3.bf16.msra.mxu1 %v2468_v31  ;;  %v2191_v7 = vld [vmem:[%s3015_s5] ss:$0 sm:$0xff] }
  0x16   : > { %2322 = vmatprep.subr.bf16.mxu1 %v2564_v29 }
  0x19   : > { %2323 = vmatpush3.bf16.msra.mxu1 %v2469_v32 }
  0x1a   : > { %2328 = vmatprep.subr.bf16.mxu1 %v2564_v29 }
  0x99   : > { %v501_v8 = vpop.xlane.xlu0 %500 }
  0x9a   : > { %v506_v9 = vmul.f32 0.015625, %v501_v8  ;;  %v528_v10 = vpop.xlane.xlu1 %527 }
  0x9b   : > { %v532_v11 = vmul.f32 0.015625, %v528_v10  ;;  %v2185_v10 = vld [vmem:[%s3013_s3] ss:$0 sm:$0xff] }
  0x9c   : > { %v508_v12 = vsub.f32 %v494_v0, %v506_v9  ;;  %v2473_v0 = vld [vmem:[%s3014_s4] sm:$0xff]  }
  0x9d   : > { %v2675_v13 = vsub.f32 %v496_v3, %v532_v11  ;;  %v504_v14 = vpop.xlane.xlu0 %503 }
  0x9e   : > { %v507_v15 = vmul.f32 0.015625, %v504_v14  ;;  %v531_v16 = vpop.xlane.xlu1 %530  ;;  %v510_v17 = vmul.f32 %v508_v12, %v508_v12 }
  0x9f   : > { %v533_v18 = vmul.f32 0.015625, %v531_v16  ;;  %v536_v19 = vmul.f32 %v2675_v13, %v2675_v13 }
  0xa0   : > { %v509_v20 = vsub.f32 %v495_v1, %v507_v15  ;;  %v512_v21 = vsel %vm498_vm0, %v510_v17, 0.0 }
  0xa1   : > { %v535_v22 = vsub.f32 %v497_v4, %v533_v18  ;;  %513 = vadd.xlane.f32.xlu0 %v512_v21  ;;  %v538_v23 = vsel %vm498_vm0, %v536_v19, 0.0 }
  0xa2   : > { %v511_v24 = vmul.f32 %v509_v20, %v509_v20 }
  0xa3   : > { %v537_v25 = vmul.f32 %v535_v22, %v535_v22 }
  0xa4   : > { %v515_v26 = vsel %vm498_vm0, %v511_v24, 0.0 }
  0xa5   : > { %539 = vadd.xlane.f32.xlu0 %v538_v23  ;;  %516 = vadd.xlane.f32.xlu1 %v515_v26  ;;  %v541_v27 = vsel %vm498_vm0, %v537_v25, 0.0 }
  0xa9   : > { %542 = vadd.xlane.f32.xlu1 %v541_v27 }
 0x12a   : > { %v514_v33 = vpop.xlane.xlu0 %513 }
 0x12b   : > { %v518_v34 = vmul.f32 0.015625, %v514_v33 }
 0x12d   : > { %v520_v35 = vadd.f32 1e-06, %v518_v34 }
 0x12e   : > { %v517_v36 = vpop.xlane.xlu1 %516  ;;  %v540_v37 = vpop.xlane.xlu0 %539 }
 0x12f   : > { %v519_v38 = vmul.f32 0.015625, %v517_v36  ;;  %v544_v39 = vmul.f32 0.015625, %v540_v37  ;;  %2506 = vrsqrt.f32 %v520_v35 }
 0x131   : > { %v521_v40 = vadd.f32 1e-06, %v519_v38  ;;  %v546_v41 = vadd.f32 1e-05, %v544_v39 }
 0x132   : > { %v543_v42 = vpop.xlane.xlu1 %542 }
 0x133   : > { %2508 = vrsqrt.f32 %v521_v40  ;;  %v545_v43 = vmul.f32 0.015625, %v543_v42 }
 0x134   : > { %2510 = vrsqrt.f32 %v546_v41 }
 0x135   : > { %v547_v44 = vadd.f32 1e-05, %v545_v43 }
 0x137   : > { %2512 = vrsqrt.f32 %v547_v44 }
 0x13c   : > { %v2507_v45 = vpop.eup %2506 }
 0x13d   : > { %v524_v47 = vmul.f32 %v2507_v45, %v508_v12 }
 0x140   : > { %v2509_v46 = vpop.eup %2508 }
 0x141   : > { %v525_v48 = vmul.f32 %v2509_v46, %v509_v20  ;;  %v2511_v49 = vpop.eup %2510 }
 0x142   : > { %v550_v55 = vmul.f32 %v2511_v49, %v2675_v13 }
 0x143   : > { %v572_v50 = vcombine.low %v524_v47, %v525_v48 }
 0x144   : > { %v2513_v51 = vpop.eup %2512  ;;  %v559_v59 = vmul.f32 %v2183_v57, %v550_v55 }
 0x145   : > { %v551_v53 = vmul.f32 %v2513_v51, %v535_v22  ;;  %v574_v54 = vpack.c.bf16 %v572_v50, %v572_v50 }
 0x146   : > { %v568_v63 = vadd.f32 %v2184_v61, %v559_v59 }
 0x147   : > { %2325 = vmatmul.mubr.msk.bf16.vlgmr.msra.gmra.mxu1 %vm614_vm2, %v574_v54  ;;  %v560_v58 = vmul.f32 %v2183_v57, %v551_v53 }
 0x148   : > { %2329 = vmatpush3.bf16.msra.mxu1 %v2470_v52  ;;  %2336 = vmatprep.mubr.msk.bf16.mxu1 %vm2565_vm1, %v2564_v29 }
 0x149   : > { %2330 = vmatprep.subr.bf16.mxu1 %v2564_v29  ;;  %v569_v62 = vadd.f32 %v2184_v61, %v560_v58 }
 0x14b   : > { %v663_v1 = vcombine.low %v568_v63, %v569_v62 }
 0x14c   : > { %2331 = vmatpush3.bf16.msra.mxu1 %v2471_v56 }
 0x14d   : > { %2332 = vmatprep.subr.bf16.mxu1 %v2564_v29  ;;  %v665_v2 = vpack.c.bf16 %v663_v1, %v663_v1 }
 0x150   : > { %2333 = vmatpush3.bf16.msra.mxu1 %v2472_v60 }
 0x151   : > { %2334 = vmatprep.subr.bf16.mxu1 %v2564_v29 }
 0x154   : > { %2335 = vmatpush3.bf16.msra.mxu1 %v2473_v0 }
 0x155   : > { %2346 = vmatprep.subr.bf16.mxu1 %v2564_v29 }
 0x157   : > { %2337 = vmatmul.mubr.msk.bf16.vlgmr.msra.gmra.mxu1 %vm614_vm2, %v665_v2 }
 0x158   : > { %2348 = vmatprep.mubr.msk.bf16.mxu1 %vm2565_vm1, %v2564_v29 }
 0x207   : > { %v652_v3 = vpop.f32.mrf.mxu1 }
 0x208   : > { %v653_v15 = vadd.f32 %v2185_v10, %v652_v3 }
 0x209   : > { %v2326_v4 = vpop.f32.mrf.mxu1 }
 0x20a   : > { %v659_v20 = vcombine.high %v653_v15, %v653_v15  ;;  %v2750_v21 = vpack.c.bf16 %v653_v15, %v653_v15 }
 0x20b   : > { %v655_v5 = vpop.f32.mrf.mxu1 }
 0x20c   : > { %v2752_v22 = vpack.c.bf16 %v659_v20, %v659_v20 }
 0x20d   : > { %v2327_v6 = vpop.f32.mrf.mxu1 }
 0x217   : > { %v742_v8 = vpop.f32.mrf.mxu1 }
 0x218   : > { %v743_v9 = vadd.f32 %v2191_v7, %v742_v8 }
 0x219   : > { %v2338_v11 = vpop.f32.mrf.mxu1 }
 0x21a   : > { %v749_v12 = vcombine.high %v743_v9, %v743_v9  ;;  %v2740_v13 = vpack.c.bf16 %v743_v9, %v743_v9 }
 0x21b   : > { %v745_v14 = vpop.f32.mrf.mxu1 }
 0x21c   : > { %v2742_v16 = vpack.c.bf16 %v749_v12, %v749_v12  ;;  %v760_v17 = vsel %vm755_vm3, %v2740_v13, 0 }
 0x21d   : > { %v2339_v18 = vpop.f32.mrf.mxu1  ;;  %2341 = vmatpush3.bf16.xpose.msra.mxu0 %v760_v17 }
 0x21e   : > { %v806_v19 = vsel %vm755_vm3, %v2742_v16, 0  ;;  %2352 = vmatprep.subr.bf16.mxu0 %v2564_v29 }
 0x21f   : > { %2347 = vmatpush3.bf16.xpose.msra.mxu1 %v806_v19 }
 0x220   : > { %2358 = vmatprep.subr.bf16.mxu1 %v2564_v29 }
 0x224   : > { %2343 = vmatmul.mubr.msk.bf16.vlgmr.msra.gmra.mxu0 %vm755_vm3, %v2750_v21 }
 0x225   : > { %2354 = vmatprep.mubr.msk.bf16.mxu0 %vm2565_vm1, %v2564_v29 }
 0x226   : > { %2349 = vmatmul.mubr.msk.bf16.vlgmr.msra.gmra.mxu1 %vm755_vm3, %v2752_v22 }
 0x227   : > { %2360 = vmatprep.mubr.msk.bf16.mxu1 %vm2565_vm1, %v2564_v29 }
 0x2e4   : > { %v796_v23 = vpop.f32.mrf.mxu0 }
 0x2e5   : > { %v848_v24 = vmul.f32 0.25, %v796_v23 }
 0x2e6   : > { %v2344_v25 = vpop.f32.mrf.mxu0  ;;  %v842_v26 = vpop.f32.mrf.mxu1 }
 0x2e7   : > { %v849_v27 = vmul.f32 0.25, %v842_v26  ;;  %v851_v28 = vsel %vm850_vm4, %v848_v24, -inf }
 0x2e8   : > { %852 = vmax.xlane.f32.xlu0 %v851_v28  ;;  %v799_v30 = vpop.f32.mrf.mxu0  ;;  %v2350_v31 = vpop.f32.mrf.mxu1 }
 0x2e9   : > { %v854_v32 = vsel %vm850_vm4, %v849_v27, -inf }
 0x2ea   : > { %v2345_v33 = vpop.f32.mrf.mxu0  ;;  %855 = vmax.xlane.f32.xlu1 %v854_v32  ;;  %v845_v34 = vpop.f32.mrf.mxu1 }
 0x2ec   : > { %v2351_v35 = vpop.f32.mrf.mxu1 }
 0x2fb   : > { %927 = vrot.lane.b32.xlu1 %v2742_v16, %s2566_s21 }
 0x2ff   : > { %978 = vrot.lane.b32.xlu1 %v2740_v13, %s2567_s22 }
 0x371   : > { %v853_v36 = vpop.xlane.xlu0 %852 }
 0x372   : > { %v857_v37 = vsub.f32 %v848_v24, %v853_v36 }
 0x373   : > { %v856_v38 = vpop.xlane.xlu1 %855 }
 0x374   : > { %v859_v39 = vmul.f32 1.442695, %v857_v37  ;;  %v858_v40 = vsub.f32 %v849_v27, %v856_v38 }
 0x376   : > { %2514 = vpow2.f32 %v859_v39  ;;  %v861_v41 = vmul.f32 1.442695, %v858_v40 }
 0x377   : > { %v928_v42 = vpop.permute.xlu1 %927 }
 0x378   : > { %2516 = vpow2.f32 %v861_v41  ;;  %v933_v43 = vsel %vm882_vm5, %v928_v42, 0 }
 0x379   : > { %2359 = vmatpush3.bf16.msra.mxu1 %v933_v43 }
 0x37a   : > { %2370 = vmatprep.subr.bf16.mxu1 %v2564_v29 }
 0x37b   : > { %v979_v48 = vpop.permute.xlu1 %978 }
 0x37c   : > { %v984_v59 = vsel %vm755_vm3, %v979_v48, 0 }
 0x383   : > { %v2515_v44 = vpop.eup %2514 }
 0x384   : > { %v863_v45 = vsel %vm850_vm4, %v2515_v44, 0.0 }
 0x385   : > { %v2517_v46 = vpop.eup %2516  ;;  %864 = vadd.xlane.f32.xlu0 %v863_v45 }
 0x386   : > { %v866_v47 = vsel %vm850_vm4, %v2517_v46, 0.0 }
 0x387   : > { %867 = vadd.xlane.f32.xlu1 %v866_v47 }
 0x398   : > { %1029 = vrot.lane.b32.xlu1 %v2742_v16, %s2567_s22 }
 0x39b   : > { %876 = vrot.lane.b32.xlu0 %v2740_v13, %s2566_s21 }
 0x39c   : > { %1027 = vrot.lane.b32.xlu1 %v2752_v22, %s2567_s22 }
 0x39f   : > { %976 = vrot.lane.b32.xlu0 %v2750_v21, %s2567_s22 }
 0x40e   : > { %v865_v49 = vpop.xlane.xlu0 %864 }
 0x40f   : > { %2518 = vrcp.f32 %v865_v49 }
 0x410   : > { %v868_v50 = vpop.xlane.xlu1 %867 }
 0x411   : > { %2520 = vrcp.f32 %v868_v50 }
 0x412   : > { %v877_v51 = vpop.permute.xlu0 %876 }
 0x413   : > { %v884_v52 = vsel %vm882_vm5, %v877_v51, 0 }
 0x414   : > { %2353 = vmatpush3.bf16.msra.mxu0 %v884_v52  ;;  %v1030_v58 = vpop.permute.xlu1 %1029 }
 0x415   : > { %2364 = vmatprep.subr.bf16.mxu0 %v2564_v29  ;;  %v1035_v61 = vsel %vm755_vm3, %v1030_v58, 0 }
 0x416   : > { %v977_v62 = vpop.permute.xlu0 %976 }
 0x418   : > { %v1028_v63 = vpop.permute.xlu1 %1027 }
 0x41c   : > { %v2519_v53 = vpop.eup %2518 }
 0x41d   : > { %v871_v54 = vmul.f32 %v2519_v53, %v2515_v44 }
 0x41e   : > { %v2521_v55 = vpop.eup %2520 }
 0x41f   : > { %v873_v56 = vpack.c.bf16 %v871_v54, %v871_v54  ;;  %v872_v57 = vmul.f32 %v2521_v55, %v2517_v46 }
 0x421   : > { %2355 = vmatmul.mubr.msk.bf16.vlgmr.msra.gmra.mxu0 %vm878_vm6, %v873_v56  ;;  %v874_v60 = vpack.c.bf16 %v872_v57, %v872_v57 }
 0x422   : > { %2365 = vmatpush3.bf16.xpose.msra.mxu0 %v984_v59  ;;  %2366 = vmatprep.mubr.msk.bf16.mxu0 %vm2565_vm1, %v2564_v29 }
 0x423   : > { %2361 = vmatmul.mubr.msk.bf16.vlgmr.msra.gmra.mxu1 %vm878_vm6, %v874_v60  ;;  %2376 = vmatprep.subr.bf16.mxu0 %v2564_v29 }
 0x424   : > { %2371 = vmatpush3.bf16.xpose.msra.mxu1 %v1035_v61  ;;  %2372 = vmatprep.mubr.msk.bf16.mxu1 %vm2565_vm1, %v2564_v29 }
 0x425   : > { %2382 = vmatprep.subr.bf16.mxu1 %v2564_v29 }
 0x429   : > { %2367 = vmatmul.mubr.msk.bf16.vlgmr.msra.gmra.mxu0 %vm755_vm3, %v977_v62 }
 0x42a   : > { %2378 = vmatprep.mubr.msk.bf16.mxu0 %vm2565_vm1, %v2564_v29 }
 0x42b   : > { %2373 = vmatmul.mubr.msk.bf16.vlgmr.msra.gmra.mxu1 %vm755_vm3, %v1028_v63 }
 0x42c   : > { %2384 = vmatprep.mubr.msk.bf16.mxu1 %vm2565_vm1, %v2564_v29 }
 0x4e1   : > { %v2792_v0 = vpop.f32.mrf.mxu0 }
 0x4e3   : > { %v2356_v1 = vpop.f32.mrf.mxu0  ;;  %v2794_v2 = vpop.f32.mrf.mxu1 }
 0x4e5   : > { %v923_v3 = vpop.f32.mrf.mxu0  ;;  %v2362_v4 = vpop.f32.mrf.mxu1 }
 0x4e7   : > { %v2357_v5 = vpop.f32.mrf.mxu0  ;;  %v972_v6 = vpop.f32.mrf.mxu1 }
 0x4e9   : > { %v2363_v7 = vpop.f32.mrf.mxu1  ;;  %v1020_v8 = vpop.f32.mrf.mxu0 }
 0x4ea   : > { %v1077_v9 = vmul.f32 0.25, %v1020_v8 }
 0x4eb   : > { %v2368_v10 = vpop.f32.mrf.mxu0  ;;  %v1071_v11 = vpop.f32.mrf.mxu1 }
 0x4ec   : > { %v1078_v12 = vmul.f32 0.25, %v1071_v11  ;;  %v1079_v14 = vsel %vm850_vm4, %v1077_v9, -inf }
 0x4ed   : > { %1080 = vmax.xlane.f32.xlu0 %v1079_v14  ;;  %v1023_v15 = vpop.f32.mrf.mxu0  ;;  %v2374_v17 = vpop.f32.mrf.mxu1 }
 0x4ee   : > { %v1082_v18 = vsel %vm850_vm4, %v1078_v12, -inf }
 0x4ef   : > { %v2369_v19 = vpop.f32.mrf.mxu0  ;;  %1083 = vmax.xlane.f32.xlu1 %v1082_v18  ;;  %v1074_v20 = vpop.f32.mrf.mxu1 }
 0x4f1   : > { %v2375_v23 = vpop.f32.mrf.mxu1 }
 0x500   : > { %1151 = vrot.lane.b32.xlu1 %v2742_v16, %s2568_s23 }
 0x504   : > { %1201 = vrot.lane.b32.xlu1 %v2740_v13, %s2569_s24 }
 0x508   : > { %1251 = vrot.lane.b32.xlu1 %v2742_v16, %s2569_s24 }
 0x50c   : > { %1249 = vrot.lane.b32.xlu1 %v2752_v22, %s2569_s24 }
 0x576   : > { %v1081_v24 = vpop.xlane.xlu0 %1080 }
 0x577   : > { %v1085_v25 = vsub.f32 %v1077_v9, %v1081_v24 }
 0x578   : > { %v1084_v26 = vpop.xlane.xlu1 %1083 }
 0x579   : > { %v1087_v27 = vmul.f32 1.442695, %v1085_v25  ;;  %v1086_v28 = vsub.f32 %v1078_v12, %v1084_v26 }
 0x57b   : > { %2522 = vpow2.f32 %v1087_v27  ;;  %v1089_v30 = vmul.f32 1.442695, %v1086_v28 }
 0x57c   : > { %v1152_v31 = vpop.permute.xlu1 %1151 }
 0x57d   : > { %2524 = vpow2.f32 %v1089_v30  ;;  %v1157_v32 = vsel %vm882_vm5, %v1152_v31, 0 }
 0x57e   : > { %2383 = vmatpush3.bf16.msra.mxu1 %v1157_v32 }
 0x57f   : > { %2394 = vmatprep.subr.bf16.mxu1 %v2564_v29 }
 0x580   : > { %v1202_v42 = vpop.permute.xlu1 %1201 }
 0x581   : > { %v1207_v46 = vsel %vm755_vm3, %v1202_v42, 0 }
 0x584   : > { %v1252_v48 = vpop.permute.xlu1 %1251 }
 0x585   : > { %v1257_v50 = vsel %vm755_vm3, %v1252_v48, 0 }
 0x588   : > { %v2523_v33 = vpop.eup %2522  ;;  %v1250_v52 = vpop.permute.xlu1 %1249 }
 0x589   : > { %v1091_v34 = vsel %vm850_vm4, %v2523_v33, 0.0 }
 0x58a   : > { %v2525_v35 = vpop.eup %2524  ;;  %1092 = vadd.xlane.f32.xlu0 %v1091_v34 }
 0x58b   : > { %v1094_v36 = vsel %vm850_vm4, %v2525_v35, 0.0 }
 0x58e   : > { %1095 = vadd.xlane.f32.xlu0 %v1094_v36 }
 0x5a4   : > { %1103 = vrot.lane.b32.xlu0 %v2740_v13, %s2568_s23 }
 0x5a8   : > { %1199 = vrot.lane.b32.xlu0 %v2750_v21, %s2569_s24 }
 0x613   : > { %v1093_v37 = vpop.xlane.xlu0 %1092 }
 0x614   : > { %2526 = vrcp.f32 %v1093_v37 }
 0x617   : > { %v1096_v38 = vpop.xlane.xlu0 %1095 }
 0x618   : > { %2528 = vrcp.f32 %v1096_v38 }
 0x61b   : > { %v1104_v39 = vpop.permute.xlu0 %1103 }
 0x61c   : > { %v1109_v40 = vsel %vm882_vm5, %v1104_v39, 0 }
 0x61d   : > { %2377 = vmatpush3.bf16.msra.mxu0 %v1109_v40 }
 0x61e   : > { %2388 = vmatprep.subr.bf16.mxu0 %v2564_v29 }
 0x61f   : > { %v1200_v51 = vpop.permute.xlu0 %1199 }
 0x621   : > { %v2527_v41 = vpop.eup %2526 }
 0x622   : > { %v1099_v43 = vmul.f32 %v2527_v41, %v2523_v33 }
 0x624   : > { %v1101_v44 = vpack.c.bf16 %v1099_v43, %v1099_v43 }
 0x625   : > { %v2529_v45 = vpop.eup %2528 }
 0x626   : > { %2379 = vmatmul.mubr.msk.bf16.vlgmr.msra.gmra.mxu0 %vm878_vm6, %v1101_v44  ;;  %v1100_v47 = vmul.f32 %v2529_v45, %v2525_v35 }
 0x627   : > { %2389 = vmatpush3.bf16.xpose.msra.mxu0 %v1207_v46  ;;  %2390 = vmatprep.mubr.msk.bf16.mxu0 %vm2565_vm1, %v2564_v29 }
 0x628   : > { %v1102_v49 = vpack.c.bf16 %v1100_v47, %v1100_v47  ;;  %2400 = vmatprep.subr.bf16.mxu0 %v2564_v29 }
 0x62a   : > { %2385 = vmatmul.mubr.msk.bf16.vlgmr.msra.gmra.mxu1 %vm878_vm6, %v1102_v49 }
 0x62b   : > { %2395 = vmatpush3.bf16.xpose.msra.mxu1 %v1257_v50  ;;  %2396 = vmatprep.mubr.msk.bf16.mxu1 %vm2565_vm1, %v2564_v29 }
 0x62c   : > { %2406 = vmatprep.subr.bf16.mxu1 %v2564_v29 }
 0x62e   : > { %2391 = vmatmul.mubr.msk.bf16.vlgmr.msra.gmra.mxu0 %vm755_vm3, %v1200_v51 }
 0x62f   : > { %2402 = vmatprep.mubr.msk.bf16.mxu0 %vm2565_vm1, %v2564_v29 }
 0x632   : > { %2397 = vmatmul.mubr.msk.bf16.vlgmr.msra.gmra.mxu1 %vm755_vm3, %v1250_v52 }
 0x633   : > { %2408 = vmatprep.mubr.msk.bf16.mxu1 %vm2565_vm1, %v2564_v29 }
 0x6e6   : > { %v2828_v53 = vpop.f32.mrf.mxu0 }
 0x6e8   : > { %v2380_v54 = vpop.f32.mrf.mxu0 }
 0x6ea   : > { %v1148_v55 = vpop.f32.mrf.mxu0  ;;  %v2830_v56 = vpop.f32.mrf.mxu1 }
 0x6ec   : > { %v2381_v57 = vpop.f32.mrf.mxu0  ;;  %v2386_v58 = vpop.f32.mrf.mxu1 }
 0x6ee   : > { %v1196_v59 = vpop.f32.mrf.mxu1  ;;  %v1243_v60 = vpop.f32.mrf.mxu0 }
 0x6ef   : > { %v1299_v61 = vmul.f32 0.25, %v1243_v60 }
 0x6f0   : > { %v2387_v62 = vpop.f32.mrf.mxu1  ;;  %v2392_v63 = vpop.f32.mrf.mxu0 }
 0x6f1   : > { %v1301_v1 = vsel %vm850_vm4, %v1299_v61, -inf }
 0x6f2   : > { %1302 = vmax.xlane.f32.xlu0 %v1301_v1  ;;  %v1246_v3 = vpop.f32.mrf.mxu0  ;;  %v1293_v4 = vpop.f32.mrf.mxu1 }
 0x6f3   : > { %v1300_v5 = vmul.f32 0.25, %v1293_v4 }
 0x6f4   : > { %v2393_v6 = vpop.f32.mrf.mxu0  ;;  %v2398_v7 = vpop.f32.mrf.mxu1 }
 0x6f5   : > { %v1304_v8 = vsel %vm850_vm4, %v1300_v5, -inf }
 0x6f6   : > { %1305 = vmax.xlane.f32.xlu1 %v1304_v8  ;;  %v1296_v9 = vpop.f32.mrf.mxu1 }
 0x6f8   : > { %v2399_v10 = vpop.f32.mrf.mxu1 }
 0x707   : > { %1373 = vrot.lane.b32.xlu1 %v2742_v16, %s2570_s25 }
 0x70b   : > { %1423 = vrot.lane.b32.xlu1 %v2740_v13, %s2571_s26 }
 0x70f   : > { %1473 = vrot.lane.b32.xlu1 %v2742_v16, %s2571_s26 }
 0x713   : > { %1471 = vrot.lane.b32.xlu1 %v2752_v22, %s2571_s26 }
 0x77b   : > { %v1303_v11 = vpop.xlane.xlu0 %1302 }
 0x77c   : > { %v1307_v12 = vsub.f32 %v1299_v61, %v1303_v11 }
 0x77e   : > { %v1309_v14 = vmul.f32 1.442695, %v1307_v12 }
 0x77f   : > { %v1306_v15 = vpop.xlane.xlu1 %1305 }
 0x780   : > { %2530 = vpow2.f32 %v1309_v14  ;;  %v1308_v17 = vsub.f32 %v1300_v5, %v1306_v15 }
 0x782   : > { %v1311_v18 = vmul.f32 1.442695, %v1308_v17 }
 0x783   : > { %v1374_v19 = vpop.permute.xlu1 %1373 }
 0x784   : > { %2532 = vpow2.f32 %v1311_v18  ;;  %v1379_v20 = vsel %vm882_vm5, %v1374_v19, 0 }
 0x785   : > { %2407 = vmatpush3.bf16.msra.mxu1 %v1379_v20 }
 0x786   : > { %2418 = vmatprep.subr.bf16.mxu1 %v2564_v29 }
 0x787   : > { %v1424_v32 = vpop.permute.xlu1 %1423 }
 0x788   : > { %v1429_v36 = vsel %vm755_vm3, %v1424_v32, 0 }
 0x78b   : > { %v1474_v37 = vpop.permute.xlu1 %1473 }
 0x78c   : > { %v1479_v39 = vsel %vm755_vm3, %v1474_v37, 0 }
 0x78d   : > { %v2531_v23 = vpop.eup %2530 }
 0x78e   : > { %v1313_v24 = vsel %vm850_vm4, %v2531_v23, 0.0 }
 0x78f   : > { %1314 = vadd.xlane.f32.xlu0 %v1313_v24  ;;  %v1472_v41 = vpop.permute.xlu1 %1471  ;;  %v2474_v24 = vld [vmem:[%s3018_s8 + $0x18] sm:$0xff]  }
 0x791   : > { %v2533_v25 = vpop.eup %2532 }
 0x792   : > { %v1316_v22 = vsel %vm850_vm4, %v2533_v25, 0.0 }
 0x793   : > { %1317 = vadd.xlane.f32.xlu0 %v1316_v22  ;;  %v2476_v22 = vld [vmem:[%s3018_s8 + $0x8] sm:$0xff]  }
 0x7a9   : > { %1325 = vrot.lane.b32.xlu0 %v2740_v13, %s2570_s25 }
 0x7ad   : > { %1421 = vrot.lane.b32.xlu0 %v2750_v21, %s2571_s26 }
 0x818   : > { %v1315_v26 = vpop.xlane.xlu0 %1314 }
 0x819   : > { %2534 = vrcp.f32 %v1315_v26  ;;  %v2477_v26 = vld [vmem:[%s3018_s8] sm:$0xff]  }
 0x81c   : > { %v1318_v27 = vpop.xlane.xlu0 %1317 }
 0x81d   : > { %2536 = vrcp.f32 %v1318_v27 }
 0x820   : > { %v1326_v28 = vpop.permute.xlu0 %1325 }
 0x821   : > { %v1331_v30 = vsel %vm882_vm5, %v1326_v28, 0 }
 0x822   : > { %2401 = vmatpush3.bf16.msra.mxu0 %v1331_v30 }
 0x823   : > { %2412 = vmatprep.subr.bf16.mxu0 %v2564_v29 }
 0x824   : > { %v1422_v40 = vpop.permute.xlu0 %1421 }
 0x826   : > { %v2535_v31 = vpop.eup %2534 }
 0x827   : > { %v1321_v33 = vmul.f32 %v2535_v31, %v2531_v23 }
 0x829   : > { %v1323_v34 = vpack.c.bf16 %v1321_v33, %v1321_v33 }
 0x82a   : > { %v2537_v35 = vpop.eup %2536 }
 0x82b   : > { %2403 = vmatmul.mubr.msk.bf16.vlgmr.msra.gmra.mxu0 %vm878_vm6, %v1323_v34  ;;  %v1322_v21 = vmul.f32 %v2537_v35, %v2533_v25  ;;  %v2475_v25 = vld [vmem:[%s3018_s8 + $0x10] sm:$0xff]  }
 0x82c   : > { %2413 = vmatpush3.bf16.xpose.msra.mxu0 %v1429_v36  ;;  %2414 = vmatprep.mubr.msk.bf16.mxu0 %vm2565_vm1, %v2564_v29 }
 0x82d   : > { %v1324_v38 = vpack.c.bf16 %v1322_v21, %v1322_v21  ;;  %2424 = vmatprep.subr.bf16.mxu0 %v2564_v29 }
 0x82f   : > { %2409 = vmatmul.mubr.msk.bf16.vlgmr.msra.gmra.mxu1 %vm878_vm6, %v1324_v38 }
 0x830   : > { %2419 = vmatpush3.bf16.xpose.msra.mxu1 %v1479_v39  ;;  %2420 = vmatprep.mubr.msk.bf16.mxu1 %vm2565_vm1, %v2564_v29 }
 0x831   : > { %2430 = vmatprep.subr.bf16.mxu1 %v2564_v29 }
 0x833   : > { %2415 = vmatmul.mubr.msk.bf16.vlgmr.msra.gmra.mxu0 %vm755_vm3, %v1422_v40 }
 0x834   : > { %2426 = vmatprep.mubr.msk.bf16.mxu0 %vm2565_vm1, %v2564_v29 }
 0x837   : > { %2421 = vmatmul.mubr.msk.bf16.vlgmr.msra.gmra.mxu1 %vm755_vm3, %v1472_v41 }
 0x838   : > { %2432 = vmatprep.mubr.msk.bf16.mxu1 %vm2565_vm1, %v2564_v29 }
 0x8eb   : > { %v1367_v42 = vpop.f32.mrf.mxu0 }
 0x8ed   : > { %v2404_v43 = vpop.f32.mrf.mxu0 }
 0x8ef   : > { %v1370_v44 = vpop.f32.mrf.mxu0  ;;  %v1415_v45 = vpop.f32.mrf.mxu1 }
 0x8f1   : > { %v2405_v46 = vpop.f32.mrf.mxu0  ;;  %v2410_v47 = vpop.f32.mrf.mxu1 }
 0x8f3   : > { %v1418_v48 = vpop.f32.mrf.mxu1  ;;  %v1465_v49 = vpop.f32.mrf.mxu0 }
 0x8f4   : > { %v1521_v50 = vmul.f32 0.25, %v1465_v49  ;;  %v2213_v48 = vld [vmem:[%s3019_s9] ss:$0 sm:$0xff] }
 0x8f5   : > { %v2411_v51 = vpop.f32.mrf.mxu1  ;;  %v2416_v52 = vpop.f32.mrf.mxu0 }
 0x8f6   : > { %v1523_v54 = vsel %vm850_vm4, %v1521_v50, -inf  ;;  %v2554_v52 = vld [vmem:[%s2663_s19] sm:$0xf] }
 0x8f7   : > { %1524 = vmax.xlane.f32.xlu0 %v1523_v54  ;;  %v1468_v55 = vpop.f32.mrf.mxu0  ;;  %v1515_v57 = vpop.f32.mrf.mxu1 }
 0x8f8   : > { %v1522_v58 = vmul.f32 0.25, %v1515_v57  ;;  %v2555_v55 = vld [vmem:[%s2663_s19 + $0x4] sm:$0xf] }
 0x8f9   : > { %v2417_v59 = vpop.f32.mrf.mxu0  ;;  %v2422_v60 = vpop.f32.mrf.mxu1 }
 0x8fa   : > { %v1526_v61 = vsel %vm850_vm4, %v1522_v58, -inf }
 0x8fb   : > { %1527 = vmax.xlane.f32.xlu1 %v1526_v61  ;;  %v1518_v62 = vpop.f32.mrf.mxu1 }
 0x8fd   : > { %v2423_v63 = vpop.f32.mrf.mxu1 }
 0x90c   : > { %1595 = vrot.lane.b32.xlu1 %v2742_v16, %s2572_s27 }
 0x910   : > { %1645 = vrot.lane.b32.xlu1 %v2828_v53, %s2572_s27 }
 0x914   : > { %1647 = vrot.lane.b32.xlu1 %v2830_v56, %s2572_s27 }
 0x918   : > { %1655 = vrot.lane.b32.xlu1 %v1415_v45, %s2570_s25 }
 0x980   : > { %v1525_v1 = vpop.xlane.xlu0 %1524 }
 0x981   : > { %v1529_v3 = vsub.f32 %v1521_v50, %v1525_v1 }
 0x983   : > { %v1531_v4 = vmul.f32 1.442695, %v1529_v3 }
 0x984   : > { %v1528_v5 = vpop.xlane.xlu1 %1527 }
 0x985   : > { %2538 = vpow2.f32 %v1531_v4  ;;  %v1530_v6 = vsub.f32 %v1522_v58, %v1528_v5 }
 0x987   : > { %v1533_v7 = vmul.f32 1.442695, %v1530_v6 }
 0x988   : > { %v1596_v8 = vpop.permute.xlu1 %1595 }
 0x989   : > { %2540 = vpow2.f32 %v1533_v7  ;;  %v1601_v9 = vsel %vm882_vm5, %v1596_v8, 0 }
 0x98a   : > { %2431 = vmatpush3.bf16.msra.mxu1 %v1601_v9  ;;  %v2478_v9 = vld [vmem:[%s3020_s10 + $0x30] ss:$8 sps:$4 sm:$0xff]  }
 0x98c   : > { %v1646_v36 = vpop.permute.xlu1 %1645 }
 0x98d   : > { %v1667_v39 = vsel %vm755_vm3, %v2792_v0, %v1646_v36  ;;  %v2496_v36 = vld [vmem:[%s3022_s12 + $0x60] sm:$0xff]  }
 0x990   : > { %v1648_v21 = vpop.permute.xlu1 %1647 }
 0x991   : > { %v1668_v40 = vsel %vm755_vm3, %v2794_v2, %v1648_v21  ;;  %v2497_v21 = vld [vmem:[%s3022_s12 + $0x20] sm:$0xff]  }
 0x992   : > { %v2539_v10 = vpop.eup %2538 }
 0x993   : > { %v1535_v16 = vsel %vm850_vm4, %v2539_v10, 0.0 }
 0x994   : > { %1536 = vadd.xlane.f32.xlu0 %v1535_v16  ;;  %v1656_v37 = vpop.permute.xlu1 %1655  ;;  %v2483_v16 = vld [vmem:[%s3020_s10 + $0x24] ss:$8 sps:$4 sm:$0xff]  }
 0x995   : > { %v1671_v41 = vsel %vm1669_vm7, %v1668_v40, %v1656_v37  ;;  %v2499_v37 = vld [vmem:[%s3022_s12 + $0x18] sm:$0xff]   ;;  %v2502_v40 = vld [vmem:[%s3022_s12 + $0x48] sm:$0xff]  }
 0x996   : > { %v2541_v53 = vpop.eup %2540 }
 0x997   : > { %v1538_v56 = vsel %vm850_vm4, %v2541_v53, 0.0 }
 0x998   : > { %1539 = vadd.xlane.f32.xlu0 %v1538_v56  ;;  %v2573_v56 = vmov 0  }
 0x9ae   : > { %1547 = vrot.lane.b32.xlu0 %v2740_v13, %s2572_s27 }
 0x9b2   : > { %1653 = vrot.lane.b32.xlu0 %v1367_v42, %s2570_s25 }
 0xa1d   : > { %v1537_v11 = vpop.xlane.xlu0 %1536 }
 0xa1e   : > { %2542 = vrcp.f32 %v1537_v11  ;;  %v2486_v11 = vld [vmem:[%s3020_s10 + $0x14] ss:$8 sps:$4 sm:$0xff]  }
 0xa21   : > { %v1540_v12 = vpop.xlane.xlu0 %1539 }
 0xa22   : > { %2544 = vrcp.f32 %v1540_v12  ;;  %v2484_v12 = vld [vmem:[%s3020_s10 + $0x10] ss:$8 sps:$4 sm:$0xff]  }
 0xa25   : > { %v1548_v14 = vpop.permute.xlu0 %1547 }
 0xa26   : > { %v1553_v15 = vsel %vm882_vm5, %v1548_v14, 0  ;;  %v2489_v14 = vld [vmem:[%s3020_s10 + $0x4] ss:$8 sps:$4 sm:$0xff]  }
 0xa27   : > { %2425 = vmatpush3.bf16.msra.mxu0 %v1553_v15  ;;  %v2487_v15 = vld [vmem:[%s3020_s10] ss:$8 sps:$4 sm:$0xff]  }
 0xa28   : > { %2436 = vmatprep.subr.bf16.mxu0 %v2564_v29 }
 0xa2b   : > { %v2543_v17 = vpop.eup %2542 }
 0xa2c   : > { %v1543_v18 = vmul.f32 %v2543_v17, %v2539_v10  ;;  %v2480_v10 = vld [vmem:[%s3020_s10 + $0x34] ss:$8 sps:$4 sm:$0xff]  }
 0xa2d   : > { %1869 = vmatprep.subr.bf16.mxu1 %v2480_v10 }
 0xa2e   : > { %v1545_v19 = vpack.c.bf16 %v1543_v18, %v1543_v18 }
 0xa2f   : > { %v2545_v20 = vpop.eup %2544 }
 0xa30   : > { %2427 = vmatmul.mubr.msk.bf16.vlgmr.msra.gmra.mxu0 %vm878_vm6, %v1545_v19  ;;  %v1544_v23 = vmul.f32 %v2545_v20, %v2541_v53  ;;  %v2481_v53 = vld [vmem:[%s3020_s10 + $0x20] ss:$8 sps:$4 sm:$0xff]  }
 0xa31   : > { %2444 = vmatprep.mubr.msk.bf16.mxu0 %vm2565_vm1, %v2564_v29  ;;  %2437 = vmatpush3.bf16.msra.mxu0 %v2474_v24 }
 0xa32   : > { %v1546_v13 = vpack.c.bf16 %v1544_v23, %v1544_v23  ;;  %2438 = vmatprep.subr.bf16.mxu0 %v2564_v29 }
 0xa34   : > { %2433 = vmatmul.mubr.msk.bf16.vlgmr.msra.gmra.mxu1 %vm878_vm6, %v1546_v13 }
 0xa35   : > { %2439 = vmatpush3.bf16.msra.mxu0 %v2475_v25  ;;  %1870 = vmatpush1.bf16.msra.mxu1 %v2478_v9 }
 0xa36   : > { %2440 = vmatprep.subr.bf16.mxu0 %v2564_v29  ;;  %1893 = vmatprep.mubr.bf16.mxu1 %v2573_v56 }
 0xa37   : > { %1871 = vmatprep.subr.bf16.mxu1 %v2483_v16 }
 0xa39   : > { %2441 = vmatpush3.bf16.msra.mxu0 %v2476_v22  ;;  %1872 = vmatpush1.bf16.msra.mxu1 %v2481_v53 }
 0xa3a   : > { %2442 = vmatprep.subr.bf16.mxu0 %v2564_v29  ;;  %v1654_v29 = vpop.permute.xlu0 %1653  ;;  %1873 = vmatprep.subr.bf16.mxu1 %v2486_v11 }
 0xa3b   : > { %v1670_v42 = vsel %vm1669_vm7, %v1667_v39, %v1654_v29  ;;  %v2498_v29 = vld [vmem:[%s3022_s12 + $0x58] sm:$0xff]   ;;  %v2501_v39 = vld [vmem:[%s3022_s12 + $0x10] sm:$0xff]  }
 0xa3d   : > { %2443 = vmatpush3.bf16.msra.mxu0 %v2477_v26  ;;  %1874 = vmatpush1.bf16.msra.mxu1 %v2484_v12 }
 0xa3e   : > { %1875 = vmatprep.subr.bf16.mxu1 %v2489_v14 }
 0xa41   : > { %1876 = vmatpush1.bf16.msra.mxu1 %v2487_v15 }
 0xaf0   : > { %v1589_v27 = vpop.f32.mrf.mxu0 }
 0xaf1   : > { %1661 = vrot.lane.b32.xlu0 %v1589_v27, %s2568_s23 }
 0xaf2   : > { %v2428_v28 = vpop.f32.mrf.mxu0 }
 0xaf4   : > { %v1592_v30 = vpop.f32.mrf.mxu0  ;;  %v1637_v31 = vpop.f32.mrf.mxu1 }
 0xaf5   : > { %1663 = vrot.lane.b32.xlu1 %v1637_v31, %s2568_s23  ;;  %v2490_v30 = vld [vmem:[%s3022_s12 + $0x78] sm:$0xff]   ;;  %s491_s23 = scalar_lea.vmem %s3024_s14, %s2657_s16 }
 0xaf6   : > { %v2429_v32 = vpop.f32.mrf.mxu0  ;;  %v2434_v33 = vpop.f32.mrf.mxu1  ;;  %v2491_v31 = vld [vmem:[%s3022_s12 + $0x38] sm:$0xff]   ;;  %2294 = vmatprep.subr.bf16.mxu0 %v2490_v30 }
 0xaf7   : > { %v2492_v32 = vld [vmem:[%s3022_s12 + $0x70] sm:$0xff]  }
 0xaf8   : > { %v1640_v34 = vpop.f32.mrf.mxu1  ;;  %v2493_v33 = vld [vmem:[%s3022_s12 + $0x30] sm:$0xff]  }
 0xaf9   : > { %v2494_v34 = vld [vmem:[%s3022_s12 + $0x68] sm:$0xff]  }
 0xafa   : > { %v2435_v35 = vpop.f32.mrf.mxu1 }
 0xafb   : > { %v2495_v35 = vld [vmem:[%s3022_s12 + $0x28] sm:$0xff]  }
 0xb63   : > { %v1662_v38 = vpop.permute.xlu0 %1661 }
 0xb64   : > { %v1673_v44 = vsel %vm1672_vm8, %v1670_v42, %v1662_v38  ;;  %v2500_v38 = vld [vmem:[%s3022_s12 + $0x50] sm:$0xff]   ;;  %v2504_v42 = vld [vmem:[%s3022_s12 + $0x40] sm:$0xff]  }
 0xb67   : > { %v1664_v43 = vpop.permute.xlu1 %1663 }
 0xb68   : > { %v1674_v45 = vsel %vm1672_vm8, %v1671_v41, %v1664_v43  ;;  %v2503_v41 = vld [vmem:[%s3022_s12 + $0x8] sm:$0xff]   ;;  %v2505_v43 = vld [vmem:[%s3022_s12] sm:$0xff]  }
 0xb69   : > { %v1677_v46 = vcombine.low %v1673_v44, %v1674_v45  ;;  %v1808_v44 = vlaneseq }
 0xb6b   : > { %v1679_v47 = vpack.c.bf16 %v1677_v46, %v1677_v46  ;;  %v1809_v45 = vshrl.u32 %v1808_v44, 7 }
 0xb6d   : > { %2445 = vmatmul.mubr.msk.bf16.vlgmr.msra.gmra.mxu0 %vm614_vm2, %v1679_v47  ;;  %v1810_v46 = vsub.s32 0, %v1809_v45  ;;  %v1806_v47 = vld [vmem:[%s3021_s11] sm:$0x3] }
 0xb6e   : > { %2295 = vmatpush3.bf16.msra.mxu0 %v2491_v31 }
 0xb6f   : > { %2296 = vmatprep.subr.bf16.mxu0 %v2492_v32 }
 0xb72   : > { %2297 = vmatpush3.bf16.msra.mxu0 %v2493_v33 }
 0xb73   : > { %2298 = vmatprep.subr.bf16.mxu0 %v2494_v34 }
 0xb76   : > { %2299 = vmatpush3.bf16.msra.mxu0 %v2495_v35 }
 0xb77   : > { %2300 = vmatprep.subr.bf16.mxu0 %v2496_v36 }
 0xb7a   : > { %2301 = vmatpush3.bf16.msra.mxu0 %v2497_v21 }
 0xb7b   : > { %2302 = vmatprep.subr.bf16.mxu0 %v2498_v29 }
 0xb7e   : > { %2303 = vmatpush3.bf16.msra.mxu0 %v2499_v37 }
 0xb7f   : > { %2304 = vmatprep.subr.bf16.mxu0 %v2500_v38 }
 0xb82   : > { %2305 = vmatpush3.bf16.msra.mxu0 %v2501_v39 }
 0xb83   : > { %2306 = vmatprep.subr.bf16.mxu0 %v2502_v40 }
 0xb86   : > { %2307 = vmatpush3.bf16.msra.mxu0 %v2503_v41 }
 0xb87   : > { %2308 = vmatprep.subr.bf16.mxu0 %v2504_v42 }
 0xb8a   : > { %2309 = vmatpush3.bf16.msra.mxu0 %v2505_v43 }
 0xc2d   : > { %v1756_v49 = vpop.f32.mrf.mxu0 }
 0xc2e   : > { %v1757_v50 = vadd.f32 %v2213_v48, %v1756_v49  ;;  %v1814_v48 = vsub.s32 1, %v1809_v45  ;;  %v1811_v49 = vrot.slane %v1806_v47, %v1810_v46 }
 0xc2f   : > { %v2446_v0 = vpop.f32.mrf.mxu0 }
 0xc30   : > { %v1763_v51 = vcombine.high %v1757_v50, %v1757_v50  ;;  %v2907_v2 = vadd.f32 %v2554_v52, %v1757_v50  ;;  %v1815_v50 = vrot.slane %v1806_v47, %v1814_v48 }
 0xc31   : > { %v1759_v54 = vpop.f32.mrf.mxu0 }
 0xc32   : > { %v2910_v57 = vadd.f32 %v2555_v55, %v1763_v51  ;;  %v1767_v58 = vsel %vm498_vm0, %v2907_v2, 0.0 }
 0xc33   : > { %1768 = vadd.xlane.f32.xlu0 %v1767_v58  ;;  %v2447_v59 = vpop.f32.mrf.mxu0 }
 0xc34   : > { %v1770_v60 = vsel %vm498_vm0, %v2910_v57, 0.0 }
 0xc35   : > { %1771 = vadd.xlane.f32.xlu1 %v1770_v60 }
 0xcbc   : > { %v1769_v61 = vpop.xlane.xlu0 %1768 }
 0xcbd   : > { %v1773_v62 = vmul.f32 0.015625, %v1769_v61 }
 0xcbe   : > { %v1772_v63 = vpop.xlane.xlu1 %1771 }
 0xcbf   : > { %v1775_v1 = vsub.f32 %v2907_v2, %v1773_v62  ;;  %v1774_v3 = vmul.f32 0.015625, %v1772_v63 }
 0xcc1   : > { %v1776_v4 = vsub.f32 %v2910_v57, %v1774_v3  ;;  %v1777_v5 = vmul.f32 %v1775_v1, %v1775_v1 }
 0xcc3   : > { %v1779_v6 = vsel %vm498_vm0, %v1777_v5, 0.0  ;;  %v1778_v7 = vmul.f32 %v1776_v4, %v1776_v4 }
 0xcc4   : > { %1780 = vadd.xlane.f32.xlu0 %v1779_v6 }
 0xcc5   : > { %v1782_v8 = vsel %vm498_vm0, %v1778_v7, 0.0 }
 0xcc8   : > { %1783 = vadd.xlane.f32.xlu0 %v1782_v8 }
 0xd4d   : > { %v1781_v17 = vpop.xlane.xlu0 %1780 }
 0xd4e   : > { %v1785_v18 = vmul.f32 0.015625, %v1781_v17  ;;  %v2228_v17 = vld [vmem:[%s3023_s13] ss:$0 sm:$0xff] }
 0xd50   : > { %v1787_v19 = vadd.f32 1e-06, %v1785_v18 }
 0xd51   : > { %v1784_v20 = vpop.xlane.xlu0 %1783 }
 0xd52   : > { %v1786_v23 = vmul.f32 0.015625, %v1784_v20  ;;  %2546 = vrsqrt.f32 %v1787_v19 }
 0xd54   : > { %v1788_v13 = vadd.f32 1e-06, %v1786_v23 }
 0xd56   : > { %2548 = vrsqrt.f32 %v1788_v13 }
 0xd5f   : > { %v2547_v24 = vpop.eup %2546 }
 0xd60   : > { %v1791_v22 = vmul.f32 %v2547_v24, %v1775_v1 }
 0xd63   : > { %v2549_v25 = vpop.eup %2548 }
 0xd64   : > { %v1792_v26 = vmul.f32 %v2549_v25, %v1776_v4 }
 0xd66   : > { %v1795_v27 = vcombine.low %v1791_v22, %v1792_v26 }
 0xd68   : > { %v1797_v28 = vpack.c.bf16 %v1795_v27, %v1795_v27 }
 0xd6a   : > { %2227 = vmatmul.mubr.msk.bf16.vlgmr.msra.gmra.mxu1 %vm614_vm2, %v1797_v28 }
 0xe2a   : > { %v1895_v0 = vpop.f32.mrf.mxu1 }
 0xe2b   : > { %v1896_v51 = vadd.f32 %v1895_v0, %v1811_v49 }
 0xe2c   : > { %v1897_v52 = vpop.f32.mrf.mxu1 }
 0xe2d   : > { %v1904_v54 = vmul.f32 0.044715, %v1896_v51  ;;  %v1898_v55 = vadd.f32 %v1897_v52, %v1815_v50  ;;  %v1902_v10 = vmul.f32 0.5, %v1896_v51 }
 0xe2e   : > { %v1899_v58 = vpop.f32.mrf.mxu1 }
 0xe2f   : > { %v1906_v59 = vmul.f32 %v1904_v54, %v1896_v51  ;;  %v1905_v60 = vmul.f32 0.044715, %v1898_v55  ;;  %v1903_v16 = vmul.f32 0.5, %v1898_v55 }
 0xe30   : > { %v1900_v61 = vpop.f32.mrf.mxu1 }
 0xe31   : > { %v1908_v62 = vmul.f32 %v1906_v59, %v1896_v51  ;;  %v1907_v63 = vmul.f32 %v1905_v60, %v1898_v55 }
 0xe33   : > { %v1910_v1 = vadd.f32 %v1908_v62, %v1896_v51  ;;  %v1909_v3 = vmul.f32 %v1907_v63, %v1898_v55 }
 0xe35   : > { %v1912_v4 = vmul.f32 0.7978846, %v1910_v1  ;;  %v1911_v5 = vadd.f32 %v1909_v3, %v1898_v55 }
 0xe37   : > { %v1913_v6 = vmul.f32 0.7978846, %v1911_v5  ;;  %2550 = vtanh.f32 %v1912_v4 }
 0xe39   : > { %2552 = vtanh.f32 %v1913_v6 }
 0xe44   : > { %v2551_v7 = vpop.eup %2550 }
 0xe45   : > { %v1916_v8 = vadd.f32 1.0, %v2551_v7 }
 0xe46   : > { %v2553_v9 = vpop.eup %2552 }
 0xe47   : > { %v1917_v53 = vadd.f32 1.0, %v2553_v9  ;;  %v1918_v56 = vmul.f32 %v1916_v8, %v1902_v10 }
 0xe49   : > { %v1919_v11 = vmul.f32 %v1917_v53, %v1903_v16  ;;  %v1920_v14 = vpack.c.bf16 %v1918_v56, %v1918_v56 }
 0xe4b   : > { %v1921_v12 = vpack.c.bf16 %v1919_v11, %v1919_v11 }
 0xe4d   : > { %2089 = vmatprep.mubr.bf16.mxu0 %v1921_v12 }
 0xe4e   : > { %2090 = vmatmul.mubr.bf16.vlgmr.msra.gmra.mxu0 %v1920_v14 }
 0xf0e   : > { %v2310_v15 = vpop.f32.mrf.mxu0 }
 0xf10   : > { %v2311_v18 = vpop.f32.mrf.mxu0 }
 0xf11   : > { %v2312_v19 = vadd.f32 %v2311_v18, %v2310_v15 }
 0xf12   : > { %v2313_v20 = vpop.f32.mrf.mxu0 }
 0xf13   : > { %v2092_v23 = vadd.f32 %v2312_v19, %v2228_v17 }
 0xf14   : > { %v2314_v13 = vpop.f32.mrf.mxu0 }
 0xf15   : > { %v2098_v24 = vcombine.high %v2092_v23, %v2092_v23  ;;  %v2100_v25 = vadd.f32 %v2092_v23, %v2907_v2 }
 0xf17   : > { %v2101_v22 = vadd.f32 %v2098_v24, %v2910_v57  ;;  %2102 = vst.msk [vmem:[%s491_s23] sm:$0xf] %vm498_vm0, %v2100_v25 }
 0xf19   : > { %2103 = vst.msk [vmem:[%s491_s23 + $0x4] sm:$0xf] %vm498_vm0, %v2101_v22 }
 0xf1a PF: > { %s24_s29 = sadd.s32 1, %s2562_s29  }
 0xf1b   : > { %p21_p4 = scmp.ge.s32.totalorder %s24_s29, 4  }
 0xf1d   :  { %23 = sbr.rel (!%p21_p4) target bundleno = 1 (0x1), region = 109 }

// kernel: _lambda_.26
= control target key start
LH: loop header
LB: loop body
LE: loop exit
PB: predicated region body
PF: predicated region fallthrough
CT: control target
= control target key end

     0   :  { %s2332_s30 = smov 0   ;;  %s2685_s0 = inlined_call_operand.vmem [shape: f32[4,4,64], index: 0, kind: input, shape index: {}]   ;;  %s2686_s1 = inlined_call_operand.vmem [shape: bf16[64,192], index: 1, kind: input, shape index: {}]   ;;  %s2687_s2 = inlined_call_operand.vmem [shape: f32[1,192], index: 2, kind: input, shape index: {}]   ;;  %s2688_s3 = inlined_call_operand.vmem [shape: bf16[64,64], index: 3, kind: input, shape index: {}]   ;;  %s2689_s4 = inlined_call_operand.vmem [shape: f32[1,64], index: 4, kind: input, shape index: {}]   ;;  %s2690_s5 = inlined_call_operand.vmem [shape: bf16[64,256], index: 5, kind: input, shape index: {}]   ;;  %s2691_s6 = inlined_call_operand.vmem [shape: f32[1,256], index: 6, kind: input, shape index: {}]   ;;  %s2692_s7 = inlined_call_operand.vmem [shape: bf16[256,64], index: 7, kind: input, shape index: {}]   ;;  %s2693_s8 = inlined_call_operand.vmem [shape: f32[1,64], index: 8, kind: input, shape index: {}]   ;;  %s2694_s9 = inlined_call_operand.vmem [shape: f32[4,4,64], index: 9, kind: output, shape index: {}]  }
   0x1 LB: > { %s1906_s10 = sadd.s32 4294967295, %s2270_s30   ;;  %p1910_p0 = scmp.ge.s32.totalorder %s2270_s30, 1  ;;  %s2270_s30 = sphi %s2332_s30, %s19_s30  }
   0x2   : > { %p288_p1 = scmp.lt.s32.totalorder %s2270_s30, 3 }
   0x4   : > { %p289_p2 = pnand %p1910_p0, %p288_p1 }
   0x5   : > { %s1911_s11 = sshll.u32 (!%p289_p2), %s1906_s10, 1  ;;  %s2275_s16 = smov (!%p289_p2), 64  }
   0x6   : > { %292 = sbr.rel (%p289_p2) target bundleno = 3973 (0xf85), region = 56  ;;  %p325_p3 = scmp.lt.s32.totalorder (!%p289_p2), %s1911_s11, 3 }
   0x7   : > { %s2276_s17 = smov (!%p289_p2), 48   ;;  %s2277_s18 = smov (!%p289_p2), 112  }
   0x8   : > { %s2278_s19 = smov (!%p289_p2), 32   ;;  %s2279_s20 = smov (!%p289_p2), 96  }
   0x9   : > { %s2280_s21 = smov (!%p289_p2), 16   ;;  %s2281_s22 = smov (!%p289_p2), 80  }
   0xb   : > { %vm339_vm0 = vcmask 519168   ;;  %s2696_s11 = smov (!%p325_p3, %s1911_s11), 3  ;;  %v2176_v14 = vld [vmem:[%s2686_s1 + $0x34] ss:$8 sps:$4 sm:$0xff]   ;;  %v2178_v15 = vld [vmem:[%s2686_s1 + $0x30] ss:$8 sps:$4 sm:$0xff]   ;;  %v382_v36 = vlaneseq }
   0xc   : > { %s1912_s12 = sshll.u32 %s2696_s11, 2  ;;  %v2179_v16 = vld [vmem:[%s2686_s1 + $0x24] ss:$8 sps:$4 sm:$0xff]   ;;  %444 = vmatprep.subr.bf16.mxu1 %v2176_v14  ;;  %v2181_v17 = vld [vmem:[%s2686_s1 + $0x20] ss:$8 sps:$4 sm:$0xff]   ;;  %v2272_v18 = vmov 0  }
   0xd   : > { %s328_s15 = scalar_lea.vmem %s2685_s0, %s1912_s12  ;;  %445 = vmatpush1.bf16.msra.mxu1 %v2178_v15  ;;  %468 = vmatprep.mubr.bf16.mxu1 %v2272_v18  ;;  %v2182_v19 = vld [vmem:[%s2686_s1 + $0x14] ss:$8 sps:$4 sm:$0xff]   ;;  %v2184_v20 = vld [vmem:[%s2686_s1 + $0x10] ss:$8 sps:$4 sm:$0xff]   ;;  %v2185_v21 = vld [vmem:[%s2686_s1 + $0x4] ss:$8 sps:$4 sm:$0xff]  }
   0xe   : > { %v2348_v0 = vld [vmem:[%s328_s15] sm:$0xf]  ;;  %v2350_v1 = vld [vmem:[%s328_s15 + $0x4] sm:$0xf]  ;;  %446 = vmatprep.subr.bf16.mxu1 %v2179_v16  ;;  %vm432_vm1 = vcmask 523264   ;;  %v2273_v35 = vmov 0.0   ;;  %s334_s15 = scalar_lea.vmem %s2694_s9, %s1912_s12 }
   0xf   : > { %v340_v2 = vsel %vm339_vm0, %v2348_v0, 0.0  ;;  %v343_v3 = vsel %vm339_vm0, %v2350_v1, 0.0  ;;  %v2187_v22 = vld [vmem:[%s2686_s1] ss:$8 sps:$4 sm:$0xff]   ;;  %2047 = vmatprep.subr.bf16.mxu0 %v2273_v35  ;;  %v2388_v37 = vshrl.u32 %v382_v36, 7  ;;  %vm2274_vm2 = vmmov 0  }
  0x10   : > { %341 = vadd.xlane.f32.xlu0 %v340_v2  ;;  %v380_v40 = vld [vmem:[%s2687_s2] sm:$0x3]  ;;  %2049 = vmatprep.mubr.msk.bf16.mxu0 %vm2274_vm2, %v2273_v35  ;;  %vm621_vm3 = vcmask 1041408   ;;  %vm494_vm4 = vcmask 130048   ;;  %vm592_vm5 = vcmask 27648   ;;  %vm617_vm6 = vcmask 31744  }
  0x11   : > { %447 = vmatpush1.bf16.msra.mxu1 %v2181_v17  ;;  %v384_v38 = vsub.s32 0, %v2388_v37  ;;  %v388_v39 = vsub.s32 1, %v2388_v37  ;;  %vm1415_vm7 = vcmask 261120   ;;  %vm1418_vm8 = vcmask 392192  }
  0x12   : > { %448 = vmatprep.subr.bf16.mxu1 %v2182_v19 }
  0x13   : > { %v385_v41 = vrot.slane %v380_v40, %v384_v38  ;;  %v389_v42 = vrot.slane %v380_v40, %v388_v39 }
  0x14   : > { %344 = vadd.xlane.f32.xlu0 %v343_v3 }
  0x15   : > { %449 = vmatpush1.bf16.msra.mxu1 %v2184_v20 }
  0x16   : > { %450 = vmatprep.subr.bf16.mxu1 %v2185_v21 }
  0x19   : > { %451 = vmatpush1.bf16.msra.mxu1 %v2187_v22 }
  0x1a   : > { %2035 = vmatprep.subr.bf16.mxu1 %v2273_v35 }
  0x99   : > { %v342_v4 = vpop.xlane.xlu0 %341 }
  0x9a   : > { %v347_v5 = vmul.f32 0.015625, %v342_v4 }
  0x9c   : > { %v349_v6 = vsub.f32 %v2348_v0, %v347_v5 }
  0x9d   : > { %v345_v7 = vpop.xlane.xlu0 %344 }
  0x9e   : > { %v348_v8 = vmul.f32 0.015625, %v345_v7  ;;  %v351_v9 = vmul.f32 %v349_v6, %v349_v6 }
  0xa0   : > { %v350_v10 = vsub.f32 %v2350_v1, %v348_v8  ;;  %v353_v11 = vsel %vm339_vm0, %v351_v9, 0.0 }
  0xa1   : > { %354 = vadd.xlane.f32.xlu1 %v353_v11 }
  0xa2   : > { %v352_v12 = vmul.f32 %v350_v10, %v350_v10 }
  0xa4   : > { %v356_v13 = vsel %vm339_vm0, %v352_v12, 0.0 }
  0xa5   : > { %357 = vadd.xlane.f32.xlu1 %v356_v13 }
 0x12a   : > { %v355_v23 = vpop.xlane.xlu1 %354 }
 0x12b   : > { %v359_v24 = vmul.f32 0.015625, %v355_v23 }
 0x12d   : > { %v361_v25 = vadd.f32 1e-06, %v359_v24 }
 0x12e   : > { %v358_v26 = vpop.xlane.xlu1 %357 }
 0x12f   : > { %v360_v27 = vmul.f32 0.015625, %v358_v26  ;;  %2220 = vrsqrt.f32 %v361_v25 }
 0x131   : > { %v362_v28 = vadd.f32 1e-06, %v360_v27 }
 0x133   : > { %2222 = vrsqrt.f32 %v362_v28 }
 0x13c   : > { %v2221_v29 = vpop.eup %2220 }
 0x13d   : > { %v365_v31 = vmul.f32 %v2221_v29, %v349_v6 }
 0x140   : > { %v2223_v30 = vpop.eup %2222 }
 0x141   : > { %v366_v32 = vmul.f32 %v2223_v30, %v350_v10 }
 0x143   : > { %v369_v33 = vcombine.low %v365_v31, %v366_v32 }
 0x145   : > { %v371_v34 = vpack.c.bf16 %v369_v33, %v369_v33 }
 0x147   : > { %1923 = vmatmul.mubr.msk.bf16.vlgmr.msra.gmra.mxu1 %vm432_vm1, %v371_v34 }
 0x148   : > { %2037 = vmatprep.mubr.msk.bf16.mxu1 %vm2274_vm2, %v2273_v35 }
 0x207   : > { %v470_v43 = vpop.f32.mrf.mxu1 }
 0x208   : > { %v471_v45 = vadd.f32 %v470_v43, %v385_v41 }
 0x209   : > { %v472_v44 = vpop.f32.mrf.mxu1 }
 0x20a   : > { %v473_v46 = vadd.f32 %v472_v44, %v389_v42 }
 0x20b   : > { %v474_v47 = vpop.f32.mrf.mxu1 }
 0x20c   : > { %v479_v48 = vcombine.low %v471_v45, %v473_v46  ;;  %v480_v49 = vcombine.high %v471_v45, %v473_v46  ;;  %v1924_v50 = vcombine.low %v473_v46, %v473_v46  ;;  %v1925_v51 = vcombine.high %v473_v46, %v473_v46 }
 0x20d   : > { %v475_v52 = vpop.f32.mrf.mxu1 }
 0x20e   : > { %v2403_v53 = vpack.c.bf16 %v479_v48, %v479_v48  ;;  %v2405_v54 = vpack.c.bf16 %v480_v49, %v480_v49  ;;  %v489_v55 = vpack.c.bf16 %v1924_v50, %v1924_v50  ;;  %v2407_v56 = vpack.i.bf16 %v1925_v51, %v1924_v50 }
 0x20f   : > { %v490_v62 = vpack.c.bf16 %v1925_v51, %v1925_v51 }
 0x210   : > { %542 = vrot.lane.b32.xlu1 %v2405_v54, %s2275_s16  ;;  %492 = vrot.lane.b32.xlu0 %v2403_v53, %s2275_s16  ;;  %v623_v57 = vsel %vm621_vm3, %v489_v55, 0 }
 0x211   : > { %2048 = vmatpush3.bf16.msra.mxu0 %v623_v57  ;;  %v669_v63 = vsel %vm621_vm3, %v490_v62, 0 }
 0x212   : > { %2059 = vmatprep.subr.bf16.mxu0 %v2273_v35 }
 0x282   : > { %v493_v58 = vpop.permute.xlu0 %492  ;;  %v543_v60 = vpop.permute.xlu1 %542 }
 0x283   : > { %v499_v59 = vsel %vm494_vm4, %v493_v58, 0  ;;  %v548_v61 = vsel %vm494_vm4, %v543_v60, 0 }
 0x284   : > { %2036 = vmatpush3.bf16.xpose.msra.mxu1 %v499_v59 }
 0x285   : > { %2041 = vmatprep.subr.bf16.mxu1 %v2273_v35 }
 0x28b   : > { %2038 = vmatmul.mubr.msk.bf16.vlgmr.msra.gmra.mxu1 %vm494_vm4, %v2403_v53 }
 0x28c   : > { %2042 = vmatpush3.bf16.xpose.msra.mxu1 %v548_v61  ;;  %2043 = vmatprep.mubr.msk.bf16.mxu1 %vm2274_vm2, %v2273_v35 }
 0x28d   : > { %2053 = vmatprep.subr.bf16.mxu1 %v2273_v35 }
 0x293   : > { %2044 = vmatmul.mubr.msk.bf16.vlgmr.msra.gmra.mxu1 %vm494_vm4, %v2405_v54 }
 0x294   : > { %2054 = vmatpush3.bf16.msra.mxu1 %v669_v63  ;;  %2055 = vmatprep.mubr.msk.bf16.mxu1 %vm2274_vm2, %v2273_v35 }
 0x295   : > { %2065 = vmatprep.subr.bf16.mxu1 %v2273_v35 }
 0x34b   : > { %v535_v2 = vpop.f32.mrf.mxu1 }
 0x34c   : > { %v590_v3 = vmul.f32 0.25, %v535_v2 }
 0x34d   : > { %v2039_v4 = vpop.f32.mrf.mxu1 }
 0x34e   : > { %v593_v5 = vsel %vm592_vm5, %v590_v3, -inf }
 0x34f   : > { %594 = vmax.xlane.f32.xlu1 %v593_v5  ;;  %v538_v6 = vpop.f32.mrf.mxu1 }
 0x351   : > { %v2040_v7 = vpop.f32.mrf.mxu1 }
 0x353   : > { %v584_v8 = vpop.f32.mrf.mxu1 }
 0x354   : > { %v591_v9 = vmul.f32 0.25, %v584_v8 }
 0x355   : > { %v2045_v10 = vpop.f32.mrf.mxu1 }
 0x356   : > { %v596_v11 = vsel %vm592_vm5, %v591_v9, -inf }
 0x357   : > { %597 = vmax.xlane.f32.xlu0 %v596_v11  ;;  %v587_v12 = vpop.f32.mrf.mxu1 }
 0x359   : > { %v2046_v13 = vpop.f32.mrf.mxu1 }
 0x360   : > { %771 = vrot.lane.b32.xlu1 %v2405_v54, %s2276_s17 }
 0x3d8   : > { %v595_v14 = vpop.xlane.xlu1 %594 }
 0x3d9   : > { %v599_v15 = vsub.f32 %v590_v3, %v595_v14 }
 0x3db   : > { %v601_v16 = vmul.f32 1.442695, %v599_v15 }
 0x3dc   : > { %v772_v26 = vpop.permute.xlu1 %771 }
 0x3dd   : > { %2224 = vpow2.f32 %v601_v16  ;;  %v777_v41 = vsel %vm494_vm4, %v772_v26, 0 }
 0x3e0   : > { %v598_v17 = vpop.xlane.xlu0 %597 }
 0x3e1   : > { %v600_v19 = vsub.f32 %v591_v9, %v598_v17 }
 0x3e3   : > { %v603_v20 = vmul.f32 1.442695, %v600_v19 }
 0x3e5   : > { %2226 = vpow2.f32 %v603_v20 }
 0x3ea   : > { %v2225_v21 = vpop.eup %2224 }
 0x3eb   : > { %v605_v22 = vsel %vm592_vm5, %v2225_v21, 0.0 }
 0x3ec   : > { %606 = vadd.xlane.f32.xlu0 %v605_v22 }
 0x3f2   : > { %v2227_v23 = vpop.eup %2226 }
 0x3f3   : > { %v608_v24 = vsel %vm592_vm5, %v2227_v23, 0.0 }
 0x3f4   : > { %609 = vadd.xlane.f32.xlu1 %v608_v24 }
 0x402   : > { %721 = vrot.lane.b32.xlu0 %v2403_v53, %s2276_s17 }
 0x405   : > { %719 = vrot.lane.b32.xlu1 %v2403_v53, %s2277_s18 }
 0x409   : > { %769 = vrot.lane.b32.xlu1 %v2405_v54, %s2277_s18 }
 0x475   : > { %v607_v25 = vpop.xlane.xlu0 %606 }
 0x476   : > { %2228 = vrcp.f32 %v607_v25 }
 0x479   : > { %v722_v30 = vpop.permute.xlu0 %721 }
 0x47a   : > { %v727_v32 = vsel %vm494_vm4, %v722_v30, 0 }
 0x47d   : > { %v610_v27 = vpop.xlane.xlu1 %609 }
 0x47e   : > { %2230 = vrcp.f32 %v610_v27 }
 0x481   : > { %v720_v40 = vpop.permute.xlu1 %719 }
 0x483   : > { %v2229_v28 = vpop.eup %2228 }
 0x484   : > { %v613_v29 = vmul.f32 %v2229_v28, %v2225_v21 }
 0x485   : > { %v770_v42 = vpop.permute.xlu1 %769 }
 0x486   : > { %v615_v31 = vpack.c.bf16 %v613_v29, %v613_v29 }
 0x488   : > { %2050 = vmatmul.mubr.msk.bf16.vlgmr.msra.gmra.mxu0 %vm617_vm6, %v615_v31 }
 0x489   : > { %2060 = vmatpush3.bf16.xpose.msra.mxu0 %v727_v32  ;;  %2061 = vmatprep.mubr.msk.bf16.mxu0 %vm2274_vm2, %v2273_v35 }
 0x48a   : > { %2071 = vmatprep.subr.bf16.mxu0 %v2273_v35 }
 0x48b   : > { %v2231_v33 = vpop.eup %2230 }
 0x48c   : > { %v614_v34 = vmul.f32 %v2231_v33, %v2227_v23 }
 0x48e   : > { %v616_v36 = vpack.c.bf16 %v614_v34, %v614_v34 }
 0x490   : > { %2056 = vmatmul.mubr.msk.bf16.vlgmr.msra.gmra.mxu1 %vm617_vm6, %v616_v36  ;;  %2062 = vmatmul.mubr.msk.bf16.vlgmr.msra.gmra.mxu0 %vm494_vm4, %v720_v40 }
 0x491   : > { %2066 = vmatpush3.bf16.xpose.msra.mxu1 %v777_v41  ;;  %2067 = vmatprep.mubr.msk.bf16.mxu1 %vm2274_vm2, %v2273_v35 }
 0x492   : > { %2077 = vmatprep.subr.bf16.mxu1 %v2273_v35  ;;  %2073 = vmatprep.mubr.msk.bf16.mxu0 %vm2274_vm2, %v2273_v35 }
 0x498   : > { %2068 = vmatmul.mubr.msk.bf16.vlgmr.msra.gmra.mxu1 %vm494_vm4, %v770_v42 }
 0x499   : > { %2079 = vmatprep.mubr.msk.bf16.mxu1 %vm2274_vm2, %v2273_v35 }
 0x548   : > { %v2455_v43 = vpop.f32.mrf.mxu0 }
 0x54a   : > { %v2051_v44 = vpop.f32.mrf.mxu0 }
 0x54c   : > { %v662_v45 = vpop.f32.mrf.mxu0 }
 0x54e   : > { %v2052_v46 = vpop.f32.mrf.mxu0 }
 0x550   : > { %v2457_v47 = vpop.f32.mrf.mxu1  ;;  %v763_v48 = vpop.f32.mrf.mxu0 }
 0x551   : > { %v819_v49 = vmul.f32 0.25, %v763_v48 }
 0x552   : > { %v2057_v50 = vpop.f32.mrf.mxu1  ;;  %v2063_v51 = vpop.f32.mrf.mxu0 }
 0x553   : > { %v821_v52 = vsel %vm592_vm5, %v819_v49, -inf }
 0x554   : > { %822 = vmax.xlane.f32.xlu0 %v821_v52  ;;  %v708_v55 = vpop.f32.mrf.mxu1  ;;  %v766_v57 = vpop.f32.mrf.mxu0 }
 0x556   : > { %v2058_v58 = vpop.f32.mrf.mxu1  ;;  %v2064_v59 = vpop.f32.mrf.mxu0 }
 0x558   : > { %v813_v60 = vpop.f32.mrf.mxu1 }
 0x559   : > { %v820_v61 = vmul.f32 0.25, %v813_v60 }
 0x55a   : > { %v2069_v62 = vpop.f32.mrf.mxu1 }
 0x55b   : > { %v824_v63 = vsel %vm592_vm5, %v820_v61, -inf }
 0x55c   : > { %825 = vmax.xlane.f32.xlu1 %v824_v63  ;;  %v816_v2 = vpop.f32.mrf.mxu1 }
 0x55e   : > { %v2070_v3 = vpop.f32.mrf.mxu1 }
 0x56d   : > { %947 = vrot.lane.b32.xlu1 %v2403_v53, %s2278_s19 }
 0x571   : > { %997 = vrot.lane.b32.xlu1 %v2405_v54, %s2278_s19 }
 0x575   : > { %945 = vrot.lane.b32.xlu1 %v2403_v53, %s2279_s20 }
 0x5dd   : > { %v823_v4 = vpop.xlane.xlu0 %822 }
 0x5de   : > { %v827_v5 = vsub.f32 %v819_v49, %v823_v4 }
 0x5e0   : > { %v829_v6 = vmul.f32 1.442695, %v827_v5 }
 0x5e2   : > { %2232 = vpow2.f32 %v829_v6 }
 0x5e5   : > { %v826_v7 = vpop.xlane.xlu1 %825 }
 0x5e6   : > { %v828_v8 = vsub.f32 %v820_v61, %v826_v7 }
 0x5e8   : > { %v831_v9 = vmul.f32 1.442695, %v828_v8 }
 0x5e9   : > { %v948_v24 = vpop.permute.xlu1 %947 }
 0x5ea   : > { %2234 = vpow2.f32 %v831_v9  ;;  %v953_v28 = vsel %vm494_vm4, %v948_v24, 0 }
 0x5ed   : > { %v998_v30 = vpop.permute.xlu1 %997 }
 0x5ee   : > { %v1003_v33 = vsel %vm494_vm4, %v998_v30, 0 }
 0x5ef   : > { %v2233_v10 = vpop.eup %2232 }
 0x5f0   : > { %v833_v11 = vsel %vm592_vm5, %v2233_v10, 0.0 }
 0x5f1   : > { %834 = vadd.xlane.f32.xlu0 %v833_v11  ;;  %v946_v34 = vpop.permute.xlu1 %945 }
 0x5f7   : > { %v2235_v12 = vpop.eup %2234 }
 0x5f8   : > { %v836_v13 = vsel %vm592_vm5, %v2235_v12, 0.0 }
 0x5f9   : > { %837 = vadd.xlane.f32.xlu0 %v836_v13 }
 0x60f   : > { %2162 = vrot.lane.b32.xlu0 %v2407_v56, %s2277_s18 }
 0x613   : > { %995 = vrot.lane.b32.xlu0 %v2405_v54, %s2279_s20 }
 0x67a   : > { %v835_v14 = vpop.xlane.xlu0 %834 }
 0x67b   : > { %2236 = vrcp.f32 %v835_v14 }
 0x682   : > { %v838_v15 = vpop.xlane.xlu0 %837 }
 0x683   : > { %2238 = vrcp.f32 %v838_v15 }
 0x686   : > { %v2163_v16 = vpop.permute.xlu0 %2162 }
 0x687   : > { %v2165_v17 = vunpack.i.h.bf16 %v2163_v16  ;;  %v2164_v19 = vunpack.i.l.bf16 %v2163_v16 }
 0x688   : > { %v2237_v20 = vpop.eup %2236 }
 0x689   : > { %v718_v21 = vpack.c.bf16 %v2165_v17, %v2165_v17  ;;  %v717_v22 = vpack.c.bf16 %v2164_v19, %v2164_v19  ;;  %v841_v23 = vmul.f32 %v2237_v20, %v2233_v10 }
 0x68a   : > { %v996_v36 = vpop.permute.xlu0 %995 }
 0x68b   : > { %v849_v25 = vsel %vm621_vm3, %v717_v22, 0  ;;  %v895_v26 = vsel %vm621_vm3, %v718_v21, 0  ;;  %v843_v27 = vpack.c.bf16 %v841_v23, %v841_v23 }
 0x68c   : > { %2072 = vmatpush3.bf16.msra.mxu0 %v849_v25  ;;  %2078 = vmatpush3.bf16.msra.mxu1 %v895_v26 }
 0x68d   : > { %2083 = vmatprep.subr.bf16.mxu0 %v2273_v35  ;;  %2089 = vmatprep.subr.bf16.mxu1 %v2273_v35 }
 0x68f   : > { %2074 = vmatmul.mubr.msk.bf16.vlgmr.msra.gmra.mxu0 %vm617_vm6, %v843_v27 }
 0x690   : > { %v2239_v29 = vpop.eup %2238  ;;  %2084 = vmatpush3.bf16.xpose.msra.mxu0 %v953_v28  ;;  %2085 = vmatprep.mubr.msk.bf16.mxu0 %vm2274_vm2, %v2273_v35 }
 0x691   : > { %v842_v31 = vmul.f32 %v2239_v29, %v2235_v12  ;;  %2095 = vmatprep.subr.bf16.mxu0 %v2273_v35 }
 0x693   : > { %v844_v32 = vpack.c.bf16 %v842_v31, %v842_v31 }
 0x695   : > { %2080 = vmatmul.mubr.msk.bf16.vlgmr.msra.gmra.mxu1 %vm617_vm6, %v844_v32 }
 0x696   : > { %2090 = vmatpush3.bf16.xpose.msra.mxu1 %v1003_v33  ;;  %2091 = vmatprep.mubr.msk.bf16.mxu1 %vm2274_vm2, %v2273_v35 }
 0x697   : > { %2086 = vmatmul.mubr.msk.bf16.vlgmr.msra.gmra.mxu0 %vm494_vm4, %v946_v34  ;;  %2101 = vmatprep.subr.bf16.mxu1 %v2273_v35 }
 0x698   : > { %2097 = vmatprep.mubr.msk.bf16.mxu0 %vm2274_vm2, %v2273_v35 }
 0x69d   : > { %2092 = vmatmul.mubr.msk.bf16.vlgmr.msra.gmra.mxu1 %vm494_vm4, %v996_v36 }
 0x69e   : > { %2103 = vmatprep.mubr.msk.bf16.mxu1 %vm2274_vm2, %v2273_v35 }
 0x74f   : > { %v2493_v40 = vpop.f32.mrf.mxu0 }
 0x751   : > { %v2075_v41 = vpop.f32.mrf.mxu0 }
 0x753   : > { %v888_v42 = vpop.f32.mrf.mxu0 }
 0x755   : > { %v2076_v44 = vpop.f32.mrf.mxu0  ;;  %v2495_v45 = vpop.f32.mrf.mxu1 }
 0x757   : > { %v2081_v46 = vpop.f32.mrf.mxu1  ;;  %v989_v48 = vpop.f32.mrf.mxu0 }
 0x758   : > { %v1045_v49 = vmul.f32 0.25, %v989_v48 }
 0x759   : > { %v934_v50 = vpop.f32.mrf.mxu1  ;;  %v2087_v51 = vpop.f32.mrf.mxu0 }
 0x75a   : > { %v1047_v52 = vsel %vm592_vm5, %v1045_v49, -inf }
 0x75b   : > { %1048 = vmax.xlane.f32.xlu1 %v1047_v52  ;;  %v2082_v55 = vpop.f32.mrf.mxu1  ;;  %v992_v57 = vpop.f32.mrf.mxu0 }
 0x75d   : > { %v2088_v58 = vpop.f32.mrf.mxu0  ;;  %v1039_v59 = vpop.f32.mrf.mxu1 }
 0x75e   : > { %v1046_v60 = vmul.f32 0.25, %v1039_v59 }
 0x75f   : > { %v2093_v61 = vpop.f32.mrf.mxu1 }
 0x760   : > { %v1050_v62 = vsel %vm592_vm5, %v1046_v60, -inf }
 0x761   : > { %1051 = vmax.xlane.f32.xlu0 %v1050_v62  ;;  %v1042_v63 = vpop.f32.mrf.mxu1 }
 0x763   : > { %v2094_v2 = vpop.f32.mrf.mxu1 }
 0x76c   : > { %2167 = vrot.lane.b32.xlu1 %v2407_v56, %s2279_s20 }
 0x770   : > { %1223 = vrot.lane.b32.xlu1 %v2405_v54, %s2280_s21 }
 0x774   : > { %1171 = vrot.lane.b32.xlu1 %v2403_v53, %s2281_s22 }
 0x778   : > { %1221 = vrot.lane.b32.xlu1 %v2405_v54, %s2281_s22 }
 0x7e4   : > { %v1049_v3 = vpop.xlane.xlu1 %1048 }
 0x7e5   : > { %v1053_v4 = vsub.f32 %v1045_v49, %v1049_v3 }
 0x7e7   : > { %v1055_v5 = vmul.f32 1.442695, %v1053_v4 }
 0x7e8   : > { %v2168_v6 = vpop.permute.xlu1 %2167 }
 0x7e9   : > { %2240 = vpow2.f32 %v1055_v5  ;;  %v2170_v7 = vunpack.i.h.bf16 %v2168_v6  ;;  %v2169_v8 = vunpack.i.l.bf16 %v2168_v6 }
 0x7ea   : > { %v1052_v9 = vpop.xlane.xlu0 %1051 }
 0x7eb   : > { %v944_v10 = vpack.c.bf16 %v2170_v7, %v2170_v7  ;;  %v943_v11 = vpack.c.bf16 %v2169_v8, %v2169_v8  ;;  %v1054_v12 = vsub.f32 %v1046_v60, %v1052_v9 }
 0x7ec   : > { %v1224_v28 = vpop.permute.xlu1 %1223 }
 0x7ed   : > { %v1057_v13 = vmul.f32 1.442695, %v1054_v12  ;;  %v1075_v14 = vsel %vm621_vm3, %v943_v11, 0  ;;  %v1121_v15 = vsel %vm621_vm3, %v944_v10, 0  ;;  %v1229_v30 = vsel %vm494_vm4, %v1224_v28, 0 }
 0x7ee   : > { %2096 = vmatpush3.bf16.msra.mxu0 %v1075_v14  ;;  %2102 = vmatpush3.bf16.msra.mxu1 %v1121_v15 }
 0x7ef   : > { %2242 = vpow2.f32 %v1057_v13  ;;  %2107 = vmatprep.subr.bf16.mxu0 %v2273_v35  ;;  %2113 = vmatprep.subr.bf16.mxu1 %v2273_v35 }
 0x7f0   : > { %v1172_v31 = vpop.permute.xlu1 %1171 }
 0x7f4   : > { %v1222_v32 = vpop.permute.xlu1 %1221 }
 0x7f6   : > { %v2241_v54 = vpop.eup %2240 }
 0x7f7   : > { %v1059_v16 = vsel %vm592_vm5, %v2241_v54, 0.0 }
 0x7f8   : > { %1060 = vadd.xlane.f32.xlu0 %v1059_v16 }
 0x7fc   : > { %v2243_v17 = vpop.eup %2242 }
 0x7fd   : > { %v1062_v19 = vsel %vm592_vm5, %v2243_v17, 0.0 }
 0x7fe   : > { %1063 = vadd.xlane.f32.xlu0 %v1062_v19 }
 0x814   : > { %1173 = vrot.lane.b32.xlu0 %v2403_v53, %s2280_s21 }
 0x881   : > { %v1061_v20 = vpop.xlane.xlu0 %1060 }
 0x882   : > { %2244 = vrcp.f32 %v1061_v20 }
 0x887   : > { %v1064_v21 = vpop.xlane.xlu0 %1063 }
 0x888   : > { %2246 = vrcp.f32 %v1064_v21 }
 0x88b   : > { %v1174_v24 = vpop.permute.xlu0 %1173 }
 0x88c   : > { %v1179_v26 = vsel %vm494_vm4, %v1174_v24, 0  ;;  %v2188_v24 = vld [vmem:[%s2688_s3 + $0x18] sm:$0xff]  }
 0x88f   : > { %v2245_v22 = vpop.eup %2244 }
 0x890   : > { %v1067_v23 = vmul.f32 %v2245_v22, %v2241_v54 }
 0x892   : > { %v1069_v25 = vpack.c.bf16 %v1067_v23, %v1067_v23 }
 0x894   : > { %2098 = vmatmul.mubr.msk.bf16.vlgmr.msra.gmra.mxu0 %vm617_vm6, %v1069_v25  ;;  %v2189_v25 = vld [vmem:[%s2688_s3 + $0x10] sm:$0xff]  }
 0x895   : > { %v2247_v27 = vpop.eup %2246  ;;  %2108 = vmatpush3.bf16.xpose.msra.mxu0 %v1179_v26  ;;  %2109 = vmatprep.mubr.msk.bf16.mxu0 %vm2274_vm2, %v2273_v35  ;;  %v2190_v26 = vld [vmem:[%s2688_s3 + $0x8] sm:$0xff]  }
 0x896   : > { %v1068_v29 = vmul.f32 %v2247_v27, %v2243_v17  ;;  %2119 = vmatprep.subr.bf16.mxu0 %v2273_v35 }
 0x898   : > { %v1070_v53 = vpack.c.bf16 %v1068_v29, %v1068_v29 }
 0x89a   : > { %2104 = vmatmul.mubr.msk.bf16.vlgmr.msra.gmra.mxu1 %vm617_vm6, %v1070_v53 }
 0x89b   : > { %2114 = vmatpush3.bf16.xpose.msra.mxu1 %v1229_v30  ;;  %2115 = vmatprep.mubr.msk.bf16.mxu1 %vm2274_vm2, %v2273_v35 }
 0x89c   : > { %2110 = vmatmul.mubr.msk.bf16.vlgmr.msra.gmra.mxu0 %vm494_vm4, %v1172_v31  ;;  %2125 = vmatprep.subr.bf16.mxu1 %v2273_v35 }
 0x89d   : > { %2121 = vmatprep.mubr.msk.bf16.mxu0 %vm2274_vm2, %v2273_v35 }
 0x8a2   : > { %2116 = vmatmul.mubr.msk.bf16.vlgmr.msra.gmra.mxu1 %vm494_vm4, %v1222_v32 }
 0x8a3   : > { %2127 = vmatprep.mubr.msk.bf16.mxu1 %vm2274_vm2, %v2273_v35 }
 0x954   : > { %v1111_v33 = vpop.f32.mrf.mxu0 }
 0x956   : > { %v2099_v34 = vpop.f32.mrf.mxu0 }
 0x958   : > { %v1114_v36 = vpop.f32.mrf.mxu0 }
 0x95a   : > { %v2100_v41 = vpop.f32.mrf.mxu0  ;;  %v1157_v42 = vpop.f32.mrf.mxu1 }
 0x95c   : > { %v2105_v44 = vpop.f32.mrf.mxu1  ;;  %v1215_v46 = vpop.f32.mrf.mxu0 }
 0x95d   : > { %v1271_v48 = vmul.f32 0.25, %v1215_v46 }
 0x95e   : > { %v1160_v49 = vpop.f32.mrf.mxu1  ;;  %v2111_v50 = vpop.f32.mrf.mxu0 }
 0x95f   : > { %v1273_v51 = vsel %vm592_vm5, %v1271_v48, -inf }
 0x960   : > { %1274 = vmax.xlane.f32.xlu0 %v1273_v51  ;;  %v2106_v52 = vpop.f32.mrf.mxu1  ;;  %v1218_v55 = vpop.f32.mrf.mxu0 }
 0x962   : > { %v2112_v57 = vpop.f32.mrf.mxu0  ;;  %v1265_v58 = vpop.f32.mrf.mxu1 }
 0x963   : > { %v1272_v59 = vmul.f32 0.25, %v1265_v58  ;;  %v1942_v58 = vld [vmem:[%s2689_s4] ss:$0 sm:$0xff] }
 0x964   : > { %v2117_v60 = vpop.f32.mrf.mxu1 }
 0x965   : > { %v1276_v61 = vsel %vm592_vm5, %v1272_v59, -inf }
 0x966   : > { %1277 = vmax.xlane.f32.xlu1 %v1276_v61  ;;  %v1268_v62 = vpop.f32.mrf.mxu1 }
 0x968   : > { %v2118_v63 = vpop.f32.mrf.mxu1 }
 0x977   : > { %1391 = vrot.lane.b32.xlu1 %v2493_v40, %s2280_s21 }
 0x97b   : > { %1393 = vrot.lane.b32.xlu1 %v2495_v45, %s2280_s21 }
 0x97f   : > { %1399 = vrot.lane.b32.xlu1 %v1111_v33, %s2278_s19 }
 0x9e9   : > { %v1275_v2 = vpop.xlane.xlu0 %1274 }
 0x9ea   : > { %v1279_v3 = vsub.f32 %v1271_v48, %v1275_v2 }
 0x9ec   : > { %v1281_v4 = vmul.f32 1.442695, %v1279_v3 }
 0x9ee   : > { %2248 = vpow2.f32 %v1281_v4 }
 0x9ef   : > { %v1278_v5 = vpop.xlane.xlu1 %1277 }
 0x9f0   : > { %v1280_v6 = vsub.f32 %v1272_v59, %v1278_v5 }
 0x9f2   : > { %v1283_v7 = vmul.f32 1.442695, %v1280_v6 }
 0x9f3   : > { %v1392_v34 = vpop.permute.xlu1 %1391 }
 0x9f4   : > { %2250 = vpow2.f32 %v1283_v7  ;;  %v1413_v44 = vsel %vm494_vm4, %v2455_v43, %v1392_v34  ;;  %v2210_v34 = vld [vmem:[%s2692_s7 + $0x60] sm:$0xff]  }
 0x9f7   : > { %v1394_v36 = vpop.permute.xlu1 %1393 }
 0x9f8   : > { %v1414_v46 = vsel %vm494_vm4, %v2457_v47, %v1394_v36  ;;  %v2211_v36 = vld [vmem:[%s2692_s7 + $0x20] sm:$0xff]  }
 0x9fb   : > { %v2249_v8 = vpop.eup %2248 }
 0x9fc   : > { %v1285_v9 = vsel %vm592_vm5, %v2249_v8, 0.0 }
 0x9fd   : > { %1286 = vadd.xlane.f32.xlu0 %v1285_v9 }
 0xa01   : > { %v2251_v10 = vpop.eup %2250 }
 0xa02   : > { %v1288_v40 = vsel %vm592_vm5, %v2251_v10, 0.0 }
 0xa03   : > { %1289 = vadd.xlane.f32.xlu0 %v1288_v40 }
 0xa19   : > { %2172 = vrot.lane.b32.xlu0 %v2407_v56, %s2281_s22 }
 0xa1d   : > { %1401 = vrot.lane.b32.xlu0 %v1157_v42, %s2278_s19 }
 0xa86   : > { %v1287_v45 = vpop.xlane.xlu0 %1286 }
 0xa87   : > { %2252 = vrcp.f32 %v1287_v45 }
 0xa8c   : > { %v1290_v11 = vpop.xlane.xlu0 %1289 }
 0xa8d   : > { %2254 = vrcp.f32 %v1290_v11  ;;  %v2192_v11 = vld [vmem:[%s2690_s5 + $0x30] ss:$8 sps:$4 sm:$0xff]  }
 0xa90   : > { %v2173_v12 = vpop.permute.xlu0 %2172 }
 0xa91   : > { %v2175_v13 = vunpack.i.h.bf16 %v2173_v12  ;;  %v2174_v14 = vunpack.i.l.bf16 %v2173_v12  ;;  %v2194_v12 = vld [vmem:[%s2690_s5 + $0x34] ss:$8 sps:$4 sm:$0xff]  }
 0xa93   : > { %v1170_v15 = vpack.c.bf16 %v2175_v13, %v2175_v13  ;;  %v1169_v54 = vpack.c.bf16 %v2174_v14, %v2174_v14  ;;  %v2197_v13 = vld [vmem:[%s2690_s5 + $0x24] ss:$8 sps:$4 sm:$0xff]   ;;  %v2195_v14 = vld [vmem:[%s2690_s5 + $0x20] ss:$8 sps:$4 sm:$0xff]  }
 0xa94   : > { %v2253_v16 = vpop.eup %2252  ;;  %v1402_v41 = vpop.permute.xlu0 %1401 }
 0xa95   : > { %v1301_v17 = vsel %vm621_vm3, %v1169_v54, 0  ;;  %v1347_v19 = vsel %vm621_vm3, %v1170_v15, 0  ;;  %v1293_v20 = vmul.f32 %v2253_v16, %v2249_v8  ;;  %v1417_v49 = vsel %vm1415_vm7, %v1414_v46, %v1402_v41  ;;  %v2200_v15 = vld [vmem:[%s2690_s5 + $0x14] ss:$8 sps:$4 sm:$0xff]   ;;  %v2198_v54 = vld [vmem:[%s2690_s5 + $0x10] ss:$8 sps:$4 sm:$0xff]  }
 0xa96   : > { %2120 = vmatpush3.bf16.msra.mxu0 %v1301_v17  ;;  %2126 = vmatpush3.bf16.msra.mxu1 %v1347_v19  ;;  %v2203_v16 = vld [vmem:[%s2690_s5 + $0x4] ss:$8 sps:$4 sm:$0xff]   ;;  %v2201_v17 = vld [vmem:[%s2690_s5] ss:$8 sps:$4 sm:$0xff]   ;;  %v2213_v41 = vld [vmem:[%s2692_s7 + $0x18] sm:$0xff]  }
 0xa97   : > { %v1295_v56 = vpack.c.bf16 %v1293_v20, %v1293_v20  ;;  %2131 = vmatprep.subr.bf16.mxu0 %v2273_v35  ;;  %1615 = vmatprep.subr.bf16.mxu1 %v2194_v12  ;;  %v2216_v46 = vld [vmem:[%s2692_s7 + $0x48] sm:$0xff]  }
 0xa99   : > { %2122 = vmatmul.mubr.msk.bf16.vlgmr.msra.gmra.mxu0 %vm617_vm6, %v1295_v56 }
 0xa9a   : > { %v2255_v21 = vpop.eup %2254  ;;  %2139 = vmatprep.mubr.msk.bf16.mxu0 %vm2274_vm2, %v2273_v35  ;;  %2132 = vmatpush3.bf16.msra.mxu0 %v2188_v24 }
 0xa9b   : > { %v1294_v22 = vmul.f32 %v2255_v21, %v2251_v10  ;;  %2133 = vmatprep.subr.bf16.mxu0 %v2273_v35 }
 0xa9d   : > { %v1296_v23 = vpack.c.bf16 %v1294_v22, %v1294_v22 }
 0xa9e   : > { %2134 = vmatpush3.bf16.msra.mxu0 %v2189_v25 }
 0xa9f   : > { %2128 = vmatmul.mubr.msk.bf16.vlgmr.msra.gmra.mxu1 %vm617_vm6, %v1296_v23  ;;  %2135 = vmatprep.subr.bf16.mxu0 %v2273_v35 }
 0xaa0   : > { %1639 = vmatprep.mubr.bf16.mxu1 %v2272_v18  ;;  %v2191_v18 = vld [vmem:[%s2688_s3] sm:$0xff]   ;;  %1616 = vmatpush1.bf16.msra.mxu1 %v2192_v11 }
 0xaa1   : > { %1617 = vmatprep.subr.bf16.mxu1 %v2197_v13 }
 0xaa2   : > { %2136 = vmatpush3.bf16.msra.mxu0 %v2190_v26 }
 0xaa3   : > { %2137 = vmatprep.subr.bf16.mxu0 %v2273_v35  ;;  %v1400_v35 = vpop.permute.xlu1 %1399 }
 0xaa4   : > { %v1416_v48 = vsel %vm1415_vm7, %v1413_v44, %v1400_v35  ;;  %1618 = vmatpush1.bf16.msra.mxu1 %v2195_v14  ;;  %v2212_v35 = vld [vmem:[%s2692_s7 + $0x58] sm:$0xff]   ;;  %v2215_v44 = vld [vmem:[%s2692_s7 + $0x10] sm:$0xff]  }
 0xaa5   : > { %1619 = vmatprep.subr.bf16.mxu1 %v2200_v15  ;;  %v1957_v15 = vld [vmem:[%s2693_s8] ss:$0 sm:$0xff] }
 0xaa6   : > { %2138 = vmatpush3.bf16.msra.mxu0 %v2191_v18 }
 0xaa8   : > { %1620 = vmatpush1.bf16.msra.mxu1 %v2198_v54 }
 0xaa9   : > { %1621 = vmatprep.subr.bf16.mxu1 %v2203_v16 }
 0xaac   : > { %1622 = vmatpush1.bf16.msra.mxu1 %v2201_v17 }
 0xb59   : > { %v1337_v27 = vpop.f32.mrf.mxu0 }
 0xb5a   : > { %1407 = vrot.lane.b32.xlu1 %v1337_v27, %s2276_s17 }
 0xb5b   : > { %v2123_v28 = vpop.f32.mrf.mxu0 }
 0xb5d   : > { %v1340_v29 = vpop.f32.mrf.mxu0 }
 0xb5e   : > { %v2204_v29 = vld [vmem:[%s2692_s7 + $0x78] sm:$0xff]  }
 0xb5f   : > { %v2124_v53 = vpop.f32.mrf.mxu0  ;;  %v1383_v30 = vpop.f32.mrf.mxu1  ;;  %2013 = vmatprep.subr.bf16.mxu0 %v2204_v29 }
 0xb60   : > { %1409 = vrot.lane.b32.xlu0 %v1383_v30, %s2276_s17  ;;  %v2205_v53 = vld [vmem:[%s2692_s7 + $0x38] sm:$0xff]   ;;  %v2206_v30 = vld [vmem:[%s2692_s7 + $0x70] sm:$0xff]  }
 0xb61   : > { %v2129_v31 = vpop.f32.mrf.mxu1 }
 0xb62   : > { %v2207_v31 = vld [vmem:[%s2692_s7 + $0x30] sm:$0xff]  }
 0xb63   : > { %v1386_v32 = vpop.f32.mrf.mxu1 }
 0xb64   : > { %v2208_v32 = vld [vmem:[%s2692_s7 + $0x68] sm:$0xff]  }
 0xb65   : > { %v2130_v33 = vpop.f32.mrf.mxu1 }
 0xb66   : > { %v2209_v33 = vld [vmem:[%s2692_s7 + $0x28] sm:$0xff]  }
 0xbcc   : > { %v1408_v42 = vpop.permute.xlu1 %1407 }
 0xbcd   : > { %v1419_v51 = vsel %vm1418_vm8, %v1416_v48, %v1408_v42  ;;  %v2214_v42 = vld [vmem:[%s2692_s7 + $0x50] sm:$0xff]   ;;  %v2217_v48 = vld [vmem:[%s2692_s7 + $0x8] sm:$0xff]  }
 0xbd2   : > { %v1410_v50 = vpop.permute.xlu0 %1409 }
 0xbd3   : > { %v1420_v52 = vsel %vm1418_vm8, %v1417_v49, %v1410_v50  ;;  %v2218_v49 = vld [vmem:[%s2692_s7 + $0x40] sm:$0xff]  }
 0xbd4   : > { %v1423_v55 = vcombine.low %v1419_v51, %v1420_v52  ;;  %v2219_v50 = vld [vmem:[%s2692_s7] sm:$0xff]  }
 0xbd5   : > { %v1552_v51 = vld [vmem:[%s2691_s6] sm:$0x3] }
 0xbd6   : > { %v1425_v57 = vpack.c.bf16 %v1423_v55, %v1423_v55  ;;  %v1557_v52 = vrot.slane %v1552_v51, %v384_v38  ;;  %v1561_v55 = vrot.slane %v1552_v51, %v388_v39 }
 0xbd8   : > { %2140 = vmatmul.mubr.msk.bf16.vlgmr.msra.gmra.mxu0 %vm432_vm1, %v1425_v57 }
 0xbd9   : > { %2014 = vmatpush3.bf16.msra.mxu0 %v2205_v53 }
 0xbda   : > { %2015 = vmatprep.subr.bf16.mxu0 %v2206_v30 }
 0xbdd   : > { %2016 = vmatpush3.bf16.msra.mxu0 %v2207_v31 }
 0xbde   : > { %2017 = vmatprep.subr.bf16.mxu0 %v2208_v32 }
 0xbe1   : > { %2018 = vmatpush3.bf16.msra.mxu0 %v2209_v33 }
 0xbe2   : > { %2019 = vmatprep.subr.bf16.mxu0 %v2210_v34 }
 0xbe5   : > { %2020 = vmatpush3.bf16.msra.mxu0 %v2211_v36 }
 0xbe6   : > { %2021 = vmatprep.subr.bf16.mxu0 %v2212_v35 }
 0xbe9   : > { %2022 = vmatpush3.bf16.msra.mxu0 %v2213_v41 }
 0xbea   : > { %2023 = vmatprep.subr.bf16.mxu0 %v2214_v42 }
 0xbed   : > { %2024 = vmatpush3.bf16.msra.mxu0 %v2215_v44 }
 0xbee   : > { %2025 = vmatprep.subr.bf16.mxu0 %v2216_v46 }
 0xbf1   : > { %2026 = vmatpush3.bf16.msra.mxu0 %v2217_v48 }
 0xbf2   : > { %2027 = vmatprep.subr.bf16.mxu0 %v2218_v49 }
 0xbf5   : > { %2028 = vmatpush3.bf16.msra.mxu0 %v2219_v50 }
 0xc98   : > { %v1502_v59 = vpop.f32.mrf.mxu0 }
 0xc99   : > { %v1503_v60 = vadd.f32 %v1942_v58, %v1502_v59 }
 0xc9a   : > { %v2141_v61 = vpop.f32.mrf.mxu0 }
 0xc9b   : > { %v1509_v43 = vcombine.high %v1503_v60, %v1503_v60  ;;  %v2577_v62 = vadd.f32 %v1503_v60, %v2348_v0 }
 0xc9c   : > { %v1505_v47 = vpop.f32.mrf.mxu0 }
 0xc9d   : > { %v2580_v63 = vadd.f32 %v1509_v43, %v2350_v1  ;;  %v1513_v2 = vsel %vm339_vm0, %v2577_v62, 0.0 }
 0xc9e   : > { %1514 = vadd.xlane.f32.xlu1 %v1513_v2  ;;  %v2142_v3 = vpop.f32.mrf.mxu0 }
 0xc9f   : > { %v1516_v4 = vsel %vm339_vm0, %v2580_v63, 0.0 }
 0xca0   : > { %1517 = vadd.xlane.f32.xlu0 %v1516_v4 }
 0xd27   : > { %v1515_v5 = vpop.xlane.xlu1 %1514 }
 0xd28   : > { %v1519_v6 = vmul.f32 0.015625, %v1515_v5 }
 0xd29   : > { %v1518_v7 = vpop.xlane.xlu0 %1517 }
 0xd2a   : > { %v1521_v8 = vsub.f32 %v2577_v62, %v1519_v6  ;;  %v1520_v0 = vmul.f32 0.015625, %v1518_v7 }
 0xd2c   : > { %v1522_v9 = vsub.f32 %v2580_v63, %v1520_v0  ;;  %v1523_v10 = vmul.f32 %v1521_v8, %v1521_v8 }
 0xd2e   : > { %v1525_v1 = vsel %vm339_vm0, %v1523_v10, 0.0  ;;  %v1524_v40 = vmul.f32 %v1522_v9, %v1522_v9 }
 0xd2f   : > { %1526 = vadd.xlane.f32.xlu0 %v1525_v1 }
 0xd30   : > { %v1528_v45 = vsel %vm339_vm0, %v1524_v40, 0.0 }
 0xd33   : > { %1529 = vadd.xlane.f32.xlu0 %v1528_v45 }
 0xdb8   : > { %v1527_v19 = vpop.xlane.xlu0 %1526 }
 0xdb9   : > { %v1531_v20 = vmul.f32 0.015625, %v1527_v19 }
 0xdbb   : > { %v1533_v56 = vadd.f32 1e-06, %v1531_v20 }
 0xdbc   : > { %v1530_v21 = vpop.xlane.xlu0 %1529 }
 0xdbd   : > { %v1532_v22 = vmul.f32 0.015625, %v1530_v21  ;;  %2256 = vrsqrt.f32 %v1533_v56 }
 0xdbf   : > { %v1534_v23 = vadd.f32 1e-06, %v1532_v22 }
 0xdc1   : > { %2258 = vrsqrt.f32 %v1534_v23 }
 0xdca   : > { %v2257_v24 = vpop.eup %2256 }
 0xdcb   : > { %v1537_v26 = vmul.f32 %v2257_v24, %v1521_v8 }
 0xdce   : > { %v2259_v25 = vpop.eup %2258 }
 0xdcf   : > { %v1538_v18 = vmul.f32 %v2259_v25, %v1522_v9 }
 0xdd1   : > { %v1541_v27 = vcombine.low %v1537_v26, %v1538_v18 }
 0xdd3   : > { %v1543_v28 = vpack.c.bf16 %v1541_v27, %v1541_v27 }
 0xdd5   : > { %1956 = vmatmul.mubr.msk.bf16.vlgmr.msra.gmra.mxu1 %vm432_vm1, %v1543_v28 }
 0xe95   : > { %v1641_v57 = vpop.f32.mrf.mxu1 }
 0xe96   : > { %v1642_v58 = vadd.f32 %v1641_v57, %v1557_v52 }
 0xe97   : > { %v1643_v59 = vpop.f32.mrf.mxu1 }
 0xe98   : > { %v1650_v60 = vmul.f32 0.044715, %v1642_v58  ;;  %v1644_v61 = vadd.f32 %v1643_v59, %v1561_v55  ;;  %v1648_v10 = vmul.f32 0.5, %v1642_v58 }
 0xe99   : > { %v1645_v43 = vpop.f32.mrf.mxu1 }
 0xe9a   : > { %v1652_v47 = vmul.f32 %v1650_v60, %v1642_v58  ;;  %v1651_v2 = vmul.f32 0.044715, %v1644_v61  ;;  %v1649_v1 = vmul.f32 0.5, %v1644_v61 }
 0xe9b   : > { %v1646_v3 = vpop.f32.mrf.mxu1 }
 0xe9c   : > { %v1654_v4 = vmul.f32 %v1652_v47, %v1642_v58  ;;  %v1653_v5 = vmul.f32 %v1651_v2, %v1644_v61 }
 0xe9e   : > { %v1656_v6 = vadd.f32 %v1654_v4, %v1642_v58  ;;  %v1655_v7 = vmul.f32 %v1653_v5, %v1644_v61 }
 0xea0   : > { %v1658_v8 = vmul.f32 0.7978846, %v1656_v6  ;;  %v1657_v0 = vadd.f32 %v1655_v7, %v1644_v61 }
 0xea2   : > { %v1659_v9 = vmul.f32 0.7978846, %v1657_v0  ;;  %2260 = vtanh.f32 %v1658_v8 }
 0xea4   : > { %2262 = vtanh.f32 %v1659_v9 }
 0xeaf   : > { %v2261_v37 = vpop.eup %2260 }
 0xeb0   : > { %v1662_v38 = vadd.f32 1.0, %v2261_v37 }
 0xeb1   : > { %v2263_v39 = vpop.eup %2262 }
 0xeb2   : > { %v1663_v40 = vadd.f32 1.0, %v2263_v39  ;;  %v1664_v45 = vmul.f32 %v1662_v38, %v1648_v10 }
 0xeb4   : > { %v1665_v11 = vmul.f32 %v1663_v40, %v1649_v1  ;;  %v1666_v13 = vpack.c.bf16 %v1664_v45, %v1664_v45 }
 0xeb6   : > { %v1667_v12 = vpack.c.bf16 %v1665_v11, %v1665_v11 }
 0xeb8   : > { %1835 = vmatprep.mubr.bf16.mxu0 %v1667_v12 }
 0xeb9   : > { %1836 = vmatmul.mubr.bf16.vlgmr.msra.gmra.mxu0 %v1666_v13 }
 0xf79   : > { %v2029_v14 = vpop.f32.mrf.mxu0 }
 0xf7b   : > { %v2030_v54 = vpop.f32.mrf.mxu0 }
 0xf7c   : > { %v2031_v16 = vadd.f32 %v2030_v54, %v2029_v14 }
 0xf7d   : > { %v2032_v17 = vpop.f32.mrf.mxu0 }
 0xf7e   : > { %v1838_v19 = vadd.f32 %v2031_v16, %v1957_v15 }
 0xf7f   : > { %v2033_v20 = vpop.f32.mrf.mxu0 }
 0xf80   : > { %v1844_v56 = vcombine.high %v1838_v19, %v1838_v19  ;;  %v1846_v21 = vadd.f32 %v1838_v19, %v2577_v62 }
 0xf82   : > { %v1847_v22 = vadd.f32 %v1844_v56, %v2580_v63  ;;  %1848 = vst.msk [vmem:[%s334_s15] sm:$0xf] %vm339_vm0, %v1846_v21 }
 0xf84   : > { %1849 = vst.msk [vmem:[%s334_s15 + $0x4] sm:$0xf] %vm339_vm0, %v1847_v22 }
 0xf85 PF: > { %s19_s30 = sadd.s32 1, %s2270_s30  }
 0xf86   : > { %p16_p4 = scmp.ge.s32.totalorder %s19_s30, 4  }
 0xf88   :  { %18 = sbr.rel (!%p16_p4) target bundleno = 1 (0x1), region = 86 }

// kernel: _lambda_.28
= control target key start
LH: loop header
LB: loop body
LE: loop exit
PB: predicated region body
PF: predicated region fallthrough
CT: control target
= control target key end

     0   :  { %s1652_s0 = inlined_call_operand.vmem [shape: f32[16,64], index: 0, kind: input, shape index: {}]   ;;  %s1653_s1 = inlined_call_operand.vmem [shape: f32[16,32], index: 1, kind: input, shape index: {}]   ;;  %s1654_s2 = inlined_call_operand.vmem [shape: bf16[64,34], index: 2, kind: input, shape index: {}]   ;;  %s1655_s3 = inlined_call_operand.vmem [shape: f32[1,34], index: 3, kind: input, shape index: {}]   ;;  %s1656_s4 = inlined_call_operand.hbm [shape: f32[1,32], index: 4, kind: input, shape index: {}]   ;;  %s1657_s5 = inlined_call_operand.hbm [shape: f32[1,32], index: 5, kind: input, shape index: {}]   ;;  %s1658_s6 = inlined_call_operand.vmem [shape: bf16[32,32], index: 6, kind: input, shape index: {}]   ;;  %s1659_s7 = inlined_call_operand.hbm [shape: f32[1,32], index: 7, kind: input, shape index: {}]   ;;  %s1660_s8 = inlined_call_operand.vmem [shape: bf16[32,2], index: 8, kind: input, shape index: {}]   ;;  %s1661_s9 = inlined_call_operand.hbm [shape: f32[1,2], index: 9, kind: input, shape index: {}]   ;;  %s1662_s10 = inlined_call_operand.vmem [shape: f32[16,2], index: 10, kind: output, shape index: {0}]   ;;  %s1663_s11 = inlined_call_operand.vmem [shape: f32[16,32], index: 11, kind: output, shape index: {1}]   ;;  %s1664_s12 = inlined_call_operand.hbm [shape: f32[16,2], index: 12, kind: output, shape index: {2}]  }
   0x1   :  { %1668 = sst [smem:[#allocation17_spill]] %s1652_s0 }
   0x2   :  { %18 = vsyncpa [#allocation3], 0 }
   0x3   :  { %19 = vsyncpa [#allocation6], 0 }
   0x4   :  { %20 = vsyncpa [#allocation9], 0 }
   0x5   :  { %21 = vsyncpa [#allocation4], 0 }
   0x6   :  { %23 = vsyncpa [#allocation4 + $0x1], 0  ;;  %s1424_s21 = smov 0   ;;  %s1426_s22 = smov 0  }
   0x7   :  { %s1428_s23 = smov 0   ;;  %s1430_s24 = smov 0  }
   0x8 LB: > { %1669 = sst [smem:[#allocation15_spill]] %s1343_s23  ;;  %s1445_s25 = sadd.s32 4294967295, %s1347_s24   ;;  %s1347_s24 = sphi %s1430_s24, %s1688_s24   ;;  %s1343_s23 = sphi %s1428_s23, %s1685_s23   ;;  %s1339_s22 = sphi %s1426_s22, %s1687_s22   ;;  %s1335_s21 = sphi %s1424_s21, %s1686_s21  }
   0x9   : > { %s991_s26 = sadd.s32 4294967294, %s1347_s24   ;;  %s1449_s27 = sadd.s32 1, %s1347_s24  }
   0xa   : > { %s308_s28 = sadd.s32 1, %s1343_s23  ;;  %s305_s29 = ssub.s32 %s1347_s24, %s1449_s27 }
   0xb   : > { %p318_p0 = scmp.ne.s32.totalorder %s1343_s23, %s1339_s22  ;;  %p306_p1 = scmp.eq.s32.totalorder %s305_s29, 0 }
   0xc   : > { %p319_p2 = scmp.eq.s32.totalorder %s1445_s25, 1  ;;  %p324_p3 = scmp.ne.s32.totalorder %s1339_s22, %s1335_s21 }
   0xd   : > { %p325_p4 = scmp.eq.s32.totalorder %s991_s26, 1  ;;  %p992_p7 = scmp.ge.s32.totalorder %s1347_s24, 1 }
   0xe   : > { %s1460_s30 = scalar_select %p306_p1, %s1343_s23, %s308_s28  }
   0xf   : > { %p1462_p5 = por %p319_p2, %p318_p0  ;;  %p1466_p6 = por %p325_p4, %p324_p3 }
  0x10   : > { %1670 = sst [smem:[#allocation16_spill]] %s1460_s30  ;;  %p332_p8 = scmp.lt.s32.totalorder %s1347_s24, 3 }
  0x11   : > { %s1671_s13 = scalar_select %p1462_p5, 1, 0 }
  0x12   : > { %s1672_s14 = scalar_select %p1466_p6, 1, 0 }
  0x13   : > { %p1665_p9 = scmp.eq.s32.totalorder %s1445_s25, 0  ;;  %p1473_p10 = pnand %p992_p7, %p332_p8 }
  0x14   : > { %s1349_s16 = smov [#allocation5]   ;;  %s1350_s18 = smov [#allocation2]  }
  0x15   : > { %s362_s17 = sshll.u32 %s1349_s16, 4  ;;  %p1086_p11 = pneg %p1473_p10  ;;  %s363_s17 = int_to_ptr.vmem [resolvable:$true] %s362_s17 }
  0x16   : > { %s351_s19 = sshll.u32 %s1350_s18, 4  ;;  %s1351_s26 = smov [#allocation7]   ;;  %s352_s19 = int_to_ptr.vmem [resolvable:$true] %s351_s19 }
  0x17   : > { %p1481_p12 = pnand %p1665_p9, %p1086_p11  ;;  %s376_s28 = sshll.u32 %s1351_s26, 4  ;;  %s1485_s28 = int_to_ptr.vmem [resolvable:$true] %s376_s28 }
  0x18   : > { %s1182_s29 = scalar_lea.vmem %s363_s17, 16  ;;  %s1189_s16 = scalar_lea.vmem %s363_s17, 32 }
  0x19   : > { %p1173_p13 = pneg %p1481_p12  ;;  %p1183_p0 = scmp.ne.s32.totalorder %s363_s17, %s1182_s29 }
  0x1a   : > { %p1190_p3 = scmp.lt.s32.totalorder %s363_s17, %s363_s17  ;;  %p1191_p4 = scmp.lt.s32.totalorder %s1189_s16, %s1182_s29 }
  0x1b   : > { %p1185_p1 = pnand %p1183_p0, %p1173_p13 }
  0x1c   : > { %p1192_p7 = por %p1191_p4, %p1190_p3 }
  0x1d   : > { %p1186_p2 = pneg %p1185_p1 }
  0x1f   : > { %p1193_p8 = pnand %p1192_p7, %p1186_p2 }
  0x21   : > { %1196 = shalt.err (!%p1193_p8)
}
  0x22   : > { %1092 = dma.hbm_to_vmem [thread:$0]  (!%p1481_p12), %s1657_s5, 16, %s363_s17, [#allocation6]  }
  0x23   : > { %s1208_s30 = scalar_lea.vmem %s352_s19, 16  ;;  %s1215_s23 = scalar_lea.vmem %s352_s19, 32 }
  0x24   : > { %p1209_p11 = scmp.ne.s32.totalorder %s352_s19, %s1208_s30  ;;  %p1216_p1 = scmp.lt.s32.totalorder %s352_s19, %s352_s19 }
  0x25   : > { %p1217_p6 = scmp.lt.s32.totalorder %s1215_s23, %s1208_s30 }
  0x26   : > { %p1211_p9 = pnand %p1209_p11, %p1173_p13 }
  0x27   : > { %p1218_p5 = por %p1217_p6, %p1216_p1 }
  0x28   : > { %p1212_p0 = pneg %p1211_p9 }
  0x2a   : > { %p1219_p3 = pnand %p1218_p5, %p1212_p0 }
  0x2c   : > { %1222 = shalt.err (!%p1219_p3)
}
  0x2d   : > { %1089 = dma.hbm_to_vmem [thread:$0]  (!%p1481_p12), %s1656_s4, 16, %s352_s19, [#allocation3]  }
  0x2e   : > { %s1234_s17 = scalar_lea.vmem %s1485_s28, 16  ;;  %s1241_s23 = scalar_lea.vmem %s1485_s28, 32 }
  0x2f   : > { %p1235_p2 = scmp.ne.s32.totalorder %s1485_s28, %s1234_s17  ;;  %p1242_p5 = scmp.lt.s32.totalorder %s1485_s28, %s1485_s28 }
  0x30   : > { %p1243_p6 = scmp.lt.s32.totalorder %s1241_s23, %s1234_s17 }
  0x31   : > { %p1237_p9 = pnand %p1235_p2, %p1173_p13 }
  0x32   : > { %p1244_p7 = por %p1243_p6, %p1242_p5 }
  0x33   : > { %p1238_p4 = pneg %p1237_p9 }
  0x35   : > { %p1245_p8 = pnand %p1244_p7, %p1238_p4 }
  0x37   : > { %1248 = shalt.err (!%p1245_p8)
}
  0x38   : > { %1095 = dma.hbm_to_vmem [thread:$0]  (!%p1481_p12), %s1659_s7, 16, %s1485_s28, [#allocation6]  }
  0x39   : > { %s1352_s19 = smov [#allocation8]  }
  0x3a   : > { %s390_s26 = sshll.u32 %s1352_s19, 4  ;;  %s391_s26 = int_to_ptr.vmem [resolvable:$true] %s390_s26 }
  0x3b   : > { %s1260_s29 = scalar_lea.vmem %s391_s26, 16  ;;  %s1267_s16 = scalar_lea.vmem %s391_s26, 32 }
  0x3c   : > { %p1261_p11 = scmp.ne.s32.totalorder %s391_s26, %s1260_s29  ;;  %p1268_p3 = scmp.lt.s32.totalorder %s391_s26, %s391_s26 }
  0x3d   : > { %p1269_p2 = scmp.lt.s32.totalorder %s1267_s16, %s1260_s29 }
  0x3e   : > { %p1263_p0 = pnand %p1261_p11, %p1173_p13 }
  0x3f   : > { %p1270_p9 = por %p1269_p2, %p1268_p3 }
  0x40   : > { %p1264_p1 = pneg %p1263_p0 }
  0x42   : > { %p1271_p4 = pnand %p1270_p9, %p1264_p1 }
  0x44   : > { %1274 = shalt.err (!%p1271_p4)
}
  0x45   : > { %1098 = dma.hbm_to_vmem [thread:$0]  (!%p1481_p12), %s1661_s9, 16, %s391_s26, [#allocation9]  }
  0x46   : > { %417 = sbr.rel (%p1473_p10) target bundleno = 1439 (0x59f), region = 60  ;;  %p1675_p5 = scmp.eq.s32.totalorder (!%p1473_p10), %s1445_s25, 0 }
  0x4b   : > { %1318 = dma.done.wait (%p1675_p5), [#allocation3], 16   ;;  %p1676_p13 = pmov %p1675_p5 }
  0x4c   : > { %p1677_p6 = pmov %p1675_p5 }
  0x4d   : > { %1320 = vsyncadd (%p1676_p13), [#allocation3], 4294967280 }
  0x4e   : > { %1322 = dma.done.wait (%p1677_p6), [#allocation6], 32   ;;  %p1678_p7 = pmov %p1675_p5 }
  0x4f   : > { %p1679_p8 = pmov %p1675_p5 }
  0x50   : > { %1324 = vsyncadd (%p1678_p7), [#allocation6], 4294967264 }
  0x51   : > { %1326 = dma.done.wait (%p1679_p8), [#allocation9], 16   ;;  %p1680_p12 = pmov %p1675_p5 }
  0x52   : > { %v1353_v0 = vmov 0.0   ;;  %vm1354_vm0 = vmmov 0   ;;  %p482_p10 = scmp.lt.s32.totalorder %s1445_s25, 1  ;;  %v1153_v1 = vld [vmem:[%s1654_s2 + $0x18] sm:$0xff]   ;;  %v1154_v2 = vld [vmem:[%s1654_s2 + $0x10] sm:$0xff]   ;;  %v1155_v3 = vld [vmem:[%s1654_s2 + $0x8] sm:$0xff]  }
  0x53   : > { %1328 = vsyncadd (%p1680_p12), [#allocation9], 4294967280  ;;  %1040 = vmatprep.subr.bf16.mxu0 %v1353_v0  ;;  %1048 = vmatprep.mubr.msk.bf16.mxu0 %vm1354_vm0, %v1353_v0  ;;  %s1681_s0 = sld [smem:[#allocation17_spill]]  ;;  %v1156_v4 = vld [vmem:[%s1654_s2] sm:$0xff]   ;;  %vm540_vm1 = vcmask 523264   ;;  %vm584_vm2 = vcmask 15360  }
  0x54   : > { %1052 = vmatprep.subr.bf16.mxu1 %v1353_v0  ;;  %1056 = vmatprep.mubr.msk.bf16.mxu1 %vm1354_vm0, %v1353_v0  ;;  %s483_s28 = scalar_select %p482_p10, %s1445_s25, 1  ;;  %v1008_v7 = vld [vmem:[%s1655_s3] ss:$0 sm:$0xff]  ;;  %vm590_vm3 = vcmask 261120   ;;  %v1015_v22 = vld [vmem:[#allocation5] ss:$0 sm:$0xff] }
  0x55   : > { %1041 = vmatpush3.bf16.msra.mxu0 %v1153_v1  ;;  %s1355_s16 = smov 126   ;;  %v1014_v15 = vld [vmem:[#allocation2] ss:$0 sm:$0xff]  ;;  %s1356_s17 = smov 2   ;;  %v1157_v23 = vld [vmem:[%s1658_s6 + $0x8] sm:$0xff]  }
  0x56   : > { %1042 = vmatprep.subr.bf16.mxu0 %v1353_v0  ;;  %s1559_s29 = sshll.u32 %s483_s28, 3  ;;  %1053 = vmatpush3.bf16.msra.mxu1 %v1157_v23  ;;  %v1158_v24 = vld [vmem:[%s1658_s6] sm:$0xff]   ;;  %v1159_v36 = vld [vmem:[%s1660_s8 + $0x8] sm:$0xff]   ;;  %s1026_s18 = sshll.u32 %s1445_s25, 7 }
  0x57   : > { %s493_s26 = scalar_lea.vmem %s1662_s10, %s1559_s29  ;;  %1054 = vmatprep.subr.bf16.mxu1 %v1353_v0  ;;  %v1160_v37 = vld [vmem:[%s1660_s8] sm:$0xff]   ;;  %s497_s28 = scalar_lea.vmem %s1663_s11, %s1559_s29 }
  0x58   : > { %v1016_v38 = vld [vmem:[#allocation7] ss:$0 sm:$0xff]  ;;  %p1682_p0 = scmp.ne.s32.totalorder %s1671_s13, 0 }
  0x59   : > { %1043 = vmatpush3.bf16.msra.mxu0 %v1154_v2  ;;  %s485_s23 = scalar_lea.vmem %s1681_s0, %s1559_s29 }
  0x5a   : > { %1044 = vmatprep.subr.bf16.mxu0 %v1353_v0  ;;  %v499_v5 = vld [vmem:[%s485_s23] sm:$0xff]  ;;  %1055 = vmatpush3.bf16.msra.mxu1 %v1158_v24  ;;  %s489_s23 = scalar_lea.vmem %s1653_s1, %s1559_s29  ;;  %s479_s29 = sand.u32 1, %s1339_s22  }
  0x5b   : > { %v500_v6 = vpack.c.bf16 %v499_v5, %v499_v5  ;;  %1060 = vmatprep.subr.bf16.mxu1 %v1353_v0  ;;  %v726_v5 = vld [vmem:[%s489_s23] sm:$0xff]  ;;  %s1003_s30 = sshll.u32 %s479_s29, 3  ;;  %s1616_s23 = scalar_lea.hbm %s1664_s12, %s1026_s18 }
  0x5c   : > { %s481_s19 = scalar_lea.vmem [#allocation10], %s1003_s30  ;;  %s812_s15 = scalar_lea.sflag [#allocation4], %s479_s29 }
  0x5d   : > { %1045 = vmatpush3.bf16.msra.mxu0 %v1155_v3 }
  0x5e   : > { %1046 = vmatprep.subr.bf16.mxu0 %v1353_v0 }
  0x61   : > { %1047 = vmatpush3.bf16.msra.mxu0 %v1156_v4 }
  0x64   : > { %1049 = vmatmul.mubr.msk.bf16.vlgmr.msra.gmra.mxu0 %vm540_vm1, %v500_v6 }
 0x124   : > { %v578_v8 = vpop.f32.mrf.mxu0 }
 0x125   : > { %v579_v9 = vadd.f32 %v1008_v7, %v578_v8 }
 0x126   : > { %v1050_v10 = vpop.f32.mrf.mxu0 }
 0x127   : > { %585 = vst.msk [vmem:[%s493_s26] sm:$0xff] %vm584_vm2, %v579_v9  ;;  %587 = vrot.lane.b32.xlu0 %v579_v9, %s1355_s16  ;;  %s831_s26 = sshll.u32 %s481_s19, 4  ;;  %s832_s26 = int_to_ptr.vmem [resolvable:$true] %s831_s26 }
 0x128   : > { %v581_v11 = vpop.f32.mrf.mxu0  ;;  %s1275_s20 = scalar_lea.vmem %s832_s26, 128 }
 0x129   : > { %p1276_p11 = scmp.ne.s32.totalorder %s832_s26, %s1275_s20 }
 0x12a   : > { %v1051_v12 = vpop.f32.mrf.mxu0 }
 0x12b   : > { %p1277_p1 = pnand %p1276_p11, %p1682_p0 }
 0x12d   : > { %p1278_p3 = pneg %p1277_p1 }
 0x199   : > { %v588_v13 = vpop.permute.xlu0 %587 }
 0x19a   : > { %v591_v14 = vsel %vm590_vm3, %v588_v13, 0.0 }
 0x19b   : > { %592 = vadd.xlane.f32.xlu0 %v591_v14 }
 0x1b1   : > { %615 = vrot.lane.b32.xlu0 %v1014_v15, %s1356_s17 }
 0x224   : > { %v593_v16 = vpop.xlane.xlu0 %592 }
 0x225   : > { %v595_v17 = vmul.f32 0.03125, %v593_v16 }
 0x227   : > { %v596_v18 = vsub.f32 %v579_v9, %v595_v17  ;;  %v1020_v9 = vld [vmem:[#allocation8] ss:$0 sm:$0xff] }
 0x228   : > { %v616_v29 = vpop.permute.xlu0 %615 }
 0x229   : > { %v597_v19 = vmul.f32 %v596_v18, %v596_v18 }
 0x22b   : > { %599 = vrot.lane.b32.xlu1 %v597_v19, %s1355_s16 }
 0x29d   : > { %v600_v20 = vpop.permute.xlu1 %599 }
 0x29e   : > { %v602_v21 = vsel %vm590_vm3, %v600_v20, 0.0 }
 0x29f   : > { %603 = vadd.xlane.f32.xlu1 %v602_v21 }
 0x2b0   : > { %625 = vrot.lane.b32.xlu1 %v1015_v22, %s1356_s17 }
 0x328   : > { %v604_v25 = vpop.xlane.xlu1 %603 }
 0x329   : > { %v605_v26 = vmul.f32 0.03125, %v604_v25 }
 0x32b   : > { %v606_v27 = vadd.f32 1e-05, %v605_v26 }
 0x32c   : > { %v626_v31 = vpop.permute.xlu1 %625 }
 0x32d   : > { %1161 = vrsqrt.f32 %v606_v27 }
 0x33a   : > { %v1162_v28 = vpop.eup %1161 }
 0x33b   : > { %v608_v30 = vmul.f32 %v1162_v28, %v596_v18 }
 0x33d   : > { %v618_v32 = vmul.f32 %v616_v29, %v608_v30 }
 0x33f   : > { %v628_v33 = vadd.f32 %v626_v31, %v618_v32 }
 0x341   : > { %v629_v34 = vpack.c.bf16 %v628_v33, %v628_v33 }
 0x343   : > { %642 = vrot.lane.b32.xlu0 %v629_v34, %s1355_s16 }
 0x3b5   : > { %v643_v35 = vpop.permute.xlu0 %642 }
 0x3b6   : > { %1057 = vmatmul.mubr.msk.bf16.vlgmr.msra.gmra.mxu1 %vm590_vm3, %v643_v35 }
 0x3b7   : > { %1064 = vmatprep.mubr.msk.bf16.mxu1 %vm1354_vm0, %v1353_v0  ;;  %1061 = vmatpush3.bf16.msra.mxu1 %v1159_v36 }
 0x3b8   : > { %1062 = vmatprep.subr.bf16.mxu1 %v1353_v0  ;;  %v1357_v0 = vmov -1.0  }
 0x3bb   : > { %1063 = vmatpush3.bf16.msra.mxu1 %v1160_v37 }
 0x476   : > { %v693_v39 = vpop.f32.mrf.mxu1 }
 0x477   : > { %v694_v40 = vadd.f32 %v1016_v38, %v693_v39 }
 0x478   : > { %v1058_v41 = vpop.f32.mrf.mxu1 }
 0x479   : > { %v700_v42 = vmul.f32 0.70710677, %v694_v40  ;;  %v699_v3 = vmul.f32 0.5, %v694_v40 }
 0x47a   : > { %v696_v43 = vpop.f32.mrf.mxu1 }
 0x47b   : > { %v703_v44 = vand.u32 2147483647, %v700_v42  ;;  %vm701_vm4 = vcmp.ge.f32.partialorder %v700_v42, 0.0 }
 0x47c   : > { %v1059_v45 = vpop.f32.mrf.mxu1  ;;  %v702_v1 = vsel %vm701_vm4, 1.0, %v1357_v0 }
 0x47d   : > { %v704_v46 = vmul.f32 0.3275911, %v703_v44  ;;  %v717_v48 = vsub.f32 0.0, %v703_v44 }
 0x47f   : > { %v705_v47 = vadd.f32 1.0, %v704_v46  ;;  %v718_v49 = vmul.f32 %v717_v48, %v703_v44 }
 0x481   : > { %1163 = vrcp.f32 %v705_v47  ;;  %v719_v52 = vmul.f32 1.442695, %v718_v49 }
 0x483   : > { %1165 = vpow2.f32 %v719_v52 }
 0x48e   : > { %v1164_v50 = vpop.eup %1163 }
 0x48f   : > { %v708_v51 = vmul.f32 1.0614054, %v1164_v50 }
 0x490   : > { %v1166_v61 = vpop.eup %1165 }
 0x491   : > { %v709_v53 = vadd.f32 -1.4531521, %v708_v51 }
 0x493   : > { %v710_v54 = vmul.f32 %v1164_v50, %v709_v53 }
 0x495   : > { %v711_v55 = vadd.f32 1.4214138, %v710_v54 }
 0x497   : > { %v712_v56 = vmul.f32 %v1164_v50, %v711_v55 }
 0x499   : > { %v713_v57 = vadd.f32 -0.28449672, %v712_v56 }
 0x49b   : > { %v714_v58 = vmul.f32 %v1164_v50, %v713_v57 }
 0x49d   : > { %v715_v59 = vadd.f32 0.2548296, %v714_v58 }
 0x49f   : > { %v716_v60 = vmul.f32 %v1164_v50, %v715_v59 }
 0x4a1   : > { %v721_v62 = vmul.f32 %v1166_v61, %v716_v60 }
 0x4a3   : > { %v722_v63 = vsub.f32 1.0, %v721_v62 }
 0x4a5   : > { %v723_v2 = vmul.f32 %v722_v63, %v702_v1 }
 0x4a7   : > { %v724_v4 = vadd.f32 1.0, %v723_v2 }
 0x4a9   : > { %v725_v6 = vmul.f32 %v724_v4, %v699_v3 }
 0x4ab   : > { %v727_v7 = vadd.f32 %v726_v5, %v725_v6 }
 0x4ad   : > { %728 = vst.msk [vmem:[%s497_s28] sm:$0xff] %vm590_vm3, %v727_v7  ;;  %v729_v8 = vpack.c.bf16 %v727_v7, %v727_v7  ;;  %s1358_s28 = smov [#allocation10]  }
 0x4ae   : > { %s1279_s0 = sshll.u32 %s1358_s28, 4  ;;  %s1280_s0 = int_to_ptr.vmem [resolvable:$false] %s1279_s0 }
 0x4af   : > { %1065 = vmatmul.mubr.msk.bf16.vlgmr.msra.gmra.mxu1 %vm590_vm3, %v729_v8  ;;  %s1281_s25 = scalar_lea.vmem %s1280_s0, 256  ;;  %p1282_p2 = scmp.lt.s32.totalorder %s832_s26, %s1280_s0 }
 0x4b0   : > { %p1283_p9 = scmp.lt.s32.totalorder %s1281_s25, %s1275_s20 }
 0x4b2   : > { %p1284_p4 = por %p1283_p9, %p1282_p2 }
 0x4b4   : > { %p1285_p5 = pnand %p1284_p4, %p1278_p3 }
 0x56f   : > { %v790_v10 = vpop.f32.mrf.mxu1 }
 0x570   : > { %v791_v11 = vadd.f32 %v1020_v9, %v790_v10 }
 0x571   : > { %v1066_v12 = vpop.f32.mrf.mxu1 }
 0x572   : > { %v1024_v13 = vmul.f32 -1.442695, %v791_v11 }
 0x573   : > { %v793_v14 = vpop.f32.mrf.mxu1 }
 0x574   : > { %1167 = vpow2.f32 %v1024_v13 }
 0x575   : > { %v1067_v15 = vpop.f32.mrf.mxu1 }
 0x581   : > { %v1168_v16 = vpop.eup %1167 }
 0x582   : > { %v799_v17 = vadd.f32 1.0, %v1168_v16 }
 0x584   : > { %1169 = vrcp.f32 %v799_v17 }
 0x591   : > { %v1170_v18 = vpop.eup %1169 }
 0x592   : > { %802 = vst.msk [vmem:[%s481_s19] sm:$0xff] %vm584_vm2, %v1170_v18 }
 0x593   : > { %1288 = shalt.err (!%p1285_p5)
}
 0x594   : > { %s1289_s30 = scalar_lea.hbm %s1616_s23, 128  ;;  %s1293_s19 = scalar_lea.hbm %s1664_s12, 256 }
 0x595   : > { %p1290_p13 = scmp.ne.s32.totalorder %s1616_s23, %s1289_s30  ;;  %p1294_p8 = scmp.lt.s32.totalorder %s1616_s23, %s1664_s12 }
 0x596   : > { %p1295_p12 = scmp.lt.s32.totalorder %s1293_s19, %s1289_s30 }
 0x597   : > { %p1291_p6 = pnand %p1290_p13, %p1682_p0 }
 0x598   : > { %p1296_p10 = por %p1295_p12, %p1294_p8 }
 0x599   : > { %p1292_p7 = pneg %p1291_p6 }
 0x59b   : > { %p1297_p11 = pnand %p1296_p10, %p1292_p7 }
 0x59d   : > { %1300 = shalt.err (!%p1297_p11)
}
 0x59e   : > { %1084 = dma.vmem_to_hbm [thread:$0]  (%p1682_p0), %s832_s26, 128, %s1616_s23, %s812_s15  }
 0x59f PF: > { %p1111_p1 = scmp.ge.s32.totalorder %s1347_s24, 2  ;;  %s857_s0 = sand.u32 1, %s1335_s21  }
 0x5a0   : > { %p1683_p3 = scmp.ne.s32.totalorder %s1672_s14, 0  ;;  %s858_s20 = scalar_lea.sflag [#allocation4], %s857_s0 }
 0x5a2   : > { %p1100_p2 = pnand %p1111_p1, %p1683_p3 }
 0x5a4   : > { %p1101_p9 = pneg %p1100_p2 }
 0x5a6   : > { %1330 = dma.done.wait (%p1101_p9), %s858_s20, 128  }
 0x5a7   : > { %1332 = vsyncadd (%p1101_p9), %s858_s20, 4294967168  ;;  %s1684_s28 = sld [smem:[#allocation15_spill]]  ;;  %p26_p4 = scmp.ge.s32.totalorder %s1449_s27, 4  }
 0x5a8   : > { %s1685_s23 = sld [smem:[#allocation16_spill]]  ;;  %s1686_s21 = smov %s1339_s22 }
 0x5a9   : > { %s1688_s24 = smov %s1449_s27  ;;  %28 = sbr.rel (!%p26_p4) target bundleno = 8 (0x8), region = 139 }
 0x5ad   : > { %s1687_s22 = smov %s1684_s28 }
 0x5ae   :  { %863 = vsyncpa [#allocation3], 1 }
 0x5af   :  { %865 = vsyncpa [#allocation3 + $0x1], 1 }
 0x5b0   :  { %866 = vsyncpa [#allocation6], 1 }
 0x5b1   :  { %867 = vsyncpa [#allocation9], 1 }
 0x5b2   :  { %868 = vsyncpa [#allocation4], 1 }
 0x5b3   :  { %870 = vsyncpa [#allocation4 + $0x1], 1 }

// kernel: _lambda_.24
= control target key start
LH: loop header
LB: loop body
LE: loop exit
PB: predicated region body
PF: predicated region fallthrough
CT: control target
= control target key end

     0   :  { %s3581_s30 = smov 0   ;;  %s4131_s0 = inlined_call_operand.vmem [shape: f32[8,4,64], index: 0, kind: input, shape index: {}]   ;;  %s4132_s1 = inlined_call_operand.vmem [shape: bf16[64,192], index: 1, kind: input, shape index: {}]   ;;  %s4133_s2 = inlined_call_operand.vmem [shape: f32[1,192], index: 2, kind: input, shape index: {}]   ;;  %s4134_s3 = inlined_call_operand.vmem [shape: bf16[64,64], index: 3, kind: input, shape index: {}]   ;;  %s4135_s4 = inlined_call_operand.vmem [shape: f32[1,64], index: 4, kind: input, shape index: {}]   ;;  %s4136_s5 = inlined_call_operand.vmem [shape: bf16[64,256], index: 5, kind: input, shape index: {}]   ;;  %s4137_s6 = inlined_call_operand.vmem [shape: f32[1,256], index: 6, kind: input, shape index: {}]   ;;  %s4138_s7 = inlined_call_operand.vmem [shape: bf16[256,64], index: 7, kind: input, shape index: {}]   ;;  %s4139_s8 = inlined_call_operand.vmem [shape: f32[1,64], index: 8, kind: input, shape index: {}]   ;;  %s4140_s9 = inlined_call_operand.vmem [shape: f32[8,4,64], index: 9, kind: output, shape index: {}]  }
   0x1 LB: > { %s2946_s10 = sadd.s32 4294967295, %s3519_s30   ;;  %p2950_p0 = scmp.ge.s32.totalorder %s3519_s30, 1  ;;  %s3519_s30 = sphi %s3581_s30, %s19_s30  }
   0x2   : > { %p288_p1 = scmp.lt.s32.totalorder %s3519_s30, 3 }
   0x4   : > { %p289_p2 = pnand %p2950_p0, %p288_p1 }
   0x5   : > { %s2951_s11 = sshll.u32 (!%p289_p2), %s2946_s10, 2  ;;  %s3524_s17 = smov (!%p289_p2), 64  }
   0x6   : > { %292 = sbr.rel (%p289_p2) target bundleno = 4172 (0x104c), region = 56  ;;  %p325_p3 = scmp.lt.s32.totalorder (!%p289_p2), %s2951_s11, 7 }
   0x7   : > { %s3525_s18 = smov (!%p289_p2), 48   ;;  %s3526_s19 = smov (!%p289_p2), 112  }
   0x8   : > { %s3527_s20 = smov (!%p289_p2), 96   ;;  %s3528_s21 = smov (!%p289_p2), 32  }
   0x9   : > { %s3529_s22 = smov (!%p289_p2), 80   ;;  %s3530_s23 = smov (!%p289_p2), 16  }
   0xb   : > { %vm341_vm0 = vcmask 519168   ;;  %s4142_s11 = smov (!%p325_p3, %s2951_s11), 7  ;;  %v3377_v28 = vld [vmem:[%s4132_s1 + $0x34] ss:$8 sps:$4 sm:$0xff]   ;;  %v3379_v29 = vld [vmem:[%s4132_s1 + $0x30] ss:$8 sps:$4 sm:$0xff]   ;;  %v414_v60 = vlaneseq }
   0xc   : > { %s2952_s12 = sshll.u32 %s4142_s11, 2  ;;  %v3380_v30 = vld [vmem:[%s4132_s1 + $0x24] ss:$8 sps:$4 sm:$0xff]   ;;  %476 = vmatprep.subr.bf16.mxu1 %v3377_v28  ;;  %v3382_v31 = vld [vmem:[%s4132_s1 + $0x20] ss:$8 sps:$4 sm:$0xff]   ;;  %v3521_v32 = vmov 0  }
   0xd   : > { %s3597_s15 = scalar_lea.vmem %s4131_s0, %s2952_s12  ;;  %477 = vmatpush1.bf16.msra.mxu1 %v3379_v29  ;;  %500 = vmatprep.mubr.bf16.mxu1 %v3521_v32  ;;  %v3383_v33 = vld [vmem:[%s4132_s1 + $0x14] ss:$8 sps:$4 sm:$0xff]   ;;  %v3385_v34 = vld [vmem:[%s4132_s1 + $0x10] ss:$8 sps:$4 sm:$0xff]   ;;  %v3386_v35 = vld [vmem:[%s4132_s1 + $0x4] ss:$8 sps:$4 sm:$0xff]  }
   0xe   : > { %v337_v0 = vld [vmem:[%s3597_s15] sm:$0xf]  ;;  %v339_v1 = vld [vmem:[%s3597_s15 + $0x8] sm:$0xf]  ;;  %v338_v2 = vld [vmem:[%s3597_s15 + $0x4] sm:$0xf]  ;;  %478 = vmatprep.subr.bf16.mxu1 %v3380_v30 }
   0xf   : > { %v342_v3 = vsel %vm341_vm0, %v337_v0, 0.0  ;;  %v348_v4 = vsel %vm341_vm0, %v339_v1, 0.0  ;;  %v340_v5 = vld [vmem:[%s3597_s15 + $0xc] sm:$0xf]  ;;  %v345_v6 = vsel %vm341_vm0, %v338_v2, 0.0  ;;  %vm464_vm1 = vcmask 523264  }
  0x10   : > { %343 = vadd.xlane.f32.xlu0 %v342_v3  ;;  %349 = vadd.xlane.f32.xlu1 %v348_v4  ;;  %v351_v7 = vsel %vm341_vm0, %v340_v5, 0.0  ;;  %v3388_v36 = vld [vmem:[%s4132_s1] ss:$8 sps:$4 sm:$0xff]   ;;  %v3637_v61 = vshrl.u32 %v414_v60, 7  ;;  %vm3523_vm2 = vmmov 0   ;;  %vm542_vm3 = vcmask 130048  }
  0x11   : > { %479 = vmatpush1.bf16.msra.mxu1 %v3382_v31  ;;  %vm793_vm4 = vcmask 1041408   ;;  %vm740_vm5 = vcmask 27648   ;;  %vm789_vm6 = vcmask 31744   ;;  %vm2383_vm7 = vcmask 261120  }
  0x12   : > { %480 = vmatprep.subr.bf16.mxu1 %v3383_v33  ;;  %v416_v62 = vsub.s32 0, %v3637_v61  ;;  %v420_v63 = vsub.s32 1, %v3637_v61  ;;  %vm2388_vm8 = vcmask 392192  }
  0x14   : > { %346 = vadd.xlane.f32.xlu0 %v345_v6  ;;  %352 = vadd.xlane.f32.xlu1 %v351_v7 }
  0x15   : > { %481 = vmatpush1.bf16.msra.mxu1 %v3385_v34 }
  0x16   : > { %482 = vmatprep.subr.bf16.mxu1 %v3386_v35 }
  0x19   : > { %483 = vmatpush1.bf16.msra.mxu1 %v3388_v36 }
  0x99   : > { %v344_v8 = vpop.xlane.xlu0 %343  ;;  %v350_v9 = vpop.xlane.xlu1 %349 }
  0x9a   : > { %v355_v10 = vmul.f32 0.015625, %v344_v8  ;;  %v357_v11 = vmul.f32 0.015625, %v350_v9 }
  0x9c   : > { %v359_v12 = vsub.f32 %v337_v0, %v355_v10  ;;  %v361_v13 = vsub.f32 %v339_v1, %v357_v11  ;;  %v412_v0 = vld [vmem:[%s4133_s2] sm:$0x3]  ;;  %v3522_v1 = vmov 0.0  }
  0x9d   : > { %v347_v14 = vpop.xlane.xlu0 %346  ;;  %v353_v15 = vpop.xlane.xlu1 %352  ;;  %3125 = vmatprep.subr.bf16.mxu1 %v3522_v1  ;;  %3137 = vmatprep.subr.bf16.mxu0 %v3522_v1  ;;  %v421_v3 = vrot.slane %v412_v0, %v420_v63 }
  0x9e   : > { %v356_v16 = vmul.f32 0.015625, %v347_v14  ;;  %v358_v17 = vmul.f32 0.015625, %v353_v15  ;;  %v363_v18 = vmul.f32 %v359_v12, %v359_v12  ;;  %v365_v19 = vmul.f32 %v361_v13, %v361_v13  ;;  %3139 = vmatprep.mubr.msk.bf16.mxu0 %vm3523_vm2, %v3522_v1 }
  0xa0   : > { %v360_v20 = vsub.f32 %v338_v2, %v356_v16  ;;  %v362_v21 = vsub.f32 %v340_v5, %v358_v17  ;;  %v367_v22 = vsel %vm341_vm0, %v363_v18, 0.0  ;;  %v373_v23 = vsel %vm341_vm0, %v365_v19, 0.0 }
  0xa1   : > { %368 = vadd.xlane.f32.xlu0 %v367_v22  ;;  %v417_v2 = vrot.slane %v412_v0, %v416_v62 }
  0xa2   : > { %v364_v24 = vmul.f32 %v360_v20, %v360_v20  ;;  %v366_v25 = vmul.f32 %v362_v21, %v362_v21 }
  0xa4   : > { %v370_v26 = vsel %vm341_vm0, %v364_v24, 0.0  ;;  %v376_v27 = vsel %vm341_vm0, %v366_v25, 0.0 }
  0xa5   : > { %374 = vadd.xlane.f32.xlu0 %v373_v23  ;;  %371 = vadd.xlane.f32.xlu1 %v370_v26 }
  0xa9   : > { %377 = vadd.xlane.f32.xlu1 %v376_v27 }
 0x12a   : > { %v369_v37 = vpop.xlane.xlu0 %368 }
 0x12b   : > { %v379_v38 = vmul.f32 0.015625, %v369_v37 }
 0x12d   : > { %v383_v43 = vadd.f32 1e-06, %v379_v38 }
 0x12e   : > { %v372_v39 = vpop.xlane.xlu1 %371  ;;  %v375_v40 = vpop.xlane.xlu0 %374 }
 0x12f   : > { %v380_v41 = vmul.f32 0.015625, %v372_v39  ;;  %v381_v42 = vmul.f32 0.015625, %v375_v40 }
 0x131   : > { %v384_v44 = vadd.f32 1e-06, %v380_v41  ;;  %v385_v45 = vadd.f32 1e-06, %v381_v42 }
 0x132   : > { %v378_v46 = vpop.xlane.xlu1 %377 }
 0x133   : > { %3421 = vrsqrt.f32 %v384_v44  ;;  %v382_v47 = vmul.f32 0.015625, %v378_v46 }
 0x134   : > { %3423 = vrsqrt.f32 %v383_v43 }
 0x135   : > { %3425 = vrsqrt.f32 %v385_v45  ;;  %v386_v48 = vadd.f32 1e-06, %v382_v47 }
 0x137   : > { %3427 = vrsqrt.f32 %v386_v48 }
 0x140   : > { %v3422_v49 = vpop.eup %3421 }
 0x141   : > { %v3424_v50 = vpop.eup %3423  ;;  %v392_v52 = vmul.f32 %v3422_v49, %v360_v20 }
 0x142   : > { %v3426_v51 = vpop.eup %3425  ;;  %v391_v54 = vmul.f32 %v3424_v50, %v359_v12 }
 0x143   : > { %v393_v55 = vmul.f32 %v3426_v51, %v361_v13 }
 0x144   : > { %v3428_v53 = vpop.eup %3427  ;;  %v399_v57 = vcombine.low %v391_v54, %v392_v52 }
 0x145   : > { %v394_v56 = vmul.f32 %v3428_v53, %v362_v21 }
 0x147   : > { %v400_v58 = vcombine.low %v393_v55, %v394_v56 }
 0x149   : > { %v403_v59 = vpack.c.bf16 %v400_v58, %v399_v57 }
 0x14b   : > { %2963 = vmatmul.mubr.msk.bf16.vlgmr.msra.gmra.mxu1 %vm464_vm1, %v403_v59 }
 0x14c   : > { %3127 = vmatprep.mubr.msk.bf16.mxu1 %vm3523_vm2, %v3522_v1 }
 0x20b   : > { %v502_v4 = vpop.f32.mrf.mxu1 }
 0x20c   : > { %v503_v6 = vadd.f32 %v502_v4, %v417_v2 }
 0x20d   : > { %v504_v5 = vpop.f32.mrf.mxu1 }
 0x20e   : > { %v505_v7 = vadd.f32 %v504_v5, %v421_v3 }
 0x20f   : > { %v506_v8 = vpop.f32.mrf.mxu1 }
 0x210   : > { %v515_v9 = vcombine.low %v503_v6, %v505_v7  ;;  %v516_v10 = vcombine.high %v503_v6, %v505_v7  ;;  %v2964_v11 = vcombine.low %v505_v7, %v505_v7  ;;  %v2965_v12 = vcombine.high %v505_v7, %v505_v7 }
 0x211   : > { %v508_v13 = vpop.f32.mrf.mxu1  ;;  %v507_v16 = vadd.f32 %v506_v8, %v417_v2 }
 0x212   : > { %v3654_v14 = vpack.c.bf16 %v515_v9, %v515_v9  ;;  %v3656_v15 = vpack.c.bf16 %v516_v10, %v516_v10  ;;  %v509_v17 = vadd.f32 %v508_v13, %v421_v3  ;;  %v3658_v18 = vpack.i.bf16 %v2965_v12, %v2964_v11 }
 0x213   : > { %v535_v31 = vpack.c.bf16 %v2964_v11, %v2964_v11  ;;  %v536_v37 = vpack.c.bf16 %v2965_v12, %v2965_v12 }
 0x214   : > { %v517_v19 = vcombine.low %v507_v16, %v509_v17  ;;  %v3660_v20 = vcombine.low %v509_v17, %v509_v17  ;;  %v3662_v21 = vcombine.high %v509_v17, %v509_v17  ;;  %590 = vrot.lane.b32.xlu1 %v3656_v15, %s3524_s17  ;;  %540 = vrot.lane.b32.xlu0 %v3654_v14, %s3524_s17 }
 0x215   : > { %v518_v22 = vcombine.high %v507_v16, %v509_v17  ;;  %v795_v34 = vsel %vm793_vm4, %v535_v31, 0  ;;  %v841_v38 = vsel %vm793_vm4, %v536_v37, 0 }
 0x216   : > { %v3666_v23 = vpack.c.bf16 %v517_v19, %v517_v19  ;;  %v3670_v24 = vpack.i.bf16 %v3662_v21, %v3660_v20 }
 0x217   : > { %v3673_v25 = vpack.c.bf16 %v518_v22, %v518_v22 }
 0x218   : > { %639 = vrot.lane.b32.xlu1 %v3666_v23, %s3524_s17 }
 0x21c   : > { %688 = vrot.lane.b32.xlu1 %v3673_v25, %s3524_s17 }
 0x286   : > { %v591_v26 = vpop.permute.xlu1 %590  ;;  %v541_v27 = vpop.permute.xlu0 %540 }
 0x287   : > { %v547_v28 = vsel %vm542_vm3, %v541_v27, 0  ;;  %v596_v33 = vsel %vm542_vm3, %v591_v26, 0 }
 0x288   : > { %3126 = vmatpush3.bf16.xpose.msra.mxu1 %v547_v28 }
 0x289   : > { %3131 = vmatprep.subr.bf16.mxu1 %v3522_v1 }
 0x28a   : > { %v640_v29 = vpop.permute.xlu1 %639 }
 0x28b   : > { %v645_v30 = vsel %vm542_vm3, %v640_v29, 0 }
 0x28c   : > { %3138 = vmatpush3.bf16.xpose.msra.mxu0 %v645_v30 }
 0x28d   : > { %3149 = vmatprep.subr.bf16.mxu0 %v3522_v1 }
 0x28e   : > { %v689_v35 = vpop.permute.xlu1 %688 }
 0x28f   : > { %3128 = vmatmul.mubr.msk.bf16.vlgmr.msra.gmra.mxu1 %vm542_vm3, %v3654_v14  ;;  %v694_v36 = vsel %vm542_vm3, %v689_v35, 0 }
 0x290   : > { %3132 = vmatpush3.bf16.xpose.msra.mxu1 %v596_v33  ;;  %3133 = vmatprep.mubr.msk.bf16.mxu1 %vm3523_vm2, %v3522_v1 }
 0x291   : > { %3143 = vmatprep.subr.bf16.mxu1 %v3522_v1 }
 0x293   : > { %3140 = vmatmul.mubr.msk.bf16.vlgmr.msra.gmra.mxu0 %vm542_vm3, %v3666_v23 }
 0x294   : > { %3150 = vmatpush3.bf16.msra.mxu0 %v795_v34  ;;  %3151 = vmatprep.mubr.msk.bf16.mxu0 %vm3523_vm2, %v3522_v1 }
 0x295   : > { %3161 = vmatprep.subr.bf16.mxu0 %v3522_v1 }
 0x297   : > { %3134 = vmatmul.mubr.msk.bf16.vlgmr.msra.gmra.mxu1 %vm542_vm3, %v3656_v15 }
 0x298   : > { %3144 = vmatpush3.bf16.xpose.msra.mxu1 %v694_v36  ;;  %3145 = vmatprep.mubr.msk.bf16.mxu1 %vm3523_vm2, %v3522_v1 }
 0x299   : > { %3155 = vmatprep.subr.bf16.mxu1 %v3522_v1 }
 0x29f   : > { %3146 = vmatmul.mubr.msk.bf16.vlgmr.msra.gmra.mxu1 %vm542_vm3, %v3673_v25 }
 0x2a0   : > { %3156 = vmatpush3.bf16.msra.mxu1 %v841_v38  ;;  %3157 = vmatprep.mubr.msk.bf16.mxu1 %vm3523_vm2, %v3522_v1  ;;  %v537_v38 = vpack.c.bf16 %v3660_v20, %v3660_v20 }
 0x2a1   : > { %3167 = vmatprep.subr.bf16.mxu1 %v3522_v1 }
 0x34f   : > { %v583_v39 = vpop.f32.mrf.mxu1 }
 0x350   : > { %v736_v40 = vmul.f32 0.25, %v583_v39 }
 0x351   : > { %v3129_v41 = vpop.f32.mrf.mxu1 }
 0x352   : > { %v741_v43 = vsel %vm740_vm5, %v736_v40, -inf  ;;  %v887_v41 = vsel %vm793_vm4, %v537_v38, 0 }
 0x353   : > { %v681_v42 = vpop.f32.mrf.mxu0  ;;  %742 = vmax.xlane.f32.xlu0 %v741_v43  ;;  %v586_v45 = vpop.f32.mrf.mxu1 }
 0x354   : > { %v738_v44 = vmul.f32 0.25, %v681_v42  ;;  %v538_v45 = vpack.c.bf16 %v3662_v21, %v3662_v21 }
 0x355   : > { %v3141_v46 = vpop.f32.mrf.mxu0  ;;  %v3130_v47 = vpop.f32.mrf.mxu1 }
 0x356   : > { %v747_v48 = vsel %vm740_vm5, %v738_v44, -inf }
 0x357   : > { %v684_v49 = vpop.f32.mrf.mxu0  ;;  %748 = vmax.xlane.f32.xlu0 %v747_v48  ;;  %v632_v50 = vpop.f32.mrf.mxu1 }
 0x358   : > { %v737_v51 = vmul.f32 0.25, %v632_v50  ;;  %v933_v49 = vsel %vm793_vm4, %v538_v45, 0 }
 0x359   : > { %v3142_v52 = vpop.f32.mrf.mxu0  ;;  %v3135_v53 = vpop.f32.mrf.mxu1 }
 0x35a   : > { %v744_v54 = vsel %vm740_vm5, %v737_v51, -inf }
 0x35b   : > { %745 = vmax.xlane.f32.xlu1 %v744_v54  ;;  %v635_v55 = vpop.f32.mrf.mxu1 }
 0x35d   : > { %v3136_v56 = vpop.f32.mrf.mxu1 }
 0x35f   : > { %v730_v57 = vpop.f32.mrf.mxu1 }
 0x360   : > { %v739_v58 = vmul.f32 0.25, %v730_v57 }
 0x361   : > { %v3147_v59 = vpop.f32.mrf.mxu1 }
 0x362   : > { %v750_v60 = vsel %vm740_vm5, %v739_v58, -inf }
 0x363   : > { %751 = vmax.xlane.f32.xlu0 %v750_v60  ;;  %v733_v0 = vpop.f32.mrf.mxu1 }
 0x365   : > { %v3148_v2 = vpop.f32.mrf.mxu1 }
 0x36c   : > { %1043 = vrot.lane.b32.xlu1 %v3656_v15, %s3525_s18 }
 0x3dc   : > { %v743_v3 = vpop.xlane.xlu0 %742 }
 0x3dd   : > { %v753_v4 = vsub.f32 %v736_v40, %v743_v3 }
 0x3df   : > { %v757_v5 = vmul.f32 1.442695, %v753_v4 }
 0x3e0   : > { %v749_v6 = vpop.xlane.xlu0 %748 }
 0x3e1   : > { %3429 = vpow2.f32 %v757_v5  ;;  %v755_v7 = vsub.f32 %v738_v44, %v749_v6 }
 0x3e3   : > { %v761_v8 = vmul.f32 1.442695, %v755_v7 }
 0x3e4   : > { %v746_v9 = vpop.xlane.xlu1 %745 }
 0x3e5   : > { %3431 = vpow2.f32 %v761_v8  ;;  %v754_v10 = vsub.f32 %v737_v51, %v746_v9 }
 0x3e7   : > { %v759_v11 = vmul.f32 1.442695, %v754_v10 }
 0x3e8   : > { %v1044_v33 = vpop.permute.xlu1 %1043 }
 0x3e9   : > { %3433 = vpow2.f32 %v759_v11 }
 0x3ec   : > { %v752_v26 = vpop.xlane.xlu0 %751 }
 0x3ed   : > { %v756_v27 = vsub.f32 %v739_v58, %v752_v26  ;;  %v1049_v58 = vsel %vm542_vm3, %v1044_v33, 0 }
 0x3ee   : > { %v3430_v12 = vpop.eup %3429 }
 0x3ef   : > { %v765_v13 = vsel %vm740_vm5, %v3430_v12, 0.0  ;;  %v763_v28 = vmul.f32 1.442695, %v756_v27 }
 0x3f0   : > { %766 = vadd.xlane.f32.xlu0 %v765_v13 }
 0x3f1   : > { %3435 = vpow2.f32 %v763_v28 }
 0x3f2   : > { %v3432_v16 = vpop.eup %3431 }
 0x3f3   : > { %v771_v17 = vsel %vm740_vm5, %v3432_v16, 0.0 }
 0x3f4   : > { %772 = vadd.xlane.f32.xlu0 %v771_v17 }
 0x3f6   : > { %v3434_v19 = vpop.eup %3433 }
 0x3f7   : > { %v768_v22 = vsel %vm740_vm5, %v3434_v19, 0.0 }
 0x3f8   : > { %769 = vadd.xlane.f32.xlu1 %v768_v22 }
 0x3fe   : > { %v3436_v29 = vpop.eup %3435 }
 0x3ff   : > { %v774_v30 = vsel %vm740_vm5, %v3436_v29, 0.0 }
 0x409   : > { %991 = vrot.lane.b32.xlu1 %v3654_v14, %s3526_s19 }
 0x40a   : > { %993 = vrot.lane.b32.xlu0 %v3654_v14, %s3525_s18 }
 0x40e   : > { %1093 = vrot.lane.b32.xlu0 %v3666_v23, %s3525_s18 }
 0x412   : > { %1091 = vrot.lane.b32.xlu0 %v3666_v23, %s3526_s19 }
 0x42d   : > { %775 = vadd.xlane.f32.xlu1 %v774_v30 }
 0x43e   : > { %1041 = vrot.lane.b32.xlu1 %v3656_v15, %s3526_s19 }
 0x442   : > { %1143 = vrot.lane.b32.xlu1 %v3673_v25, %s3525_s18 }
 0x446   : > { %1141 = vrot.lane.b32.xlu1 %v3673_v25, %s3526_s19 }
 0x479   : > { %v767_v31 = vpop.xlane.xlu0 %766 }
 0x47a   : > { %3437 = vrcp.f32 %v767_v31 }
 0x47d   : > { %v773_v34 = vpop.xlane.xlu0 %772 }
 0x47e   : > { %3439 = vrcp.f32 %v773_v34 }
 0x481   : > { %v770_v35 = vpop.xlane.xlu1 %769  ;;  %v994_v20 = vpop.permute.xlu0 %993 }
 0x482   : > { %3441 = vrcp.f32 %v770_v35  ;;  %v999_v48 = vsel %vm542_vm3, %v994_v20, 0 }
 0x485   : > { %v1094_v21 = vpop.permute.xlu0 %1093  ;;  %v992_v50 = vpop.permute.xlu1 %991 }
 0x486   : > { %v1099_v51 = vsel %vm542_vm3, %v1094_v21, 0 }
 0x487   : > { %v3438_v36 = vpop.eup %3437 }
 0x488   : > { %v781_v37 = vmul.f32 %v3438_v36, %v3430_v12 }
 0x489   : > { %v1092_v52 = vpop.permute.xlu0 %1091 }
 0x48a   : > { %v785_v39 = vpack.c.bf16 %v781_v37, %v781_v37 }
 0x48b   : > { %v3440_v40 = vpop.eup %3439 }
 0x48c   : > { %3152 = vmatmul.mubr.msk.bf16.vlgmr.msra.gmra.mxu0 %vm789_vm6, %v785_v39  ;;  %v783_v42 = vmul.f32 %v3440_v40, %v3432_v16 }
 0x48d   : > { %3162 = vmatpush3.bf16.msra.mxu0 %v887_v41  ;;  %3163 = vmatprep.mubr.msk.bf16.mxu0 %vm3523_vm2, %v3522_v1 }
 0x48e   : > { %3173 = vmatprep.subr.bf16.mxu0 %v3522_v1  ;;  %v787_v47 = vpack.c.bf16 %v783_v42, %v783_v42 }
 0x48f   : > { %v3442_v43 = vpop.eup %3441 }
 0x490   : > { %v782_v44 = vmul.f32 %v3442_v43, %v3434_v19 }
 0x492   : > { %v786_v46 = vpack.c.bf16 %v782_v44, %v782_v44 }
 0x494   : > { %3158 = vmatmul.mubr.msk.bf16.vlgmr.msra.gmra.mxu1 %vm789_vm6, %v786_v46  ;;  %3164 = vmatmul.mubr.msk.bf16.vlgmr.msra.gmra.mxu0 %vm789_vm6, %v787_v47 }
 0x495   : > { %3168 = vmatpush3.bf16.msra.mxu1 %v933_v49  ;;  %3174 = vmatpush3.bf16.xpose.msra.mxu0 %v999_v48 }
 0x496   : > { %3175 = vmatprep.mubr.msk.bf16.mxu0 %vm3523_vm2, %v3522_v1  ;;  %3185 = vmatprep.subr.bf16.mxu0 %v3522_v1 }
 0x497   : > { %3169 = vmatprep.mubr.msk.bf16.mxu1 %vm3523_vm2, %v3522_v1  ;;  %3179 = vmatprep.subr.bf16.mxu1 %v3522_v1 }
 0x49c   : > { %3176 = vmatmul.mubr.msk.bf16.vlgmr.msra.gmra.mxu0 %vm542_vm3, %v992_v50 }
 0x49d   : > { %3186 = vmatpush3.bf16.xpose.msra.mxu0 %v1099_v51  ;;  %3187 = vmatprep.mubr.msk.bf16.mxu0 %vm3523_vm2, %v3522_v1 }
 0x49e   : > { %3197 = vmatprep.subr.bf16.mxu0 %v3522_v1 }
 0x4a4   : > { %3188 = vmatmul.mubr.msk.bf16.vlgmr.msra.gmra.mxu0 %vm542_vm3, %v1092_v52 }
 0x4a5   : > { %3199 = vmatprep.mubr.msk.bf16.mxu0 %vm3523_vm2, %v3522_v1 }
 0x4b6   : > { %v776_v53 = vpop.xlane.xlu1 %775 }
 0x4b7   : > { %3443 = vrcp.f32 %v776_v53 }
 0x4ba   : > { %v1042_v57 = vpop.permute.xlu1 %1041 }
 0x4be   : > { %v1144_v59 = vpop.permute.xlu1 %1143 }
 0x4bf   : > { %v1149_v60 = vsel %vm542_vm3, %v1144_v59, 0 }
 0x4c2   : > { %v1142_v0 = vpop.permute.xlu1 %1141 }
 0x4c4   : > { %v3444_v54 = vpop.eup %3443 }
 0x4c5   : > { %v784_v55 = vmul.f32 %v3444_v54, %v3436_v29 }
 0x4c7   : > { %v788_v56 = vpack.c.bf16 %v784_v55, %v784_v55 }
 0x4c9   : > { %3170 = vmatmul.mubr.msk.bf16.vlgmr.msra.gmra.mxu1 %vm789_vm6, %v788_v56 }
 0x4ca   : > { %3180 = vmatpush3.bf16.xpose.msra.mxu1 %v1049_v58  ;;  %3181 = vmatprep.mubr.msk.bf16.mxu1 %vm3523_vm2, %v3522_v1 }
 0x4cb   : > { %3191 = vmatprep.subr.bf16.mxu1 %v3522_v1 }
 0x4d1   : > { %3182 = vmatmul.mubr.msk.bf16.vlgmr.msra.gmra.mxu1 %vm542_vm3, %v1042_v57 }
 0x4d2   : > { %3192 = vmatpush3.bf16.xpose.msra.mxu1 %v1149_v60  ;;  %3193 = vmatprep.mubr.msk.bf16.mxu1 %vm3523_vm2, %v3522_v1 }
 0x4d3   : > { %3203 = vmatprep.subr.bf16.mxu1 %v3522_v1 }
 0x4d9   : > { %3194 = vmatmul.mubr.msk.bf16.vlgmr.msra.gmra.mxu1 %vm542_vm3, %v1142_v0 }
 0x4da   : > { %3205 = vmatprep.mubr.msk.bf16.mxu1 %vm3523_vm2, %v3522_v1 }
 0x54c   : > { %v3768_v2 = vpop.f32.mrf.mxu0 }
 0x54e   : > { %v3153_v3 = vpop.f32.mrf.mxu0 }
 0x550   : > { %v834_v4 = vpop.f32.mrf.mxu0 }
 0x552   : > { %v3154_v5 = vpop.f32.mrf.mxu0 }
 0x554   : > { %v3770_v6 = vpop.f32.mrf.mxu1  ;;  %v3772_v7 = vpop.f32.mrf.mxu0 }
 0x556   : > { %v3159_v8 = vpop.f32.mrf.mxu1  ;;  %v3165_v9 = vpop.f32.mrf.mxu0 }
 0x558   : > { %v880_v10 = vpop.f32.mrf.mxu1  ;;  %v926_v11 = vpop.f32.mrf.mxu0 }
 0x55a   : > { %v3160_v12 = vpop.f32.mrf.mxu1  ;;  %v3166_v13 = vpop.f32.mrf.mxu0 }
 0x55c   : > { %v1035_v16 = vpop.f32.mrf.mxu0 }
 0x55d   : > { %v1191_v17 = vmul.f32 0.25, %v1035_v16 }
 0x55e   : > { %v3177_v19 = vpop.f32.mrf.mxu0 }
 0x55f   : > { %v1195_v22 = vsel %vm740_vm5, %v1191_v17, -inf }
 0x560   : > { %1196 = vmax.xlane.f32.xlu0 %v1195_v22  ;;  %v1038_v26 = vpop.f32.mrf.mxu0 }
 0x562   : > { %v3178_v27 = vpop.f32.mrf.mxu0 }
 0x564   : > { %v1135_v28 = vpop.f32.mrf.mxu0 }
 0x565   : > { %v1193_v29 = vmul.f32 0.25, %v1135_v28 }
 0x566   : > { %v3189_v30 = vpop.f32.mrf.mxu0 }
 0x567   : > { %v1201_v31 = vsel %vm740_vm5, %v1193_v29, -inf }
 0x568   : > { %1202 = vmax.xlane.f32.xlu0 %v1201_v31  ;;  %v1138_v33 = vpop.f32.mrf.mxu0 }
 0x56a   : > { %v3190_v34 = vpop.f32.mrf.mxu0 }
 0x589   : > { %v3776_v35 = vpop.f32.mrf.mxu1 }
 0x58b   : > { %v3171_v36 = vpop.f32.mrf.mxu1 }
 0x58d   : > { %v972_v37 = vpop.f32.mrf.mxu1 }
 0x58f   : > { %v3172_v38 = vpop.f32.mrf.mxu1 }
 0x591   : > { %v1085_v39 = vpop.f32.mrf.mxu1 }
 0x592   : > { %v1192_v40 = vmul.f32 0.25, %v1085_v39 }
 0x593   : > { %v3183_v41 = vpop.f32.mrf.mxu1 }
 0x594   : > { %v1198_v42 = vsel %vm740_vm5, %v1192_v40, -inf }
 0x595   : > { %1199 = vmax.xlane.f32.xlu1 %v1198_v42  ;;  %v1088_v43 = vpop.f32.mrf.mxu1 }
 0x597   : > { %v3184_v44 = vpop.f32.mrf.mxu1 }
 0x599   : > { %v1185_v45 = vpop.f32.mrf.mxu1 }
 0x59a   : > { %v1194_v20 = vmul.f32 0.25, %v1185_v45 }
 0x59b   : > { %v3195_v46 = vpop.f32.mrf.mxu1 }
 0x59c   : > { %v1204_v47 = vsel %vm740_vm5, %v1194_v20, -inf }
 0x59d   : > { %1205 = vmax.xlane.f32.xlu0 %v1204_v47  ;;  %v1188_v48 = vpop.f32.mrf.mxu1 }
 0x59f   : > { %v3196_v49 = vpop.f32.mrf.mxu1 }
 0x5e9   : > { %v1197_v21 = vpop.xlane.xlu0 %1196 }
 0x5ea   : > { %v1207_v50 = vsub.f32 %v1191_v17, %v1197_v21 }
 0x5ec   : > { %v1211_v51 = vmul.f32 1.442695, %v1207_v50 }
 0x5ee   : > { %3445 = vpow2.f32 %v1211_v51 }
 0x5f1   : > { %v1203_v52 = vpop.xlane.xlu0 %1202 }
 0x5f2   : > { %v1209_v53 = vsub.f32 %v1193_v29, %v1203_v52 }
 0x5f4   : > { %v1215_v54 = vmul.f32 1.442695, %v1209_v53 }
 0x5f6   : > { %3447 = vpow2.f32 %v1215_v54 }
 0x5fb   : > { %v3446_v55 = vpop.eup %3445 }
 0x5fc   : > { %v1219_v56 = vsel %vm740_vm5, %v3446_v55, 0.0 }
 0x5fd   : > { %1220 = vadd.xlane.f32.xlu0 %v1219_v56 }
 0x603   : > { %v3448_v57 = vpop.eup %3447 }
 0x604   : > { %v1225_v58 = vsel %vm740_vm5, %v3448_v57, 0.0 }
 0x605   : > { %1226 = vadd.xlane.f32.xlu0 %v1225_v58 }
 0x61b   : > { %3348 = vrot.lane.b32.xlu0 %v3658_v18, %s3526_s19 }
 0x61e   : > { %v1200_v59 = vpop.xlane.xlu1 %1199 }
 0x61f   : > { %v1208_v60 = vsub.f32 %v1192_v40, %v1200_v59  ;;  %1443 = vrot.lane.b32.xlu0 %v3654_v14, %s3527_s20 }
 0x621   : > { %v1213_v0 = vmul.f32 1.442695, %v1208_v60 }
 0x623   : > { %3449 = vpow2.f32 %v1213_v0  ;;  %1545 = vrot.lane.b32.xlu0 %v3666_v23, %s3528_s21 }
 0x626   : > { %v1206_v5 = vpop.xlane.xlu0 %1205 }
 0x627   : > { %1543 = vrot.lane.b32.xlu0 %v3666_v23, %s3527_s20  ;;  %v1210_v8 = vsub.f32 %v1194_v20, %v1206_v5 }
 0x629   : > { %v1217_v9 = vmul.f32 1.442695, %v1210_v8 }
 0x62b   : > { %3451 = vpow2.f32 %v1217_v9 }
 0x630   : > { %v3450_v3 = vpop.eup %3449 }
 0x631   : > { %v1222_v4 = vsel %vm740_vm5, %v3450_v3, 0.0 }
 0x632   : > { %1223 = vadd.xlane.f32.xlu1 %v1222_v4 }
 0x638   : > { %v3797_v10 = vpop.eup %3451 }
 0x639   : > { %v1228_v11 = vsel %vm740_vm5, %v3797_v10, 0.0 }
 0x643   : > { %3353 = vrot.lane.b32.xlu1 %v3670_v24, %s3526_s19 }
 0x647   : > { %1445 = vrot.lane.b32.xlu1 %v3654_v14, %s3528_s21 }
 0x64b   : > { %1495 = vrot.lane.b32.xlu1 %v3656_v15, %s3528_s21 }
 0x66f   : > { %1229 = vadd.xlane.f32.xlu1 %v1228_v11 }
 0x680   : > { %1493 = vrot.lane.b32.xlu1 %v3656_v15, %s3527_s20 }
 0x684   : > { %1595 = vrot.lane.b32.xlu1 %v3673_v25, %s3528_s21 }
 0x686   : > { %v1221_v12 = vpop.xlane.xlu0 %1220 }
 0x687   : > { %3453 = vrcp.f32 %v1221_v12 }
 0x688   : > { %1593 = vrot.lane.b32.xlu1 %v3673_v25, %s3527_s20 }
 0x68e   : > { %v1227_v13 = vpop.xlane.xlu0 %1226 }
 0x68f   : > { %3455 = vrcp.f32 %v1227_v13 }
 0x692   : > { %v3349_v16 = vpop.permute.xlu0 %3348 }
 0x693   : > { %v3351_v17 = vunpack.i.h.bf16 %v3349_v16  ;;  %v3350_v19 = vunpack.i.l.bf16 %v3349_v16 }
 0x694   : > { %v3454_v22 = vpop.eup %3453 }
 0x695   : > { %v988_v26 = vpack.c.bf16 %v3351_v17, %v3351_v17  ;;  %v987_v27 = vpack.c.bf16 %v3350_v19, %v3350_v19  ;;  %v1235_v28 = vmul.f32 %v3454_v22, %v3446_v55 }
 0x696   : > { %v1444_v44 = vpop.permute.xlu0 %1443 }
 0x697   : > { %v1247_v29 = vsel %vm793_vm4, %v987_v27, 0  ;;  %v1293_v30 = vsel %vm793_vm4, %v988_v26, 0  ;;  %v1239_v31 = vpack.c.bf16 %v1235_v28, %v1235_v28 }
 0x698   : > { %3198 = vmatpush3.bf16.msra.mxu0 %v1247_v29  ;;  %3204 = vmatpush3.bf16.msra.mxu1 %v1293_v30 }
 0x699   : > { %3209 = vmatprep.subr.bf16.mxu0 %v3522_v1  ;;  %3215 = vmatprep.subr.bf16.mxu1 %v3522_v1 }
 0x69a   : > { %v1546_v49 = vpop.permute.xlu0 %1545 }
 0x69b   : > { %3200 = vmatmul.mubr.msk.bf16.vlgmr.msra.gmra.mxu0 %vm789_vm6, %v1239_v31  ;;  %v1551_v50 = vsel %vm542_vm3, %v1546_v49, 0 }
 0x69c   : > { %3211 = vmatprep.mubr.msk.bf16.mxu0 %vm3523_vm2, %v3522_v1  ;;  %v3456_v34 = vpop.eup %3455 }
 0x69d   : > { %v1237_v39 = vmul.f32 %v3456_v34, %v3448_v57 }
 0x69e   : > { %v1544_v51 = vpop.permute.xlu0 %1543 }
 0x69f   : > { %v1241_v43 = vpack.c.bf16 %v1237_v39, %v1237_v39 }
 0x6bb   : > { %v1224_v33 = vpop.xlane.xlu1 %1223 }
 0x6bc   : > { %3457 = vrcp.f32 %v1224_v33 }
 0x6bf   : > { %v3354_v36 = vpop.permute.xlu1 %3353 }
 0x6c0   : > { %v3355_v37 = vunpack.i.l.bf16 %v3354_v36  ;;  %v3356_v42 = vunpack.i.h.bf16 %v3354_v36 }
 0x6c2   : > { %v989_v38 = vpack.c.bf16 %v3355_v37, %v3355_v37  ;;  %v990_v46 = vpack.c.bf16 %v3356_v42, %v3356_v42 }
 0x6c3   : > { %v1446_v41 = vpop.permute.xlu1 %1445 }
 0x6c4   : > { %v1339_v40 = vsel %vm793_vm4, %v989_v38, 0  ;;  %v1451_v45 = vsel %vm542_vm3, %v1446_v41, 0  ;;  %v1385_v21 = vsel %vm793_vm4, %v990_v46, 0 }
 0x6c5   : > { %3210 = vmatpush3.bf16.msra.mxu0 %v1339_v40 }
 0x6c6   : > { %3221 = vmatprep.subr.bf16.mxu0 %v3522_v1 }
 0x6c7   : > { %v1496_v52 = vpop.permute.xlu1 %1495 }
 0x6c8   : > { %3212 = vmatmul.mubr.msk.bf16.vlgmr.msra.gmra.mxu0 %vm789_vm6, %v1241_v43  ;;  %v1501_v58 = vsel %vm542_vm3, %v1496_v52, 0 }
 0x6c9   : > { %v3458_v20 = vpop.eup %3457  ;;  %3222 = vmatpush3.bf16.xpose.msra.mxu0 %v1451_v45  ;;  %3223 = vmatprep.mubr.msk.bf16.mxu0 %vm3523_vm2, %v3522_v1 }
 0x6ca   : > { %v1236_v47 = vmul.f32 %v3458_v20, %v3450_v3  ;;  %3233 = vmatprep.subr.bf16.mxu0 %v3522_v1 }
 0x6cc   : > { %v1240_v48 = vpack.c.bf16 %v1236_v47, %v1236_v47 }
 0x6ce   : > { %3206 = vmatmul.mubr.msk.bf16.vlgmr.msra.gmra.mxu1 %vm789_vm6, %v1240_v48 }
 0x6cf   : > { %3216 = vmatpush3.bf16.msra.mxu1 %v1385_v21  ;;  %3217 = vmatprep.mubr.msk.bf16.mxu1 %vm3523_vm2, %v3522_v1 }
 0x6d0   : > { %3224 = vmatmul.mubr.msk.bf16.vlgmr.msra.gmra.mxu0 %vm542_vm3, %v1444_v44  ;;  %3227 = vmatprep.subr.bf16.mxu1 %v3522_v1 }
 0x6d1   : > { %3234 = vmatpush3.bf16.xpose.msra.mxu0 %v1551_v50  ;;  %3235 = vmatprep.mubr.msk.bf16.mxu0 %vm3523_vm2, %v3522_v1 }
 0x6d2   : > { %3245 = vmatprep.subr.bf16.mxu0 %v3522_v1 }
 0x6d8   : > { %3236 = vmatmul.mubr.msk.bf16.vlgmr.msra.gmra.mxu0 %vm542_vm3, %v1544_v51 }
 0x6d9   : > { %3247 = vmatprep.mubr.msk.bf16.mxu0 %vm3523_vm2, %v3522_v1 }
 0x6f8   : > { %v1230_v53 = vpop.xlane.xlu1 %1229 }
 0x6f9   : > { %3459 = vrcp.f32 %v1230_v53 }
 0x6fc   : > { %v1494_v57 = vpop.permute.xlu1 %1493 }
 0x700   : > { %v1596_v59 = vpop.permute.xlu1 %1595 }
 0x701   : > { %v1601_v60 = vsel %vm542_vm3, %v1596_v59, 0 }
 0x704   : > { %v1594_v0 = vpop.permute.xlu1 %1593 }
 0x706   : > { %v3460_v54 = vpop.eup %3459 }
 0x707   : > { %v1238_v55 = vmul.f32 %v3460_v54, %v3797_v10 }
 0x709   : > { %v1242_v56 = vpack.c.bf16 %v1238_v55, %v1238_v55 }
 0x70b   : > { %3218 = vmatmul.mubr.msk.bf16.vlgmr.msra.gmra.mxu1 %vm789_vm6, %v1242_v56 }
 0x70c   : > { %3228 = vmatpush3.bf16.xpose.msra.mxu1 %v1501_v58  ;;  %3229 = vmatprep.mubr.msk.bf16.mxu1 %vm3523_vm2, %v3522_v1 }
 0x70d   : > { %3239 = vmatprep.subr.bf16.mxu1 %v3522_v1 }
 0x713   : > { %3230 = vmatmul.mubr.msk.bf16.vlgmr.msra.gmra.mxu1 %vm542_vm3, %v1494_v57 }
 0x714   : > { %3240 = vmatpush3.bf16.xpose.msra.mxu1 %v1601_v60  ;;  %3241 = vmatprep.mubr.msk.bf16.mxu1 %vm3523_vm2, %v3522_v1 }
 0x715   : > { %3251 = vmatprep.subr.bf16.mxu1 %v3522_v1 }
 0x71b   : > { %3242 = vmatmul.mubr.msk.bf16.vlgmr.msra.gmra.mxu1 %vm542_vm3, %v1594_v0 }
 0x71c   : > { %3253 = vmatprep.mubr.msk.bf16.mxu1 %vm3523_vm2, %v3522_v1 }
 0x75b   : > { %v3848_v3 = vpop.f32.mrf.mxu0 }
 0x75d   : > { %v3201_v4 = vpop.f32.mrf.mxu0 }
 0x75f   : > { %v1286_v5 = vpop.f32.mrf.mxu0 }
 0x761   : > { %v3202_v8 = vpop.f32.mrf.mxu0 }
 0x788   : > { %v3850_v9 = vpop.f32.mrf.mxu0 }
 0x78a   : > { %v3213_v10 = vpop.f32.mrf.mxu0 }
 0x78c   : > { %v1378_v11 = vpop.f32.mrf.mxu0 }
 0x78e   : > { %v3852_v12 = vpop.f32.mrf.mxu1  ;;  %v3214_v13 = vpop.f32.mrf.mxu0 }
 0x790   : > { %v3207_v16 = vpop.f32.mrf.mxu1  ;;  %v1487_v17 = vpop.f32.mrf.mxu0 }
 0x791   : > { %v1643_v19 = vmul.f32 0.25, %v1487_v17 }
 0x792   : > { %v1332_v22 = vpop.f32.mrf.mxu1  ;;  %v3225_v26 = vpop.f32.mrf.mxu0 }
 0x793   : > { %v1647_v27 = vsel %vm740_vm5, %v1643_v19, -inf }
 0x794   : > { %1648 = vmax.xlane.f32.xlu0 %v1647_v27  ;;  %v3208_v28 = vpop.f32.mrf.mxu1  ;;  %v1490_v29 = vpop.f32.mrf.mxu0 }
 0x796   : > { %v3226_v30 = vpop.f32.mrf.mxu0 }
 0x798   : > { %v1587_v31 = vpop.f32.mrf.mxu0 }
 0x799   : > { %v1645_v33 = vmul.f32 0.25, %v1587_v31 }
 0x79a   : > { %v3237_v34 = vpop.f32.mrf.mxu0 }
 0x79b   : > { %v1653_v36 = vsel %vm740_vm5, %v1645_v33, -inf }
 0x79c   : > { %1654 = vmax.xlane.f32.xlu0 %v1653_v36  ;;  %v1590_v37 = vpop.f32.mrf.mxu0 }
 0x79e   : > { %v3238_v38 = vpop.f32.mrf.mxu0 }
 0x7cb   : > { %v3856_v39 = vpop.f32.mrf.mxu1 }
 0x7cd   : > { %v3219_v40 = vpop.f32.mrf.mxu1 }
 0x7cf   : > { %v1424_v41 = vpop.f32.mrf.mxu1 }
 0x7d1   : > { %v3220_v42 = vpop.f32.mrf.mxu1 }
 0x7d3   : > { %v1537_v43 = vpop.f32.mrf.mxu1 }
 0x7d4   : > { %v1644_v44 = vmul.f32 0.25, %v1537_v43 }
 0x7d5   : > { %v3231_v45 = vpop.f32.mrf.mxu1 }
 0x7d6   : > { %v1650_v20 = vsel %vm740_vm5, %v1644_v44, -inf }
 0x7d7   : > { %1651 = vmax.xlane.f32.xlu1 %v1650_v20  ;;  %v1540_v46 = vpop.f32.mrf.mxu1 }
 0x7d9   : > { %v3232_v47 = vpop.f32.mrf.mxu1 }
 0x7db   : > { %v1637_v48 = vpop.f32.mrf.mxu1 }
 0x7dc   : > { %v1646_v49 = vmul.f32 0.25, %v1637_v48 }
 0x7dd   : > { %v3243_v21 = vpop.f32.mrf.mxu1 }
 0x7de   : > { %v1656_v50 = vsel %vm740_vm5, %v1646_v49, -inf }
 0x7df   : > { %1657 = vmax.xlane.f32.xlu0 %v1656_v50  ;;  %v1640_v51 = vpop.f32.mrf.mxu1 }
 0x7e1   : > { %v3244_v52 = vpop.f32.mrf.mxu1 }
 0x81d   : > { %v1649_v53 = vpop.xlane.xlu0 %1648 }
 0x81e   : > { %v1659_v54 = vsub.f32 %v1643_v19, %v1649_v53 }
 0x820   : > { %v1663_v55 = vmul.f32 1.442695, %v1659_v54 }
 0x822   : > { %3461 = vpow2.f32 %v1663_v55 }
 0x825   : > { %v1655_v56 = vpop.xlane.xlu0 %1654 }
 0x826   : > { %v1661_v57 = vsub.f32 %v1645_v33, %v1655_v56 }
 0x828   : > { %v1667_v58 = vmul.f32 1.442695, %v1661_v57 }
 0x82a   : > { %3463 = vpow2.f32 %v1667_v58 }
 0x82f   : > { %v3462_v59 = vpop.eup %3461 }
 0x830   : > { %v1671_v60 = vsel %vm740_vm5, %v3462_v59, 0.0 }
 0x831   : > { %1672 = vadd.xlane.f32.xlu0 %v1671_v60 }
 0x837   : > { %v3464_v0 = vpop.eup %3463 }
 0x838   : > { %v1677_v4 = vsel %vm740_vm5, %v3464_v0, 0.0 }
 0x839   : > { %1678 = vadd.xlane.f32.xlu0 %v1677_v4 }
 0x84f   : > { %3358 = vrot.lane.b32.xlu0 %v3658_v18, %s3527_s20 }
 0x853   : > { %1895 = vrot.lane.b32.xlu0 %v3654_v14, %s3529_s22 }
 0x857   : > { %1997 = vrot.lane.b32.xlu0 %v3666_v23, %s3530_s23 }
 0x85b   : > { %1995 = vrot.lane.b32.xlu0 %v3666_v23, %s3529_s22 }
 0x860   : > { %v1652_v5 = vpop.xlane.xlu1 %1651 }
 0x861   : > { %v1660_v8 = vsub.f32 %v1644_v44, %v1652_v5 }
 0x863   : > { %v1665_v10 = vmul.f32 1.442695, %v1660_v8 }
 0x865   : > { %3465 = vpow2.f32 %v1665_v10 }
 0x868   : > { %v1658_v16 = vpop.xlane.xlu0 %1657 }
 0x869   : > { %v1662_v17 = vsub.f32 %v1646_v49, %v1658_v16 }
 0x86b   : > { %v1669_v23 = vmul.f32 1.442695, %v1662_v17 }
 0x86d   : > { %3467 = vpow2.f32 %v1669_v23 }
 0x872   : > { %v3466_v11 = vpop.eup %3465 }
 0x873   : > { %v1674_v13 = vsel %vm740_vm5, %v3466_v11, 0.0 }
 0x874   : > { %1675 = vadd.xlane.f32.xlu1 %v1674_v13 }
 0x87a   : > { %v3877_v19 = vpop.eup %3467 }
 0x87b   : > { %v1680_v22 = vsel %vm740_vm5, %v3877_v19, 0.0 }
 0x885   : > { %3363 = vrot.lane.b32.xlu1 %v3670_v24, %s3527_s20 }
 0x889   : > { %1897 = vrot.lane.b32.xlu1 %v3654_v14, %s3530_s23 }
 0x88d   : > { %1947 = vrot.lane.b32.xlu1 %v3656_v15, %s3530_s23 }
 0x8b1   : > { %1681 = vadd.xlane.f32.xlu1 %v1680_v22 }
 0x8ba   : > { %v1673_v26 = vpop.xlane.xlu0 %1672 }
 0x8bb   : > { %3469 = vrcp.f32 %v1673_v26 }
 0x8c2   : > { %1945 = vrot.lane.b32.xlu1 %v3656_v15, %s3529_s22  ;;  %v1679_v27 = vpop.xlane.xlu0 %1678 }
 0x8c3   : > { %3471 = vrcp.f32 %v1679_v27 }
 0x8c6   : > { %2047 = vrot.lane.b32.xlu1 %v3673_v25, %s3530_s23  ;;  %v3359_v14 = vpop.permute.xlu0 %3358 }
 0x8c7   : > { %v3361_v28 = vunpack.i.h.bf16 %v3359_v14  ;;  %v3360_v29 = vunpack.i.l.bf16 %v3359_v14 }
 0x8c8   : > { %v3470_v30 = vpop.eup %3469 }
 0x8c9   : > { %v1440_v31 = vpack.c.bf16 %v3361_v28, %v3361_v28  ;;  %v1439_v33 = vpack.c.bf16 %v3360_v29, %v3360_v29  ;;  %v1687_v34 = vmul.f32 %v3470_v30, %v3462_v59 }
 0x8ca   : > { %2045 = vrot.lane.b32.xlu1 %v3673_v25, %s3529_s22  ;;  %v1896_v47 = vpop.permute.xlu0 %1895 }
 0x8cb   : > { %v1699_v36 = vsel %vm793_vm4, %v1439_v33, 0  ;;  %v1745_v37 = vsel %vm793_vm4, %v1440_v31, 0  ;;  %v1691_v15 = vpack.c.bf16 %v1687_v34, %v1687_v34 }
 0x8cc   : > { %3246 = vmatpush3.bf16.msra.mxu0 %v1699_v36  ;;  %3252 = vmatpush3.bf16.msra.mxu1 %v1745_v37 }
 0x8cd   : > { %3257 = vmatprep.subr.bf16.mxu0 %v3522_v1  ;;  %3263 = vmatprep.subr.bf16.mxu1 %v3522_v1 }
 0x8ce   : > { %v1998_v52 = vpop.permute.xlu0 %1997 }
 0x8cf   : > { %3248 = vmatmul.mubr.msk.bf16.vlgmr.msra.gmra.mxu0 %vm789_vm6, %v1691_v15  ;;  %v2003_v54 = vsel %vm542_vm3, %v1998_v52, 0 }
 0x8d0   : > { %3259 = vmatprep.mubr.msk.bf16.mxu0 %vm3523_vm2, %v3522_v1  ;;  %v3472_v25 = vpop.eup %3471 }
 0x8d1   : > { %v1689_v43 = vmul.f32 %v3472_v25, %v3464_v0 }
 0x8d2   : > { %v1996_v55 = vpop.permute.xlu0 %1995 }
 0x8d3   : > { %v1693_v46 = vpack.c.bf16 %v1689_v43, %v1689_v43 }
 0x8fd   : > { %v1676_v38 = vpop.xlane.xlu1 %1675 }
 0x8fe   : > { %3473 = vrcp.f32 %v1676_v38 }
 0x901   : > { %v3364_v40 = vpop.permute.xlu1 %3363 }
 0x902   : > { %v3365_v41 = vunpack.i.l.bf16 %v3364_v40  ;;  %v3366_v20 = vunpack.i.h.bf16 %v3364_v40 }
 0x904   : > { %v1441_v42 = vpack.c.bf16 %v3365_v41, %v3365_v41  ;;  %v1442_v21 = vpack.c.bf16 %v3366_v20, %v3366_v20 }
 0x905   : > { %v1898_v45 = vpop.permute.xlu1 %1897 }
 0x906   : > { %v1791_v44 = vsel %vm793_vm4, %v1441_v42, 0  ;;  %v1903_v48 = vsel %vm542_vm3, %v1898_v45, 0  ;;  %v1837_v53 = vsel %vm793_vm4, %v1442_v21, 0 }
 0x907   : > { %3258 = vmatpush3.bf16.msra.mxu0 %v1791_v44 }
 0x908   : > { %3269 = vmatprep.subr.bf16.mxu0 %v3522_v1 }
 0x909   : > { %v1948_v56 = vpop.permute.xlu1 %1947 }
 0x90a   : > { %3260 = vmatmul.mubr.msk.bf16.vlgmr.msra.gmra.mxu0 %vm789_vm6, %v1693_v46  ;;  %v1953_v4 = vsel %vm542_vm3, %v1948_v56, 0 }
 0x90b   : > { %v3474_v49 = vpop.eup %3473  ;;  %3270 = vmatpush3.bf16.xpose.msra.mxu0 %v1903_v48  ;;  %3271 = vmatprep.mubr.msk.bf16.mxu0 %vm3523_vm2, %v3522_v1 }
 0x90c   : > { %v1688_v50 = vmul.f32 %v3474_v49, %v3466_v11  ;;  %3281 = vmatprep.subr.bf16.mxu0 %v3522_v1 }
 0x90e   : > { %v1692_v51 = vpack.c.bf16 %v1688_v50, %v1688_v50 }
 0x910   : > { %3254 = vmatmul.mubr.msk.bf16.vlgmr.msra.gmra.mxu1 %vm789_vm6, %v1692_v51 }
 0x911   : > { %3264 = vmatpush3.bf16.msra.mxu1 %v1837_v53  ;;  %3265 = vmatprep.mubr.msk.bf16.mxu1 %vm3523_vm2, %v3522_v1 }
 0x912   : > { %3272 = vmatmul.mubr.msk.bf16.vlgmr.msra.gmra.mxu0 %vm542_vm3, %v1896_v47  ;;  %3275 = vmatprep.subr.bf16.mxu1 %v3522_v1 }
 0x913   : > { %3282 = vmatpush3.bf16.xpose.msra.mxu0 %v2003_v54  ;;  %3283 = vmatprep.mubr.msk.bf16.mxu0 %vm3523_vm2, %v3522_v1 }
 0x914   : > { %3293 = vmatprep.subr.bf16.mxu0 %v3522_v1 }
 0x91a   : > { %3284 = vmatmul.mubr.msk.bf16.vlgmr.msra.gmra.mxu0 %vm542_vm3, %v1996_v55 }
 0x91b   : > { %3295 = vmatprep.mubr.msk.bf16.mxu0 %vm3523_vm2, %v3522_v1 }
 0x93a   : > { %v1682_v57 = vpop.xlane.xlu1 %1681 }
 0x93b   : > { %3475 = vrcp.f32 %v1682_v57 }
 0x93e   : > { %v1946_v0 = vpop.permute.xlu1 %1945 }
 0x942   : > { %v2048_v5 = vpop.permute.xlu1 %2047 }
 0x943   : > { %v2053_v8 = vsel %vm542_vm3, %v2048_v5, 0 }
 0x946   : > { %v2046_v10 = vpop.permute.xlu1 %2045 }
 0x948   : > { %v3476_v58 = vpop.eup %3475 }
 0x949   : > { %v1690_v59 = vmul.f32 %v3476_v58, %v3877_v19 }
 0x94b   : > { %v1694_v60 = vpack.c.bf16 %v1690_v59, %v1690_v59 }
 0x94d   : > { %3266 = vmatmul.mubr.msk.bf16.vlgmr.msra.gmra.mxu1 %vm789_vm6, %v1694_v60 }
 0x94e   : > { %3276 = vmatpush3.bf16.xpose.msra.mxu1 %v1953_v4  ;;  %3277 = vmatprep.mubr.msk.bf16.mxu1 %vm3523_vm2, %v3522_v1 }
 0x94f   : > { %3287 = vmatprep.subr.bf16.mxu1 %v3522_v1 }
 0x955   : > { %3278 = vmatmul.mubr.msk.bf16.vlgmr.msra.gmra.mxu1 %vm542_vm3, %v1946_v0 }
 0x956   : > { %3288 = vmatpush3.bf16.xpose.msra.mxu1 %v2053_v8  ;;  %3289 = vmatprep.mubr.msk.bf16.mxu1 %vm3523_vm2, %v3522_v1 }
 0x957   : > { %3299 = vmatprep.subr.bf16.mxu1 %v3522_v1 }
 0x95d   : > { %3290 = vmatmul.mubr.msk.bf16.vlgmr.msra.gmra.mxu1 %vm542_vm3, %v2046_v10 }
 0x95e   : > { %3301 = vmatprep.mubr.msk.bf16.mxu1 %vm3523_vm2, %v3522_v1 }
 0x98f   : > { %v1735_v11 = vpop.f32.mrf.mxu0 }
 0x991   : > { %v3249_v13 = vpop.f32.mrf.mxu0 }
 0x993   : > { %v1738_v16 = vpop.f32.mrf.mxu0 }
 0x995   : > { %v3250_v17 = vpop.f32.mrf.mxu0 }
 0x9ca   : > { %v1827_v23 = vpop.f32.mrf.mxu0 }
 0x9cc   : > { %v3261_v19 = vpop.f32.mrf.mxu0 }
 0x9ce   : > { %v1830_v22 = vpop.f32.mrf.mxu0 }
 0x9d0   : > { %v3928_v26 = vpop.f32.mrf.mxu1  ;;  %v3262_v27 = vpop.f32.mrf.mxu0 }
 0x9d2   : > { %v3255_v14 = vpop.f32.mrf.mxu1  ;;  %v1939_v28 = vpop.f32.mrf.mxu0 }
 0x9d3   : > { %v2095_v29 = vmul.f32 0.25, %v1939_v28 }
 0x9d4   : > { %v1784_v30 = vpop.f32.mrf.mxu1  ;;  %v3273_v31 = vpop.f32.mrf.mxu0 }
 0x9d5   : > { %v2099_v33 = vsel %vm740_vm5, %v2095_v29, -inf }
 0x9d6   : > { %2100 = vmax.xlane.f32.xlu0 %v2099_v33  ;;  %v3256_v34 = vpop.f32.mrf.mxu1  ;;  %v1942_v36 = vpop.f32.mrf.mxu0 }
 0x9d8   : > { %v3274_v37 = vpop.f32.mrf.mxu0 }
 0x9da   : > { %v2039_v15 = vpop.f32.mrf.mxu0 }
 0x9db   : > { %v2097_v38 = vmul.f32 0.25, %v2039_v15 }
 0x9dc   : > { %v3285_v25 = vpop.f32.mrf.mxu0 }
 0x9dd   : > { %v2105_v40 = vsel %vm740_vm5, %v2097_v38, -inf }
 0x9de   : > { %2106 = vmax.xlane.f32.xlu0 %v2105_v40  ;;  %v2042_v41 = vpop.f32.mrf.mxu0 }
 0x9e0   : > { %v3286_v42 = vpop.f32.mrf.mxu0 }
 0xa0d   : > { %v1873_v43 = vpop.f32.mrf.mxu1 }
 0xa0f   : > { %v3267_v44 = vpop.f32.mrf.mxu1 }
 0xa11   : > { %v1876_v45 = vpop.f32.mrf.mxu1 }
 0xa13   : > { %v3268_v20 = vpop.f32.mrf.mxu1 }
 0xa15   : > { %v1989_v46 = vpop.f32.mrf.mxu1 }
 0xa16   : > { %v2096_v47 = vmul.f32 0.25, %v1989_v46 }
 0xa17   : > { %v3279_v48 = vpop.f32.mrf.mxu1 }
 0xa18   : > { %v2102_v49 = vsel %vm740_vm5, %v2096_v47, -inf }
 0xa19   : > { %2103 = vmax.xlane.f32.xlu1 %v2102_v49  ;;  %v1992_v21 = vpop.f32.mrf.mxu1 }
 0xa1b   : > { %v3280_v50 = vpop.f32.mrf.mxu1 }
 0xa1d   : > { %v2089_v51 = vpop.f32.mrf.mxu1 }
 0xa1e   : > { %v2098_v52 = vmul.f32 0.25, %v2089_v51 }
 0xa1f   : > { %v3291_v53 = vpop.f32.mrf.mxu1 }
 0xa20   : > { %v2108_v54 = vsel %vm740_vm5, %v2098_v52, -inf }
 0xa21   : > { %2109 = vmax.xlane.f32.xlu0 %v2108_v54  ;;  %v2092_v55 = vpop.f32.mrf.mxu1 }
 0xa23   : > { %v3292_v56 = vpop.f32.mrf.mxu1 }
 0xa5f   : > { %v2101_v57 = vpop.xlane.xlu0 %2100 }
 0xa60   : > { %v2111_v58 = vsub.f32 %v2095_v29, %v2101_v57  ;;  %v3390_v57 = vld [vmem:[%s4134_s3 + $0x10] sm:$0xff]  }
 0xa62   : > { %v2115_v59 = vmul.f32 1.442695, %v2111_v58  ;;  %v3392_v58 = vld [vmem:[%s4134_s3] sm:$0xff]  }
 0xa64   : > { %3477 = vpow2.f32 %v2115_v59 }
 0xa67   : > { %v2107_v60 = vpop.xlane.xlu0 %2106 }
 0xa68   : > { %v2113_v0 = vsub.f32 %v2097_v38, %v2107_v60 }
 0xa6a   : > { %v2119_v4 = vmul.f32 1.442695, %v2113_v0 }
 0xa6c   : > { %3479 = vpow2.f32 %v2119_v4 }
 0xa71   : > { %v3478_v5 = vpop.eup %3477 }
 0xa72   : > { %v2123_v8 = vsel %vm740_vm5, %v3478_v5, 0.0 }
 0xa73   : > { %2124 = vadd.xlane.f32.xlu0 %v2123_v8 }
 0xa79   : > { %v3480_v10 = vpop.eup %3479 }
 0xa7a   : > { %v2129_v13 = vsel %vm740_vm5, %v3480_v10, 0.0 }
 0xa7b   : > { %2130 = vadd.xlane.f32.xlu0 %v2129_v13 }
 0xa91   : > { %3368 = vrot.lane.b32.xlu0 %v3658_v18, %s3529_s22 }
 0xa95   : > { %2339 = vrot.lane.b32.xlu0 %v3850_v9, %s3530_s23 }
 0xa99   : > { %2351 = vrot.lane.b32.xlu0 %v1735_v11, %s3528_s21 }
 0xa9d   : > { %2355 = vrot.lane.b32.xlu0 %v1827_v23, %s3528_s21 }
 0xaa2   : > { %v2104_v16 = vpop.xlane.xlu1 %2103 }
 0xaa3   : > { %v2112_v17 = vsub.f32 %v2096_v47, %v2104_v16 }
 0xaa5   : > { %v2117_v19 = vmul.f32 1.442695, %v2112_v17 }
 0xaa7   : > { %3481 = vpow2.f32 %v2117_v19 }
 0xaaa   : > { %v2110_v22 = vpop.xlane.xlu0 %2109 }
 0xaab   : > { %v2114_v27 = vsub.f32 %v2098_v52, %v2110_v22  ;;  %v3389_v52 = vld [vmem:[%s4134_s3 + $0x18] sm:$0xff]  }
 0xaad   : > { %v2121_v14 = vmul.f32 1.442695, %v2114_v27 }
 0xaaf   : > { %3483 = vpow2.f32 %v2121_v14 }
 0xab4   : > { %v3482_v28 = vpop.eup %3481 }
 0xab5   : > { %v2126_v29 = vsel %vm740_vm5, %v3482_v28, 0.0 }
 0xab6   : > { %2127 = vadd.xlane.f32.xlu1 %v2126_v29 }
 0xabc   : > { %v3484_v18 = vpop.eup %3483 }
 0xabd   : > { %v2132_v30 = vsel %vm740_vm5, %v3484_v18, 0.0 }
 0xabe   : > { %2133 = vadd.xlane.f32.xlu1 %v2132_v30 }
 0xacf   : > { %3373 = vrot.lane.b32.xlu1 %v3670_v24, %s3529_s22 }
 0xad3   : > { %2335 = vrot.lane.b32.xlu1 %v3848_v3, %s3530_s23 }
 0xad7   : > { %2337 = vrot.lane.b32.xlu1 %v3852_v12, %s3530_s23 }
 0xadb   : > { %2341 = vrot.lane.b32.xlu1 %v3856_v39, %s3530_s23 }
 0xadf   : > { %2353 = vrot.lane.b32.xlu1 %v3928_v26, %s3528_s21 }
 0xae3   : > { %2357 = vrot.lane.b32.xlu1 %v1873_v43, %s3528_s21 }
 0xafc   : > { %v2125_v9 = vpop.xlane.xlu0 %2124 }
 0xafd   : > { %3485 = vrcp.f32 %v2125_v9 }
 0xb04   : > { %v2131_v11 = vpop.xlane.xlu0 %2130 }
 0xb05   : > { %3487 = vrcp.f32 %v2131_v11 }
 0xb08   : > { %v3369_v23 = vpop.permute.xlu0 %3368 }
 0xb09   : > { %v3371_v31 = vunpack.i.h.bf16 %v3369_v23  ;;  %v3370_v24 = vunpack.i.l.bf16 %v3369_v23 }
 0xb0a   : > { %v3486_v33 = vpop.eup %3485 }
 0xb0b   : > { %v1892_v34 = vpack.c.bf16 %v3371_v31, %v3371_v31  ;;  %v1891_v3 = vpack.c.bf16 %v3370_v24, %v3370_v24  ;;  %v2139_v36 = vmul.f32 %v3486_v33, %v3478_v5 }
 0xb0c   : > { %v2340_v14 = vpop.permute.xlu0 %2339 }
 0xb0d   : > { %v2151_v12 = vsel %vm793_vm4, %v1891_v3, 0  ;;  %v2197_v37 = vsel %vm793_vm4, %v1892_v34, 0  ;;  %v2143_v39 = vpack.c.bf16 %v2139_v36, %v2139_v36  ;;  %v2381_v3 = vsel %vm542_vm3, %v3772_v7, %v2340_v14  ;;  %v3000_v7 = vld [vmem:[%s4135_s4] ss:$0 sm:$0xff] }
 0xb0e   : > { %3294 = vmatpush3.bf16.msra.mxu0 %v2151_v12  ;;  %3300 = vmatpush3.bf16.msra.mxu1 %v2197_v37 }
 0xb0f   : > { %3305 = vmatprep.subr.bf16.mxu0 %v3522_v1  ;;  %3311 = vmatprep.subr.bf16.mxu1 %v3522_v1 }
 0xb10   : > { %v2352_v29 = vpop.permute.xlu0 %2351 }
 0xb11   : > { %3296 = vmatmul.mubr.msk.bf16.vlgmr.msra.gmra.mxu0 %vm789_vm6, %v2143_v39 }
 0xb12   : > { %3307 = vmatprep.mubr.msk.bf16.mxu0 %vm3523_vm2, %v3522_v1  ;;  %v3488_v38 = vpop.eup %3487 }
 0xb13   : > { %v2141_v20 = vmul.f32 %v3488_v38, %v3480_v10 }
 0xb14   : > { %v2356_v30 = vpop.permute.xlu0 %2355 }
 0xb15   : > { %v2145_v49 = vpack.c.bf16 %v2141_v20, %v2141_v20  ;;  %v2386_v37 = vsel %vm2383_vm7, %v2381_v3, %v2356_v30  ;;  %v3404_v3 = vld [vmem:[%s4136_s5 + $0x4] ss:$8 sps:$4 sm:$0xff]  }
 0xb3f   : > { %v2128_v26 = vpop.xlane.xlu1 %2127 }
 0xb40   : > { %3489 = vrcp.f32 %v2128_v26 }
 0xb47   : > { %v2134_v15 = vpop.xlane.xlu1 %2133 }
 0xb48   : > { %3491 = vrcp.f32 %v2134_v15 }
 0xb4b   : > { %v3374_v25 = vpop.permute.xlu1 %3373 }
 0xb4c   : > { %v3376_v40 = vunpack.i.h.bf16 %v3374_v25  ;;  %v3375_v41 = vunpack.i.l.bf16 %v3374_v25 }
 0xb4d   : > { %v3490_v42 = vpop.eup %3489 }
 0xb4e   : > { %v1894_v43 = vpack.c.bf16 %v3376_v40, %v3376_v40  ;;  %v1893_v44 = vpack.c.bf16 %v3375_v41, %v3375_v41  ;;  %v2140_v45 = vmul.f32 %v3490_v42, %v3482_v28 }
 0xb4f   : > { %v2336_v22 = vpop.permute.xlu1 %2335 }
 0xb50   : > { %v2243_v46 = vsel %vm793_vm4, %v1893_v44, 0  ;;  %v2144_v47 = vpack.c.bf16 %v2140_v45, %v2140_v45  ;;  %v2289_v48 = vsel %vm793_vm4, %v1894_v43, 0  ;;  %v2379_v31 = vsel %vm542_vm3, %v3768_v2, %v2336_v22  ;;  %v3509_v45 = vld [vmem:[%s3597_s15] sm:$0xf] }
 0xb51   : > { %3306 = vmatpush3.bf16.msra.mxu0 %v2243_v46  ;;  %v2384_v26 = vsel %vm2383_vm7, %v2379_v31, %v2352_v29  ;;  %v3396_v31 = vld [vmem:[%s4136_s5 + $0x20] ss:$8 sps:$4 sm:$0xff]  }
 0xb52   : > { %3302 = vmatmul.mubr.msk.bf16.vlgmr.msra.gmra.mxu1 %vm789_vm6, %v2144_v47  ;;  %3317 = vmatprep.subr.bf16.mxu0 %v3522_v1  ;;  %v3510_v47 = vld [vmem:[%s3597_s15 + $0x4] sm:$0xf] }
 0xb53   : > { %3312 = vmatpush3.bf16.msra.mxu1 %v2289_v48  ;;  %3313 = vmatprep.mubr.msk.bf16.mxu1 %vm3523_vm2, %v3522_v1  ;;  %v2338_v27 = vpop.permute.xlu1 %2337 }
 0xb54   : > { %3308 = vmatmul.mubr.msk.bf16.vlgmr.msra.gmra.mxu0 %vm789_vm6, %v2145_v49  ;;  %v2380_v24 = vsel %vm542_vm3, %v3770_v6, %v2338_v27 }
 0xb55   : > { %v3492_v21 = vpop.eup %3491  ;;  %3325 = vmatprep.mubr.msk.bf16.mxu0 %vm3523_vm2, %v3522_v1  ;;  %3318 = vmatpush3.bf16.msra.mxu0 %v3389_v52  ;;  %v3511_v52 = vld [vmem:[%s3597_s15 + $0x8] sm:$0xf] }
 0xb56   : > { %v2142_v50 = vmul.f32 %v3492_v21, %v3484_v18  ;;  %3319 = vmatprep.subr.bf16.mxu0 %v3522_v1 }
 0xb57   : > { %v2342_v28 = vpop.permute.xlu1 %2341 }
 0xb58   : > { %v2146_v51 = vpack.c.bf16 %v2142_v50, %v2142_v50  ;;  %v2382_v36 = vsel %vm542_vm3, %v3776_v35, %v2342_v28 }
 0xb59   : > { %3320 = vmatpush3.bf16.msra.mxu0 %v3390_v57 }
 0xb5a   : > { %3314 = vmatmul.mubr.msk.bf16.vlgmr.msra.gmra.mxu1 %vm789_vm6, %v2146_v51  ;;  %3321 = vmatprep.subr.bf16.mxu0 %v3522_v1 }
 0xb5b   : > { %2651 = vmatprep.mubr.bf16.mxu1 %v3521_v32  ;;  %v3391_v32 = vld [vmem:[%s4134_s3 + $0x8] sm:$0xff]   ;;  %v2354_v18 = vpop.permute.xlu1 %2353 }
 0xb5c   : > { %v2385_v33 = vsel %vm2383_vm7, %v2380_v24, %v2354_v18  ;;  %v3401_v24 = vld [vmem:[%s4136_s5 + $0x14] ss:$8 sps:$4 sm:$0xff]  }
 0xb5d   : > { %3322 = vmatpush3.bf16.msra.mxu0 %v3391_v32 }
 0xb5e   : > { %3323 = vmatprep.subr.bf16.mxu0 %v3522_v1 }
 0xb5f   : > { %v2358_v9 = vpop.permute.xlu1 %2357 }
 0xb60   : > { %v2387_v39 = vsel %vm2383_vm7, %v2382_v36, %v2358_v9  ;;  %v3395_v9 = vld [vmem:[%s4136_s5 + $0x34] ss:$8 sps:$4 sm:$0xff]  }
 0xb61   : > { %3324 = vmatpush3.bf16.msra.mxu0 %v3392_v58  ;;  %2627 = vmatprep.subr.bf16.mxu1 %v3395_v9 }
 0xbd1   : > { %v2187_v53 = vpop.f32.mrf.mxu0 }
 0xbd2   : > { %2367 = vrot.lane.b32.xlu0 %v2187_v53, %s3525_s18 }
 0xbd3   : > { %v3297_v54 = vpop.f32.mrf.mxu0 }
 0xbd5   : > { %v2190_v55 = vpop.f32.mrf.mxu0 }
 0xbd6   : > { %v3512_v55 = vld [vmem:[%s3597_s15 + $0xc] sm:$0xf]  ;;  %s334_s15 = scalar_lea.vmem %s4140_s9, %s2952_s12 }
 0xbd7   : > { %v3298_v56 = vpop.f32.mrf.mxu0 }
 0xc12   : > { %v2233_v59 = vpop.f32.mrf.mxu1 }
 0xc13   : > { %2369 = vrot.lane.b32.xlu1 %v2233_v59, %s3525_s18 }
 0xc14   : > { %v3303_v60 = vpop.f32.mrf.mxu1  ;;  %v2279_v0 = vpop.f32.mrf.mxu0 }
 0xc15   : > { %2371 = vrot.lane.b32.xlu0 %v2279_v0, %s3525_s18 }
 0xc16   : > { %v2236_v4 = vpop.f32.mrf.mxu1  ;;  %v3309_v5 = vpop.f32.mrf.mxu0 }
 0xc18   : > { %v3304_v8 = vpop.f32.mrf.mxu1  ;;  %v2282_v10 = vpop.f32.mrf.mxu0 }
 0xc1a   : > { %v3310_v13 = vpop.f32.mrf.mxu0  ;;  %v2325_v16 = vpop.f32.mrf.mxu1 }
 0xc1b   : > { %2373 = vrot.lane.b32.xlu1 %v2325_v16, %s3525_s18 }
 0xc1c   : > { %v3315_v1 = vpop.f32.mrf.mxu1 }
 0xc1e   : > { %v2328_v17 = vpop.f32.mrf.mxu1 }
 0xc20   : > { %v3316_v19 = vpop.f32.mrf.mxu1 }
 0xc44   : > { %v2368_v11 = vpop.permute.xlu0 %2367 }
 0xc45   : > { %v2389_v2 = vsel %vm2388_vm8, %v2384_v26, %v2368_v11  ;;  %v3393_v11 = vld [vmem:[%s4136_s5 + $0x30] ss:$8 sps:$4 sm:$0xff]  }
 0xc46   : > { %2628 = vmatpush1.bf16.msra.mxu1 %v3393_v11 }
 0xc85   : > { %v2370_v23 = vpop.permute.xlu1 %2369 }
 0xc86   : > { %v2390_v12 = vsel %vm2388_vm8, %v2385_v33, %v2370_v23  ;;  %v3398_v23 = vld [vmem:[%s4136_s5 + $0x24] ss:$8 sps:$4 sm:$0xff]   ;;  %v3399_v33 = vld [vmem:[%s4136_s5 + $0x10] ss:$8 sps:$4 sm:$0xff]  }
 0xc87   : > { %v2372_v34 = vpop.permute.xlu0 %2371  ;;  %v2397_v6 = vcombine.low %v2389_v2, %v2390_v12  ;;  %2629 = vmatprep.subr.bf16.mxu1 %v3398_v23 }
 0xc88   : > { %v2391_v38 = vsel %vm2388_vm8, %v2386_v37, %v2372_v34  ;;  %2630 = vmatpush1.bf16.msra.mxu1 %v3396_v31  ;;  %v3402_v34 = vld [vmem:[%s4136_s5] ss:$8 sps:$4 sm:$0xff]  }
 0xc89   : > { %2631 = vmatprep.subr.bf16.mxu1 %v3401_v24 }
 0xc8c   : > { %2632 = vmatpush1.bf16.msra.mxu1 %v3399_v33 }
 0xc8d   : > { %v2374_v15 = vpop.permute.xlu1 %2373  ;;  %2633 = vmatprep.subr.bf16.mxu1 %v3404_v3 }
 0xc8e   : > { %v2392_v25 = vsel %vm2388_vm8, %v2387_v39, %v2374_v15 }
 0xc8f   : > { %v2398_v40 = vcombine.low %v2391_v38, %v2392_v25 }
 0xc90   : > { %2634 = vmatpush1.bf16.msra.mxu1 %v3402_v34 }
 0xc91   : > { %v2401_v41 = vpack.c.bf16 %v2398_v40, %v2397_v6 }
 0xc93   : > { %3326 = vmatmul.mubr.msk.bf16.vlgmr.msra.gmra.mxu0 %vm464_vm1, %v2401_v41 }
 0xd53   : > { %v2478_v35 = vpop.f32.mrf.mxu0 }
 0xd54   : > { %v2479_v42 = vadd.f32 %v3000_v7, %v2478_v35 }
 0xd55   : > { %v3327_v43 = vpop.f32.mrf.mxu0 }
 0xd56   : > { %v2487_v44 = vcombine.high %v2479_v42, %v2479_v42  ;;  %v4005_v20 = vadd.f32 %v3509_v45, %v2479_v42 }
 0xd57   : > { %v2481_v46 = vpop.f32.mrf.mxu0 }
 0xd58   : > { %v4008_v48 = vadd.f32 %v3510_v47, %v2487_v44  ;;  %v2482_v49 = vadd.f32 %v3000_v7, %v2481_v46  ;;  %v2495_v21 = vsel %vm341_vm0, %v4005_v20, 0.0 }
 0xd59   : > { %2496 = vadd.xlane.f32.xlu0 %v2495_v21  ;;  %v3328_v50 = vpop.f32.mrf.mxu0 }
 0xd5a   : > { %v2488_v51 = vcombine.high %v2482_v49, %v2482_v49  ;;  %v4013_v53 = vadd.f32 %v3511_v52, %v2482_v49  ;;  %v2498_v54 = vsel %vm341_vm0, %v4008_v48, 0.0  ;;  %v3406_v52 = vld [vmem:[%s4138_s7 + $0x38] sm:$0xff]  }
 0xd5b   : > { %2499 = vadd.xlane.f32.xlu1 %v2498_v54  ;;  %v3407_v54 = vld [vmem:[%s4138_s7 + $0x70] sm:$0xff]  }
 0xd5c   : > { %v4018_v56 = vadd.f32 %v3512_v55, %v2488_v51  ;;  %v2501_v57 = vsel %vm341_vm0, %v4013_v53, 0.0  ;;  %v3405_v51 = vld [vmem:[%s4138_s7 + $0x78] sm:$0xff]   ;;  %v3408_v55 = vld [vmem:[%s4138_s7 + $0x30] sm:$0xff]  }
 0xd5d   : > { %2502 = vadd.xlane.f32.xlu0 %v2501_v57  ;;  %3103 = vmatprep.subr.bf16.mxu0 %v3405_v51  ;;  %v3409_v57 = vld [vmem:[%s4138_s7 + $0x68] sm:$0xff]  }
 0xd5e   : > { %v2504_v32 = vsel %vm341_vm0, %v4018_v56, 0.0  ;;  %3104 = vmatpush3.bf16.msra.mxu0 %v3406_v52 }
 0xd5f   : > { %3105 = vmatprep.subr.bf16.mxu0 %v3407_v54 }
 0xd61   : > { %2505 = vadd.xlane.f32.xlu0 %v2504_v32  ;;  %v3410_v32 = vld [vmem:[%s4138_s7 + $0x28] sm:$0xff]  }
 0xd62   : > { %3106 = vmatpush3.bf16.msra.mxu0 %v3408_v55 }
 0xd63   : > { %3107 = vmatprep.subr.bf16.mxu0 %v3409_v57 }
 0xd66   : > { %3108 = vmatpush3.bf16.msra.mxu0 %v3410_v32 }
 0xde2   : > { %v2497_v58 = vpop.xlane.xlu0 %2496 }
 0xde3   : > { %v2507_v59 = vmul.f32 0.015625, %v2497_v58  ;;  %v3411_v58 = vld [vmem:[%s4138_s7 + $0x60] sm:$0xff]  }
 0xde4   : > { %v2500_v60 = vpop.xlane.xlu1 %2499  ;;  %3109 = vmatprep.subr.bf16.mxu0 %v3411_v58  ;;  %v3015_v58 = vld [vmem:[%s4139_s8] ss:$0 sm:$0xff] }
 0xde5   : > { %v2511_v0 = vsub.f32 %v4005_v20, %v2507_v59  ;;  %v2508_v4 = vmul.f32 0.015625, %v2500_v60  ;;  %v3412_v59 = vld [vmem:[%s4138_s7 + $0x20] sm:$0xff]   ;;  %v3413_v60 = vld [vmem:[%s4138_s7 + $0x58] sm:$0xff]  }
 0xde6   : > { %v2503_v5 = vpop.xlane.xlu0 %2502  ;;  %3110 = vmatpush3.bf16.msra.mxu0 %v3412_v59 }
 0xde7   : > { %v2512_v8 = vsub.f32 %v4008_v48, %v2508_v4  ;;  %v2509_v10 = vmul.f32 0.015625, %v2503_v5  ;;  %v2515_v13 = vmul.f32 %v2511_v0, %v2511_v0  ;;  %3111 = vmatprep.subr.bf16.mxu0 %v3413_v60  ;;  %v3415_v4 = vld [vmem:[%s4138_s7 + $0x50] sm:$0xff]  }
 0xde8   : > { %v3416_v5 = vld [vmem:[%s4138_s7 + $0x10] sm:$0xff]  }
 0xde9   : > { %v2513_v16 = vsub.f32 %v4013_v53, %v2509_v10  ;;  %v2519_v1 = vsel %vm341_vm0, %v2515_v13, 0.0  ;;  %v2516_v17 = vmul.f32 %v2512_v8, %v2512_v8  ;;  %v3418_v10 = vld [vmem:[%s4138_s7 + $0x8] sm:$0xff]   ;;  %v3419_v13 = vld [vmem:[%s4138_s7 + $0x40] sm:$0xff]  }
 0xdea   : > { %2520 = vadd.xlane.f32.xlu0 %v2519_v1  ;;  %v2506_v19 = vpop.xlane.xlu0 %2505  ;;  %v2564_v1 = vld [vmem:[%s4137_s6] sm:$0x3] }
 0xdeb   : > { %v2510_v22 = vmul.f32 0.015625, %v2506_v19  ;;  %v2522_v27 = vsel %vm341_vm0, %v2516_v17, 0.0  ;;  %v2517_v14 = vmul.f32 %v2513_v16, %v2513_v16  ;;  %v2569_v17 = vrot.slane %v2564_v1, %v416_v62 }
 0xdec   : > { %2523 = vadd.xlane.f32.xlu1 %v2522_v27  ;;  %v2573_v19 = vrot.slane %v2564_v1, %v420_v63 }
 0xded   : > { %v2514_v28 = vsub.f32 %v4018_v56, %v2510_v22  ;;  %v2525_v29 = vsel %vm341_vm0, %v2517_v14, 0.0 }
 0xdee   : > { %2526 = vadd.xlane.f32.xlu0 %v2525_v29 }
 0xdef   : > { %v2518_v18 = vmul.f32 %v2514_v28, %v2514_v28 }
 0xdf1   : > { %v2528_v30 = vsel %vm341_vm0, %v2518_v18, 0.0 }
 0xdf2   : > { %2529 = vadd.xlane.f32.xlu1 %v2528_v30 }
 0xe73   : > { %v2521_v36 = vpop.xlane.xlu0 %2520 }
 0xe74   : > { %v2531_v12 = vmul.f32 0.015625, %v2521_v36 }
 0xe75   : > { %v2524_v37 = vpop.xlane.xlu1 %2523 }
 0xe76   : > { %v2532_v39 = vmul.f32 0.015625, %v2524_v37  ;;  %v2535_v38 = vadd.f32 1e-06, %v2531_v12 }
 0xe77   : > { %v2527_v26 = vpop.xlane.xlu0 %2526 }
 0xe78   : > { %v2536_v15 = vadd.f32 1e-06, %v2532_v39  ;;  %v2533_v2 = vmul.f32 0.015625, %v2527_v26 }
 0xe7a   : > { %v2537_v25 = vadd.f32 1e-06, %v2533_v2  ;;  %3493 = vrsqrt.f32 %v2536_v15 }
 0xe7b   : > { %v2530_v6 = vpop.xlane.xlu1 %2529  ;;  %3495 = vrsqrt.f32 %v2535_v38 }
 0xe7c   : > { %v2534_v40 = vmul.f32 0.015625, %v2530_v6  ;;  %3497 = vrsqrt.f32 %v2537_v25 }
 0xe7e   : > { %v2538_v41 = vadd.f32 1e-06, %v2534_v40 }
 0xe80   : > { %3499 = vrsqrt.f32 %v2538_v41 }
 0xe87   : > { %v3494_v7 = vpop.eup %3493 }
 0xe88   : > { %v3496_v35 = vpop.eup %3495  ;;  %v2544_v43 = vmul.f32 %v3494_v7, %v2512_v8  ;;  %v3417_v8 = vld [vmem:[%s4138_s7 + $0x48] sm:$0xff]  }
 0xe89   : > { %v3498_v42 = vpop.eup %3497  ;;  %v2543_v45 = vmul.f32 %v3496_v35, %v2511_v0  ;;  %v3414_v0 = vld [vmem:[%s4138_s7 + $0x18] sm:$0xff]  }
 0xe8a   : > { %v2545_v46 = vmul.f32 %v3498_v42, %v2513_v16  ;;  %3112 = vmatpush3.bf16.msra.mxu0 %v3414_v0  ;;  %v3420_v16 = vld [vmem:[%s4138_s7] sm:$0xff]  }
 0xe8b   : > { %v2551_v49 = vcombine.low %v2543_v45, %v2544_v43  ;;  %3113 = vmatprep.subr.bf16.mxu0 %v3415_v4 }
 0xe8d   : > { %v3500_v44 = vpop.eup %3499 }
 0xe8e   : > { %v2546_v47 = vmul.f32 %v3500_v44, %v2514_v28  ;;  %3114 = vmatpush3.bf16.msra.mxu0 %v3416_v5 }
 0xe8f   : > { %3115 = vmatprep.subr.bf16.mxu0 %v3417_v8 }
 0xe90   : > { %v2552_v21 = vcombine.low %v2545_v46, %v2546_v47 }
 0xe92   : > { %v2555_v50 = vpack.c.bf16 %v2552_v21, %v2551_v49  ;;  %3116 = vmatpush3.bf16.msra.mxu0 %v3418_v10 }
 0xe93   : > { %3117 = vmatprep.subr.bf16.mxu0 %v3419_v13 }
 0xe94   : > { %3014 = vmatmul.mubr.msk.bf16.vlgmr.msra.gmra.mxu1 %vm464_vm1, %v2555_v50 }
 0xe96   : > { %3118 = vmatpush3.bf16.msra.mxu0 %v3420_v16 }
 0xf54   : > { %v2653_v22 = vpop.f32.mrf.mxu1 }
 0xf55   : > { %v2654_v27 = vadd.f32 %v2653_v22, %v2569_v17 }
 0xf56   : > { %v2655_v14 = vpop.f32.mrf.mxu1 }
 0xf57   : > { %v2666_v28 = vmul.f32 0.044715, %v2654_v27  ;;  %v2656_v29 = vadd.f32 %v2655_v14, %v2573_v19  ;;  %v2662_v21 = vmul.f32 0.5, %v2654_v27 }
 0xf58   : > { %v2657_v18 = vpop.f32.mrf.mxu1 }
 0xf59   : > { %v2670_v30 = vmul.f32 %v2666_v28, %v2654_v27  ;;  %v2667_v9 = vmul.f32 0.044715, %v2656_v29  ;;  %v2658_v11 = vadd.f32 %v2657_v18, %v2569_v17  ;;  %v2663_v46 = vmul.f32 0.5, %v2656_v29 }
 0xf5a   : > { %v2659_v23 = vpop.f32.mrf.mxu1 }
 0xf5b   : > { %v2674_v31 = vmul.f32 %v2670_v30, %v2654_v27  ;;  %v2671_v24 = vmul.f32 %v2667_v9, %v2656_v29  ;;  %v2668_v33 = vmul.f32 0.044715, %v2658_v11  ;;  %v2660_v34 = vadd.f32 %v2659_v23, %v2573_v19 }
 0xf5c   : > { %v2664_v44 = vmul.f32 0.5, %v2658_v11 }
 0xf5d   : > { %v2678_v3 = vadd.f32 %v2674_v31, %v2654_v27  ;;  %v2675_v36 = vmul.f32 %v2671_v24, %v2656_v29  ;;  %v2672_v62 = vmul.f32 %v2668_v33, %v2658_v11  ;;  %v2669_v12 = vmul.f32 0.044715, %v2660_v34 }
 0xf5e   : > { %v2665_v47 = vmul.f32 0.5, %v2660_v34 }
 0xf5f   : > { %v2676_v61 = vmul.f32 %v2672_v62, %v2658_v11  ;;  %v2673_v63 = vmul.f32 %v2669_v12, %v2660_v34  ;;  %v2679_v37 = vadd.f32 %v2675_v36, %v2656_v29  ;;  %v2682_v39 = vmul.f32 0.7978846, %v2678_v3 }
 0xf61   : > { %v2680_v26 = vadd.f32 %v2676_v61, %v2658_v11  ;;  %v2677_v15 = vmul.f32 %v2673_v63, %v2660_v34  ;;  %v2683_v2 = vmul.f32 0.7978846, %v2679_v37 }
 0xf63   : > { %v2684_v38 = vmul.f32 0.7978846, %v2680_v26  ;;  %v2681_v25 = vadd.f32 %v2677_v15, %v2660_v34  ;;  %3501 = vtanh.f32 %v2683_v2 }
 0xf64   : > { %3503 = vtanh.f32 %v2682_v39 }
 0xf65   : > { %3505 = vtanh.f32 %v2684_v38  ;;  %v2685_v6 = vmul.f32 0.7978846, %v2681_v25 }
 0xf67   : > { %3507 = vtanh.f32 %v2685_v6 }
 0xf70   : > { %v3502_v40 = vpop.eup %3501 }
 0xf71   : > { %v3504_v41 = vpop.eup %3503  ;;  %v2691_v35 = vadd.f32 1.0, %v3502_v40 }
 0xf72   : > { %v3506_v7 = vpop.eup %3505  ;;  %v2690_v45 = vadd.f32 1.0, %v3504_v41 }
 0xf73   : > { %v2692_v42 = vadd.f32 1.0, %v3506_v7  ;;  %v2695_v51 = vmul.f32 %v2691_v35, %v2663_v46 }
 0xf74   : > { %v3508_v43 = vpop.eup %3507  ;;  %v2694_v54 = vmul.f32 %v2690_v45, %v2662_v21 }
 0xf75   : > { %v2693_v49 = vadd.f32 1.0, %v3508_v43  ;;  %v2696_v50 = vmul.f32 %v2692_v42, %v2664_v44 }
 0xf77   : > { %v2697_v52 = vmul.f32 %v2693_v49, %v2665_v47  ;;  %v2698_v57 = vpack.c.bf16 %v2696_v50, %v2694_v54 }
 0xf79   : > { %v2699_v55 = vpack.c.bf16 %v2697_v52, %v2695_v51 }
 0xf7b   : > { %2867 = vmatprep.mubr.bf16.mxu0 %v2699_v55 }
 0xf7c   : > { %2868 = vmatmul.mubr.bf16.vlgmr.msra.gmra.mxu0 %v2698_v57 }
0x103c   : > { %v3119_v32 = vpop.f32.mrf.mxu0 }
0x103e   : > { %v3120_v59 = vpop.f32.mrf.mxu0 }
0x103f   : > { %v3121_v60 = vadd.f32 %v3120_v59, %v3119_v32 }
0x1040   : > { %v3122_v0 = vpop.f32.mrf.mxu0 }
0x1041   : > { %v2870_v4 = vadd.f32 %v3121_v60, %v3015_v58 }
0x1042   : > { %v3123_v5 = vpop.f32.mrf.mxu0 }
0x1043   : > { %v2878_v8 = vcombine.high %v2870_v4, %v2870_v4  ;;  %v2882_v10 = vadd.f32 %v2870_v4, %v4005_v20  ;;  %v3124_v13 = vadd.f32 %v3123_v5, %v3122_v0 }
0x1045   : > { %v2883_v16 = vadd.f32 %v2878_v8, %v4008_v48  ;;  %2886 = vst.msk [vmem:[%s334_s15] sm:$0xf] %vm341_vm0, %v2882_v10  ;;  %v2873_v1 = vadd.f32 %v3124_v13, %v3015_v58 }
0x1047   : > { %2887 = vst.msk [vmem:[%s334_s15 + $0x4] sm:$0xf] %vm341_vm0, %v2883_v16  ;;  %v2879_v17 = vcombine.high %v2873_v1, %v2873_v1  ;;  %v2884_v19 = vadd.f32 %v2873_v1, %v4013_v53 }
0x1049   : > { %v2885_v22 = vadd.f32 %v2879_v17, %v4018_v56  ;;  %2888 = vst.msk [vmem:[%s334_s15 + $0x8] sm:$0xf] %vm341_vm0, %v2884_v19 }
0x104b   : > { %2889 = vst.msk [vmem:[%s334_s15 + $0xc] sm:$0xf] %vm341_vm0, %v2885_v22 }
0x104c PF: > { %s19_s30 = sadd.s32 1, %s3519_s30  }
0x104d   : > { %p16_p4 = scmp.ge.s32.totalorder %s19_s30, 4  }
0x104f   :  { %18 = sbr.rel (!%p16_p4) target bundleno = 1 (0x1), region = 86 }

// kernel: _lambda_.37
= control target key start
LH: loop header
LB: loop body
LE: loop exit
PB: predicated region body
PF: predicated region fallthrough
CT: control target
= control target key end

     0   :  { %s1328_s0 = inlined_call_operand.vmem [shape: f32[16,64], index: 0, kind: input, shape index: {}]   ;;  %s1329_s1 = inlined_call_operand.vmem [shape: f32[16,32], index: 1, kind: input, shape index: {}]   ;;  %s1330_s2 = inlined_call_operand.vmem [shape: bf16[64,34], index: 2, kind: input, shape index: {}]   ;;  %s1331_s3 = inlined_call_operand.vmem [shape: f32[1,34], index: 3, kind: input, shape index: {}]   ;;  %s1332_s4 = inlined_call_operand.vmem [shape: f32[1,32], index: 4, kind: input, shape index: {}]   ;;  %s1333_s5 = inlined_call_operand.vmem [shape: f32[1,32], index: 5, kind: input, shape index: {}]   ;;  %s1334_s6 = inlined_call_operand.vmem [shape: bf16[32,32], index: 6, kind: input, shape index: {}]   ;;  %s1335_s7 = inlined_call_operand.vmem [shape: f32[1,32], index: 7, kind: input, shape index: {}]   ;;  %s1336_s8 = inlined_call_operand.vmem [shape: bf16[32,2], index: 8, kind: input, shape index: {}]   ;;  %s1337_s9 = inlined_call_operand.vmem [shape: f32[1,2], index: 9, kind: input, shape index: {}]   ;;  %s1338_s10 = inlined_call_operand.vmem [shape: f32[16,2], index: 10, kind: output, shape index: {0}]   ;;  %s1339_s11 = inlined_call_operand.hbm [shape: f32[16,32], index: 11, kind: output, shape index: {1}]   ;;  %s1340_s12 = inlined_call_operand.vmem [shape: f32[16,2], index: 12, kind: output, shape index: {2}]  }
   0x1   :  { %1341 = sst [smem:[#allocation6_spill]] %s1328_s0 }
   0x2   :  { %1342 = sst [smem:[#allocation7_spill]] %s1329_s1 }
   0x3   :  { %1343 = sst [smem:[#allocation8_spill]] %s1330_s2 }
   0x4   :  { %18 = vsyncpa [#allocation3], 0 }
   0x5   :  { %20 = vsyncpa [#allocation3 + $0x1], 0  ;;  %s1163_s21 = smov 0   ;;  %s1165_s22 = smov 0  }
   0x6   :  { %s1167_s23 = smov 0   ;;  %s1169_s24 = smov 0  }
   0x7 LB: > { %s1184_s25 = sadd.s32 4294967295, %s1090_s24   ;;  %s899_s26 = sadd.s32 4294967294, %s1090_s24   ;;  %s1090_s24 = sphi %s1169_s24, %s1354_s24   ;;  %s1086_s23 = sphi %s1167_s23, %s1353_s23   ;;  %s1082_s22 = sphi %s1165_s22, %s1352_s22   ;;  %s1078_s21 = sphi %s1163_s21, %s1351_s21  }
   0x8   : > { %s1188_s27 = sadd.s32 1, %s1090_s24   ;;  %s279_s28 = sadd.s32 1, %s1086_s23 }
   0x9   : > { %s276_s29 = ssub.s32 %s1090_s24, %s1188_s27  ;;  %p289_p0 = scmp.ne.s32.totalorder %s1086_s23, %s1082_s22 }
   0xa   : > { %p277_p1 = scmp.eq.s32.totalorder %s276_s29, 0  ;;  %p290_p2 = scmp.eq.s32.totalorder %s1184_s25, 1 }
   0xb   : > { %p295_p3 = scmp.ne.s32.totalorder %s1082_s22, %s1078_s21  ;;  %p296_p4 = scmp.eq.s32.totalorder %s899_s26, 1 }
   0xc   : > { %s1199_s30 = scalar_select %p277_p1, %s1086_s23, %s279_s28  }
   0xd   : > { %p1201_p5 = por %p290_p2, %p289_p0  ;;  %p1205_p6 = por %p296_p4, %p295_p3 }
   0xe   : > { %1344 = sst [smem:[#allocation5_spill]] %s1199_s30  ;;  %p902_p7 = scmp.ge.s32.totalorder %s1090_s24, 1 }
   0xf   : > { %p378_p8 = scmp.lt.s32.totalorder %s1090_s24, 3 }
  0x11   : > { %p379_p9 = pnand %p902_p7, %p378_p8 }
  0x12   : > { %s1347_s2 = sld [smem:[#allocation8_spill]] (!%p379_p9)  ;;  %p431_p10 = scmp.lt.s32.totalorder (!%p379_p9), %s1184_s25, 1 }
  0x13   : > { %382 = sbr.rel (%p379_p9) target bundleno = 1368 (0x558), region = 60  ;;  %s1348_s0 = sld [smem:[#allocation6_spill]] (!%p379_p9) }
  0x14   : > { %s1094_s15 = smov (!%p379_p9), 126   ;;  %s1095_s30 = smov (!%p379_p9), 2  }
  0x15   : > { %s422_s26 = sand.u32 (!%p379_p9), 1, %s1082_s22   ;;  %s1349_s1 = sld [smem:[#allocation7_spill]] (!%p379_p9) }
  0x18   : > { %v1012_v0 = vld [vmem:[%s1347_s2 + $0x18] sm:$0xff]   ;;  %v1092_v1 = vmov 0.0   ;;  %v1013_v2 = vld [vmem:[%s1347_s2 + $0x10] sm:$0xff]   ;;  %vm1093_vm0 = vmmov 0   ;;  %s432_s19 = scalar_select %p431_p10, %s1184_s25, 1  ;;  %v1014_v3 = vld [vmem:[%s1347_s2 + $0x8] sm:$0xff]  }
  0x19   : > { %940 = vmatprep.subr.bf16.mxu0 %v1092_v1  ;;  %952 = vmatprep.subr.bf16.mxu1 %v1092_v1  ;;  %v1015_v4 = vld [vmem:[%s1347_s2] sm:$0xff]   ;;  %vm489_vm1 = vcmask 523264   ;;  %vm533_vm2 = vcmask 15360   ;;  %vm539_vm3 = vcmask 261120   ;;  %v1016_v23 = vld [vmem:[%s1334_s6 + $0x8] sm:$0xff]  }
  0x1a   : > { %941 = vmatpush3.bf16.msra.mxu0 %v1012_v0  ;;  %948 = vmatprep.mubr.msk.bf16.mxu0 %vm1093_vm0, %v1092_v1  ;;  %s1229_s28 = sshll.u32 %s432_s19, 3  ;;  %v908_v7 = vld [vmem:[%s1331_s3] ss:$0 sm:$0xff]  ;;  %v1018_v36 = vld [vmem:[%s1336_s8 + $0x8] sm:$0xff]   ;;  %v1096_v0 = vmov -1.0   ;;  %s926_s19 = sshll.u32 %s1184_s25, 7 }
  0x1b   : > { %942 = vmatprep.subr.bf16.mxu0 %v1092_v1  ;;  %956 = vmatprep.mubr.msk.bf16.mxu1 %vm1093_vm0, %v1092_v1  ;;  %s434_s16 = scalar_lea.vmem %s1348_s0, %s1229_s28  ;;  %s442_s29 = scalar_lea.vmem %s1338_s10, %s1229_s28  ;;  %v914_v15 = vld [vmem:[%s1332_s4] ss:$0 sm:$0xff] }
  0x1c   : > { %v448_v5 = vld [vmem:[%s434_s16] sm:$0xff]  ;;  %953 = vmatpush3.bf16.msra.mxu1 %v1016_v23  ;;  %s438_s17 = scalar_lea.vmem %s1349_s1, %s1229_s28  ;;  %s757_s16 = scalar_lea.sflag [#allocation3], %s422_s26 }
  0x1d   : > { %v449_v6 = vpack.c.bf16 %v448_v5, %v448_v5  ;;  %v915_v22 = vld [vmem:[%s1333_s5] ss:$0 sm:$0xff]  ;;  %954 = vmatprep.subr.bf16.mxu1 %v1092_v1 }
  0x1e   : > { %943 = vmatpush3.bf16.msra.mxu0 %v1013_v2  ;;  %v1017_v24 = vld [vmem:[%s1334_s6] sm:$0xff]  }
  0x1f   : > { %944 = vmatprep.subr.bf16.mxu0 %v1092_v1  ;;  %v1019_v37 = vld [vmem:[%s1336_s8] sm:$0xff]  }
  0x20   : > { %955 = vmatpush3.bf16.msra.mxu1 %v1017_v24  ;;  %v916_v38 = vld [vmem:[%s1335_s7] ss:$0 sm:$0xff] }
  0x21   : > { %960 = vmatprep.subr.bf16.mxu1 %v1092_v1  ;;  %v675_v5 = vld [vmem:[%s438_s17] sm:$0xff]  ;;  %s1097_s17 = smov [#allocation2]  }
  0x22   : > { %945 = vmatpush3.bf16.msra.mxu0 %v1014_v3  ;;  %s1034_s2 = sshll.u32 %s1097_s17, 4  ;;  %s1035_s2 = int_to_ptr.vmem [resolvable:$false] %s1034_s2 }
  0x23   : > { %946 = vmatprep.subr.bf16.mxu0 %v1092_v1 }
  0x26   : > { %947 = vmatpush3.bf16.msra.mxu0 %v1015_v4 }
  0x29   : > { %949 = vmatmul.mubr.msk.bf16.vlgmr.msra.gmra.mxu0 %vm489_vm1, %v449_v6 }
  0xe9   : > { %v527_v8 = vpop.f32.mrf.mxu0 }
  0xea   : > { %v528_v9 = vadd.f32 %v908_v7, %v527_v8 }
  0xeb   : > { %v950_v10 = vpop.f32.mrf.mxu0 }
  0xec   : > { %534 = vst.msk [vmem:[%s442_s29] sm:$0xff] %vm533_vm2, %v528_v9  ;;  %536 = vrot.lane.b32.xlu0 %v528_v9, %s1094_s15  ;;  %s775_s29 = scalar_lea.hbm %s1339_s11, %s926_s19 }
  0xed   : > { %v530_v11 = vpop.f32.mrf.mxu0 }
  0xef   : > { %v951_v12 = vpop.f32.mrf.mxu0 }
 0x15e   : > { %v537_v13 = vpop.permute.xlu0 %536 }
 0x15f   : > { %v540_v14 = vsel %vm539_vm3, %v537_v13, 0.0 }
 0x160   : > { %541 = vadd.xlane.f32.xlu0 %v540_v14 }
 0x176   : > { %564 = vrot.lane.b32.xlu0 %v914_v15, %s1095_s30 }
 0x1e9   : > { %v542_v16 = vpop.xlane.xlu0 %541 }
 0x1ea   : > { %v544_v17 = vmul.f32 0.03125, %v542_v16 }
 0x1ec   : > { %v545_v18 = vsub.f32 %v528_v9, %v544_v17 }
 0x1ed   : > { %v565_v29 = vpop.permute.xlu0 %564 }
 0x1ee   : > { %v546_v19 = vmul.f32 %v545_v18, %v545_v18 }
 0x1f0   : > { %548 = vrot.lane.b32.xlu1 %v546_v19, %s1094_s15 }
 0x262   : > { %v549_v20 = vpop.permute.xlu1 %548 }
 0x263   : > { %v551_v21 = vsel %vm539_vm3, %v549_v20, 0.0 }
 0x264   : > { %552 = vadd.xlane.f32.xlu1 %v551_v21 }
 0x275   : > { %574 = vrot.lane.b32.xlu1 %v915_v22, %s1095_s30  ;;  %s903_s30 = sshll.u32 %s422_s26, 3 }
 0x276   : > { %s424_s18 = scalar_lea.vmem [#allocation2], %s903_s30  ;;  %s1036_s30 = scalar_lea.vmem %s1035_s2, 256 }
 0x277   : > { %s777_s20 = sshll.u32 %s424_s18, 4  ;;  %s778_s20 = int_to_ptr.vmem [resolvable:$true] %s777_s20 }
 0x278   : > { %s1030_s1 = scalar_lea.vmem %s778_s20, 128  ;;  %p1037_p0 = scmp.lt.s32.totalorder %s778_s20, %s1035_s2 }
 0x279   : > { %p1031_p11 = scmp.ne.s32.totalorder %s778_s20, %s1030_s1  ;;  %p1038_p1 = scmp.lt.s32.totalorder %s1036_s30, %s1030_s1 }
 0x27b   : > { %p1032_p12 = pnand %p1031_p11, %p1201_p5  ;;  %p1039_p2 = por %p1038_p1, %p1037_p0 }
 0x27d   : > { %p1033_p13 = pneg %p1032_p12 }
 0x27f   : > { %p1040_p3 = pnand %p1039_p2, %p1033_p13 }
 0x2ed   : > { %v553_v25 = vpop.xlane.xlu1 %552 }
 0x2ee   : > { %v554_v26 = vmul.f32 0.03125, %v553_v25 }
 0x2f0   : > { %v555_v27 = vadd.f32 1e-05, %v554_v26 }
 0x2f1   : > { %v575_v31 = vpop.permute.xlu1 %574 }
 0x2f2   : > { %1020 = vrsqrt.f32 %v555_v27 }
 0x2ff   : > { %v1021_v28 = vpop.eup %1020 }
 0x300   : > { %v557_v30 = vmul.f32 %v1021_v28, %v545_v18 }
 0x302   : > { %v567_v32 = vmul.f32 %v565_v29, %v557_v30 }
 0x304   : > { %v577_v33 = vadd.f32 %v575_v31, %v567_v32 }
 0x306   : > { %v578_v34 = vpack.c.bf16 %v577_v33, %v577_v33 }
 0x308   : > { %591 = vrot.lane.b32.xlu0 %v578_v34, %s1094_s15 }
 0x37a   : > { %v592_v35 = vpop.permute.xlu0 %591 }
 0x37b   : > { %957 = vmatmul.mubr.msk.bf16.vlgmr.msra.gmra.mxu1 %vm539_vm3, %v592_v35 }
 0x37c   : > { %964 = vmatprep.mubr.msk.bf16.mxu1 %vm1093_vm0, %v1092_v1  ;;  %961 = vmatpush3.bf16.msra.mxu1 %v1018_v36 }
 0x37d   : > { %962 = vmatprep.subr.bf16.mxu1 %v1092_v1 }
 0x380   : > { %963 = vmatpush3.bf16.msra.mxu1 %v1019_v37 }
 0x43b   : > { %v642_v39 = vpop.f32.mrf.mxu1 }
 0x43c   : > { %v643_v40 = vadd.f32 %v916_v38, %v642_v39 }
 0x43d   : > { %v958_v41 = vpop.f32.mrf.mxu1 }
 0x43e   : > { %v649_v42 = vmul.f32 0.70710677, %v643_v40  ;;  %v648_v3 = vmul.f32 0.5, %v643_v40 }
 0x43f   : > { %v645_v43 = vpop.f32.mrf.mxu1 }
 0x440   : > { %v652_v44 = vand.u32 2147483647, %v649_v42  ;;  %vm650_vm4 = vcmp.ge.f32.partialorder %v649_v42, 0.0 }
 0x441   : > { %v959_v45 = vpop.f32.mrf.mxu1  ;;  %v651_v1 = vsel %vm650_vm4, 1.0, %v1096_v0 }
 0x442   : > { %v653_v46 = vmul.f32 0.3275911, %v652_v44  ;;  %v666_v48 = vsub.f32 0.0, %v652_v44 }
 0x444   : > { %v654_v47 = vadd.f32 1.0, %v653_v46  ;;  %v667_v49 = vmul.f32 %v666_v48, %v652_v44 }
 0x446   : > { %1022 = vrcp.f32 %v654_v47  ;;  %v668_v52 = vmul.f32 1.442695, %v667_v49 }
 0x448   : > { %1024 = vpow2.f32 %v668_v52 }
 0x453   : > { %v1023_v50 = vpop.eup %1022 }
 0x454   : > { %v657_v51 = vmul.f32 1.0614054, %v1023_v50 }
 0x455   : > { %v1025_v61 = vpop.eup %1024 }
 0x456   : > { %v658_v53 = vadd.f32 -1.4531521, %v657_v51 }
 0x458   : > { %v659_v54 = vmul.f32 %v1023_v50, %v658_v53 }
 0x45a   : > { %v660_v55 = vadd.f32 1.4214138, %v659_v54 }
 0x45c   : > { %v661_v56 = vmul.f32 %v1023_v50, %v660_v55 }
 0x45e   : > { %v662_v57 = vadd.f32 -0.28449672, %v661_v56 }
 0x460   : > { %v663_v58 = vmul.f32 %v1023_v50, %v662_v57 }
 0x462   : > { %v664_v59 = vadd.f32 0.2548296, %v663_v58 }
 0x464   : > { %v665_v60 = vmul.f32 %v1023_v50, %v664_v59 }
 0x466   : > { %v670_v62 = vmul.f32 %v1025_v61, %v665_v60 }
 0x468   : > { %v671_v63 = vsub.f32 1.0, %v670_v62 }
 0x46a   : > { %v672_v2 = vmul.f32 %v671_v63, %v651_v1 }
 0x46c   : > { %v673_v4 = vadd.f32 1.0, %v672_v2 }
 0x46e   : > { %v674_v6 = vmul.f32 %v673_v4, %v648_v3 }
 0x470   : > { %v676_v7 = vadd.f32 %v675_v5, %v674_v6 }
 0x472   : > { %v678_v8 = vpack.c.bf16 %v676_v7, %v676_v7  ;;  %677 = vst.msk [vmem:[%s424_s18] sm:$0xff] %vm539_vm3, %v676_v7 }
 0x474   : > { %965 = vmatmul.mubr.msk.bf16.vlgmr.msra.gmra.mxu1 %vm539_vm3, %v678_v8 }
 0x475   : > { %1043 = shalt.err (!%p1040_p3)
}
 0x476   : > { %s1044_s25 = scalar_lea.hbm %s775_s29, 128  ;;  %s1048_s18 = scalar_lea.hbm %s1339_s11, 256 }
 0x477   : > { %p1045_p4 = scmp.ne.s32.totalorder %s775_s29, %s1044_s25  ;;  %p1049_p9 = scmp.lt.s32.totalorder %s775_s29, %s1339_s11 }
 0x478   : > { %p1050_p10 = scmp.lt.s32.totalorder %s1048_s18, %s1044_s25 }
 0x479   : > { %p1046_p7 = pnand %p1045_p4, %p1201_p5 }
 0x47a   : > { %p1051_p11 = por %p1050_p10, %p1049_p9 }
 0x47b   : > { %p1047_p8 = pneg %p1046_p7 }
 0x47d   : > { %p1052_p12 = pnand %p1051_p11, %p1047_p8 }
 0x47f   : > { %1055 = shalt.err (!%p1052_p12)
}
 0x480   : > { %968 = dma.vmem_to_hbm [thread:$0]  (%p1201_p5), %s778_s20, 128, %s775_s29, %s757_s16   ;;  %v920_v9 = vld [vmem:[%s1337_s9] ss:$0 sm:$0xff] }
 0x481   : > { %s446_s13 = scalar_lea.vmem %s1340_s12, %s1229_s28 }
 0x534   : > { %v739_v10 = vpop.f32.mrf.mxu1 }
 0x535   : > { %v740_v11 = vadd.f32 %v920_v9, %v739_v10 }
 0x536   : > { %v966_v12 = vpop.f32.mrf.mxu1 }
 0x537   : > { %v924_v13 = vmul.f32 -1.442695, %v740_v11 }
 0x538   : > { %v742_v14 = vpop.f32.mrf.mxu1 }
 0x539   : > { %1026 = vpow2.f32 %v924_v13 }
 0x53a   : > { %v967_v15 = vpop.f32.mrf.mxu1 }
 0x546   : > { %v1027_v16 = vpop.eup %1026 }
 0x547   : > { %v748_v17 = vadd.f32 1.0, %v1027_v16 }
 0x549   : > { %1028 = vrcp.f32 %v748_v17 }
 0x556   : > { %v1029_v18 = vpop.eup %1028 }
 0x557   : > { %751 = vst.msk [vmem:[%s446_s13] sm:$0xff] %vm533_vm2, %v1029_v18 }
 0x558 PF: > { %p974_p5 = scmp.ge.s32.totalorder %s1090_s24, 2  ;;  %s799_s20 = sand.u32 1, %s1078_s21  }
 0x559   : > { %s800_s29 = scalar_lea.sflag [#allocation3], %s799_s20 }
 0x55a   : > { %p971_p13 = pnand %p974_p5, %p1205_p6 }
 0x55c   : > { %p972_p0 = pneg %p971_p13 }
 0x55e   : > { %1073 = dma.done.wait (%p972_p0), %s800_s29, 128  }
 0x55f   : > { %1075 = vsyncadd (%p972_p0), %s800_s29, 4294967168  ;;  %s1350_s16 = sld [smem:[#allocation5_spill]]  ;;  %p23_p1 = scmp.ge.s32.totalorder %s1188_s27, 4  }
 0x560   : > { %s1351_s21 = smov %s1082_s22  ;;  %s1352_s22 = smov %s1086_s23 }
 0x561   : > { %s1354_s24 = smov %s1188_s27  ;;  %25 = sbr.rel (!%p23_p1) target bundleno = 7 (0x7), region = 122 }
 0x565   : > { %s1353_s23 = smov %s1350_s16 }
 0x566   :  { %812 = vsyncpa [#allocation3], 1 }
 0x567   :  { %814 = vsyncpa [#allocation3 + $0x1], 1 }

</bundles_post_ra>
